<compile_context>
chip_gen: v7x
topology: tpu7x:2x2x1
jax: 0.10.0
libtpu: 0.0.40
codegen_flags: <defaults>
</compile_context>

<pallas_src>
import functools
import math

import jax
import jax.numpy as jnp
from jax.experimental import pallas as pl
from jax.experimental.pallas import tpu as pltpu


def _round_up(x, m):
    return ((x + m - 1) // m) * m


def _ceil_div(a, b):
    return -(-a // b)


# ----------------------------------------------------------------------------
# Pallas kernel: fused  out = act(patches @ W + bias)
# ----------------------------------------------------------------------------
def _mm_bias_act_kernel(p_ref, w_ref, b_ref, o_ref, *, act):
    # bf16 x bf16 -> f32 accumulation on the MXU.
    acc = jnp.dot(p_ref[...], w_ref[...], preferred_element_type=jnp.float32)
    acc = acc + b_ref[...]
    if act == "leaky_relu":
        acc = jnp.where(acc >= 0.0, acc, 0.2 * acc)
    elif act == "tanh":
        acc = jnp.tanh(acc)
    else:
        assert act == "none", act
    o_ref[...] = acc.astype(o_ref.dtype)


# ----------------------------------------------------------------------------
# Glue
# ----------------------------------------------------------------------------
def _nearest_resize(x_nhwc, out_h, out_w):
    """nn.Upsample(size=(out_h,out_w), mode='nearest') on NHWC input (plain-JAX gather)."""
    _, H, W, _ = x_nhwc.shape
    hi = jnp.array([(i * H) // out_h for i in range(out_h)], jnp.int32)
    wi = jnp.array([(j * W) // out_w for j in range(out_w)], jnp.int32)
    return x_nhwc[:, hi][:, :, wi]


def _row_tiling(M):
    """Pick (TM, Mpad): 8-aligned rows; >=2 grid steps when there is enough work."""
    M8 = _round_up(M, 8)
    if M8 <= 256:
        return M8, M8                              # single block, grid == 1
    n_tiles = max(2, _ceil_div(M8, 512))           # tiles of <= ~512 rows, at least 2
    TM = _round_up(_ceil_div(M8, n_tiles), 8)
    return TM, TM * n_tiles


def conv2d_bias_act(x, w_oihw, bias, *, pad, act, out_dtype=jnp.float32):
    """Conv2d(stride=1, padding=pad, bias=True) + activation as one fused Pallas call.

    x: (N,H,W,Cx) float32 NHWC (may carry zero-padded channels), w_oihw: (Cout,Cin,KH,KW).
    """
    N, H, W, Cx = x.shape
    Cout, Cin, KH, KW = w_oihw.shape
    if Cx > Cin:  # incoming activations carry zero-padded channels -> zero weight rows
        w_oihw = jnp.pad(w_oihw, ((0, 0), (0, Cx - Cin), (0, 0), (0, 0)))
        Cin = Cx

    # im2col in bf16 (halves patch HBM traffic vs f32).  Patch order: (kh, kw, cin).
    xb = x.astype(jnp.bfloat16)
    xp = jnp.pad(xb, ((0, 0), (pad, pad), (pad, pad), (0, 0)))
    OH = H + 2 * pad - KH + 1
    OW = W + 2 * pad - KW + 1
    views = [xp[:, i:i + OH, j:j + OW, :] for i in range(KH) for j in range(KW)]
    patches = jnp.stack(views, axis=3).reshape(N * OH * OW, KH * KW * Cin)

    # (Cout,Cin,KH,KW) -> (KH*KW*Cin, Cout) bf16; bias f32.
    wmat = jnp.transpose(w_oihw, (2, 3, 1, 0)).reshape(KH * KW * Cin, Cout)
    wmat = wmat.astype(jnp.bfloat16)
    bvec = bias.astype(jnp.float32)

    # Lane-dense output: pad Cout to a multiple of 128 with zero weights / zero bias.
    Coutp = _round_up(Cout, 128)
    if Coutp != Cout:
        wmat = jnp.pad(wmat, ((0, 0), (0, Coutp - Cout)))
        bvec = jnp.pad(bvec, ((0, Coutp - Cout),))
    bvec = bvec.reshape(1, Coutp)

    # Dense MXU feed: pad K to a multiple of 128 with zeros.
    M, K = patches.shape
    Kp = _round_up(K, 128)
    if Kp != K:
        patches = jnp.pad(patches, ((0, 0), (0, Kp - K)))
        wmat = jnp.pad(wmat, ((0, Kp - K), (0, 0)))

    TM, Mpad = _row_tiling(M)
    if Mpad != M:
        patches = jnp.pad(patches, ((0, Mpad - M), (0, 0)))
    grid = (Mpad // TM,)

    cost = pl.CostEstimate(
        flops=2 * Mpad * Kp * Coutp,
        transcendentals=(Mpad * Coutp) if act == "tanh" else 0,
        bytes_accessed=Mpad * Kp * 2 + Kp * Coutp * 2 + Mpad * Coutp * 4 + Coutp * 4,
    )

    out = pl.pallas_call(
        functools.partial(_mm_bias_act_kernel, act=act),
        out_shape=jax.ShapeDtypeStruct((Mpad, Coutp), out_dtype),
        grid_spec=pltpu.PrefetchScalarGridSpec(
            num_scalar_prefetch=0,
            grid=grid,
            in_specs=[
                pl.BlockSpec((TM, Kp), lambda i: (i, 0)),
                pl.BlockSpec((Kp, Coutp), lambda i: (0, 0)),
                pl.BlockSpec((1, Coutp), lambda i: (0, 0)),
            ],
            out_specs=pl.BlockSpec((TM, Coutp), lambda i: (i, 0)),
        ),
        compiler_params=pltpu.CompilerParams(
            dimension_semantics=("parallel",),
            vmem_limit_bytes=32 * 1024 * 1024,
        ),
        cost_estimate=cost,
    )(patches, wmat, bvec)

    return out[:M].reshape(N, OH, OW, Coutp)


# ----------------------------------------------------------------------------
# Parameter init (deterministic; PyTorch Conv2d default init distribution)
# ----------------------------------------------------------------------------
def init_generator_params(key, width=12):
    nfms = width
    cfg = [
        # (Cin, Cout, KH, KW, pad, upsample_size)
        (512, nfms * 8, 2, 2, 1, (2, 2)),
        (nfms * 8, 256, 3, 3, 1, (4, 4)),
        (256, 256, 3, 3, 1, (8, 8)),
        (256, 256, 3, 3, 1, (14, 14)),
    ]
    params = []
    for cin, cout, kh, kw, pad, up in cfg:
        key, wk, bk = jax.random.split(key, 3)
        bound = 1.0 / math.sqrt(cin * kh * kw)
        w = jax.random.uniform(wk, (cout, cin, kh, kw), jnp.float32, -bound, bound)
        b = jax.random.uniform(bk, (cout,), jnp.float32, -bound, bound)
        params.append({"w": w, "b": b, "pad": pad, "up": up})
    return params


# ----------------------------------------------------------------------------
# Forward pass (Generator.forward, deconv=False)
# ----------------------------------------------------------------------------
def generator_forward(params, x_nchw):
    x = jnp.transpose(x_nchw.astype(jnp.float32), (0, 2, 3, 1))  # NCHW -> NHWC
    n_layers = len(params)
    for li, p in enumerate(params):
        x = _nearest_resize(x, *p["up"])
        # Last decoder conv has no LeakyReLU; Tanh (output_act) is fused into its epilogue.
        act = "tanh" if li == n_layers - 1 else "leaky_relu"
        x = conv2d_bias_act(x, p["w"], p["b"], pad=p["pad"], act=act)
    x = x[..., : params[-1]["w"].shape[0]]   # drop channel padding (no-op: last Cout = 256)
    return jnp.transpose(x, (0, 3, 1, 2))    # NHWC -> NCHW


# ----------------------------------------------------------------------------
if __name__ == "__main__":
    key = jax.random.PRNGKey(0)
    pkey, xkey = jax.random.split(key)
    params = init_generator_params(pkey, width=12)

    # Generator input: (N, 512, 1, 1) latent feature map (decoder upsamples to 2x2 first).
    x = jax.random.normal(xkey, (2, 512, 1, 1), jnp.float32)

    fwd = jax.jit(lambda inp: generator_forward(params, inp))
    y = jax.block_until_ready(fwd(x))

    assert y.shape == (2, 256, 14, 14), y.shape
    assert bool(jnp.all(jnp.isfinite(y)))
    assert bool(jnp.all(jnp.abs(y) <= 1.0))  # Tanh output range
    print("KERNEL_OK")
</pallas_src>

<mosaic_0001>
module attributes {stable_mosaic.version = 11 : i64} {
  func.func @_mm_bias_act_kernel(%arg0: i32, %arg1: memref<24x2048xbf16, #tpu.memory_space<vmem>>, %arg2: memref<2048x128xbf16, #tpu.memory_space<vmem>>, %arg3: memref<1x128xf32, #tpu.memory_space<vmem>>, %arg4: memref<24x128xf32, #tpu.memory_space<vmem>>) attributes {dimension_semantics = [#tpu.dimension_semantics<parallel>], iteration_bounds = array<i64: 1>, scalar_prefetch = 0 : i64, scratch_operands = 0 : i64, tpu.core_type = #tpu.core_type<tc>, window_params = [{transform_indices = @transform_0, window_bounds = array<i64: 24, 2048>}, {pipeline_mode = #tpu.pipeline_mode<synchronous>, transform_indices = @transform_1, window_bounds = array<i64: 2048, 128>}, {pipeline_mode = #tpu.pipeline_mode<synchronous>, transform_indices = @transform_2, window_bounds = array<i64: 1, 128>}, {transform_indices = @transform_3, window_bounds = array<i64: 24, 128>}]} {
    %c0 = arith.constant 0 : index
    %c0_0 = arith.constant 0 : index
    %0 = vector.load %arg1[%c0, %c0_0] : memref<24x2048xbf16, #tpu.memory_space<vmem>>, vector<24x2048xbf16>
    %c0_1 = arith.constant 0 : index
    %c0_2 = arith.constant 0 : index
    %1 = vector.load %arg2[%c0_1, %c0_2] : memref<2048x128xbf16, #tpu.memory_space<vmem>>, vector<2048x128xbf16>
    %cst = arith.constant dense<0.000000e+00> : vector<24x128xf32>
    %2 = tpu.matmul %0, %1, %cst {dimension_numbers = #tpu.dot_dimension_numbers<[1], [0], [0], [1], [0, 0, 1, 1], [], []>} : vector<24x2048xbf16>, vector<2048x128xbf16>, vector<24x128xf32> -> vector<24x128xf32>
    %c0_3 = arith.constant 0 : index
    %c0_4 = arith.constant 0 : index
    %3 = vector.load %arg3[%c0_3, %c0_4] : memref<1x128xf32, #tpu.memory_space<vmem>>, vector<1x128xf32>
    %4 = vector.broadcast %3 : vector<1x128xf32> to vector<24x128xf32>
    %5 = arith.addf %2, %4 : vector<24x128xf32>
    %cst_5 = arith.constant 0.000000e+00 : f32
    %6 = vector.broadcast %cst_5 : f32 to vector<24x128xf32>
    %7 = arith.cmpf oge, %5, %6 : vector<24x128xf32>
    %cst_6 = arith.constant 2.000000e-01 : f32
    %8 = vector.broadcast %cst_6 : f32 to vector<24x128xf32>
    %9 = arith.mulf %8, %5 : vector<24x128xf32>
    %10 = arith.select %7, %5, %9 : vector<24x128xi1>, vector<24x128xf32>
    %c0_7 = arith.constant 0 : index
    %c0_8 = arith.constant 0 : index
    %11 = vector.load %arg4[%c0_7, %c0_8] : memref<24x128xf32, #tpu.memory_space<vmem>>, vector<24x128xf32>
    tpu.vector_store %arg4[%c0_7, %c0_8], %10 {strides = array<i32>} : memref<24x128xf32, #tpu.memory_space<vmem>>, vector<24x128xf32>,
    return
  }
  func.func @transform_0(%arg0: i32) -> (i32, i32) {
    %c0_i32 = arith.constant 0 : i32
    %c0_i32_0 = arith.constant 0 : i32
    return %arg0, %c0_i32 : i32, i32
  }
  func.func @transform_1(%arg0: i32) -> (i32, i32) {
    %c0_i32 = arith.constant 0 : i32
    %c0_i32_0 = arith.constant 0 : i32
    %c0_i32_1 = arith.constant 0 : i32
    return %c0_i32, %c0_i32_0 : i32, i32
  }
  func.func @transform_2(%arg0: i32) -> (i32, i32) {
    %c0_i32 = arith.constant 0 : i32
    %c0_i32_0 = arith.constant 0 : i32
    %c0_i32_1 = arith.constant 0 : i32
    return %c0_i32, %c0_i32_0 : i32, i32
  }
  func.func @transform_3(%arg0: i32) -> (i32, i32) {
    %c0_i32 = arith.constant 0 : i32
    %c0_i32_0 = arith.constant 0 : i32
    return %arg0, %c0_i32 : i32, i32
  }
}

module attributes {stable_mosaic.version = 11 : i64} {
  func.func @_mm_bias_act_kernel(%arg0: i32, %arg1: memref<32x1152xbf16, #tpu.memory_space<vmem>>, %arg2: memref<1152x256xbf16, #tpu.memory_space<vmem>>, %arg3: memref<1x256xf32, #tpu.memory_space<vmem>>, %arg4: memref<32x256xf32, #tpu.memory_space<vmem>>) attributes {dimension_semantics = [#tpu.dimension_semantics<parallel>], iteration_bounds = array<i64: 1>, scalar_prefetch = 0 : i64, scratch_operands = 0 : i64, tpu.core_type = #tpu.core_type<tc>, window_params = [{transform_indices = @transform_0, window_bounds = array<i64: 32, 1152>}, {pipeline_mode = #tpu.pipeline_mode<synchronous>, transform_indices = @transform_1, window_bounds = array<i64: 1152, 256>}, {pipeline_mode = #tpu.pipeline_mode<synchronous>, transform_indices = @transform_2, window_bounds = array<i64: 1, 256>}, {transform_indices = @transform_3, window_bounds = array<i64: 32, 256>}]} {
    %c0 = arith.constant 0 : index
    %c0_0 = arith.constant 0 : index
    %0 = vector.load %arg1[%c0, %c0_0] : memref<32x1152xbf16, #tpu.memory_space<vmem>>, vector<32x1152xbf16>
    %c0_1 = arith.constant 0 : index
    %c0_2 = arith.constant 0 : index
    %1 = vector.load %arg2[%c0_1, %c0_2] : memref<1152x256xbf16, #tpu.memory_space<vmem>>, vector<1152x256xbf16>
    %cst = arith.constant dense<0.000000e+00> : vector<32x256xf32>
    %2 = tpu.matmul %0, %1, %cst {dimension_numbers = #tpu.dot_dimension_numbers<[1], [0], [0], [1], [0, 0, 1, 1], [], []>} : vector<32x1152xbf16>, vector<1152x256xbf16>, vector<32x256xf32> -> vector<32x256xf32>
    %c0_3 = arith.constant 0 : index
    %c0_4 = arith.constant 0 : index
    %3 = vector.load %arg3[%c0_3, %c0_4] : memref<1x256xf32, #tpu.memory_space<vmem>>, vector<1x256xf32>
    %4 = vector.broadcast %3 : vector<1x256xf32> to vector<32x256xf32>
    %5 = arith.addf %2, %4 : vector<32x256xf32>
    %cst_5 = arith.constant 0.000000e+00 : f32
    %6 = vector.broadcast %cst_5 : f32 to vector<32x256xf32>
    %7 = arith.cmpf oge, %5, %6 : vector<32x256xf32>
    %cst_6 = arith.constant 2.000000e-01 : f32
    %8 = vector.broadcast %cst_6 : f32 to vector<32x256xf32>
    %9 = arith.mulf %8, %5 : vector<32x256xf32>
    %10 = arith.select %7, %5, %9 : vector<32x256xi1>, vector<32x256xf32>
    %c0_7 = arith.constant 0 : index
    %c0_8 = arith.constant 0 : index
    %11 = vector.load %arg4[%c0_7, %c0_8] : memref<32x256xf32, #tpu.memory_space<vmem>>, vector<32x256xf32>
    tpu.vector_store %arg4[%c0_7, %c0_8], %10 {strides = array<i32>} : memref<32x256xf32, #tpu.memory_space<vmem>>, vector<32x256xf32>,
    return
  }
  func.func @transform_0(%arg0: i32) -> (i32, i32) {
    %c0_i32 = arith.constant 0 : i32
    %c0_i32_0 = arith.constant 0 : i32
    return %arg0, %c0_i32 : i32, i32
  }
  func.func @transform_1(%arg0: i32) -> (i32, i32) {
    %c0_i32 = arith.constant 0 : i32
    %c0_i32_0 = arith.constant 0 : i32
    %c0_i32_1 = arith.constant 0 : i32
    return %c0_i32, %c0_i32_0 : i32, i32
  }
  func.func @transform_2(%arg0: i32) -> (i32, i32) {
    %c0_i32 = arith.constant 0 : i32
    %c0_i32_0 = arith.constant 0 : i32
    %c0_i32_1 = arith.constant 0 : i32
    return %c0_i32, %c0_i32_0 : i32, i32
  }
  func.func @transform_3(%arg0: i32) -> (i32, i32) {
    %c0_i32 = arith.constant 0 : i32
    %c0_i32_0 = arith.constant 0 : i32
    return %arg0, %c0_i32 : i32, i32
  }
}

module attributes {stable_mosaic.version = 11 : i64} {
  func.func @_mm_bias_act_kernel(%arg0: i32, %arg1: memref<128x2304xbf16, #tpu.memory_space<vmem>>, %arg2: memref<2304x256xbf16, #tpu.memory_space<vmem>>, %arg3: memref<1x256xf32, #tpu.memory_space<vmem>>, %arg4: memref<128x256xf32, #tpu.memory_space<vmem>>) attributes {dimension_semantics = [#tpu.dimension_semantics<parallel>], iteration_bounds = array<i64: 1>, scalar_prefetch = 0 : i64, scratch_operands = 0 : i64, tpu.core_type = #tpu.core_type<tc>, window_params = [{transform_indices = @transform_0, window_bounds = array<i64: 128, 2304>}, {pipeline_mode = #tpu.pipeline_mode<synchronous>, transform_indices = @transform_1, window_bounds = array<i64: 2304, 256>}, {pipeline_mode = #tpu.pipeline_mode<synchronous>, transform_indices = @transform_2, window_bounds = array<i64: 1, 256>}, {transform_indices = @transform_3, window_bounds = array<i64: 128, 256>}]} {
    %c0 = arith.constant 0 : index
    %c0_0 = arith.constant 0 : index
    %0 = vector.load %arg1[%c0, %c0_0] : memref<128x2304xbf16, #tpu.memory_space<vmem>>, vector<128x2304xbf16>
    %c0_1 = arith.constant 0 : index
    %c0_2 = arith.constant 0 : index
    %1 = vector.load %arg2[%c0_1, %c0_2] : memref<2304x256xbf16, #tpu.memory_space<vmem>>, vector<2304x256xbf16>
    %cst = arith.constant dense<0.000000e+00> : vector<128x256xf32>
    %2 = tpu.matmul %0, %1, %cst {dimension_numbers = #tpu.dot_dimension_numbers<[1], [0], [0], [1], [0, 0, 1, 1], [], []>} : vector<128x2304xbf16>, vector<2304x256xbf16>, vector<128x256xf32> -> vector<128x256xf32>
    %c0_3 = arith.constant 0 : index
    %c0_4 = arith.constant 0 : index
    %3 = vector.load %arg3[%c0_3, %c0_4] : memref<1x256xf32, #tpu.memory_space<vmem>>, vector<1x256xf32>
    %4 = vector.broadcast %3 : vector<1x256xf32> to vector<128x256xf32>
    %5 = arith.addf %2, %4 : vector<128x256xf32>
    %cst_5 = arith.constant 0.000000e+00 : f32
    %6 = vector.broadcast %cst_5 : f32 to vector<128x256xf32>
    %7 = arith.cmpf oge, %5, %6 : vector<128x256xf32>
    %cst_6 = arith.constant 2.000000e-01 : f32
    %8 = vector.broadcast %cst_6 : f32 to vector<128x256xf32>
    %9 = arith.mulf %8, %5 : vector<128x256xf32>
    %10 = arith.select %7, %5, %9 : vector<128x256xi1>, vector<128x256xf32>
    %c0_7 = arith.constant 0 : index
    %c0_8 = arith.constant 0 : index
    %11 = vector.load %arg4[%c0_7, %c0_8] : memref<128x256xf32, #tpu.memory_space<vmem>>, vector<128x256xf32>
    tpu.vector_store %arg4[%c0_7, %c0_8], %10 {strides = array<i32>} : memref<128x256xf32, #tpu.memory_space<vmem>>, vector<128x256xf32>,
    return
  }
  func.func @transform_0(%arg0: i32) -> (i32, i32) {
    %c0_i32 = arith.constant 0 : i32
    %c0_i32_0 = arith.constant 0 : i32
    return %arg0, %c0_i32 : i32, i32
  }
  func.func @transform_1(%arg0: i32) -> (i32, i32) {
    %c0_i32 = arith.constant 0 : i32
    %c0_i32_0 = arith.constant 0 : i32
    %c0_i32_1 = arith.constant 0 : i32
    return %c0_i32, %c0_i32_0 : i32, i32
  }
  func.func @transform_2(%arg0: i32) -> (i32, i32) {
    %c0_i32 = arith.constant 0 : i32
    %c0_i32_0 = arith.constant 0 : i32
    %c0_i32_1 = arith.constant 0 : i32
    return %c0_i32, %c0_i32_0 : i32, i32
  }
  func.func @transform_3(%arg0: i32) -> (i32, i32) {
    %c0_i32 = arith.constant 0 : i32
    %c0_i32_0 = arith.constant 0 : i32
    return %arg0, %c0_i32 : i32, i32
  }
}

module attributes {stable_mosaic.version = 11 : i64} {
  func.func @_mm_bias_act_kernel(%arg0: i32, %arg1: memref<200x2304xbf16, #tpu.memory_space<vmem>>, %arg2: memref<2304x256xbf16, #tpu.memory_space<vmem>>, %arg3: memref<1x256xf32, #tpu.memory_space<vmem>>, %arg4: memref<200x256xf32, #tpu.memory_space<vmem>>) attributes {dimension_semantics = [#tpu.dimension_semantics<parallel>], iteration_bounds = array<i64: 2>, scalar_prefetch = 0 : i64, scratch_operands = 0 : i64, tpu.core_type = #tpu.core_type<tc>, window_params = [{transform_indices = @transform_0, window_bounds = array<i64: 200, 2304>}, {pipeline_mode = #tpu.pipeline_mode<synchronous>, transform_indices = @transform_1, window_bounds = array<i64: 2304, 256>}, {pipeline_mode = #tpu.pipeline_mode<synchronous>, transform_indices = @transform_2, window_bounds = array<i64: 1, 256>}, {transform_indices = @transform_3, window_bounds = array<i64: 200, 256>}]} {
    %c0 = arith.constant 0 : index
    %c0_0 = arith.constant 0 : index
    %0 = vector.load %arg1[%c0, %c0_0] : memref<200x2304xbf16, #tpu.memory_space<vmem>>, vector<200x2304xbf16>
    %c0_1 = arith.constant 0 : index
    %c0_2 = arith.constant 0 : index
    %1 = vector.load %arg2[%c0_1, %c0_2] : memref<2304x256xbf16, #tpu.memory_space<vmem>>, vector<2304x256xbf16>
    %cst = arith.constant dense<0.000000e+00> : vector<200x256xf32>
    %2 = tpu.matmul %0, %1, %cst {dimension_numbers = #tpu.dot_dimension_numbers<[1], [0], [0], [1], [0, 0, 1, 1], [], []>} : vector<200x2304xbf16>, vector<2304x256xbf16>, vector<200x256xf32> -> vector<200x256xf32>
    %c0_3 = arith.constant 0 : index
    %c0_4 = arith.constant 0 : index
    %3 = vector.load %arg3[%c0_3, %c0_4] : memref<1x256xf32, #tpu.memory_space<vmem>>, vector<1x256xf32>
    %4 = vector.broadcast %3 : vector<1x256xf32> to vector<200x256xf32>
    %5 = arith.addf %2, %4 : vector<200x256xf32>
    %6 = math.tanh %5 : vector<200x256xf32>
    %c0_5 = arith.constant 0 : index
    %c0_6 = arith.constant 0 : index
    %7 = vector.load %arg4[%c0_5, %c0_6] : memref<200x256xf32, #tpu.memory_space<vmem>>, vector<200x256xf32>
    tpu.vector_store %arg4[%c0_5, %c0_6], %6 {strides = array<i32>} : memref<200x256xf32, #tpu.memory_space<vmem>>, vector<200x256xf32>,
    return
  }
  func.func @transform_0(%arg0: i32) -> (i32, i32) {
    %c0_i32 = arith.constant 0 : i32
    %c0_i32_0 = arith.constant 0 : i32
    return %arg0, %c0_i32 : i32, i32
  }
  func.func @transform_1(%arg0: i32) -> (i32, i32) {
    %c0_i32 = arith.constant 0 : i32
    %c0_i32_0 = arith.constant 0 : i32
    %c0_i32_1 = arith.constant 0 : i32
    return %c0_i32, %c0_i32_0 : i32, i32
  }
  func.func @transform_2(%arg0: i32) -> (i32, i32) {
    %c0_i32 = arith.constant 0 : i32
    %c0_i32_0 = arith.constant 0 : i32
    %c0_i32_1 = arith.constant 0 : i32
    return %c0_i32, %c0_i32_0 : i32, i32
  }
  func.func @transform_3(%arg0: i32) -> (i32, i32) {
    %c0_i32 = arith.constant 0 : i32
    %c0_i32_0 = arith.constant 0 : i32
    return %arg0, %c0_i32 : i32, i32
  }
}

</mosaic_0001>

<bundles_post_ra>
// kernel: _lambda_.5
= control target key start
LH: loop header
LB: loop body
LE: loop exit
PB: predicated region body
PF: predicated region fallthrough
CT: control target
= control target key end

     0   :  { %s2299_s1 = inlined_call_operand.vmem [shape: bf16[1152,256], index: 1, kind: input, shape index: {}]   ;;  %s2300_s0 = inlined_call_operand.vmem [shape: bf16[32,1152], index: 0, kind: input, shape index: {}]   ;;  %s2301_s2 = inlined_call_operand.vmem [shape: f32[1,256], index: 2, kind: input, shape index: {}]   ;;  %s2302_s3 = inlined_call_operand.vmem [shape: f32[32,256], index: 3, kind: output, shape index: {}]  }
   0x1   :  { %v1523_v0 = vld [vmem:[%s2299_s1 + $0x4] ss:$8 sps:$4 sm:$0xff]   ;;  %v1527_v2 = vld [vmem:[%s2299_s1] ss:$8 sps:$4 sm:$0xff]   ;;  %v1529_v4 = vld [vmem:[%s2299_s1 + $0x14] ss:$8 sps:$4 sm:$0xff]  }
   0x2   :  { %v1525_v1 = vld [vmem:[%s2299_s1 + $0x204] ss:$8 sps:$4 sm:$0xff]   ;;  %1003 = vmatprep.subr.bf16.mxu1 %v1523_v0  ;;  %v1528_v3 = vld [vmem:[%s2299_s1 + $0x200] ss:$8 sps:$4 sm:$0xff]   ;;  %v1531_v5 = vld [vmem:[%s2299_s1 + $0x214] ss:$8 sps:$4 sm:$0xff]  }
   0x3   :  { %1109 = vmatprep.subr.bf16.mxu0 %v1525_v1  ;;  %1004 = vmatpush1.bf16.msra.mxu1 %v1527_v2  ;;  %v1533_v6 = vld [vmem:[%s2299_s1 + $0x10] ss:$8 sps:$4 sm:$0xff]   ;;  %v1535_v8 = vld [vmem:[%s2299_s1 + $0x24] ss:$8 sps:$4 sm:$0xff]   ;;  %v1539_v10 = vld [vmem:[%s2299_s1 + $0x20] ss:$8 sps:$4 sm:$0xff]  }
   0x4   :  { %1110 = vmatpush1.bf16.msra.mxu0 %v1528_v3  ;;  %1005 = vmatprep.subr.bf16.mxu1 %v1529_v4  ;;  %v1534_v7 = vld [vmem:[%s2299_s1 + $0x210] ss:$8 sps:$4 sm:$0xff]   ;;  %v1537_v9 = vld [vmem:[%s2299_s1 + $0x224] ss:$8 sps:$4 sm:$0xff]   ;;  %v1540_v11 = vld [vmem:[%s2299_s1 + $0x220] ss:$8 sps:$4 sm:$0xff]  }
   0x5   :  { %1111 = vmatprep.subr.bf16.mxu0 %v1531_v5  ;;  %v1541_v12 = vld [vmem:[%s2299_s1 + $0x34] ss:$8 sps:$4 sm:$0xff]   ;;  %v1545_v14 = vld [vmem:[%s2299_s1 + $0x30] ss:$8 sps:$4 sm:$0xff]   ;;  %v1547_v16 = vld [vmem:[%s2299_s1 + $0x44] ss:$8 sps:$4 sm:$0xff]  }
   0x6   :  { %v1543_v13 = vld [vmem:[%s2299_s1 + $0x234] ss:$8 sps:$4 sm:$0xff]   ;;  %v1546_v15 = vld [vmem:[%s2299_s1 + $0x230] ss:$8 sps:$4 sm:$0xff]   ;;  %v1549_v17 = vld [vmem:[%s2299_s1 + $0x244] ss:$8 sps:$4 sm:$0xff]  }
   0x7   :  { %1006 = vmatpush1.bf16.msra.mxu1 %v1533_v6  ;;  %v1551_v18 = vld [vmem:[%s2299_s1 + $0x40] ss:$8 sps:$4 sm:$0xff]   ;;  %v1553_v20 = vld [vmem:[%s2299_s1 + $0x54] ss:$8 sps:$4 sm:$0xff]   ;;  %v1557_v22 = vld [vmem:[%s2299_s1 + $0x50] ss:$8 sps:$4 sm:$0xff]  }
   0x8   :  { %1112 = vmatpush1.bf16.msra.mxu0 %v1534_v7  ;;  %1007 = vmatprep.subr.bf16.mxu1 %v1535_v8  ;;  %v1552_v19 = vld [vmem:[%s2299_s1 + $0x240] ss:$8 sps:$4 sm:$0xff]   ;;  %v1555_v21 = vld [vmem:[%s2299_s1 + $0x254] ss:$8 sps:$4 sm:$0xff]   ;;  %v1558_v23 = vld [vmem:[%s2299_s1 + $0x250] ss:$8 sps:$4 sm:$0xff]  }
   0x9   :  { %1113 = vmatprep.subr.bf16.mxu0 %v1537_v9  ;;  %v1559_v24 = vld [vmem:[%s2299_s1 + $0x64] ss:$8 sps:$4 sm:$0xff]   ;;  %v1563_v26 = vld [vmem:[%s2299_s1 + $0x60] ss:$8 sps:$4 sm:$0xff]   ;;  %v1565_v28 = vld [vmem:[%s2299_s1 + $0x74] ss:$8 sps:$4 sm:$0xff]  }
   0xa   :  { %v1561_v25 = vld [vmem:[%s2299_s1 + $0x264] ss:$8 sps:$4 sm:$0xff]   ;;  %v1564_v27 = vld [vmem:[%s2299_s1 + $0x260] ss:$8 sps:$4 sm:$0xff]   ;;  %v1567_v29 = vld [vmem:[%s2299_s1 + $0x274] ss:$8 sps:$4 sm:$0xff]  }
   0xb   :  { %1008 = vmatpush1.bf16.msra.mxu1 %v1539_v10  ;;  %v1569_v30 = vld [vmem:[%s2299_s1 + $0x70] ss:$8 sps:$4 sm:$0xff]   ;;  %v1571_v32 = vld [vmem:[%s2299_s1 + $0x84] ss:$8 sps:$4 sm:$0xff]   ;;  %v1575_v34 = vld [vmem:[%s2299_s1 + $0x80] ss:$8 sps:$4 sm:$0xff]  }
   0xc   :  { %1114 = vmatpush1.bf16.msra.mxu0 %v1540_v11  ;;  %1009 = vmatprep.subr.bf16.mxu1 %v1541_v12  ;;  %v1570_v31 = vld [vmem:[%s2299_s1 + $0x270] ss:$8 sps:$4 sm:$0xff]   ;;  %v1573_v33 = vld [vmem:[%s2299_s1 + $0x284] ss:$8 sps:$4 sm:$0xff]   ;;  %v1576_v35 = vld [vmem:[%s2299_s1 + $0x280] ss:$8 sps:$4 sm:$0xff]  }
   0xd   :  { %1115 = vmatprep.subr.bf16.mxu0 %v1543_v13  ;;  %v1577_v36 = vld [vmem:[%s2299_s1 + $0x94] ss:$8 sps:$4 sm:$0xff]   ;;  %v1581_v38 = vld [vmem:[%s2299_s1 + $0x90] ss:$8 sps:$4 sm:$0xff]   ;;  %v1583_v40 = vld [vmem:[%s2299_s1 + $0xa4] ss:$8 sps:$4 sm:$0xff]  }
   0xe   :  { %v1579_v37 = vld [vmem:[%s2299_s1 + $0x294] ss:$8 sps:$4 sm:$0xff]   ;;  %v1582_v39 = vld [vmem:[%s2299_s1 + $0x290] ss:$8 sps:$4 sm:$0xff]   ;;  %v1585_v41 = vld [vmem:[%s2299_s1 + $0x2a4] ss:$8 sps:$4 sm:$0xff]  }
   0xf   :  { %1010 = vmatpush1.bf16.msra.mxu1 %v1545_v14  ;;  %v1587_v42 = vld [vmem:[%s2299_s1 + $0xa0] ss:$8 sps:$4 sm:$0xff]   ;;  %v1589_v44 = vld [vmem:[%s2299_s1 + $0xb4] ss:$8 sps:$4 sm:$0xff]   ;;  %v1593_v46 = vld [vmem:[%s2299_s1 + $0xb0] ss:$8 sps:$4 sm:$0xff]  }
  0x10   :  { %1116 = vmatpush1.bf16.msra.mxu0 %v1546_v15  ;;  %1011 = vmatprep.subr.bf16.mxu1 %v1547_v16  ;;  %v1588_v43 = vld [vmem:[%s2299_s1 + $0x2a0] ss:$8 sps:$4 sm:$0xff]   ;;  %v1591_v45 = vld [vmem:[%s2299_s1 + $0x2b4] ss:$8 sps:$4 sm:$0xff]   ;;  %v1594_v47 = vld [vmem:[%s2299_s1 + $0x2b0] ss:$8 sps:$4 sm:$0xff]  }
  0x11   :  { %1117 = vmatprep.subr.bf16.mxu0 %v1549_v17  ;;  %v1621_v48 = vld [vmem:[%s2300_s0 + $0x4] ss:$36 sps:$4 sm:$0xff]   ;;  %v1627_v51 = vld [vmem:[%s2300_s0 + $0x14] ss:$36 sps:$4 sm:$0xff]  }
  0x12   :  { %v1595_v49 = vld [vmem:[%s2299_s1 + $0xc4] ss:$8 sps:$4 sm:$0xff]   ;;  %1035 = vmatprep.mubr.bf16.mxu1 %v1621_v48  ;;  %v1599_v52 = vld [vmem:[%s2299_s1 + $0xc0] ss:$8 sps:$4 sm:$0xff]   ;;  %v1601_v54 = vld [vmem:[%s2299_s1 + $0xd4] ss:$8 sps:$4 sm:$0xff]   ;;  %1141 = vmatprep.mubr.bf16.mxu0 %v1627_v51 }
  0x13   :  { %1012 = vmatpush1.bf16.msra.mxu1 %v1551_v18  ;;  %v1597_v50 = vld [vmem:[%s2299_s1 + $0x2c4] ss:$8 sps:$4 sm:$0xff]   ;;  %v1600_v53 = vld [vmem:[%s2299_s1 + $0x2c0] ss:$8 sps:$4 sm:$0xff]   ;;  %v1603_v55 = vld [vmem:[%s2299_s1 + $0x2d4] ss:$8 sps:$4 sm:$0xff]  }
  0x14   :  { %1118 = vmatpush1.bf16.msra.mxu0 %v1552_v19  ;;  %1013 = vmatprep.subr.bf16.mxu1 %v1553_v20  ;;  %v1605_v56 = vld [vmem:[%s2299_s1 + $0xd0] ss:$8 sps:$4 sm:$0xff]   ;;  %v1607_v58 = vld [vmem:[%s2299_s1 + $0xe4] ss:$8 sps:$4 sm:$0xff]   ;;  %v1611_v60 = vld [vmem:[%s2299_s1 + $0xe0] ss:$8 sps:$4 sm:$0xff]  }
  0x15   :  { %1119 = vmatprep.subr.bf16.mxu0 %v1555_v21  ;;  %v1606_v57 = vld [vmem:[%s2299_s1 + $0x2d0] ss:$8 sps:$4 sm:$0xff]   ;;  %v1609_v59 = vld [vmem:[%s2299_s1 + $0x2e4] ss:$8 sps:$4 sm:$0xff]   ;;  %v1612_v61 = vld [vmem:[%s2299_s1 + $0x2e0] ss:$8 sps:$4 sm:$0xff]  }
  0x16   :  { %v1613_v62 = vld [vmem:[%s2299_s1 + $0xf4] ss:$8 sps:$4 sm:$0xff]   ;;  %v1617_v0 = vld [vmem:[%s2299_s1 + $0xf0] ss:$8 sps:$4 sm:$0xff]   ;;  %v1624_v2 = vld [vmem:[%s2299_s1 + $0x104] ss:$8 sps:$4 sm:$0xff]  }
  0x17   :  { %1014 = vmatpush1.bf16.msra.mxu1 %v1557_v22  ;;  %v1615_v63 = vld [vmem:[%s2299_s1 + $0x2f4] ss:$8 sps:$4 sm:$0xff]   ;;  %v1618_v1 = vld [vmem:[%s2299_s1 + $0x2f0] ss:$8 sps:$4 sm:$0xff]   ;;  %v1630_v3 = vld [vmem:[%s2299_s1 + $0x304] ss:$8 sps:$4 sm:$0xff]  }
  0x18   :  { %1120 = vmatpush1.bf16.msra.mxu0 %v1558_v23  ;;  %1015 = vmatprep.subr.bf16.mxu1 %v1559_v24  ;;  %v1619_v4 = vld [vmem:[%s2300_s0] ss:$36 sps:$4 sm:$0xff]   ;;  %v1625_v6 = vld [vmem:[%s2300_s0 + $0x10] ss:$36 sps:$4 sm:$0xff]  }
  0x19   :  { %1121 = vmatprep.subr.bf16.mxu0 %v1561_v25  ;;  %v1622_v5 = vld [vmem:[%s2299_s1 + $0x100] ss:$8 sps:$4 sm:$0xff]   ;;  %v1633_v8 = vld [vmem:[%s2299_s1 + $0x114] ss:$8 sps:$4 sm:$0xff]   ;;  %v1631_v10 = vld [vmem:[%s2299_s1 + $0x110] ss:$8 sps:$4 sm:$0xff]  }
  0x1a   :  { %v1628_v7 = vld [vmem:[%s2299_s1 + $0x300] ss:$8 sps:$4 sm:$0xff]   ;;  %v1636_v9 = vld [vmem:[%s2299_s1 + $0x314] ss:$8 sps:$4 sm:$0xff]   ;;  %v1634_v11 = vld [vmem:[%s2299_s1 + $0x310] ss:$8 sps:$4 sm:$0xff]  }
  0x1b   :  { %1016 = vmatpush1.bf16.msra.mxu1 %v1563_v26  ;;  %v1639_v12 = vld [vmem:[%s2299_s1 + $0x124] ss:$8 sps:$4 sm:$0xff]   ;;  %v1637_v14 = vld [vmem:[%s2299_s1 + $0x120] ss:$8 sps:$4 sm:$0xff]   ;;  %v1645_v16 = vld [vmem:[%s2299_s1 + $0x134] ss:$8 sps:$4 sm:$0xff]  }
  0x1c   :  { %1122 = vmatpush1.bf16.msra.mxu0 %v1564_v27  ;;  %1017 = vmatprep.subr.bf16.mxu1 %v1565_v28  ;;  %v1642_v13 = vld [vmem:[%s2299_s1 + $0x324] ss:$8 sps:$4 sm:$0xff]   ;;  %v1640_v15 = vld [vmem:[%s2299_s1 + $0x320] ss:$8 sps:$4 sm:$0xff]   ;;  %v1648_v17 = vld [vmem:[%s2299_s1 + $0x334] ss:$8 sps:$4 sm:$0xff]  }
  0x1d   :  { %1123 = vmatprep.subr.bf16.mxu0 %v1567_v29  ;;  %v1643_v18 = vld [vmem:[%s2299_s1 + $0x130] ss:$8 sps:$4 sm:$0xff]   ;;  %v1651_v20 = vld [vmem:[%s2299_s1 + $0x144] ss:$8 sps:$4 sm:$0xff]   ;;  %v1649_v22 = vld [vmem:[%s2299_s1 + $0x140] ss:$8 sps:$4 sm:$0xff]  }
  0x1e   :  { %v1646_v19 = vld [vmem:[%s2299_s1 + $0x330] ss:$8 sps:$4 sm:$0xff]   ;;  %v1654_v21 = vld [vmem:[%s2299_s1 + $0x344] ss:$8 sps:$4 sm:$0xff]   ;;  %v1652_v23 = vld [vmem:[%s2299_s1 + $0x340] ss:$8 sps:$4 sm:$0xff]  }
  0x1f   :  { %1018 = vmatpush1.bf16.msra.mxu1 %v1569_v30  ;;  %v1657_v24 = vld [vmem:[%s2299_s1 + $0x154] ss:$8 sps:$4 sm:$0xff]   ;;  %v1655_v26 = vld [vmem:[%s2299_s1 + $0x150] ss:$8 sps:$4 sm:$0xff]   ;;  %v1663_v28 = vld [vmem:[%s2299_s1 + $0x164] ss:$8 sps:$4 sm:$0xff]  }
  0x20   :  { %1124 = vmatpush1.bf16.msra.mxu0 %v1570_v31  ;;  %1019 = vmatprep.subr.bf16.mxu1 %v1571_v32  ;;  %v1660_v25 = vld [vmem:[%s2299_s1 + $0x354] ss:$8 sps:$4 sm:$0xff]   ;;  %v1658_v27 = vld [vmem:[%s2299_s1 + $0x350] ss:$8 sps:$4 sm:$0xff]   ;;  %v1713_v31 = vld [vmem:[%s2300_s0 + $0x48] ss:$36 sps:$4 sm:$0xff]  }
  0x21   :  { %1125 = vmatprep.subr.bf16.mxu0 %v1573_v33  ;;  %v1709_v29 = vld [vmem:[%s2300_s0 + $0x4c] ss:$36 sps:$4 sm:$0xff]   ;;  %v1711_v30 = vld [vmem:[%s2300_s0 + $0x5c] ss:$36 sps:$4 sm:$0xff]  }
  0x22   :  { %v1666_v32 = vld [vmem:[%s2299_s1 + $0x364] ss:$8 sps:$4 sm:$0xff]   ;;  %v1717_v33 = vld [vmem:[%s2300_s0 + $0x58] ss:$36 sps:$4 sm:$0xff]  }
  0x23   :  { %1020 = vmatpush1.bf16.msra.mxu1 %v1575_v34  ;;  %v1661_v34 = vld [vmem:[%s2299_s1 + $0x160] ss:$8 sps:$4 sm:$0xff]   ;;  %v1679_v48 = vld [vmem:[%s2299_s1 + $0x190] ss:$8 sps:$4 sm:$0xff]   ;;  %v1690_v51 = vld [vmem:[%s2299_s1 + $0x3a4] ss:$8 sps:$4 sm:$0xff]  }
  0x24   :  { %1126 = vmatpush1.bf16.msra.mxu0 %v1576_v35  ;;  %1021 = vmatprep.subr.bf16.mxu1 %v1577_v36  ;;  %v1664_v35 = vld [vmem:[%s2299_s1 + $0x360] ss:$8 sps:$4 sm:$0xff]   ;;  %v1669_v36 = vld [vmem:[%s2299_s1 + $0x174] ss:$8 sps:$4 sm:$0xff]  }
  0x25   :  { %1127 = vmatprep.subr.bf16.mxu0 %v1579_v37  ;;  %v1672_v37 = vld [vmem:[%s2299_s1 + $0x374] ss:$8 sps:$4 sm:$0xff]  }
  0x27   :  { %1022 = vmatpush1.bf16.msra.mxu1 %v1581_v38  ;;  %v1667_v38 = vld [vmem:[%s2299_s1 + $0x170] ss:$8 sps:$4 sm:$0xff]  }
  0x28   :  { %1128 = vmatpush1.bf16.msra.mxu0 %v1582_v39  ;;  %1023 = vmatprep.subr.bf16.mxu1 %v1583_v40  ;;  %v1670_v39 = vld [vmem:[%s2299_s1 + $0x370] ss:$8 sps:$4 sm:$0xff]   ;;  %v1675_v40 = vld [vmem:[%s2299_s1 + $0x184] ss:$8 sps:$4 sm:$0xff]  }
  0x29   :  { %1129 = vmatprep.subr.bf16.mxu0 %v1585_v41  ;;  %v1729_v41 = vld [vmem:[%s2300_s0 + $0xc] ss:$36 sps:$4 sm:$0xff]  }
  0x2b   :  { %1024 = vmatpush1.bf16.msra.mxu1 %v1587_v42  ;;  %v1678_v42 = vld [vmem:[%s2299_s1 + $0x384] ss:$8 sps:$4 sm:$0xff]  }
  0x2c   :  { %1130 = vmatpush1.bf16.msra.mxu0 %v1588_v43  ;;  %1025 = vmatprep.subr.bf16.mxu1 %v1589_v44  ;;  %v1732_v43 = vld [vmem:[%s2300_s0 + $0x1c] ss:$36 sps:$4 sm:$0xff]  }
  0x2d   :  { %1131 = vmatprep.subr.bf16.mxu0 %v1591_v45  ;;  %v1673_v44 = vld [vmem:[%s2299_s1 + $0x180] ss:$8 sps:$4 sm:$0xff]  }
  0x2e   :  { %v1676_v45 = vld [vmem:[%s2299_s1 + $0x380] ss:$8 sps:$4 sm:$0xff]  }
  0x2f   :  { %1026 = vmatpush1.bf16.msra.mxu1 %v1593_v46  ;;  %v1681_v46 = vld [vmem:[%s2299_s1 + $0x194] ss:$8 sps:$4 sm:$0xff]  }
  0x30   :  { %1132 = vmatpush1.bf16.msra.mxu0 %v1594_v47  ;;  %1027 = vmatprep.subr.bf16.mxu1 %v1595_v49  ;;  %v1684_v47 = vld [vmem:[%s2299_s1 + $0x394] ss:$8 sps:$4 sm:$0xff]   ;;  %v1682_v49 = vld [vmem:[%s2299_s1 + $0x390] ss:$8 sps:$4 sm:$0xff]  }
  0x31   :  { %1133 = vmatprep.subr.bf16.mxu0 %v1597_v50  ;;  %v1687_v50 = vld [vmem:[%s2299_s1 + $0x1a4] ss:$8 sps:$4 sm:$0xff]  }
  0x33   :  { %1028 = vmatpush1.bf16.msra.mxu1 %v1599_v52  ;;  %v1685_v52 = vld [vmem:[%s2299_s1 + $0x1a0] ss:$8 sps:$4 sm:$0xff]  }
  0x34   :  { %1134 = vmatpush1.bf16.msra.mxu0 %v1600_v53  ;;  %1029 = vmatprep.subr.bf16.mxu1 %v1601_v54  ;;  %v1688_v53 = vld [vmem:[%s2299_s1 + $0x3a0] ss:$8 sps:$4 sm:$0xff]   ;;  %v1693_v54 = vld [vmem:[%s2299_s1 + $0x1b4] ss:$8 sps:$4 sm:$0xff]  }
  0x35   :  { %1135 = vmatprep.subr.bf16.mxu0 %v1603_v55  ;;  %v1696_v55 = vld [vmem:[%s2299_s1 + $0x3b4] ss:$8 sps:$4 sm:$0xff]  }
  0x37   :  { %1030 = vmatpush1.bf16.msra.mxu1 %v1605_v56  ;;  %v1691_v56 = vld [vmem:[%s2299_s1 + $0x1b0] ss:$8 sps:$4 sm:$0xff]  }
  0x38   :  { %1136 = vmatpush1.bf16.msra.mxu0 %v1606_v57  ;;  %1031 = vmatprep.subr.bf16.mxu1 %v1607_v58  ;;  %v1694_v57 = vld [vmem:[%s2299_s1 + $0x3b0] ss:$8 sps:$4 sm:$0xff]   ;;  %v1699_v58 = vld [vmem:[%s2299_s1 + $0x1c4] ss:$8 sps:$4 sm:$0xff]  }
  0x39   :  { %1137 = vmatprep.subr.bf16.mxu0 %v1609_v59  ;;  %v1702_v59 = vld [vmem:[%s2299_s1 + $0x3c4] ss:$8 sps:$4 sm:$0xff]  }
  0x3b   :  { %1032 = vmatpush1.bf16.msra.mxu1 %v1611_v60  ;;  %v1697_v60 = vld [vmem:[%s2299_s1 + $0x1c0] ss:$8 sps:$4 sm:$0xff]  }
  0x3c   :  { %1138 = vmatpush1.bf16.msra.mxu0 %v1612_v61  ;;  %1033 = vmatprep.subr.bf16.mxu1 %v1613_v62  ;;  %v1700_v61 = vld [vmem:[%s2299_s1 + $0x3c0] ss:$8 sps:$4 sm:$0xff]   ;;  %v1705_v62 = vld [vmem:[%s2299_s1 + $0x1d4] ss:$8 sps:$4 sm:$0xff]  }
  0x3d   :  { %1139 = vmatprep.subr.bf16.mxu0 %v1615_v63  ;;  %v1708_v63 = vld [vmem:[%s2299_s1 + $0x3d4] ss:$8 sps:$4 sm:$0xff]  }
  0x3f   :  { %1034 = vmatpush1.bf16.msra.mxu1 %v1617_v0  ;;  %v1703_v0 = vld [vmem:[%s2299_s1 + $0x1d0] ss:$8 sps:$4 sm:$0xff]  }
  0x40   :  { %1140 = vmatpush1.bf16.msra.mxu0 %v1618_v1  ;;  %1056 = vmatprep.subr.bf16.mxu1 %v1624_v2  ;;  %v1706_v1 = vld [vmem:[%s2299_s1 + $0x3d0] ss:$8 sps:$4 sm:$0xff]   ;;  %v1716_v2 = vld [vmem:[%s2299_s1 + $0x1e4] ss:$8 sps:$4 sm:$0xff]  }
  0x41   :  { %1162 = vmatprep.subr.bf16.mxu0 %v1630_v3  ;;  %v1720_v3 = vld [vmem:[%s2299_s1 + $0x3e4] ss:$8 sps:$4 sm:$0xff]  }
  0x42   :  { %1036 = vmatmul.mubr.bf16.vlgmr.msra.gmra.mrb[0].mxu1 %v1619_v4  ;;  %v1714_v4 = vld [vmem:[%s2299_s1 + $0x1e0] ss:$8 sps:$4 sm:$0xff]  }
  0x43   :  { %1142 = vmatmul.mubr.bf16.vlgmr.msra.gmra.mrb[0].mxu0 %v1625_v6  ;;  %1057 = vmatpush1.bf16.msra.mxu1 %v1622_v5  ;;  %v1718_v5 = vld [vmem:[%s2299_s1 + $0x3e0] ss:$8 sps:$4 sm:$0xff]   ;;  %v1723_v6 = vld [vmem:[%s2299_s1 + $0x1f4] ss:$8 sps:$4 sm:$0xff]  }
  0x44   :  { %1163 = vmatpush1.bf16.msra.mxu0 %v1628_v7  ;;  %1058 = vmatprep.subr.bf16.mxu1 %v1633_v8  ;;  %v1726_v7 = vld [vmem:[%s2299_s1 + $0x3f4] ss:$8 sps:$4 sm:$0xff]   ;;  %v1721_v8 = vld [vmem:[%s2299_s1 + $0x1f0] ss:$8 sps:$4 sm:$0xff]  }
  0x45   :  { %1164 = vmatprep.subr.bf16.mxu0 %v1636_v9  ;;  %1045 = vmatprep.mubr.bf16.mxu1 %v1709_v29  ;;  %v1724_v9 = vld [vmem:[%s2299_s1 + $0x3f0] ss:$8 sps:$4 sm:$0xff]   ;;  %v1759_v29 = vld [vmem:[%s2299_s1 + $0x464] ss:$8 sps:$4 sm:$0xff]  }
  0x46   :  { %1151 = vmatprep.mubr.bf16.mxu0 %v1711_v30  ;;  %v1757_v30 = vld [vmem:[%s2299_s1 + $0x460] ss:$8 sps:$4 sm:$0xff]  }
  0x47   :  { %1059 = vmatpush1.bf16.msra.mxu1 %v1631_v10  ;;  %v1735_v10 = vld [vmem:[%s2299_s1 + $0x404] ss:$8 sps:$4 sm:$0xff]  }
  0x48   :  { %1165 = vmatpush1.bf16.msra.mxu0 %v1634_v11  ;;  %1060 = vmatprep.subr.bf16.mxu1 %v1639_v12  ;;  %v1727_v11 = vld [vmem:[%s2300_s0 + $0x8] ss:$36 sps:$4 sm:$0xff]   ;;  %v1730_v12 = vld [vmem:[%s2300_s0 + $0x18] ss:$36 sps:$4 sm:$0xff]  }
  0x49   :  { %1166 = vmatprep.subr.bf16.mxu0 %v1642_v13  ;;  %v1733_v13 = vld [vmem:[%s2299_s1 + $0x400] ss:$8 sps:$4 sm:$0xff]  }
  0x4a   :  { %1046 = vmatmul.mubr.bf16.gmra.mrb[4].mxu1 %v1713_v31  ;;  %v1762_v31 = vld [vmem:[%s2299_s1 + $0x474] ss:$8 sps:$4 sm:$0xff]  }
  0x4b   :  { %1061 = vmatpush1.bf16.msra.mxu1 %v1637_v14  ;;  %1152 = vmatmul.mubr.bf16.gmra.mrb[4].mxu0 %v1717_v33  ;;  %v1738_v14 = vld [vmem:[%s2299_s1 + $0x414] ss:$8 sps:$4 sm:$0xff]   ;;  %v1763_v33 = vld [vmem:[%s2300_s0 + $0x20] ss:$36 sps:$4 sm:$0xff]  }
  0x4c   :  { %1167 = vmatpush1.bf16.msra.mxu0 %v1640_v15  ;;  %1062 = vmatprep.subr.bf16.mxu1 %v1645_v16  ;;  %v1739_v15 = vld [vmem:[%s2300_s0 + $0x54] ss:$36 sps:$4 sm:$0xff]   ;;  %v1741_v16 = vld [vmem:[%s2300_s0 + $0x64] ss:$36 sps:$4 sm:$0xff]  }
  0x4d   :  { %1168 = vmatprep.subr.bf16.mxu0 %v1648_v17  ;;  %1088 = vmatprep.mubr.bf16.mxu1 %v1729_v41  ;;  %v1736_v17 = vld [vmem:[%s2299_s1 + $0x410] ss:$8 sps:$4 sm:$0xff]  }
  0x4e   :  { %1194 = vmatprep.mubr.bf16.mxu0 %v1732_v43 }
  0x4f   :  { %1063 = vmatpush1.bf16.msra.mxu1 %v1643_v18  ;;  %v1747_v18 = vld [vmem:[%s2299_s1 + $0x424] ss:$8 sps:$4 sm:$0xff]  }
  0x50   :  { %1169 = vmatpush1.bf16.msra.mxu0 %v1646_v19  ;;  %1064 = vmatprep.subr.bf16.mxu1 %v1651_v20  ;;  %v1743_v19 = vld [vmem:[%s2300_s0 + $0x50] ss:$36 sps:$4 sm:$0xff]   ;;  %v1744_v20 = vld [vmem:[%s2300_s0 + $0x60] ss:$36 sps:$4 sm:$0xff]  }
  0x51   :  { %1170 = vmatprep.subr.bf16.mxu0 %v1654_v21  ;;  %v1745_v21 = vld [vmem:[%s2299_s1 + $0x420] ss:$8 sps:$4 sm:$0xff]  }
  0x53   :  { %1065 = vmatpush1.bf16.msra.mxu1 %v1649_v22  ;;  %v1750_v22 = vld [vmem:[%s2299_s1 + $0x434] ss:$8 sps:$4 sm:$0xff]  }
  0x54   :  { %1171 = vmatpush1.bf16.msra.mxu0 %v1652_v23  ;;  %1066 = vmatprep.subr.bf16.mxu1 %v1657_v24  ;;  %v1748_v23 = vld [vmem:[%s2299_s1 + $0x430] ss:$8 sps:$4 sm:$0xff]   ;;  %v1753_v24 = vld [vmem:[%s2299_s1 + $0x444] ss:$8 sps:$4 sm:$0xff]  }
  0x55   :  { %1172 = vmatprep.subr.bf16.mxu0 %v1660_v25  ;;  %v1765_v25 = vmov 0  }
  0x57   :  { %1067 = vmatpush1.bf16.msra.mxu1 %v1655_v26  ;;  %v1751_v26 = vld [vmem:[%s2299_s1 + $0x440] ss:$8 sps:$4 sm:$0xff]  }
  0x58   :  { %1173 = vmatpush1.bf16.msra.mxu0 %v1658_v27  ;;  %1068 = vmatprep.subr.bf16.mxu1 %v1663_v28  ;;  %v1756_v27 = vld [vmem:[%s2299_s1 + $0x454] ss:$8 sps:$4 sm:$0xff]   ;;  %v1754_v28 = vld [vmem:[%s2299_s1 + $0x450] ss:$8 sps:$4 sm:$0xff]  }
  0x59   :  { %1174 = vmatprep.subr.bf16.mxu0 %v1666_v32  ;;  %v1760_v32 = vld [vmem:[%s2299_s1 + $0x470] ss:$8 sps:$4 sm:$0xff]  }
  0x5b   :  { %1069 = vmatpush1.bf16.msra.mxu1 %v1661_v34  ;;  %v1764_v34 = vld [vmem:[%s2300_s0 + $0x68] ss:$36 sps:$4 sm:$0xff]  }
  0x5c   :  { %1175 = vmatpush1.bf16.msra.mxu0 %v1664_v35  ;;  %1070 = vmatprep.subr.bf16.mxu1 %v1669_v36  ;;  %v181_v35 = vlaneseq }
  0x5d   :  { %1176 = vmatprep.subr.bf16.mxu0 %v1672_v37 }
  0x5e   :  { %v182_v36 = vshrl.u32 %v181_v35, 7 }
  0x5f   :  { %1071 = vmatpush1.bf16.msra.mxu1 %v1667_v38 }
  0x60   :  { %1177 = vmatpush1.bf16.msra.mxu0 %v1670_v39  ;;  %1072 = vmatprep.subr.bf16.mxu1 %v1675_v40  ;;  %v183_v40 = vsub.s32 0, %v182_v36  ;;  %v187_v43 = vsub.s32 1, %v182_v36 }
  0x61   :  { %1178 = vmatprep.subr.bf16.mxu0 %v1678_v42  ;;  %v179_v42 = vld [vmem:[%s2301_s2] sm:$0x3] }
  0x63   :  { %1073 = vmatpush1.bf16.msra.mxu1 %v1673_v44  ;;  %v184_v44 = vrot.slane %v179_v42, %v183_v40 }
  0x64   :  { %1179 = vmatpush1.bf16.msra.mxu0 %v1676_v45  ;;  %1074 = vmatprep.subr.bf16.mxu1 %v1681_v46  ;;  %v188_v45 = vrot.slane %v179_v42, %v187_v43 }
  0x65   :  { %1180 = vmatprep.subr.bf16.mxu0 %v1684_v47 }
  0x67   :  { %1075 = vmatpush1.bf16.msra.mxu1 %v1679_v48 }
  0x68   :  { %1181 = vmatpush1.bf16.msra.mxu0 %v1682_v49  ;;  %1076 = vmatprep.subr.bf16.mxu1 %v1687_v50 }
  0x69   :  { %1182 = vmatprep.subr.bf16.mxu0 %v1690_v51 }
  0x6b   :  { %1077 = vmatpush1.bf16.msra.mxu1 %v1685_v52 }
  0x6c   :  { %1183 = vmatpush1.bf16.msra.mxu0 %v1688_v53  ;;  %1078 = vmatprep.subr.bf16.mxu1 %v1693_v54 }
  0x6d   :  { %1184 = vmatprep.subr.bf16.mxu0 %v1696_v55 }
  0x6f   :  { %1079 = vmatpush1.bf16.msra.mxu1 %v1691_v56 }
  0x70   :  { %1185 = vmatpush1.bf16.msra.mxu0 %v1694_v57  ;;  %1080 = vmatprep.subr.bf16.mxu1 %v1699_v58 }
  0x71   :  { %1186 = vmatprep.subr.bf16.mxu0 %v1702_v59 }
  0x73   :  { %1081 = vmatpush1.bf16.msra.mxu1 %v1697_v60 }
  0x74   :  { %1187 = vmatpush1.bf16.msra.mxu0 %v1700_v61  ;;  %1082 = vmatprep.subr.bf16.mxu1 %v1705_v62 }
  0x75   :  { %1188 = vmatprep.subr.bf16.mxu0 %v1708_v63 }
  0x77   :  { %1083 = vmatpush1.bf16.msra.mxu1 %v1703_v0 }
  0x78   :  { %1189 = vmatpush1.bf16.msra.mxu0 %v1706_v1  ;;  %1084 = vmatprep.subr.bf16.mxu1 %v1716_v2 }
  0x79   :  { %1190 = vmatprep.subr.bf16.mxu0 %v1720_v3 }
  0x7b   :  { %1085 = vmatpush1.bf16.msra.mxu1 %v1714_v4 }
  0x7c   :  { %1191 = vmatpush1.bf16.msra.mxu0 %v1718_v5  ;;  %1086 = vmatprep.subr.bf16.mxu1 %v1723_v6 }
  0x7d   :  { %1192 = vmatprep.subr.bf16.mxu0 %v1726_v7 }
  0x7f   :  { %1087 = vmatpush1.bf16.msra.mxu1 %v1721_v8 }
  0x80   :  { %1193 = vmatpush1.bf16.msra.mxu0 %v1724_v9  ;;  %1466 = vmatprep.subr.bf16.mxu1 %v1735_v10 }
  0x81   :  { %1215 = vmatprep.subr.bf16.mxu0 %v1735_v10 }
  0x82   :  { %1089 = vmatmul.mubr.bf16.vlgmr.msra.gmra.mrb[0].mxu1 %v1727_v11 }
  0x83   :  { %1195 = vmatmul.mubr.bf16.vlgmr.msra.gmra.mrb[0].mxu0 %v1730_v12  ;;  %1474 = vmatpush1.bf16.msra.mxu1 %v1733_v13 }
  0x84   :  { %1216 = vmatpush1.bf16.msra.mxu0 %v1733_v13  ;;  %1467 = vmatprep.subr.bf16.mxu1 %v1738_v14 }
  0x85   :  { %1217 = vmatprep.subr.bf16.mxu0 %v1738_v14  ;;  %1098 = vmatprep.mubr.bf16.mxu1 %v1739_v15 }
  0x86   :  { %1204 = vmatprep.mubr.bf16.mxu0 %v1741_v16 }
  0x87   :  { %1475 = vmatpush1.bf16.msra.mxu1 %v1736_v17 }
  0x88   :  { %1218 = vmatpush1.bf16.msra.mxu0 %v1736_v17  ;;  %1468 = vmatprep.subr.bf16.mxu1 %v1747_v18 }
  0x89   :  { %1219 = vmatprep.subr.bf16.mxu0 %v1747_v18 }
  0x8a   :  { %1099 = vmatmul.mubr.bf16.gmra.mrb[4].mxu1 %v1743_v19 }
  0x8b   :  { %1205 = vmatmul.mubr.bf16.gmra.mrb[4].mxu0 %v1744_v20  ;;  %1476 = vmatpush1.bf16.msra.mxu1 %v1745_v21 }
  0x8c   :  { %1220 = vmatpush1.bf16.msra.mxu0 %v1745_v21  ;;  %1469 = vmatprep.subr.bf16.mxu1 %v1750_v22 }
  0x8d   :  { %1221 = vmatprep.subr.bf16.mxu0 %v1750_v22  ;;  %1247 = vmatprep.mubr.bf16.mxu0 %v1765_v25 }
  0x8e   :  { %1257 = vmatprep.mubr.bf16.mxu1 %v1765_v25 }
  0x8f   :  { %1477 = vmatpush1.bf16.msra.mxu1 %v1748_v23 }
  0x90   :  { %1222 = vmatpush1.bf16.msra.mxu0 %v1748_v23  ;;  %1470 = vmatprep.subr.bf16.mxu1 %v1753_v24 }
  0x91   :  { %1223 = vmatprep.subr.bf16.mxu0 %v1753_v24 }
  0x93   :  { %1478 = vmatpush1.bf16.msra.mxu1 %v1751_v26 }
  0x94   :  { %1224 = vmatpush1.bf16.msra.mxu0 %v1751_v26  ;;  %1471 = vmatprep.subr.bf16.mxu1 %v1756_v27 }
  0x95   :  { %1225 = vmatprep.subr.bf16.mxu0 %v1756_v27 }
  0x97   :  { %1479 = vmatpush1.bf16.msra.mxu1 %v1754_v28 }
  0x98   :  { %1226 = vmatpush1.bf16.msra.mxu0 %v1754_v28  ;;  %1472 = vmatprep.subr.bf16.mxu1 %v1759_v29 }
  0x99   :  { %1227 = vmatprep.subr.bf16.mxu0 %v1759_v29 }
  0x9b   :  { %1480 = vmatpush1.bf16.msra.mxu1 %v1757_v30 }
  0x9c   :  { %1228 = vmatpush1.bf16.msra.mxu0 %v1757_v30  ;;  %1473 = vmatprep.subr.bf16.mxu1 %v1762_v31 }
  0x9d   :  { %1229 = vmatprep.subr.bf16.mxu0 %v1762_v31 }
  0x9f   :  { %1481 = vmatpush1.bf16.msra.mxu1 %v1760_v32 }
  0xa0   :  { %1230 = vmatpush1.bf16.msra.mxu0 %v1760_v32 }
  0xa2   :  { %1258 = vmatmul.mubr.bf16.vlgmr.msra.gmra.mrb[8].mxu1 %v1764_v34 }
  0xa3   :  { %1248 = vmatmul.mubr.bf16.vlgmr.msra.gmra.mrb[0].mxu0 %v1763_v33 }
 0x155   :  { %v1090_v37 = vpop.f32.mrb[0].mxu1 }
 0x156   :  { %v1092_v38 = vpop.f32.mrb[1].mxu1  ;;  %v1482_v62 = vadd.f32 %v1090_v37, %v184_v44 }
 0x157   :  { %v1094_v39 = vpop.f32.mrb[2].mxu1  ;;  %v1484_v63 = vadd.f32 %v1092_v38, %v188_v45 }
 0x158   :  { %v1096_v41 = vpop.f32.mrb[3].mxu1  ;;  %v1486_v6 = vadd.f32 %v1094_v39, %v184_v44 }
 0x159   :  { %v1488_v7 = vadd.f32 %v1096_v41, %v188_v45 }
 0x15d   :  { %v1100_v46 = vpop.f32.mrb[4].mxu1 }
 0x15e   :  { %v1206_v47 = vpop.f32.mrb[4].mxu0  ;;  %v1490_v48 = vadd.f32 %v1100_v46, %v184_v44  ;;  %v1102_v49 = vpop.f32.mrb[5].mxu1 }
 0x15f   :  { %v1208_v50 = vpop.f32.mrb[5].mxu0  ;;  %v1493_v51 = vadd.f32 %v1102_v49, %v188_v45  ;;  %v1104_v52 = vpop.f32.mrb[6].mxu1 }
 0x160   :  { %v1210_v53 = vpop.f32.mrb[6].mxu0  ;;  %v1491_v54 = vadd.f32 %v1490_v48, %v1206_v47  ;;  %v1496_v55 = vadd.f32 %v1104_v52, %v184_v44  ;;  %v1106_v56 = vpop.f32.mrb[7].mxu1 }
 0x161   :  { %v1212_v57 = vpop.f32.mrb[7].mxu0  ;;  %v1494_v58 = vadd.f32 %v1493_v51, %v1208_v50  ;;  %v1499_v59 = vadd.f32 %v1106_v56, %v188_v45 }
 0x162   :  { %v1497_v60 = vadd.f32 %v1496_v55, %v1210_v53 }
 0x163   :  { %v1500_v61 = vadd.f32 %v1499_v59, %v1212_v57 }
 0x175   :  { %v1259_v1 = vpop.f32.mrb[8].mxu1 }
 0x176   :  { %v1249_v0 = vpop.f32.mrb[0].mxu0  ;;  %v1492_v3 = vadd.f32 %v1491_v54, %v1259_v1  ;;  %v1261_v5 = vpop.f32.mrb[9].mxu1 }
 0x177   :  { %v1483_v2 = vadd.f32 %v1482_v62, %v1249_v0  ;;  %v1251_v4 = vpop.f32.mrb[1].mxu0  ;;  %v1495_v9 = vadd.f32 %v1494_v58, %v1261_v5  ;;  %v1263_v11 = vpop.f32.mrb[10].mxu1 }
 0x178   :  { %v1485_v8 = vadd.f32 %v1484_v63, %v1251_v4  ;;  %v1253_v10 = vpop.f32.mrb[2].mxu0  ;;  %vm1272_vm1 = vcmp.ge.f32.partialorder %v1492_v3, 0.0  ;;  %v1280_v13 = vmul.f32 0.2, %v1492_v3  ;;  %v1498_v19 = vadd.f32 %v1497_v60, %v1263_v11  ;;  %v1265_v21 = vpop.f32.mrb[11].mxu1 }
 0x179   :  { %vm1268_vm0 = vcmp.ge.f32.partialorder %v1483_v2, 0.0  ;;  %v1276_v12 = vmul.f32 0.2, %v1483_v2  ;;  %vm1273_vm3 = vcmp.ge.f32.partialorder %v1495_v9, 0.0  ;;  %v1281_v15 = vmul.f32 0.2, %v1495_v9 }
 0x17a   :  { %vm1269_vm2 = vcmp.ge.f32.partialorder %v1485_v8, 0.0  ;;  %v1277_v14 = vmul.f32 0.2, %v1485_v8  ;;  %v1288_v17 = vsel %vm1272_vm1, %v1492_v3, %v1280_v13  ;;  %v1487_v18 = vadd.f32 %v1486_v6, %v1253_v10  ;;  %v1255_v20 = vpop.f32.mrb[3].mxu0 }
 0x17b   :  { %v1284_v16 = vsel %vm1268_vm0, %v1483_v2, %v1276_v12  ;;  %1296 = vst [vmem:[%s2302_s3 + $0x20] sm:$0xff] %v1288_v17  ;;  %v1289_v23 = vsel %vm1273_vm3, %v1495_v9, %v1281_v15  ;;  %v1489_v24 = vadd.f32 %v1488_v7, %v1255_v20  ;;  %v1501_v25 = vadd.f32 %v1500_v61, %v1265_v21 }
 0x17c   :  { %1292 = vst [vmem:[%s2302_s3] sm:$0xff] %v1284_v16  ;;  %v1285_v22 = vsel %vm1269_vm2, %v1485_v8, %v1277_v14  ;;  %1297 = vst [vmem:[%s2302_s3 + $0x28] sm:$0xff] %v1289_v23  ;;  %vm1270_vm4 = vcmp.ge.f32.partialorder %v1487_v18, 0.0  ;;  %v1278_v26 = vmul.f32 0.2, %v1487_v18  ;;  %vm1274_vm5 = vcmp.ge.f32.partialorder %v1498_v19, 0.0 }
 0x17d   :  { %1293 = vst [vmem:[%s2302_s3 + $0x8] sm:$0xff] %v1285_v22  ;;  %v1282_v27 = vmul.f32 0.2, %v1498_v19  ;;  %vm1271_vm6 = vcmp.ge.f32.partialorder %v1489_v24, 0.0  ;;  %v1279_v28 = vmul.f32 0.2, %v1489_v24 }
 0x17e   :  { %vm1275_vm7 = vcmp.ge.f32.partialorder %v1501_v25, 0.0  ;;  %v1283_v29 = vmul.f32 0.2, %v1501_v25  ;;  %v1286_v30 = vsel %vm1270_vm4, %v1487_v18, %v1278_v26 }
 0x17f   :  { %v1290_v31 = vsel %vm1274_vm5, %v1498_v19, %v1282_v27  ;;  %1294 = vst [vmem:[%s2302_s3 + $0x10] sm:$0xff] %v1286_v30  ;;  %v1287_v32 = vsel %vm1271_vm6, %v1489_v24, %v1279_v28 }
 0x180   :  { %1298 = vst [vmem:[%s2302_s3 + $0x30] sm:$0xff] %v1290_v31  ;;  %v1291_v33 = vsel %vm1275_vm7, %v1501_v25, %v1283_v29  ;;  %1295 = vst [vmem:[%s2302_s3 + $0x18] sm:$0xff] %v1287_v32 }
 0x181   :  { %1299 = vst [vmem:[%s2302_s3 + $0x38] sm:$0xff] %v1291_v33 }

// kernel: _lambda_.4
= control target key start
LH: loop header
LB: loop body
LE: loop exit
PB: predicated region body
PF: predicated region fallthrough
CT: control target
= control target key end

     0   :  { %8 = vsyncpa [#allocation3], 0  ;;  %s2344_s0 = inlined_call_operand.vmem [shape: bf16[24,2048], index: 0, kind: input, shape index: {}]   ;;  %s2345_s1 = inlined_call_operand.hbm [shape: bf16[2048,128], index: 1, kind: input, shape index: {}]   ;;  %s2346_s2 = inlined_call_operand.hbm [shape: f32[1,128], index: 2, kind: input, shape index: {}]   ;;  %s2347_s3 = inlined_call_operand.vmem [shape: f32[24,128], index: 3, kind: output, shape index: {}]  }
   0x1   :  { %9 = vsyncpa [#allocation5], 0  ;;  %s2215_s12 = smov [#allocation2]   ;;  %s2167_s16 = scalar_lea.hbm %s2345_s1, 16384 }
   0x2   :  { %s17_s13 = sshll.u32 %s2215_s12, 4  ;;  %p2168_p0 = scmp.ne.s32.totalorder %s2345_s1, %s2167_s16  ;;  %s18_s13 = int_to_ptr.vmem [resolvable:$true] %s17_s13 }
   0x3   :  { %p2171_p1 = scmp.lt.u32.totalorder %s2167_s16, %s2345_s1 }
   0x5   :  { %p2173_p2 = pnand %p2171_p1, %p2168_p0 }
   0x7   :  { %2176 = shalt.err (!%p2173_p2)
}
   0x8   :  { %s2177_s21 = scalar_lea.vmem %s18_s13, 16384  ;;  %p2182_p4 = scmp.lt.s32.totalorder %s18_s13, %s18_s13 }
   0x9   :  { %p2178_p3 = scmp.ne.s32.totalorder %s18_s13, %s2177_s21  ;;  %p2183_p5 = scmp.lt.s32.totalorder %s2177_s21, %s2177_s21 }
   0xb   :  { %p2184_p6 = por %p2183_p5, %p2182_p4 }
   0xd   :  { %p2185_p7 = pnand %p2184_p6, %p2178_p3 }
   0xf   :  { %2188 = shalt.err (!%p2185_p7)
}
  0x10   :  { %s2216_s22 = smov 64   ;;  %s2217_s23 = smov 4  }
  0x11   :  { %23 = dma.hbm_to_vmem [thread:$0]  %s2345_s1, 16384, %s18_s13, [#allocation3], %s2216_s22, %s2216_s22, %s2217_s23  }
  0x12   :  { %s2218_s26 = smov [#allocation4]   ;;  %s2189_s30 = scalar_lea.hbm %s2346_s2, 16 }
  0x13   :  { %s30_s27 = sshll.u32 %s2218_s26, 4  ;;  %p2190_p8 = scmp.ne.s32.totalorder %s2346_s2, %s2189_s30  ;;  %s31_s27 = int_to_ptr.vmem [resolvable:$true] %s30_s27 }
  0x14   :  { %p2193_p9 = scmp.lt.u32.totalorder %s2189_s30, %s2346_s2 }
  0x16   :  { %p2195_p10 = pnand %p2193_p9, %p2190_p8 }
  0x18   :  { %2198 = shalt.err (!%p2195_p10)
}
  0x19   :  { %s2199_s8 = scalar_lea.vmem %s31_s27, 16  ;;  %s2203_s1 = scalar_lea.vmem %s31_s27, 32 }
  0x1a   :  { %p2200_p11 = scmp.ne.s32.totalorder %s31_s27, %s2199_s8  ;;  %p2204_p12 = scmp.lt.s32.totalorder %s31_s27, %s31_s27 }
  0x1b   :  { %p2205_p13 = scmp.lt.s32.totalorder %s2203_s1, %s2199_s8 }
  0x1d   :  { %p2206_p0 = por %p2205_p13, %p2204_p12 }
  0x1f   :  { %p2207_p1 = pnand %p2206_p0, %p2200_p11 }
  0x21   :  { %2210 = shalt.err (!%p2207_p1)
}
  0x22   :  { %33 = dma.hbm_to_vmem [thread:$0]  %s2346_s2, 16, %s31_s27, [#allocation5]  }
  0x23   :  { %2211 = dma.done.wait [#allocation3], 16384  }
  0x24   :  { %2212 = vsyncadd [#allocation3], 4294950912 }
  0x25   :  { %2213 = dma.done.wait [#allocation5], 16  }
  0x26   :  { %2214 = vsyncadd [#allocation5], 4294967280  ;;  %v2023_v0 = vld [vmem:[#allocation2 + $0x40] sm:$0xff]   ;;  %v2027_v4 = vld [vmem:[#allocation2 + $0x48] sm:$0xff]  }
  0x27   :  { %v2024_v1 = vld [vmem:[#allocation2 + $0xc0] sm:$0xff]   ;;  %1795 = vmatprep.subr.bf16.mxu0 %v2023_v0  ;;  %v2028_v5 = vld [vmem:[#allocation2 + $0xc8] sm:$0xff]   ;;  %v2031_v8 = vld [vmem:[#allocation2 + $0x50] sm:$0xff]  }
  0x28   :  { %v2025_v2 = vld [vmem:[#allocation2] sm:$0xff]   ;;  %1823 = vmatprep.subr.bf16.mxu1 %v2024_v1  ;;  %v2029_v6 = vld [vmem:[#allocation2 + $0x8] sm:$0xff]   ;;  %v2032_v9 = vld [vmem:[#allocation2 + $0xd0] sm:$0xff]  }
  0x29   :  { %v2026_v3 = vld [vmem:[#allocation2 + $0x80] sm:$0xff]   ;;  %1796 = vmatpush3.bf16.msra.mxu0 %v2025_v2  ;;  %v2030_v7 = vld [vmem:[#allocation2 + $0x88] sm:$0xff]   ;;  %v2033_v10 = vld [vmem:[#allocation2 + $0x10] sm:$0xff]  }
  0x2a   :  { %1824 = vmatpush3.bf16.msra.mxu1 %v2026_v3  ;;  %1797 = vmatprep.subr.bf16.mxu0 %v2027_v4  ;;  %v2034_v11 = vld [vmem:[#allocation2 + $0x90] sm:$0xff]   ;;  %v2035_v12 = vld [vmem:[#allocation2 + $0x58] sm:$0xff]   ;;  %v2039_v16 = vld [vmem:[#allocation2 + $0x60] sm:$0xff]  }
  0x2b   :  { %1825 = vmatprep.subr.bf16.mxu1 %v2028_v5  ;;  %v2036_v13 = vld [vmem:[#allocation2 + $0xd8] sm:$0xff]   ;;  %v2040_v17 = vld [vmem:[#allocation2 + $0xe0] sm:$0xff]   ;;  %v2043_v20 = vld [vmem:[#allocation2 + $0x68] sm:$0xff]  }
  0x2c   :  { %v2037_v14 = vld [vmem:[#allocation2 + $0x18] sm:$0xff]   ;;  %v2041_v18 = vld [vmem:[#allocation2 + $0x20] sm:$0xff]   ;;  %v2044_v21 = vld [vmem:[#allocation2 + $0xe8] sm:$0xff]  }
  0x2d   :  { %1798 = vmatpush3.bf16.msra.mxu0 %v2029_v6  ;;  %v2038_v15 = vld [vmem:[#allocation2 + $0x98] sm:$0xff]   ;;  %v2042_v19 = vld [vmem:[#allocation2 + $0xa0] sm:$0xff]   ;;  %v2045_v22 = vld [vmem:[#allocation2 + $0x28] sm:$0xff]  }
  0x2e   :  { %1826 = vmatpush3.bf16.msra.mxu1 %v2030_v7  ;;  %1799 = vmatprep.subr.bf16.mxu0 %v2031_v8  ;;  %v2046_v23 = vld [vmem:[#allocation2 + $0xa8] sm:$0xff]   ;;  %v2047_v24 = vld [vmem:[#allocation2 + $0x70] sm:$0xff]   ;;  %v2051_v28 = vld [vmem:[#allocation2 + $0x78] sm:$0xff]  }
  0x2f   :  { %1827 = vmatprep.subr.bf16.mxu1 %v2032_v9  ;;  %v2048_v25 = vld [vmem:[#allocation2 + $0xf0] sm:$0xff]   ;;  %v2052_v29 = vld [vmem:[#allocation2 + $0xf8] sm:$0xff]   ;;  %v41_v32 = vld [vmem:[%s2344_s0] sm:$0xff] }
  0x30   :  { %v2049_v26 = vld [vmem:[#allocation2 + $0x30] sm:$0xff]   ;;  %v2053_v30 = vld [vmem:[#allocation2 + $0x38] sm:$0xff]   ;;  %v49_v33 = vld [vmem:[%s2344_s0 + $0x40] sm:$0xff] }
  0x31   :  { %1800 = vmatpush3.bf16.msra.mxu0 %v2033_v10  ;;  %v2050_v27 = vld [vmem:[#allocation2 + $0xb0] sm:$0xff]   ;;  %v2054_v31 = vld [vmem:[#allocation2 + $0xb8] sm:$0xff]   ;;  %v42_v34 = vld [vmem:[%s2344_s0 + $0x8] sm:$0xff]  ;;  %v1635_v35 = vcombine.low %v41_v32, %v49_v33  ;;  %v1636_v36 = vcombine.high %v41_v32, %v49_v33 }
  0x32   :  { %1828 = vmatpush3.bf16.msra.mxu1 %v2034_v11  ;;  %1801 = vmatprep.subr.bf16.mxu0 %v2035_v12  ;;  %v50_v37 = vld [vmem:[%s2344_s0 + $0x48] sm:$0xff]  ;;  %v2055_v40 = vld [vmem:[#allocation2 + $0x140] sm:$0xff]   ;;  %v2063_v48 = vld [vmem:[#allocation2 + $0x150] sm:$0xff]  }
  0x33   :  { %1829 = vmatprep.subr.bf16.mxu1 %v2036_v13  ;;  %v1637_v38 = vcombine.low %v42_v34, %v50_v37  ;;  %v1638_v39 = vcombine.high %v42_v34, %v50_v37  ;;  %1264 = vmatprep.mubr.bf16.mxu0 %v1636_v36  ;;  %v2056_v41 = vld [vmem:[#allocation2 + $0x1c0] sm:$0xff]   ;;  %v2059_v44 = vld [vmem:[#allocation2 + $0x148] sm:$0xff]   ;;  %v2064_v49 = vld [vmem:[#allocation2 + $0x1d0] sm:$0xff]  }
  0x34   :  { %v2057_v42 = vld [vmem:[#allocation2 + $0x100] sm:$0xff]   ;;  %v2060_v45 = vld [vmem:[#allocation2 + $0x1c8] sm:$0xff]   ;;  %v2065_v50 = vld [vmem:[#allocation2 + $0x110] sm:$0xff]  }
  0x35   :  { %1802 = vmatpush3.bf16.msra.mxu0 %v2037_v14  ;;  %1312 = vmatprep.mubr.bf16.mxu1 %v1638_v39  ;;  %v2058_v43 = vld [vmem:[#allocation2 + $0x180] sm:$0xff]   ;;  %v2061_v46 = vld [vmem:[#allocation2 + $0x108] sm:$0xff]   ;;  %v2066_v51 = vld [vmem:[#allocation2 + $0x190] sm:$0xff]  }
  0x36   :  { %1830 = vmatpush3.bf16.msra.mxu1 %v2038_v15  ;;  %1803 = vmatprep.subr.bf16.mxu0 %v2039_v16  ;;  %v2062_v47 = vld [vmem:[#allocation2 + $0x188] sm:$0xff]   ;;  %v2067_v52 = vld [vmem:[#allocation2 + $0x158] sm:$0xff]   ;;  %v2071_v56 = vld [vmem:[#allocation2 + $0x160] sm:$0xff]  }
  0x37   :  { %1831 = vmatprep.subr.bf16.mxu1 %v2040_v17  ;;  %v2068_v53 = vld [vmem:[#allocation2 + $0x1d8] sm:$0xff]   ;;  %v2072_v57 = vld [vmem:[#allocation2 + $0x1e0] sm:$0xff]   ;;  %v2075_v60 = vld [vmem:[#allocation2 + $0x168] sm:$0xff]  }
  0x38   :  { %v2069_v54 = vld [vmem:[#allocation2 + $0x118] sm:$0xff]   ;;  %v2073_v58 = vld [vmem:[#allocation2 + $0x120] sm:$0xff]   ;;  %v2076_v61 = vld [vmem:[#allocation2 + $0x1e8] sm:$0xff]  }
  0x39   :  { %1804 = vmatpush3.bf16.msra.mxu0 %v2041_v18  ;;  %v2070_v55 = vld [vmem:[#allocation2 + $0x198] sm:$0xff]   ;;  %v2074_v59 = vld [vmem:[#allocation2 + $0x1a0] sm:$0xff]   ;;  %v2078_v0 = vld [vmem:[#allocation2 + $0x128] sm:$0xff]  }
  0x3a   :  { %1832 = vmatpush3.bf16.msra.mxu1 %v2042_v19  ;;  %1805 = vmatprep.subr.bf16.mxu0 %v2043_v20  ;;  %v57_v62 = vld [vmem:[%s2344_s0 + $0x80] sm:$0xff]  ;;  %v2079_v2 = vld [vmem:[#allocation2 + $0x1a8] sm:$0xff]   ;;  %v2083_v6 = vld [vmem:[#allocation2 + $0x170] sm:$0xff]  }
  0x3b   :  { %1833 = vmatprep.subr.bf16.mxu1 %v2044_v21  ;;  %v1652_v63 = vcombine.high %v57_v62, %v57_v62  ;;  %v1651_v1 = vcombine.low %v57_v62, %v57_v62  ;;  %v58_v3 = vld [vmem:[%s2344_s0 + $0x88] sm:$0xff]  ;;  %v2084_v7 = vld [vmem:[#allocation2 + $0x1f0] sm:$0xff]   ;;  %v2087_v10 = vld [vmem:[#allocation2 + $0x178] sm:$0xff]  }
  0x3c   :  { %v1654_v4 = vcombine.high %v58_v3, %v58_v3  ;;  %v1653_v5 = vcombine.low %v58_v3, %v58_v3  ;;  %v2085_v8 = vld [vmem:[#allocation2 + $0x130] sm:$0xff]   ;;  %v2088_v11 = vld [vmem:[#allocation2 + $0x1f8] sm:$0xff]   ;;  %v46_v62 = vld [vmem:[%s2344_s0 + $0x28] sm:$0xff] }
  0x3d   :  { %1806 = vmatpush3.bf16.msra.mxu0 %v2045_v22  ;;  %v2086_v9 = vld [vmem:[#allocation2 + $0x1b0] sm:$0xff]   ;;  %v2089_v12 = vld [vmem:[#allocation2 + $0x138] sm:$0xff]   ;;  %v2091_v22 = vld [vmem:[#allocation2 + $0x240] sm:$0xff]  }
  0x3e   :  { %1834 = vmatpush3.bf16.msra.mxu1 %v2046_v23  ;;  %1807 = vmatprep.subr.bf16.mxu0 %v2047_v24  ;;  %v2090_v13 = vld [vmem:[#allocation2 + $0x1b8] sm:$0xff]   ;;  %v43_v14 = vld [vmem:[%s2344_s0 + $0x10] sm:$0xff]  ;;  %v2092_v23 = vld [vmem:[#allocation2 + $0x2c0] sm:$0xff]  }
  0x3f   :  { %1835 = vmatprep.subr.bf16.mxu1 %v2048_v25  ;;  %v51_v15 = vld [vmem:[%s2344_s0 + $0x50] sm:$0xff]  ;;  %v44_v16 = vld [vmem:[%s2344_s0 + $0x18] sm:$0xff]  ;;  %v2093_v24 = vld [vmem:[#allocation2 + $0x200] sm:$0xff]  }
  0x40   :  { %v1639_v17 = vcombine.low %v43_v14, %v51_v15  ;;  %v1640_v18 = vcombine.high %v43_v14, %v51_v15  ;;  %v52_v19 = vld [vmem:[%s2344_s0 + $0x58] sm:$0xff]  ;;  %v2094_v25 = vld [vmem:[#allocation2 + $0x280] sm:$0xff]   ;;  %v2101_v33 = vld [vmem:[#allocation2 + $0x250] sm:$0xff]  }
  0x41   :  { %1808 = vmatpush3.bf16.msra.mxu0 %v2049_v26  ;;  %v1641_v20 = vcombine.low %v44_v16, %v52_v19  ;;  %v1642_v21 = vcombine.high %v44_v16, %v52_v19  ;;  %v2095_v26 = vld [vmem:[#allocation2 + $0x248] sm:$0xff]   ;;  %v2102_v34 = vld [vmem:[#allocation2 + $0x2d0] sm:$0xff]  }
  0x42   :  { %1836 = vmatpush3.bf16.msra.mxu1 %v2050_v27  ;;  %1809 = vmatprep.subr.bf16.mxu0 %v2051_v28  ;;  %v2096_v27 = vld [vmem:[#allocation2 + $0x2c8] sm:$0xff]   ;;  %v2104_v37 = vld [vmem:[#allocation2 + $0x210] sm:$0xff]  }
  0x43   :  { %1837 = vmatprep.subr.bf16.mxu1 %v2052_v29  ;;  %v2097_v28 = vld [vmem:[#allocation2 + $0x208] sm:$0xff]   ;;  %v2105_v39 = vld [vmem:[#allocation2 + $0x290] sm:$0xff]  }
  0x44   :  { %v2098_v29 = vld [vmem:[#allocation2 + $0x288] sm:$0xff]   ;;  %v2137_v15 = vld [vmem:[#allocation2 + $0x350] sm:$0xff]  }
  0x45   :  { %1810 = vmatpush3.bf16.msra.mxu0 %v2053_v30  ;;  %v59_v30 = vld [vmem:[%s2344_s0 + $0x90] sm:$0xff] }
  0x46   :  { %1838 = vmatpush3.bf16.msra.mxu1 %v2054_v31  ;;  %1851 = vmatprep.subr.bf16.mxu0 %v2055_v40  ;;  %v1656_v31 = vcombine.high %v59_v30, %v59_v30  ;;  %v1655_v32 = vcombine.low %v59_v30, %v59_v30  ;;  %v2107_v40 = vld [vmem:[#allocation2 + $0x258] sm:$0xff]   ;;  %v2138_v16 = vld [vmem:[#allocation2 + $0x3d0] sm:$0xff]   ;;  %v2151_v30 = vld [vmem:[#allocation2 + $0x368] sm:$0xff]  }
  0x47   :  { %1879 = vmatprep.subr.bf16.mxu1 %v2056_v41  ;;  %v2108_v41 = vld [vmem:[#allocation2 + $0x2d8] sm:$0xff]   ;;  %v2140_v19 = vld [vmem:[#allocation2 + $0x310] sm:$0xff]  }
  0x48   :  { %1265 = vmatmul.mubr.bf16.vlgmr.msra.gmra.mrb[0].mxu0 %v1635_v35  ;;  %v60_v35 = vld [vmem:[%s2344_s0 + $0x98] sm:$0xff] }
  0x49   :  { %1313 = vmatmul.mubr.bf16.vlgmr.msra.gmra.mrb[0].mxu1 %v1637_v38  ;;  %1852 = vmatpush3.bf16.msra.mxu0 %v2057_v42  ;;  %v1658_v36 = vcombine.high %v60_v35, %v60_v35  ;;  %v1657_v38 = vcombine.low %v60_v35, %v60_v35  ;;  %v2109_v42 = vld [vmem:[#allocation2 + $0x218] sm:$0xff]   ;;  %v2156_v35 = vld [vmem:[#allocation2 + $0x3f0] sm:$0xff]  }
  0x4a   :  { %1880 = vmatpush3.bf16.msra.mxu1 %v2058_v43  ;;  %1853 = vmatprep.subr.bf16.mxu0 %v2059_v44  ;;  %v2110_v43 = vld [vmem:[#allocation2 + $0x298] sm:$0xff]   ;;  %v2111_v44 = vld [vmem:[#allocation2 + $0x260] sm:$0xff]  }
  0x4b   :  { %1881 = vmatprep.subr.bf16.mxu1 %v2060_v45  ;;  %1272 = vmatprep.mubr.bf16.mxu0 %v1652_v63  ;;  %v2112_v45 = vld [vmem:[#allocation2 + $0x2e0] sm:$0xff]  }
  0x4c   :  { %1320 = vmatprep.mubr.bf16.mxu1 %v1654_v4  ;;  %v2127_v4 = vld [vmem:[#allocation2 + $0x340] sm:$0xff]  }
  0x4d   :  { %1854 = vmatpush3.bf16.msra.mxu0 %v2061_v46  ;;  %v2113_v46 = vld [vmem:[#allocation2 + $0x220] sm:$0xff]  }
  0x4e   :  { %1882 = vmatpush3.bf16.msra.mxu1 %v2062_v47  ;;  %1855 = vmatprep.subr.bf16.mxu0 %v2063_v48  ;;  %v2114_v47 = vld [vmem:[#allocation2 + $0x2a0] sm:$0xff]   ;;  %v2115_v48 = vld [vmem:[#allocation2 + $0x268] sm:$0xff]  }
  0x4f   :  { %1883 = vmatprep.subr.bf16.mxu1 %v2064_v49  ;;  %v2116_v49 = vld [vmem:[#allocation2 + $0x2e8] sm:$0xff]  }
  0x50   :  { %1273 = vmatmul.mubr.bf16.gmra.mrb[4].mxu0 %v1651_v1  ;;  %v54_v1 = vld [vmem:[%s2344_s0 + $0x68] sm:$0xff] }
  0x51   :  { %1856 = vmatpush3.bf16.msra.mxu0 %v2065_v50  ;;  %1321 = vmatmul.mubr.bf16.gmra.mrb[4].mxu1 %v1653_v5  ;;  %v2117_v50 = vld [vmem:[#allocation2 + $0x228] sm:$0xff]   ;;  %v1646_v3 = vcombine.high %v46_v62, %v54_v1  ;;  %v2128_v5 = vld [vmem:[#allocation2 + $0x3c0] sm:$0xff]  }
  0x52   :  { %1884 = vmatpush3.bf16.msra.mxu1 %v2066_v51  ;;  %1857 = vmatprep.subr.bf16.mxu0 %v2067_v52  ;;  %v2118_v51 = vld [vmem:[#allocation2 + $0x2a8] sm:$0xff]   ;;  %v2119_v52 = vld [vmem:[#allocation2 + $0x270] sm:$0xff]  }
  0x53   :  { %1885 = vmatprep.subr.bf16.mxu1 %v2068_v53  ;;  %1360 = vmatprep.mubr.bf16.mxu0 %v1640_v18  ;;  %v2120_v53 = vld [vmem:[#allocation2 + $0x2f0] sm:$0xff]  }
  0x54   :  { %1408 = vmatprep.mubr.bf16.mxu1 %v1642_v21  ;;  %v2141_v21 = vld [vmem:[#allocation2 + $0x390] sm:$0xff]  }
  0x55   :  { %1858 = vmatpush3.bf16.msra.mxu0 %v2069_v54  ;;  %v2121_v54 = vld [vmem:[#allocation2 + $0x230] sm:$0xff]  }
  0x56   :  { %1886 = vmatpush3.bf16.msra.mxu1 %v2070_v55  ;;  %1859 = vmatprep.subr.bf16.mxu0 %v2071_v56  ;;  %v2122_v55 = vld [vmem:[#allocation2 + $0x2b0] sm:$0xff]   ;;  %v2123_v56 = vld [vmem:[#allocation2 + $0x278] sm:$0xff]  }
  0x57   :  { %1887 = vmatprep.subr.bf16.mxu1 %v2072_v57  ;;  %v2124_v57 = vld [vmem:[#allocation2 + $0x2f8] sm:$0xff]  }
  0x59   :  { %1860 = vmatpush3.bf16.msra.mxu0 %v2073_v58  ;;  %v2125_v58 = vld [vmem:[#allocation2 + $0x238] sm:$0xff]  }
  0x5a   :  { %1888 = vmatpush3.bf16.msra.mxu1 %v2074_v59  ;;  %1861 = vmatprep.subr.bf16.mxu0 %v2075_v60  ;;  %v2126_v59 = vld [vmem:[#allocation2 + $0x2b8] sm:$0xff]   ;;  %v45_v60 = vld [vmem:[%s2344_s0 + $0x20] sm:$0xff] }
  0x5b   :  { %1889 = vmatprep.subr.bf16.mxu1 %v2076_v61  ;;  %v53_v61 = vld [vmem:[%s2344_s0 + $0x60] sm:$0xff] }
  0x5c   :  { %v1643_v63 = vcombine.low %v45_v60, %v53_v61 }
  0x5d   :  { %1862 = vmatpush3.bf16.msra.mxu0 %v2078_v0  ;;  %v1644_v0 = vcombine.high %v45_v60, %v53_v61 }
  0x5e   :  { %1890 = vmatpush3.bf16.msra.mxu1 %v2079_v2  ;;  %1863 = vmatprep.subr.bf16.mxu0 %v2083_v6  ;;  %v1645_v2 = vcombine.low %v46_v62, %v54_v1  ;;  %v2129_v6 = vld [vmem:[#allocation2 + $0x300] sm:$0xff]  }
  0x5f   :  { %1891 = vmatprep.subr.bf16.mxu1 %v2084_v7  ;;  %v2130_v7 = vld [vmem:[#allocation2 + $0x380] sm:$0xff]  }
  0x61   :  { %1864 = vmatpush3.bf16.msra.mxu0 %v2085_v8  ;;  %v2131_v8 = vld [vmem:[#allocation2 + $0x348] sm:$0xff]  }
  0x62   :  { %1892 = vmatpush3.bf16.msra.mxu1 %v2086_v9  ;;  %1865 = vmatprep.subr.bf16.mxu0 %v2087_v10  ;;  %v2132_v9 = vld [vmem:[#allocation2 + $0x3c8] sm:$0xff]  }
  0x63   :  { %1893 = vmatprep.subr.bf16.mxu1 %v2088_v11  ;;  %v2133_v10 = vld [vmem:[#allocation2 + $0x308] sm:$0xff]  }
  0x64   :  { %v2134_v11 = vld [vmem:[#allocation2 + $0x388] sm:$0xff]  }
  0x65   :  { %1866 = vmatpush3.bf16.msra.mxu0 %v2089_v12  ;;  %v61_v12 = vld [vmem:[%s2344_s0 + $0xa0] sm:$0xff] }
  0x66   :  { %1894 = vmatpush3.bf16.msra.mxu1 %v2090_v13  ;;  %1907 = vmatprep.subr.bf16.mxu0 %v2091_v22  ;;  %v1660_v13 = vcombine.high %v61_v12, %v61_v12  ;;  %v1659_v14 = vcombine.low %v61_v12, %v61_v12  ;;  %v2143_v22 = vld [vmem:[#allocation2 + $0x358] sm:$0xff]  }
  0x67   :  { %1935 = vmatprep.subr.bf16.mxu1 %v2092_v23  ;;  %v2144_v23 = vld [vmem:[#allocation2 + $0x3d8] sm:$0xff]  }
  0x68   :  { %1361 = vmatmul.mubr.bf16.vlgmr.msra.gmra.mrb[8].mxu0 %v1639_v17  ;;  %v62_v17 = vld [vmem:[%s2344_s0 + $0xa8] sm:$0xff] }
  0x69   :  { %1409 = vmatmul.mubr.bf16.vlgmr.msra.gmra.mrb[8].mxu1 %v1641_v20  ;;  %1908 = vmatpush3.bf16.msra.mxu0 %v2093_v24  ;;  %v1662_v18 = vcombine.high %v62_v17, %v62_v17  ;;  %v1661_v20 = vcombine.low %v62_v17, %v62_v17  ;;  %v2145_v24 = vld [vmem:[#allocation2 + $0x318] sm:$0xff]  }
  0x6a   :  { %1936 = vmatpush3.bf16.msra.mxu1 %v2094_v25  ;;  %1909 = vmatprep.subr.bf16.mxu0 %v2095_v26  ;;  %v2146_v25 = vld [vmem:[#allocation2 + $0x398] sm:$0xff]   ;;  %v2147_v26 = vld [vmem:[#allocation2 + $0x360] sm:$0xff]  }
  0x6b   :  { %1937 = vmatprep.subr.bf16.mxu1 %v2096_v27  ;;  %1368 = vmatprep.mubr.bf16.mxu0 %v1656_v31  ;;  %v2148_v27 = vld [vmem:[#allocation2 + $0x3e0] sm:$0xff]   ;;  %v2152_v31 = vld [vmem:[#allocation2 + $0x3e8] sm:$0xff]  }
  0x6c   :  { %1416 = vmatprep.mubr.bf16.mxu1 %v1658_v36  ;;  %v2157_v36 = vld [vmem:[#allocation2 + $0x330] sm:$0xff]  }
  0x6d   :  { %1910 = vmatpush3.bf16.msra.mxu0 %v2097_v28  ;;  %v2149_v28 = vld [vmem:[#allocation2 + $0x320] sm:$0xff]  }
  0x6e   :  { %1938 = vmatpush3.bf16.msra.mxu1 %v2098_v29  ;;  %1911 = vmatprep.subr.bf16.mxu0 %v2101_v33  ;;  %v2150_v29 = vld [vmem:[#allocation2 + $0x3a0] sm:$0xff]   ;;  %v2154_v33 = vld [vmem:[#allocation2 + $0x3a8] sm:$0xff]  }
  0x6f   :  { %1939 = vmatprep.subr.bf16.mxu1 %v2102_v34  ;;  %v2155_v34 = vld [vmem:[#allocation2 + $0x370] sm:$0xff]  }
  0x70   :  { %1369 = vmatmul.mubr.bf16.gmra.mrb[12].mxu0 %v1655_v32  ;;  %v2153_v32 = vld [vmem:[#allocation2 + $0x328] sm:$0xff]  }
  0x71   :  { %1912 = vmatpush3.bf16.msra.mxu0 %v2104_v37  ;;  %1417 = vmatmul.mubr.bf16.gmra.mrb[12].mxu1 %v1657_v38  ;;  %v2158_v37 = vld [vmem:[#allocation2 + $0x3b0] sm:$0xff]   ;;  %v2159_v38 = vld [vmem:[#allocation2 + $0x378] sm:$0xff]  }
  0x72   :  { %1940 = vmatpush3.bf16.msra.mxu1 %v2105_v39  ;;  %1913 = vmatprep.subr.bf16.mxu0 %v2107_v40  ;;  %v2160_v39 = vld [vmem:[#allocation2 + $0x3f8] sm:$0xff]  }
  0x73   :  { %1941 = vmatprep.subr.bf16.mxu1 %v2108_v41  ;;  %1456 = vmatprep.mubr.bf16.mxu0 %v1644_v0  ;;  %v2161_v40 = vld [vmem:[#allocation2 + $0x338] sm:$0xff]  }
  0x74   :  { %1504 = vmatprep.mubr.bf16.mxu1 %v1646_v3  ;;  %v2162_v41 = vld [vmem:[#allocation2 + $0x3b8] sm:$0xff]  }
  0x75   :  { %1914 = vmatpush3.bf16.msra.mxu0 %v2109_v42  ;;  %v47_v42 = vld [vmem:[%s2344_s0 + $0x30] sm:$0xff] }
  0x76   :  { %1942 = vmatpush3.bf16.msra.mxu1 %v2110_v43  ;;  %1915 = vmatprep.subr.bf16.mxu0 %v2111_v44  ;;  %v55_v43 = vld [vmem:[%s2344_s0 + $0x70] sm:$0xff]  ;;  %v48_v44 = vld [vmem:[%s2344_s0 + $0x38] sm:$0xff] }
  0x77   :  { %1943 = vmatprep.subr.bf16.mxu1 %v2112_v45  ;;  %v1647_v45 = vcombine.low %v47_v42, %v55_v43 }
  0x79   :  { %1916 = vmatpush3.bf16.msra.mxu0 %v2113_v46  ;;  %v1648_v46 = vcombine.high %v47_v42, %v55_v43 }
  0x7a   :  { %1944 = vmatpush3.bf16.msra.mxu1 %v2114_v47  ;;  %1917 = vmatprep.subr.bf16.mxu0 %v2115_v48  ;;  %v56_v47 = vld [vmem:[%s2344_s0 + $0x78] sm:$0xff]  ;;  %v63_v48 = vld [vmem:[%s2344_s0 + $0xb0] sm:$0xff] }
  0x7b   :  { %1945 = vmatprep.subr.bf16.mxu1 %v2116_v49  ;;  %v64_v49 = vld [vmem:[%s2344_s0 + $0xb8] sm:$0xff] }
  0x7d   :  { %1918 = vmatpush3.bf16.msra.mxu0 %v2117_v50  ;;  %v1649_v50 = vcombine.low %v48_v44, %v56_v47 }
  0x7e   :  { %1946 = vmatpush3.bf16.msra.mxu1 %v2118_v51  ;;  %1919 = vmatprep.subr.bf16.mxu0 %v2119_v52  ;;  %v1650_v51 = vcombine.high %v48_v44, %v56_v47  ;;  %v1664_v52 = vcombine.high %v63_v48, %v63_v48 }
  0x7f   :  { %1947 = vmatprep.subr.bf16.mxu1 %v2120_v53  ;;  %v1666_v53 = vcombine.high %v64_v49, %v64_v49 }
  0x81   :  { %1920 = vmatpush3.bf16.msra.mxu0 %v2121_v54  ;;  %v1663_v54 = vcombine.low %v63_v48, %v63_v48 }
  0x82   :  { %1948 = vmatpush3.bf16.msra.mxu1 %v2122_v55  ;;  %1921 = vmatprep.subr.bf16.mxu0 %v2123_v56  ;;  %v1665_v55 = vcombine.low %v64_v49, %v64_v49 }
  0x83   :  { %1949 = vmatprep.subr.bf16.mxu1 %v2124_v57 }
  0x85   :  { %1922 = vmatpush3.bf16.msra.mxu0 %v2125_v58  ;;  %v1634_v58 = vld [vmem:[#allocation4] ss:$0 sm:$0xff] }
  0x86   :  { %1950 = vmatpush3.bf16.msra.mxu1 %v2126_v59  ;;  %1963 = vmatprep.subr.bf16.mxu0 %v2127_v4 }
  0x87   :  { %1991 = vmatprep.subr.bf16.mxu1 %v2128_v5 }
  0x88   :  { %1457 = vmatmul.mubr.bf16.vlgmr.msra.gmra.mrb[16].mxu0 %v1643_v63 }
  0x89   :  { %1505 = vmatmul.mubr.bf16.vlgmr.msra.gmra.mrb[16].mxu1 %v1645_v2  ;;  %1964 = vmatpush3.bf16.msra.mxu0 %v2129_v6 }
  0x8a   :  { %1992 = vmatpush3.bf16.msra.mxu1 %v2130_v7  ;;  %1965 = vmatprep.subr.bf16.mxu0 %v2131_v8 }
  0x8b   :  { %1993 = vmatprep.subr.bf16.mxu1 %v2132_v9  ;;  %1464 = vmatprep.mubr.bf16.mxu0 %v1660_v13 }
  0x8c   :  { %1512 = vmatprep.mubr.bf16.mxu1 %v1662_v18 }
  0x8d   :  { %1966 = vmatpush3.bf16.msra.mxu0 %v2133_v10 }
  0x8e   :  { %1994 = vmatpush3.bf16.msra.mxu1 %v2134_v11  ;;  %1967 = vmatprep.subr.bf16.mxu0 %v2137_v15 }
  0x8f   :  { %1995 = vmatprep.subr.bf16.mxu1 %v2138_v16 }
  0x90   :  { %1465 = vmatmul.mubr.bf16.gmra.mrb[20].mxu0 %v1659_v14 }
  0x91   :  { %1968 = vmatpush3.bf16.msra.mxu0 %v2140_v19  ;;  %1513 = vmatmul.mubr.bf16.gmra.mrb[20].mxu1 %v1661_v20 }
  0x92   :  { %1996 = vmatpush3.bf16.msra.mxu1 %v2141_v21  ;;  %1969 = vmatprep.subr.bf16.mxu0 %v2143_v22 }
  0x93   :  { %1997 = vmatprep.subr.bf16.mxu1 %v2144_v23  ;;  %1552 = vmatprep.mubr.bf16.mxu0 %v1648_v46 }
  0x94   :  { %1600 = vmatprep.mubr.bf16.mxu1 %v1650_v51 }
  0x95   :  { %1970 = vmatpush3.bf16.msra.mxu0 %v2145_v24 }
  0x96   :  { %1998 = vmatpush3.bf16.msra.mxu1 %v2146_v25  ;;  %1971 = vmatprep.subr.bf16.mxu0 %v2147_v26 }
  0x97   :  { %1999 = vmatprep.subr.bf16.mxu1 %v2148_v27 }
  0x99   :  { %1972 = vmatpush3.bf16.msra.mxu0 %v2149_v28 }
  0x9a   :  { %2000 = vmatpush3.bf16.msra.mxu1 %v2150_v29  ;;  %1973 = vmatprep.subr.bf16.mxu0 %v2151_v30 }
  0x9b   :  { %2001 = vmatprep.subr.bf16.mxu1 %v2152_v31 }
  0x9d   :  { %1974 = vmatpush3.bf16.msra.mxu0 %v2153_v32 }
  0x9e   :  { %2002 = vmatpush3.bf16.msra.mxu1 %v2154_v33  ;;  %1975 = vmatprep.subr.bf16.mxu0 %v2155_v34 }
  0x9f   :  { %2003 = vmatprep.subr.bf16.mxu1 %v2156_v35 }
  0xa1   :  { %1976 = vmatpush3.bf16.msra.mxu0 %v2157_v36 }
  0xa2   :  { %2004 = vmatpush3.bf16.msra.mxu1 %v2158_v37  ;;  %1977 = vmatprep.subr.bf16.mxu0 %v2159_v38 }
  0xa3   :  { %2005 = vmatprep.subr.bf16.mxu1 %v2160_v39 }
  0xa5   :  { %1978 = vmatpush3.bf16.msra.mxu0 %v2161_v40 }
  0xa6   :  { %2006 = vmatpush3.bf16.msra.mxu1 %v2162_v41 }
  0xa8   :  { %1553 = vmatmul.mubr.bf16.vlgmr.msra.gmra.mrb[24].mxu0 %v1647_v45 }
  0xa9   :  { %1601 = vmatmul.mubr.bf16.vlgmr.msra.gmra.mrb[24].mxu1 %v1649_v50  ;;  %1560 = vmatprep.mubr.bf16.mxu0 %v1664_v52 }
  0xaa   :  { %1608 = vmatprep.mubr.bf16.mxu1 %v1666_v53 }
  0xb0   :  { %1561 = vmatmul.mubr.bf16.gmra.mrb[28].mxu0 %v1663_v54 }
  0xb1   :  { %1609 = vmatmul.mubr.bf16.gmra.mrb[28].mxu1 %v1665_v55 }
 0x11b   :  { %v1811_v56 = vpop.f32.mrb[0].mxu0 }
 0x11c   :  { %v1839_v57 = vpop.f32.mrb[0].mxu1  ;;  %v1812_v59 = vpop.f32.mrb[1].mxu0 }
 0x11d   :  { %v1813_v60 = vadd.f32 %v1812_v59, %v1811_v56  ;;  %v1840_v61 = vpop.f32.mrb[1].mxu1  ;;  %v1814_v62 = vpop.f32.mrb[2].mxu0 }
 0x11e   :  { %v1841_v63 = vadd.f32 %v1840_v61, %v1839_v57  ;;  %v1842_v0 = vpop.f32.mrb[2].mxu1  ;;  %v1815_v1 = vpop.f32.mrb[3].mxu0 }
 0x11f   :  { %v1267_v2 = vadd.f32 %v1813_v60, %v1634_v58  ;;  %v1816_v3 = vadd.f32 %v1815_v1, %v1814_v62  ;;  %v1843_v4 = vpop.f32.mrb[3].mxu1 }
 0x120   :  { %v1844_v5 = vadd.f32 %v1843_v4, %v1842_v0 }
 0x121   :  { %v1315_v6 = vadd.f32 %v1841_v63, %v1267_v2  ;;  %v1270_v7 = vadd.f32 %v1816_v3, %v1634_v58 }
 0x123   :  { %v1318_v8 = vadd.f32 %v1844_v5, %v1270_v7  ;;  %v1817_v9 = vpop.f32.mrb[4].mxu0 }
 0x124   :  { %v1818_v10 = vpop.f32.mrb[5].mxu0  ;;  %v1845_v13 = vpop.f32.mrb[4].mxu1 }
 0x125   :  { %v1819_v11 = vadd.f32 %v1818_v10, %v1817_v9  ;;  %v1820_v12 = vpop.f32.mrb[6].mxu0  ;;  %v1846_v15 = vpop.f32.mrb[5].mxu1 }
 0x126   :  { %v1821_v14 = vpop.f32.mrb[7].mxu0  ;;  %v1847_v17 = vadd.f32 %v1846_v15, %v1845_v13  ;;  %v1848_v18 = vpop.f32.mrb[6].mxu1 }
 0x127   :  { %v1275_v16 = vadd.f32 %v1819_v11, %v1634_v58  ;;  %v1849_v19 = vpop.f32.mrb[7].mxu1 }
 0x129   :  { %v1323_v20 = vadd.f32 %v1847_v17, %v1275_v16 }
 0x13b   :  { %v1867_v21 = vpop.f32.mrb[8].mxu0 }
 0x13c   :  { %v1895_v22 = vpop.f32.mrb[8].mxu1  ;;  %v1868_v23 = vpop.f32.mrb[9].mxu0 }
 0x13d   :  { %v1869_v24 = vadd.f32 %v1868_v23, %v1867_v21  ;;  %v1896_v25 = vpop.f32.mrb[9].mxu1  ;;  %v1870_v26 = vpop.f32.mrb[10].mxu0 }
 0x13e   :  { %v1897_v27 = vadd.f32 %v1896_v25, %v1895_v22  ;;  %v1898_v28 = vpop.f32.mrb[10].mxu1  ;;  %v1871_v29 = vpop.f32.mrb[11].mxu0 }
 0x13f   :  { %v1363_v30 = vadd.f32 %v1869_v24, %v1315_v6  ;;  %v1872_v31 = vadd.f32 %v1871_v29, %v1870_v26  ;;  %v1899_v32 = vpop.f32.mrb[11].mxu1 }
 0x140   :  { %v1900_v33 = vadd.f32 %v1899_v32, %v1898_v28 }
 0x141   :  { %v1411_v34 = vadd.f32 %v1897_v27, %v1363_v30  ;;  %v1366_v35 = vadd.f32 %v1872_v31, %v1318_v8 }
 0x143   :  { %v1414_v36 = vadd.f32 %v1900_v33, %v1366_v35  ;;  %v1873_v37 = vpop.f32.mrb[12].mxu0 }
 0x144   :  { %v1874_v38 = vpop.f32.mrb[13].mxu0  ;;  %v1901_v41 = vpop.f32.mrb[12].mxu1 }
 0x145   :  { %v1875_v39 = vadd.f32 %v1874_v38, %v1873_v37  ;;  %v1876_v40 = vpop.f32.mrb[14].mxu0  ;;  %v1902_v44 = vpop.f32.mrb[13].mxu1 }
 0x146   :  { %v1877_v42 = vpop.f32.mrb[15].mxu0  ;;  %v1903_v45 = vadd.f32 %v1902_v44, %v1901_v41  ;;  %v1904_v46 = vpop.f32.mrb[14].mxu1 }
 0x147   :  { %v1371_v43 = vadd.f32 %v1875_v39, %v1323_v20  ;;  %v1905_v47 = vpop.f32.mrb[15].mxu1 }
 0x149   :  { %v1419_v48 = vadd.f32 %v1903_v45, %v1371_v43 }
 0x15b   :  { %v1923_v49 = vpop.f32.mrb[16].mxu0 }
 0x15c   :  { %v1951_v50 = vpop.f32.mrb[16].mxu1  ;;  %v1924_v51 = vpop.f32.mrb[17].mxu0 }
 0x15d   :  { %v1925_v52 = vadd.f32 %v1924_v51, %v1923_v49  ;;  %v1952_v53 = vpop.f32.mrb[17].mxu1  ;;  %v1926_v54 = vpop.f32.mrb[18].mxu0 }
 0x15e   :  { %v1953_v55 = vadd.f32 %v1952_v53, %v1951_v50  ;;  %v1954_v56 = vpop.f32.mrb[18].mxu1  ;;  %v1927_v57 = vpop.f32.mrb[19].mxu0 }
 0x15f   :  { %v1459_v58 = vadd.f32 %v1925_v52, %v1411_v34  ;;  %v1928_v59 = vadd.f32 %v1927_v57, %v1926_v54  ;;  %v1955_v60 = vpop.f32.mrb[19].mxu1 }
 0x160   :  { %v1956_v61 = vadd.f32 %v1955_v60, %v1954_v56 }
 0x161   :  { %v1507_v62 = vadd.f32 %v1953_v55, %v1459_v58  ;;  %v1462_v63 = vadd.f32 %v1928_v59, %v1414_v36 }
 0x163   :  { %v1510_v0 = vadd.f32 %v1956_v61, %v1462_v63  ;;  %v1929_v1 = vpop.f32.mrb[20].mxu0 }
 0x164   :  { %v1930_v2 = vpop.f32.mrb[21].mxu0  ;;  %v1957_v5 = vpop.f32.mrb[20].mxu1 }
 0x165   :  { %v1931_v3 = vadd.f32 %v1930_v2, %v1929_v1  ;;  %v1932_v4 = vpop.f32.mrb[22].mxu0  ;;  %v1958_v8 = vpop.f32.mrb[21].mxu1 }
 0x166   :  { %v1933_v6 = vpop.f32.mrb[23].mxu0  ;;  %v1959_v9 = vadd.f32 %v1958_v8, %v1957_v5  ;;  %v1960_v10 = vpop.f32.mrb[22].mxu1 }
 0x167   :  { %v1467_v7 = vadd.f32 %v1931_v3, %v1419_v48  ;;  %v1961_v11 = vpop.f32.mrb[23].mxu1 }
 0x169   :  { %v1515_v12 = vadd.f32 %v1959_v9, %v1467_v7 }
 0x17b   :  { %v1979_v13 = vpop.f32.mrb[24].mxu0 }
 0x17c   :  { %v2007_v14 = vpop.f32.mrb[24].mxu1  ;;  %v1980_v15 = vpop.f32.mrb[25].mxu0 }
 0x17d   :  { %v1981_v16 = vadd.f32 %v1980_v15, %v1979_v13  ;;  %v2008_v17 = vpop.f32.mrb[25].mxu1  ;;  %v1982_v18 = vpop.f32.mrb[26].mxu0 }
 0x17e   :  { %v2009_v19 = vadd.f32 %v2008_v17, %v2007_v14  ;;  %v2010_v20 = vpop.f32.mrb[26].mxu1  ;;  %v1983_v21 = vpop.f32.mrb[27].mxu0 }
 0x17f   :  { %v1555_v22 = vadd.f32 %v1981_v16, %v1507_v62  ;;  %v1984_v23 = vadd.f32 %v1983_v21, %v1982_v18  ;;  %v2011_v24 = vpop.f32.mrb[27].mxu1 }
 0x180   :  { %v2012_v25 = vadd.f32 %v2011_v24, %v2010_v20 }
 0x181   :  { %v1603_v26 = vadd.f32 %v2009_v19, %v1555_v22  ;;  %v1558_v27 = vadd.f32 %v1984_v23, %v1510_v0 }
 0x183   :  { %vm1616_vm0 = vcmp.ge.f32.partialorder %v1603_v26, 0.0  ;;  %v1619_v28 = vmul.f32 0.2, %v1603_v26  ;;  %v1606_v29 = vadd.f32 %v2012_v25, %v1558_v27  ;;  %v1985_v30 = vpop.f32.mrb[28].mxu0 }
 0x184   :  { %v2013_v31 = vpop.f32.mrb[28].mxu1  ;;  %v1986_v32 = vpop.f32.mrb[29].mxu0 }
 0x185   :  { %v1622_v33 = vsel %vm1616_vm0, %v1603_v26, %v1619_v28  ;;  %vm1617_vm1 = vcmp.ge.f32.partialorder %v1606_v29, 0.0  ;;  %v1620_v34 = vmul.f32 0.2, %v1606_v29  ;;  %v1987_v35 = vadd.f32 %v1986_v32, %v1985_v30  ;;  %v2014_v36 = vpop.f32.mrb[29].mxu1  ;;  %v1988_v37 = vpop.f32.mrb[30].mxu0 }
 0x186   :  { %1625 = vst [vmem:[%s2347_s3] sm:$0xff] %v1622_v33  ;;  %v2015_v38 = vadd.f32 %v2014_v36, %v2013_v31  ;;  %v2016_v39 = vpop.f32.mrb[30].mxu1  ;;  %v1989_v40 = vpop.f32.mrb[31].mxu0 }
 0x187   :  { %v1623_v41 = vsel %vm1617_vm1, %v1606_v29, %v1620_v34  ;;  %v1563_v42 = vadd.f32 %v1987_v35, %v1515_v12  ;;  %v2017_v43 = vpop.f32.mrb[31].mxu1 }
 0x188   :  { %1626 = vst [vmem:[%s2347_s3 + $0x8] sm:$0xff] %v1623_v41 }
 0x189   :  { %v1611_v44 = vadd.f32 %v2015_v38, %v1563_v42 }
 0x18b   :  { %vm1618_vm2 = vcmp.ge.f32.partialorder %v1611_v44, 0.0  ;;  %v1621_v45 = vmul.f32 0.2, %v1611_v44 }
 0x18d   :  { %v1624_v46 = vsel %vm1618_vm2, %v1611_v44, %v1621_v45 }
 0x18e   :  { %1627 = vst [vmem:[%s2347_s3 + $0x10] sm:$0xff] %v1624_v46 }
 0x18f   :  { %1632 = vsyncpa [#allocation3], 1 }
 0x190   :  { %1633 = vsyncpa [#allocation5], 1 }

// kernel: _lambda_.6
= control target key start
LH: loop header
LB: loop body
LE: loop exit
PB: predicated region body
PF: predicated region fallthrough
CT: control target
= control target key end

     0   :  { %s6741_s1 = inlined_call_operand.vmem [shape: bf16[2304,256], index: 1, kind: input, shape index: {}]   ;;  %s6742_s0 = inlined_call_operand.vmem [shape: bf16[128,2304], index: 0, kind: input, shape index: {}]   ;;  %s6743_s2 = inlined_call_operand.vmem [shape: f32[1,256], index: 2, kind: input, shape index: {}]   ;;  %s6744_s3 = inlined_call_operand.vmem [shape: f32[128,256], index: 3, kind: output, shape index: {}]  }
   0x1   :  { %v4519_v0 = vld [vmem:[%s6741_s1 + $0x4] ss:$8 sps:$4 sm:$0xff]   ;;  %v4523_v2 = vld [vmem:[%s6741_s1] ss:$8 sps:$4 sm:$0xff]   ;;  %v4525_v4 = vld [vmem:[%s6741_s1 + $0x14] ss:$8 sps:$4 sm:$0xff]  }
   0x2   :  { %v4521_v1 = vld [vmem:[%s6741_s1 + $0x404] ss:$8 sps:$4 sm:$0xff]   ;;  %2618 = vmatprep.subr.bf16.mxu1 %v4519_v0  ;;  %v4524_v3 = vld [vmem:[%s6741_s1 + $0x400] ss:$8 sps:$4 sm:$0xff]   ;;  %v4527_v5 = vld [vmem:[%s6741_s1 + $0x414] ss:$8 sps:$4 sm:$0xff]  }
   0x3   :  { %3070 = vmatprep.subr.bf16.mxu0 %v4521_v1  ;;  %2619 = vmatpush1.bf16.msra.mxu1 %v4523_v2  ;;  %v4529_v6 = vld [vmem:[%s6741_s1 + $0x10] ss:$8 sps:$4 sm:$0xff]   ;;  %v4531_v8 = vld [vmem:[%s6741_s1 + $0x24] ss:$8 sps:$4 sm:$0xff]   ;;  %v4535_v10 = vld [vmem:[%s6741_s1 + $0x20] ss:$8 sps:$4 sm:$0xff]  }
   0x4   :  { %3071 = vmatpush1.bf16.msra.mxu0 %v4524_v3  ;;  %2620 = vmatprep.subr.bf16.mxu1 %v4525_v4  ;;  %v4530_v7 = vld [vmem:[%s6741_s1 + $0x410] ss:$8 sps:$4 sm:$0xff]   ;;  %v4533_v9 = vld [vmem:[%s6741_s1 + $0x424] ss:$8 sps:$4 sm:$0xff]   ;;  %v4536_v11 = vld [vmem:[%s6741_s1 + $0x420] ss:$8 sps:$4 sm:$0xff]  }
   0x5   :  { %3072 = vmatprep.subr.bf16.mxu0 %v4527_v5  ;;  %v4537_v12 = vld [vmem:[%s6741_s1 + $0x34] ss:$8 sps:$4 sm:$0xff]   ;;  %v4541_v14 = vld [vmem:[%s6741_s1 + $0x30] ss:$8 sps:$4 sm:$0xff]   ;;  %v4543_v16 = vld [vmem:[%s6741_s1 + $0x44] ss:$8 sps:$4 sm:$0xff]  }
   0x6   :  { %v4539_v13 = vld [vmem:[%s6741_s1 + $0x434] ss:$8 sps:$4 sm:$0xff]   ;;  %v4542_v15 = vld [vmem:[%s6741_s1 + $0x430] ss:$8 sps:$4 sm:$0xff]   ;;  %v4545_v17 = vld [vmem:[%s6741_s1 + $0x444] ss:$8 sps:$4 sm:$0xff]  }
   0x7   :  { %2621 = vmatpush1.bf16.msra.mxu1 %v4529_v6  ;;  %v4547_v18 = vld [vmem:[%s6741_s1 + $0x40] ss:$8 sps:$4 sm:$0xff]   ;;  %v4549_v20 = vld [vmem:[%s6741_s1 + $0x54] ss:$8 sps:$4 sm:$0xff]   ;;  %v4553_v22 = vld [vmem:[%s6741_s1 + $0x50] ss:$8 sps:$4 sm:$0xff]  }
   0x8   :  { %3073 = vmatpush1.bf16.msra.mxu0 %v4530_v7  ;;  %2622 = vmatprep.subr.bf16.mxu1 %v4531_v8  ;;  %v4548_v19 = vld [vmem:[%s6741_s1 + $0x440] ss:$8 sps:$4 sm:$0xff]   ;;  %v4551_v21 = vld [vmem:[%s6741_s1 + $0x454] ss:$8 sps:$4 sm:$0xff]   ;;  %v4554_v23 = vld [vmem:[%s6741_s1 + $0x450] ss:$8 sps:$4 sm:$0xff]  }
   0x9   :  { %3074 = vmatprep.subr.bf16.mxu0 %v4533_v9  ;;  %v4555_v24 = vld [vmem:[%s6741_s1 + $0x64] ss:$8 sps:$4 sm:$0xff]   ;;  %v4559_v26 = vld [vmem:[%s6741_s1 + $0x60] ss:$8 sps:$4 sm:$0xff]   ;;  %v4561_v28 = vld [vmem:[%s6741_s1 + $0x74] ss:$8 sps:$4 sm:$0xff]  }
   0xa   :  { %v4557_v25 = vld [vmem:[%s6741_s1 + $0x464] ss:$8 sps:$4 sm:$0xff]   ;;  %v4560_v27 = vld [vmem:[%s6741_s1 + $0x460] ss:$8 sps:$4 sm:$0xff]   ;;  %v4563_v29 = vld [vmem:[%s6741_s1 + $0x474] ss:$8 sps:$4 sm:$0xff]  }
   0xb   :  { %2623 = vmatpush1.bf16.msra.mxu1 %v4535_v10  ;;  %v4565_v30 = vld [vmem:[%s6741_s1 + $0x70] ss:$8 sps:$4 sm:$0xff]   ;;  %v4567_v32 = vld [vmem:[%s6741_s1 + $0x84] ss:$8 sps:$4 sm:$0xff]   ;;  %v4571_v34 = vld [vmem:[%s6741_s1 + $0x80] ss:$8 sps:$4 sm:$0xff]  }
   0xc   :  { %3075 = vmatpush1.bf16.msra.mxu0 %v4536_v11  ;;  %2624 = vmatprep.subr.bf16.mxu1 %v4537_v12  ;;  %v4566_v31 = vld [vmem:[%s6741_s1 + $0x470] ss:$8 sps:$4 sm:$0xff]   ;;  %v4569_v33 = vld [vmem:[%s6741_s1 + $0x484] ss:$8 sps:$4 sm:$0xff]   ;;  %v4572_v35 = vld [vmem:[%s6741_s1 + $0x480] ss:$8 sps:$4 sm:$0xff]  }
   0xd   :  { %3076 = vmatprep.subr.bf16.mxu0 %v4539_v13  ;;  %v4573_v36 = vld [vmem:[%s6741_s1 + $0x94] ss:$8 sps:$4 sm:$0xff]   ;;  %v4577_v38 = vld [vmem:[%s6741_s1 + $0x90] ss:$8 sps:$4 sm:$0xff]   ;;  %v4579_v40 = vld [vmem:[%s6741_s1 + $0xa4] ss:$8 sps:$4 sm:$0xff]  }
   0xe   :  { %v4575_v37 = vld [vmem:[%s6741_s1 + $0x494] ss:$8 sps:$4 sm:$0xff]   ;;  %v4578_v39 = vld [vmem:[%s6741_s1 + $0x490] ss:$8 sps:$4 sm:$0xff]   ;;  %v4581_v41 = vld [vmem:[%s6741_s1 + $0x4a4] ss:$8 sps:$4 sm:$0xff]  }
   0xf   :  { %2625 = vmatpush1.bf16.msra.mxu1 %v4541_v14  ;;  %v4583_v42 = vld [vmem:[%s6741_s1 + $0xa0] ss:$8 sps:$4 sm:$0xff]   ;;  %v4585_v44 = vld [vmem:[%s6741_s1 + $0xb4] ss:$8 sps:$4 sm:$0xff]   ;;  %v4589_v46 = vld [vmem:[%s6741_s1 + $0xb0] ss:$8 sps:$4 sm:$0xff]  }
  0x10   :  { %3077 = vmatpush1.bf16.msra.mxu0 %v4542_v15  ;;  %2626 = vmatprep.subr.bf16.mxu1 %v4543_v16  ;;  %v4584_v43 = vld [vmem:[%s6741_s1 + $0x4a0] ss:$8 sps:$4 sm:$0xff]   ;;  %v4587_v45 = vld [vmem:[%s6741_s1 + $0x4b4] ss:$8 sps:$4 sm:$0xff]   ;;  %v4590_v47 = vld [vmem:[%s6741_s1 + $0x4b0] ss:$8 sps:$4 sm:$0xff]  }
  0x11   :  { %3078 = vmatprep.subr.bf16.mxu0 %v4545_v17  ;;  %v4591_v48 = vld [vmem:[%s6741_s1 + $0xc4] ss:$8 sps:$4 sm:$0xff]   ;;  %v4595_v52 = vld [vmem:[%s6741_s1 + $0xc0] ss:$8 sps:$4 sm:$0xff]   ;;  %v4597_v54 = vld [vmem:[%s6741_s1 + $0xd4] ss:$8 sps:$4 sm:$0xff]  }
  0x12   :  { %v4617_v49 = vld [vmem:[%s6742_s0 + $0x4] ss:$72 sps:$4 sm:$0xff]   ;;  %v4596_v53 = vld [vmem:[%s6741_s1 + $0x4c0] ss:$8 sps:$4 sm:$0xff]   ;;  %v4599_v55 = vld [vmem:[%s6741_s1 + $0x4d4] ss:$8 sps:$4 sm:$0xff]  }
  0x13   :  { %2627 = vmatpush1.bf16.msra.mxu1 %v4547_v18  ;;  %v4593_v50 = vld [vmem:[%s6741_s1 + $0x4c4] ss:$8 sps:$4 sm:$0xff]   ;;  %2650 = vmatprep.mubr.bf16.mxu1 %v4617_v49  ;;  %v4601_v56 = vld [vmem:[%s6741_s1 + $0xd0] ss:$8 sps:$4 sm:$0xff]   ;;  %v4607_v60 = vld [vmem:[%s6741_s1 + $0xe0] ss:$8 sps:$4 sm:$0xff]  }
  0x14   :  { %3079 = vmatpush1.bf16.msra.mxu0 %v4548_v19  ;;  %2628 = vmatprep.subr.bf16.mxu1 %v4549_v20  ;;  %v4620_v51 = vld [vmem:[%s6742_s0 + $0x24] ss:$72 sps:$4 sm:$0xff]   ;;  %v4602_v57 = vld [vmem:[%s6741_s1 + $0x4d0] ss:$8 sps:$4 sm:$0xff]   ;;  %v4608_v61 = vld [vmem:[%s6741_s1 + $0x4e0] ss:$8 sps:$4 sm:$0xff]  }
  0x15   :  { %3080 = vmatprep.subr.bf16.mxu0 %v4551_v21  ;;  %3102 = vmatprep.mubr.bf16.mxu0 %v4620_v51  ;;  %v4603_v58 = vld [vmem:[%s6741_s1 + $0xe4] ss:$8 sps:$4 sm:$0xff]   ;;  %v4609_v62 = vld [vmem:[%s6741_s1 + $0xf4] ss:$8 sps:$4 sm:$0xff]   ;;  %v4613_v0 = vld [vmem:[%s6741_s1 + $0xf0] ss:$8 sps:$4 sm:$0xff]  }
  0x16   :  { %v4605_v59 = vld [vmem:[%s6741_s1 + $0x4e4] ss:$8 sps:$4 sm:$0xff]   ;;  %v4611_v63 = vld [vmem:[%s6741_s1 + $0x4f4] ss:$8 sps:$4 sm:$0xff]   ;;  %v4614_v1 = vld [vmem:[%s6741_s1 + $0x4f0] ss:$8 sps:$4 sm:$0xff]  }
  0x17   :  { %2629 = vmatpush1.bf16.msra.mxu1 %v4553_v22  ;;  %v4623_v2 = vld [vmem:[%s6741_s1 + $0x104] ss:$8 sps:$4 sm:$0xff]   ;;  %v4615_v4 = vld [vmem:[%s6742_s0] ss:$72 sps:$4 sm:$0xff]   ;;  %v4629_v8 = vld [vmem:[%s6741_s1 + $0x114] ss:$8 sps:$4 sm:$0xff]  }
  0x18   :  { %3081 = vmatpush1.bf16.msra.mxu0 %v4554_v23  ;;  %2630 = vmatprep.subr.bf16.mxu1 %v4555_v24  ;;  %v4626_v3 = vld [vmem:[%s6741_s1 + $0x504] ss:$8 sps:$4 sm:$0xff]   ;;  %v4618_v5 = vld [vmem:[%s6742_s0 + $0x20] ss:$72 sps:$4 sm:$0xff]   ;;  %v4632_v9 = vld [vmem:[%s6741_s1 + $0x514] ss:$8 sps:$4 sm:$0xff]  }
  0x19   :  { %3082 = vmatprep.subr.bf16.mxu0 %v4557_v25  ;;  %v4621_v6 = vld [vmem:[%s6741_s1 + $0x100] ss:$8 sps:$4 sm:$0xff]   ;;  %v4633_v10 = vld [vmem:[%s6742_s0 + $0x94] ss:$72 sps:$4 sm:$0xff]   ;;  %v4627_v12 = vld [vmem:[%s6741_s1 + $0x110] ss:$8 sps:$4 sm:$0xff]  }
  0x1a   :  { %v4624_v7 = vld [vmem:[%s6741_s1 + $0x500] ss:$8 sps:$4 sm:$0xff]   ;;  %v4635_v11 = vld [vmem:[%s6742_s0 + $0xb4] ss:$72 sps:$4 sm:$0xff]   ;;  %v4630_v13 = vld [vmem:[%s6741_s1 + $0x510] ss:$8 sps:$4 sm:$0xff]  }
  0x1b   :  { %2631 = vmatpush1.bf16.msra.mxu1 %v4559_v26  ;;  %v4640_v14 = vld [vmem:[%s6741_s1 + $0x124] ss:$8 sps:$4 sm:$0xff]   ;;  %v4637_v16 = vld [vmem:[%s6742_s0 + $0x90] ss:$72 sps:$4 sm:$0xff]   ;;  %v4638_v17 = vld [vmem:[%s6741_s1 + $0x120] ss:$8 sps:$4 sm:$0xff]  }
  0x1c   :  { %3083 = vmatpush1.bf16.msra.mxu0 %v4560_v27  ;;  %2632 = vmatprep.subr.bf16.mxu1 %v4561_v28  ;;  %v4644_v15 = vld [vmem:[%s6741_s1 + $0x524] ss:$8 sps:$4 sm:$0xff]   ;;  %v4641_v18 = vld [vmem:[%s6742_s0 + $0xb0] ss:$72 sps:$4 sm:$0xff]   ;;  %v4642_v19 = vld [vmem:[%s6741_s1 + $0x520] ss:$8 sps:$4 sm:$0xff]  }
  0x1d   :  { %3084 = vmatprep.subr.bf16.mxu0 %v4563_v29  ;;  %v4647_v20 = vld [vmem:[%s6741_s1 + $0x134] ss:$8 sps:$4 sm:$0xff]   ;;  %v4651_v22 = vld [vmem:[%s6742_s0 + $0x124] ss:$72 sps:$4 sm:$0xff]   ;;  %v4645_v24 = vld [vmem:[%s6741_s1 + $0x130] ss:$8 sps:$4 sm:$0xff]  }
  0x1e   :  { %v4650_v21 = vld [vmem:[%s6741_s1 + $0x534] ss:$8 sps:$4 sm:$0xff]   ;;  %v4653_v23 = vld [vmem:[%s6742_s0 + $0x144] ss:$72 sps:$4 sm:$0xff]   ;;  %v4648_v25 = vld [vmem:[%s6741_s1 + $0x530] ss:$8 sps:$4 sm:$0xff]  }
  0x1f   :  { %2633 = vmatpush1.bf16.msra.mxu1 %v4565_v30  ;;  %v4658_v26 = vld [vmem:[%s6741_s1 + $0x144] ss:$8 sps:$4 sm:$0xff]   ;;  %v4655_v28 = vld [vmem:[%s6742_s0 + $0x120] ss:$72 sps:$4 sm:$0xff]   ;;  %v4684_v49 = vld [vmem:[%s6741_s1 + $0x570] ss:$8 sps:$4 sm:$0xff]  }
  0x20   :  { %3085 = vmatpush1.bf16.msra.mxu0 %v4566_v31  ;;  %2634 = vmatprep.subr.bf16.mxu1 %v4567_v32  ;;  %v4662_v27 = vld [vmem:[%s6741_s1 + $0x544] ss:$8 sps:$4 sm:$0xff]   ;;  %v4656_v29 = vld [vmem:[%s6741_s1 + $0x140] ss:$8 sps:$4 sm:$0xff]   ;;  %v4665_v32 = vld [vmem:[%s6741_s1 + $0x154] ss:$8 sps:$4 sm:$0xff]  }
  0x21   :  { %3086 = vmatprep.subr.bf16.mxu0 %v4569_v33  ;;  %v4659_v30 = vld [vmem:[%s6742_s0 + $0x140] ss:$72 sps:$4 sm:$0xff]   ;;  %v4668_v33 = vld [vmem:[%s6741_s1 + $0x554] ss:$8 sps:$4 sm:$0xff]   ;;  %v4698_v51 = vld [vmem:[%s6741_s1 + $0x584] ss:$8 sps:$4 sm:$0xff]  }
  0x22   :  { %v4660_v31 = vld [vmem:[%s6741_s1 + $0x540] ss:$8 sps:$4 sm:$0xff]  }
  0x23   :  { %2635 = vmatpush1.bf16.msra.mxu1 %v4571_v34  ;;  %v4669_v34 = vld [vmem:[%s6742_s0 + $0x1b4] ss:$72 sps:$4 sm:$0xff]  }
  0x24   :  { %3087 = vmatpush1.bf16.msra.mxu0 %v4572_v35  ;;  %2636 = vmatprep.subr.bf16.mxu1 %v4573_v36  ;;  %v4671_v35 = vld [vmem:[%s6742_s0 + $0x1d4] ss:$72 sps:$4 sm:$0xff]   ;;  %v4663_v36 = vld [vmem:[%s6741_s1 + $0x150] ss:$8 sps:$4 sm:$0xff]  }
  0x25   :  { %3088 = vmatprep.subr.bf16.mxu0 %v4575_v37  ;;  %v4666_v37 = vld [vmem:[%s6741_s1 + $0x550] ss:$8 sps:$4 sm:$0xff]  }
  0x27   :  { %2637 = vmatpush1.bf16.msra.mxu1 %v4577_v38  ;;  %v4676_v38 = vld [vmem:[%s6741_s1 + $0x164] ss:$8 sps:$4 sm:$0xff]  }
  0x28   :  { %3089 = vmatpush1.bf16.msra.mxu0 %v4578_v39  ;;  %2638 = vmatprep.subr.bf16.mxu1 %v4579_v40  ;;  %v4680_v39 = vld [vmem:[%s6741_s1 + $0x564] ss:$8 sps:$4 sm:$0xff]   ;;  %v4673_v40 = vld [vmem:[%s6742_s0 + $0x1b0] ss:$72 sps:$4 sm:$0xff]  }
  0x29   :  { %3090 = vmatprep.subr.bf16.mxu0 %v4581_v41  ;;  %v4674_v41 = vld [vmem:[%s6741_s1 + $0x160] ss:$8 sps:$4 sm:$0xff]  }
  0x2b   :  { %2639 = vmatpush1.bf16.msra.mxu1 %v4583_v42  ;;  %v4677_v42 = vld [vmem:[%s6742_s0 + $0x1d0] ss:$72 sps:$4 sm:$0xff]  }
  0x2c   :  { %3091 = vmatpush1.bf16.msra.mxu0 %v4584_v43  ;;  %2640 = vmatprep.subr.bf16.mxu1 %v4585_v44  ;;  %v4678_v43 = vld [vmem:[%s6741_s1 + $0x560] ss:$8 sps:$4 sm:$0xff]   ;;  %v4683_v44 = vld [vmem:[%s6741_s1 + $0x174] ss:$8 sps:$4 sm:$0xff]  }
  0x2d   :  { %3092 = vmatprep.subr.bf16.mxu0 %v4587_v45  ;;  %v4686_v45 = vld [vmem:[%s6741_s1 + $0x574] ss:$8 sps:$4 sm:$0xff]  }
  0x2f   :  { %2641 = vmatpush1.bf16.msra.mxu1 %v4589_v46  ;;  %v4687_v46 = vld [vmem:[%s6742_s0 + $0x244] ss:$72 sps:$4 sm:$0xff]  }
  0x30   :  { %3093 = vmatpush1.bf16.msra.mxu0 %v4590_v47  ;;  %2642 = vmatprep.subr.bf16.mxu1 %v4591_v48  ;;  %v4689_v47 = vld [vmem:[%s6742_s0 + $0x264] ss:$72 sps:$4 sm:$0xff]   ;;  %v4681_v48 = vld [vmem:[%s6741_s1 + $0x170] ss:$8 sps:$4 sm:$0xff]  }
  0x31   :  { %3094 = vmatprep.subr.bf16.mxu0 %v4593_v50  ;;  %v4694_v50 = vld [vmem:[%s6741_s1 + $0x184] ss:$8 sps:$4 sm:$0xff]  }
  0x33   :  { %2643 = vmatpush1.bf16.msra.mxu1 %v4595_v52  ;;  %v4691_v52 = vld [vmem:[%s6742_s0 + $0x240] ss:$72 sps:$4 sm:$0xff]  }
  0x34   :  { %3095 = vmatpush1.bf16.msra.mxu0 %v4596_v53  ;;  %2644 = vmatprep.subr.bf16.mxu1 %v4597_v54  ;;  %v4692_v53 = vld [vmem:[%s6741_s1 + $0x180] ss:$8 sps:$4 sm:$0xff]  }
  0x35   :  { %3096 = vmatprep.subr.bf16.mxu0 %v4599_v55  ;;  %v4695_v54 = vld [vmem:[%s6742_s0 + $0x260] ss:$72 sps:$4 sm:$0xff]  }
  0x36   :  { %v4696_v55 = vld [vmem:[%s6741_s1 + $0x580] ss:$8 sps:$4 sm:$0xff]  }
  0x37   :  { %2645 = vmatpush1.bf16.msra.mxu1 %v4601_v56  ;;  %v4701_v56 = vld [vmem:[%s6741_s1 + $0x194] ss:$8 sps:$4 sm:$0xff]  }
  0x38   :  { %3097 = vmatpush1.bf16.msra.mxu0 %v4602_v57  ;;  %2646 = vmatprep.subr.bf16.mxu1 %v4603_v58  ;;  %v4704_v57 = vld [vmem:[%s6741_s1 + $0x594] ss:$8 sps:$4 sm:$0xff]  }
  0x39   :  { %3098 = vmatprep.subr.bf16.mxu0 %v4605_v59  ;;  %v4705_v58 = vld [vmem:[%s6742_s0 + $0x2d4] ss:$72 sps:$4 sm:$0xff]  }
  0x3a   :  { %v4707_v59 = vld [vmem:[%s6742_s0 + $0x2f4] ss:$72 sps:$4 sm:$0xff]  }
  0x3b   :  { %2647 = vmatpush1.bf16.msra.mxu1 %v4607_v60  ;;  %v4699_v60 = vld [vmem:[%s6741_s1 + $0x190] ss:$8 sps:$4 sm:$0xff]  }
  0x3c   :  { %3099 = vmatpush1.bf16.msra.mxu0 %v4608_v61  ;;  %2648 = vmatprep.subr.bf16.mxu1 %v4609_v62  ;;  %v4702_v61 = vld [vmem:[%s6741_s1 + $0x590] ss:$8 sps:$4 sm:$0xff]   ;;  %v4712_v62 = vld [vmem:[%s6741_s1 + $0x1a4] ss:$8 sps:$4 sm:$0xff]  }
  0x3d   :  { %3100 = vmatprep.subr.bf16.mxu0 %v4611_v63  ;;  %v4716_v63 = vld [vmem:[%s6741_s1 + $0x5a4] ss:$8 sps:$4 sm:$0xff]  }
  0x3f   :  { %2649 = vmatpush1.bf16.msra.mxu1 %v4613_v0  ;;  %v4709_v0 = vld [vmem:[%s6742_s0 + $0x2d0] ss:$72 sps:$4 sm:$0xff]  }
  0x40   :  { %3101 = vmatpush1.bf16.msra.mxu0 %v4614_v1  ;;  %2731 = vmatprep.subr.bf16.mxu1 %v4623_v2  ;;  %v4710_v1 = vld [vmem:[%s6741_s1 + $0x1a0] ss:$8 sps:$4 sm:$0xff]   ;;  %v4713_v2 = vld [vmem:[%s6742_s0 + $0x2f0] ss:$72 sps:$4 sm:$0xff]  }
  0x41   :  { %3183 = vmatprep.subr.bf16.mxu0 %v4626_v3  ;;  %v4714_v3 = vld [vmem:[%s6741_s1 + $0x5a0] ss:$8 sps:$4 sm:$0xff]  }
  0x42   :  { %2651 = vmatmul.mubr.bf16.vlgmr.msra.gmra.mrb[0].mxu1 %v4615_v4  ;;  %v4719_v4 = vld [vmem:[%s6741_s1 + $0x1b4] ss:$8 sps:$4 sm:$0xff]  }
  0x43   :  { %3103 = vmatmul.mubr.bf16.vlgmr.msra.gmra.mrb[0].mxu0 %v4618_v5  ;;  %2732 = vmatpush1.bf16.msra.mxu1 %v4621_v6  ;;  %v4722_v5 = vld [vmem:[%s6741_s1 + $0x5b4] ss:$8 sps:$4 sm:$0xff]   ;;  %v4723_v6 = vld [vmem:[%s6742_s0 + $0x364] ss:$72 sps:$4 sm:$0xff]  }
  0x44   :  { %3184 = vmatpush1.bf16.msra.mxu0 %v4624_v7  ;;  %2733 = vmatprep.subr.bf16.mxu1 %v4629_v8  ;;  %v4725_v7 = vld [vmem:[%s6742_s0 + $0x384] ss:$72 sps:$4 sm:$0xff]   ;;  %v4717_v8 = vld [vmem:[%s6741_s1 + $0x1b0] ss:$8 sps:$4 sm:$0xff]  }
  0x45   :  { %3185 = vmatprep.subr.bf16.mxu0 %v4632_v9  ;;  %2660 = vmatprep.mubr.bf16.mxu1 %v4633_v10  ;;  %v4720_v9 = vld [vmem:[%s6741_s1 + $0x5b0] ss:$8 sps:$4 sm:$0xff]   ;;  %v4730_v10 = vld [vmem:[%s6741_s1 + $0x1c4] ss:$8 sps:$4 sm:$0xff]  }
  0x46   :  { %3112 = vmatprep.mubr.bf16.mxu0 %v4635_v11  ;;  %v4734_v11 = vld [vmem:[%s6741_s1 + $0x5c4] ss:$8 sps:$4 sm:$0xff]  }
  0x47   :  { %2734 = vmatpush1.bf16.msra.mxu1 %v4627_v12  ;;  %v4727_v12 = vld [vmem:[%s6742_s0 + $0x360] ss:$72 sps:$4 sm:$0xff]  }
  0x48   :  { %3186 = vmatpush1.bf16.msra.mxu0 %v4630_v13  ;;  %2735 = vmatprep.subr.bf16.mxu1 %v4640_v14  ;;  %v4728_v13 = vld [vmem:[%s6741_s1 + $0x1c0] ss:$8 sps:$4 sm:$0xff]  }
  0x49   :  { %3187 = vmatprep.subr.bf16.mxu0 %v4644_v15  ;;  %v4731_v14 = vld [vmem:[%s6742_s0 + $0x380] ss:$72 sps:$4 sm:$0xff]  }
  0x4a   :  { %2661 = vmatmul.mubr.bf16.gmra.mrb[4].mxu1 %v4637_v16  ;;  %v4732_v15 = vld [vmem:[%s6741_s1 + $0x5c0] ss:$8 sps:$4 sm:$0xff]   ;;  %v4737_v16 = vld [vmem:[%s6741_s1 + $0x1d4] ss:$8 sps:$4 sm:$0xff]  }
  0x4b   :  { %3113 = vmatmul.mubr.bf16.gmra.mrb[4].mxu0 %v4641_v18  ;;  %2736 = vmatpush1.bf16.msra.mxu1 %v4638_v17  ;;  %v4740_v17 = vld [vmem:[%s6741_s1 + $0x5d4] ss:$8 sps:$4 sm:$0xff]  }
  0x4c   :  { %3188 = vmatpush1.bf16.msra.mxu0 %v4642_v19  ;;  %2737 = vmatprep.subr.bf16.mxu1 %v4647_v20  ;;  %v4741_v18 = vld [vmem:[%s6742_s0 + $0x3f4] ss:$72 sps:$4 sm:$0xff]   ;;  %v4735_v20 = vld [vmem:[%s6741_s1 + $0x1d0] ss:$8 sps:$4 sm:$0xff]  }
  0x4d   :  { %3189 = vmatprep.subr.bf16.mxu0 %v4650_v21  ;;  %2670 = vmatprep.mubr.bf16.mxu1 %v4651_v22  ;;  %v4743_v19 = vld [vmem:[%s6742_s0 + $0x414] ss:$72 sps:$4 sm:$0xff]   ;;  %v4738_v21 = vld [vmem:[%s6741_s1 + $0x5d0] ss:$8 sps:$4 sm:$0xff]   ;;  %v4748_v22 = vld [vmem:[%s6741_s1 + $0x1e4] ss:$8 sps:$4 sm:$0xff]  }
  0x4e   :  { %3122 = vmatprep.mubr.bf16.mxu0 %v4653_v23  ;;  %v4752_v23 = vld [vmem:[%s6741_s1 + $0x5e4] ss:$8 sps:$4 sm:$0xff]  }
  0x4f   :  { %2738 = vmatpush1.bf16.msra.mxu1 %v4645_v24  ;;  %v4745_v24 = vld [vmem:[%s6742_s0 + $0x3f0] ss:$72 sps:$4 sm:$0xff]  }
  0x50   :  { %3190 = vmatpush1.bf16.msra.mxu0 %v4648_v25  ;;  %2739 = vmatprep.subr.bf16.mxu1 %v4658_v26  ;;  %v4746_v25 = vld [vmem:[%s6741_s1 + $0x1e0] ss:$8 sps:$4 sm:$0xff]   ;;  %v4749_v26 = vld [vmem:[%s6742_s0 + $0x410] ss:$72 sps:$4 sm:$0xff]  }
  0x51   :  { %3191 = vmatprep.subr.bf16.mxu0 %v4662_v27  ;;  %v4750_v27 = vld [vmem:[%s6741_s1 + $0x5e0] ss:$8 sps:$4 sm:$0xff]  }
  0x52   :  { %2671 = vmatmul.mubr.bf16.gmra.mrb[8].mxu1 %v4655_v28  ;;  %v4755_v28 = vld [vmem:[%s6741_s1 + $0x1f4] ss:$8 sps:$4 sm:$0xff]  }
  0x53   :  { %3123 = vmatmul.mubr.bf16.gmra.mrb[8].mxu0 %v4659_v30  ;;  %2740 = vmatpush1.bf16.msra.mxu1 %v4656_v29  ;;  %v4758_v29 = vld [vmem:[%s6741_s1 + $0x5f4] ss:$8 sps:$4 sm:$0xff]  }
  0x54   :  { %3192 = vmatpush1.bf16.msra.mxu0 %v4660_v31  ;;  %2741 = vmatprep.subr.bf16.mxu1 %v4665_v32  ;;  %v4761_v30 = vld [vmem:[%s6742_s0 + $0xc] ss:$72 sps:$4 sm:$0xff]   ;;  %v4753_v32 = vld [vmem:[%s6741_s1 + $0x1f0] ss:$8 sps:$4 sm:$0xff]  }
  0x55   :  { %3193 = vmatprep.subr.bf16.mxu0 %v4668_v33  ;;  %2680 = vmatprep.mubr.bf16.mxu1 %v4669_v34  ;;  %v4764_v31 = vld [vmem:[%s6742_s0 + $0x2c] ss:$72 sps:$4 sm:$0xff]   ;;  %v4756_v33 = vld [vmem:[%s6741_s1 + $0x5f0] ss:$8 sps:$4 sm:$0xff]  }
  0x56   :  { %3132 = vmatprep.mubr.bf16.mxu0 %v4671_v35  ;;  %v4767_v34 = vld [vmem:[%s6741_s1 + $0x204] ss:$8 sps:$4 sm:$0xff]  }
  0x57   :  { %2742 = vmatpush1.bf16.msra.mxu1 %v4663_v36  ;;  %v4770_v35 = vld [vmem:[%s6741_s1 + $0x604] ss:$8 sps:$4 sm:$0xff]   ;;  %v4759_v36 = vld [vmem:[%s6742_s0 + $0x8] ss:$72 sps:$4 sm:$0xff]  }
  0x58   :  { %3194 = vmatpush1.bf16.msra.mxu0 %v4666_v37  ;;  %2743 = vmatprep.subr.bf16.mxu1 %v4676_v38  ;;  %v4762_v37 = vld [vmem:[%s6742_s0 + $0x28] ss:$72 sps:$4 sm:$0xff]  }
  0x59   :  { %3195 = vmatprep.subr.bf16.mxu0 %v4680_v39  ;;  %v4765_v38 = vld [vmem:[%s6741_s1 + $0x200] ss:$8 sps:$4 sm:$0xff]  }
  0x5a   :  { %2681 = vmatmul.mubr.bf16.gmra.mrb[12].mxu1 %v4673_v40  ;;  %v4768_v39 = vld [vmem:[%s6741_s1 + $0x600] ss:$8 sps:$4 sm:$0xff]   ;;  %v4773_v40 = vld [vmem:[%s6741_s1 + $0x214] ss:$8 sps:$4 sm:$0xff]  }
  0x5b   :  { %3133 = vmatmul.mubr.bf16.gmra.mrb[12].mxu0 %v4677_v42  ;;  %2744 = vmatpush1.bf16.msra.mxu1 %v4674_v41  ;;  %v4776_v41 = vld [vmem:[%s6741_s1 + $0x614] ss:$8 sps:$4 sm:$0xff]  }
  0x5c   :  { %3196 = vmatpush1.bf16.msra.mxu0 %v4678_v43  ;;  %2745 = vmatprep.subr.bf16.mxu1 %v4683_v44  ;;  %v4777_v42 = vld [vmem:[%s6742_s0 + $0x9c] ss:$72 sps:$4 sm:$0xff]   ;;  %v4771_v44 = vld [vmem:[%s6741_s1 + $0x210] ss:$8 sps:$4 sm:$0xff]  }
  0x5d   :  { %3197 = vmatprep.subr.bf16.mxu0 %v4686_v45  ;;  %2690 = vmatprep.mubr.bf16.mxu1 %v4687_v46  ;;  %v4779_v43 = vld [vmem:[%s6742_s0 + $0xbc] ss:$72 sps:$4 sm:$0xff]   ;;  %v4774_v45 = vld [vmem:[%s6741_s1 + $0x610] ss:$8 sps:$4 sm:$0xff]  }
  0x5e   :  { %3142 = vmatprep.mubr.bf16.mxu0 %v4689_v47  ;;  %v4784_v46 = vld [vmem:[%s6741_s1 + $0x224] ss:$8 sps:$4 sm:$0xff]  }
  0x5f   :  { %2746 = vmatpush1.bf16.msra.mxu1 %v4681_v48  ;;  %v4788_v47 = vld [vmem:[%s6741_s1 + $0x624] ss:$8 sps:$4 sm:$0xff]   ;;  %v4781_v48 = vld [vmem:[%s6742_s0 + $0x98] ss:$72 sps:$4 sm:$0xff]  }
  0x60   :  { %3198 = vmatpush1.bf16.msra.mxu0 %v4684_v49  ;;  %2747 = vmatprep.subr.bf16.mxu1 %v4694_v50  ;;  %v4782_v49 = vld [vmem:[%s6741_s1 + $0x220] ss:$8 sps:$4 sm:$0xff]  }
  0x61   :  { %3199 = vmatprep.subr.bf16.mxu0 %v4698_v51  ;;  %v4785_v50 = vld [vmem:[%s6742_s0 + $0xb8] ss:$72 sps:$4 sm:$0xff]  }
  0x62   :  { %2691 = vmatmul.mubr.bf16.gmra.mrb[16].mxu1 %v4691_v52  ;;  %v4786_v51 = vld [vmem:[%s6741_s1 + $0x620] ss:$8 sps:$4 sm:$0xff]   ;;  %v4791_v52 = vld [vmem:[%s6741_s1 + $0x234] ss:$8 sps:$4 sm:$0xff]  }
  0x63   :  { %3143 = vmatmul.mubr.bf16.gmra.mrb[16].mxu0 %v4695_v54  ;;  %2748 = vmatpush1.bf16.msra.mxu1 %v4692_v53  ;;  %v4794_v53 = vld [vmem:[%s6741_s1 + $0x634] ss:$8 sps:$4 sm:$0xff]  }
  0x64   :  { %3200 = vmatpush1.bf16.msra.mxu0 %v4696_v55  ;;  %2749 = vmatprep.subr.bf16.mxu1 %v4701_v56  ;;  %v4795_v54 = vld [vmem:[%s6742_s0 + $0x12c] ss:$72 sps:$4 sm:$0xff]   ;;  %v4789_v56 = vld [vmem:[%s6741_s1 + $0x230] ss:$8 sps:$4 sm:$0xff]  }
  0x65   :  { %3201 = vmatprep.subr.bf16.mxu0 %v4704_v57  ;;  %2700 = vmatprep.mubr.bf16.mxu1 %v4705_v58  ;;  %v4797_v55 = vld [vmem:[%s6742_s0 + $0x14c] ss:$72 sps:$4 sm:$0xff]   ;;  %v4792_v57 = vld [vmem:[%s6741_s1 + $0x630] ss:$8 sps:$4 sm:$0xff]  }
  0x66   :  { %3152 = vmatprep.mubr.bf16.mxu0 %v4707_v59  ;;  %v4802_v58 = vld [vmem:[%s6741_s1 + $0x244] ss:$8 sps:$4 sm:$0xff]  }
  0x67   :  { %2750 = vmatpush1.bf16.msra.mxu1 %v4699_v60  ;;  %v4806_v59 = vld [vmem:[%s6741_s1 + $0x644] ss:$8 sps:$4 sm:$0xff]   ;;  %v4799_v60 = vld [vmem:[%s6742_s0 + $0x128] ss:$72 sps:$4 sm:$0xff]  }
  0x68   :  { %3202 = vmatpush1.bf16.msra.mxu0 %v4702_v61  ;;  %2751 = vmatprep.subr.bf16.mxu1 %v4712_v62  ;;  %v4800_v61 = vld [vmem:[%s6741_s1 + $0x240] ss:$8 sps:$4 sm:$0xff]  }
  0x69   :  { %3203 = vmatprep.subr.bf16.mxu0 %v4716_v63  ;;  %v4803_v62 = vld [vmem:[%s6742_s0 + $0x148] ss:$72 sps:$4 sm:$0xff]  }
  0x6a   :  { %2701 = vmatmul.mubr.bf16.gmra.mrb[20].mxu1 %v4709_v0  ;;  %v4804_v63 = vld [vmem:[%s6741_s1 + $0x640] ss:$8 sps:$4 sm:$0xff]   ;;  %v4809_v0 = vld [vmem:[%s6741_s1 + $0x254] ss:$8 sps:$4 sm:$0xff]  }
  0x6b   :  { %3153 = vmatmul.mubr.bf16.gmra.mrb[20].mxu0 %v4713_v2  ;;  %2752 = vmatpush1.bf16.msra.mxu1 %v4710_v1  ;;  %v4812_v1 = vld [vmem:[%s6741_s1 + $0x654] ss:$8 sps:$4 sm:$0xff]  }
  0x6c   :  { %3204 = vmatpush1.bf16.msra.mxu0 %v4714_v3  ;;  %2753 = vmatprep.subr.bf16.mxu1 %v4719_v4  ;;  %v4813_v2 = vld [vmem:[%s6742_s0 + $0x1bc] ss:$72 sps:$4 sm:$0xff]   ;;  %v4807_v4 = vld [vmem:[%s6741_s1 + $0x250] ss:$8 sps:$4 sm:$0xff]  }
  0x6d   :  { %3205 = vmatprep.subr.bf16.mxu0 %v4722_v5  ;;  %2710 = vmatprep.mubr.bf16.mxu1 %v4723_v6  ;;  %v4815_v3 = vld [vmem:[%s6742_s0 + $0x1dc] ss:$72 sps:$4 sm:$0xff]   ;;  %v4810_v5 = vld [vmem:[%s6741_s1 + $0x650] ss:$8 sps:$4 sm:$0xff]  }
  0x6e   :  { %3162 = vmatprep.mubr.bf16.mxu0 %v4725_v7  ;;  %v4820_v6 = vld [vmem:[%s6741_s1 + $0x264] ss:$8 sps:$4 sm:$0xff]  }
  0x6f   :  { %2754 = vmatpush1.bf16.msra.mxu1 %v4717_v8  ;;  %v4824_v7 = vld [vmem:[%s6741_s1 + $0x664] ss:$8 sps:$4 sm:$0xff]   ;;  %v4817_v8 = vld [vmem:[%s6742_s0 + $0x1b8] ss:$72 sps:$4 sm:$0xff]  }
  0x70   :  { %3206 = vmatpush1.bf16.msra.mxu0 %v4720_v9  ;;  %2755 = vmatprep.subr.bf16.mxu1 %v4730_v10  ;;  %v4818_v9 = vld [vmem:[%s6741_s1 + $0x260] ss:$8 sps:$4 sm:$0xff]  }
  0x71   :  { %3207 = vmatprep.subr.bf16.mxu0 %v4734_v11  ;;  %v4821_v10 = vld [vmem:[%s6742_s0 + $0x1d8] ss:$72 sps:$4 sm:$0xff]  }
  0x72   :  { %2711 = vmatmul.mubr.bf16.gmra.mrb[24].mxu1 %v4727_v12  ;;  %v4822_v11 = vld [vmem:[%s6741_s1 + $0x660] ss:$8 sps:$4 sm:$0xff]   ;;  %v4827_v12 = vld [vmem:[%s6741_s1 + $0x274] ss:$8 sps:$4 sm:$0xff]  }
  0x73   :  { %3163 = vmatmul.mubr.bf16.gmra.mrb[24].mxu0 %v4731_v14  ;;  %2756 = vmatpush1.bf16.msra.mxu1 %v4728_v13  ;;  %v4830_v13 = vld [vmem:[%s6741_s1 + $0x674] ss:$8 sps:$4 sm:$0xff]  }
  0x74   :  { %3208 = vmatpush1.bf16.msra.mxu0 %v4732_v15  ;;  %2757 = vmatprep.subr.bf16.mxu1 %v4737_v16  ;;  %v4831_v14 = vld [vmem:[%s6742_s0 + $0x24c] ss:$72 sps:$4 sm:$0xff]   ;;  %v4825_v16 = vld [vmem:[%s6741_s1 + $0x270] ss:$8 sps:$4 sm:$0xff]  }
  0x75   :  { %3209 = vmatprep.subr.bf16.mxu0 %v4740_v17  ;;  %2720 = vmatprep.mubr.bf16.mxu1 %v4741_v18  ;;  %v4833_v15 = vld [vmem:[%s6742_s0 + $0x26c] ss:$72 sps:$4 sm:$0xff]   ;;  %v4828_v17 = vld [vmem:[%s6741_s1 + $0x670] ss:$8 sps:$4 sm:$0xff]  }
  0x76   :  { %3172 = vmatprep.mubr.bf16.mxu0 %v4743_v19  ;;  %v4838_v18 = vld [vmem:[%s6741_s1 + $0x284] ss:$8 sps:$4 sm:$0xff]  }
  0x77   :  { %2758 = vmatpush1.bf16.msra.mxu1 %v4735_v20  ;;  %v4842_v19 = vld [vmem:[%s6741_s1 + $0x684] ss:$8 sps:$4 sm:$0xff]   ;;  %v4835_v20 = vld [vmem:[%s6742_s0 + $0x248] ss:$72 sps:$4 sm:$0xff]  }
  0x78   :  { %3210 = vmatpush1.bf16.msra.mxu0 %v4738_v21  ;;  %2759 = vmatprep.subr.bf16.mxu1 %v4748_v22  ;;  %v4836_v21 = vld [vmem:[%s6741_s1 + $0x280] ss:$8 sps:$4 sm:$0xff]  }
  0x79   :  { %3211 = vmatprep.subr.bf16.mxu0 %v4752_v23  ;;  %v4839_v22 = vld [vmem:[%s6742_s0 + $0x268] ss:$72 sps:$4 sm:$0xff]  }
  0x7a   :  { %2721 = vmatmul.mubr.bf16.gmra.mrb[28].mxu1 %v4745_v24  ;;  %v4840_v23 = vld [vmem:[%s6741_s1 + $0x680] ss:$8 sps:$4 sm:$0xff]   ;;  %v4845_v24 = vld [vmem:[%s6741_s1 + $0x294] ss:$8 sps:$4 sm:$0xff]  }
  0x7b   :  { %3173 = vmatmul.mubr.bf16.gmra.mrb[28].mxu0 %v4749_v26  ;;  %2760 = vmatpush1.bf16.msra.mxu1 %v4746_v25  ;;  %v4848_v25 = vld [vmem:[%s6741_s1 + $0x694] ss:$8 sps:$4 sm:$0xff]  }
  0x7c   :  { %3212 = vmatpush1.bf16.msra.mxu0 %v4750_v27  ;;  %2761 = vmatprep.subr.bf16.mxu1 %v4755_v28  ;;  %v4849_v26 = vld [vmem:[%s6742_s0 + $0x2dc] ss:$72 sps:$4 sm:$0xff]   ;;  %v4843_v28 = vld [vmem:[%s6741_s1 + $0x290] ss:$8 sps:$4 sm:$0xff]  }
  0x7d   :  { %3213 = vmatprep.subr.bf16.mxu0 %v4758_v29  ;;  %2763 = vmatprep.mubr.bf16.mxu1 %v4761_v30  ;;  %v4851_v27 = vld [vmem:[%s6742_s0 + $0x2fc] ss:$72 sps:$4 sm:$0xff]   ;;  %v4846_v29 = vld [vmem:[%s6741_s1 + $0x690] ss:$8 sps:$4 sm:$0xff]  }
  0x7e   :  { %3215 = vmatprep.mubr.bf16.mxu0 %v4764_v31  ;;  %v4856_v30 = vld [vmem:[%s6741_s1 + $0x2a4] ss:$8 sps:$4 sm:$0xff]  }
  0x7f   :  { %2762 = vmatpush1.bf16.msra.mxu1 %v4753_v32  ;;  %v4860_v31 = vld [vmem:[%s6741_s1 + $0x6a4] ss:$8 sps:$4 sm:$0xff]   ;;  %v4853_v32 = vld [vmem:[%s6742_s0 + $0x2d8] ss:$72 sps:$4 sm:$0xff]  }
  0x80   :  { %3214 = vmatpush1.bf16.msra.mxu0 %v4756_v33  ;;  %2844 = vmatprep.subr.bf16.mxu1 %v4767_v34  ;;  %v4854_v33 = vld [vmem:[%s6741_s1 + $0x2a0] ss:$8 sps:$4 sm:$0xff]  }
  0x81   :  { %3296 = vmatprep.subr.bf16.mxu0 %v4770_v35  ;;  %v4857_v34 = vld [vmem:[%s6742_s0 + $0x2f8] ss:$72 sps:$4 sm:$0xff]  }
  0x82   :  { %2764 = vmatmul.mubr.bf16.vlgmr.msra.gmra.mrb[0].mxu1 %v4759_v36  ;;  %v4858_v35 = vld [vmem:[%s6741_s1 + $0x6a0] ss:$8 sps:$4 sm:$0xff]   ;;  %v4863_v36 = vld [vmem:[%s6741_s1 + $0x2b4] ss:$8 sps:$4 sm:$0xff]  }
  0x83   :  { %3216 = vmatmul.mubr.bf16.vlgmr.msra.gmra.mrb[0].mxu0 %v4762_v37  ;;  %2845 = vmatpush1.bf16.msra.mxu1 %v4765_v38  ;;  %v4866_v37 = vld [vmem:[%s6741_s1 + $0x6b4] ss:$8 sps:$4 sm:$0xff]  }
  0x84   :  { %3297 = vmatpush1.bf16.msra.mxu0 %v4768_v39  ;;  %2846 = vmatprep.subr.bf16.mxu1 %v4773_v40  ;;  %v4867_v38 = vld [vmem:[%s6742_s0 + $0x36c] ss:$72 sps:$4 sm:$0xff]   ;;  %v4861_v40 = vld [vmem:[%s6741_s1 + $0x2b0] ss:$8 sps:$4 sm:$0xff]  }
  0x85   :  { %3298 = vmatprep.subr.bf16.mxu0 %v4776_v41  ;;  %2773 = vmatprep.mubr.bf16.mxu1 %v4777_v42  ;;  %v4869_v39 = vld [vmem:[%s6742_s0 + $0x38c] ss:$72 sps:$4 sm:$0xff]   ;;  %v4864_v41 = vld [vmem:[%s6741_s1 + $0x6b0] ss:$8 sps:$4 sm:$0xff]  }
  0x86   :  { %3225 = vmatprep.mubr.bf16.mxu0 %v4779_v43  ;;  %v4874_v42 = vld [vmem:[%s6741_s1 + $0x2c4] ss:$8 sps:$4 sm:$0xff]  }
  0x87   :  { %2847 = vmatpush1.bf16.msra.mxu1 %v4771_v44  ;;  %v4878_v43 = vld [vmem:[%s6741_s1 + $0x6c4] ss:$8 sps:$4 sm:$0xff]   ;;  %v4871_v44 = vld [vmem:[%s6742_s0 + $0x368] ss:$72 sps:$4 sm:$0xff]  }
  0x88   :  { %3299 = vmatpush1.bf16.msra.mxu0 %v4774_v45  ;;  %2848 = vmatprep.subr.bf16.mxu1 %v4784_v46  ;;  %v4872_v45 = vld [vmem:[%s6741_s1 + $0x2c0] ss:$8 sps:$4 sm:$0xff]  }
  0x89   :  { %3300 = vmatprep.subr.bf16.mxu0 %v4788_v47  ;;  %v4875_v46 = vld [vmem:[%s6742_s0 + $0x388] ss:$72 sps:$4 sm:$0xff]  }
  0x8a   :  { %2774 = vmatmul.mubr.bf16.gmra.mrb[4].mxu1 %v4781_v48  ;;  %v4876_v47 = vld [vmem:[%s6741_s1 + $0x6c0] ss:$8 sps:$4 sm:$0xff]   ;;  %v4881_v48 = vld [vmem:[%s6741_s1 + $0x2d4] ss:$8 sps:$4 sm:$0xff]  }
  0x8b   :  { %3226 = vmatmul.mubr.bf16.gmra.mrb[4].mxu0 %v4785_v50  ;;  %2849 = vmatpush1.bf16.msra.mxu1 %v4782_v49  ;;  %v4884_v49 = vld [vmem:[%s6741_s1 + $0x6d4] ss:$8 sps:$4 sm:$0xff]  }
  0x8c   :  { %3301 = vmatpush1.bf16.msra.mxu0 %v4786_v51  ;;  %2850 = vmatprep.subr.bf16.mxu1 %v4791_v52  ;;  %v4885_v50 = vld [vmem:[%s6742_s0 + $0x3fc] ss:$72 sps:$4 sm:$0xff]   ;;  %v4879_v52 = vld [vmem:[%s6741_s1 + $0x2d0] ss:$8 sps:$4 sm:$0xff]  }
  0x8d   :  { %3302 = vmatprep.subr.bf16.mxu0 %v4794_v53  ;;  %2783 = vmatprep.mubr.bf16.mxu1 %v4795_v54  ;;  %v4887_v51 = vld [vmem:[%s6742_s0 + $0x41c] ss:$72 sps:$4 sm:$0xff]   ;;  %v4882_v53 = vld [vmem:[%s6741_s1 + $0x6d0] ss:$8 sps:$4 sm:$0xff]  }
  0x8e   :  { %3235 = vmatprep.mubr.bf16.mxu0 %v4797_v55  ;;  %v4892_v54 = vld [vmem:[%s6741_s1 + $0x2e4] ss:$8 sps:$4 sm:$0xff]  }
  0x8f   :  { %2851 = vmatpush1.bf16.msra.mxu1 %v4789_v56  ;;  %v4896_v55 = vld [vmem:[%s6741_s1 + $0x6e4] ss:$8 sps:$4 sm:$0xff]   ;;  %v4889_v56 = vld [vmem:[%s6742_s0 + $0x3f8] ss:$72 sps:$4 sm:$0xff]  }
  0x90   :  { %3303 = vmatpush1.bf16.msra.mxu0 %v4792_v57  ;;  %2852 = vmatprep.subr.bf16.mxu1 %v4802_v58  ;;  %v4890_v57 = vld [vmem:[%s6741_s1 + $0x2e0] ss:$8 sps:$4 sm:$0xff]  }
  0x91   :  { %3304 = vmatprep.subr.bf16.mxu0 %v4806_v59  ;;  %v4893_v58 = vld [vmem:[%s6742_s0 + $0x418] ss:$72 sps:$4 sm:$0xff]  }
  0x92   :  { %2784 = vmatmul.mubr.bf16.gmra.mrb[8].mxu1 %v4799_v60  ;;  %v4894_v59 = vld [vmem:[%s6741_s1 + $0x6e0] ss:$8 sps:$4 sm:$0xff]   ;;  %v4899_v60 = vld [vmem:[%s6741_s1 + $0x2f4] ss:$8 sps:$4 sm:$0xff]  }
  0x93   :  { %3236 = vmatmul.mubr.bf16.gmra.mrb[8].mxu0 %v4803_v62  ;;  %2853 = vmatpush1.bf16.msra.mxu1 %v4800_v61  ;;  %v4902_v61 = vld [vmem:[%s6741_s1 + $0x6f4] ss:$8 sps:$4 sm:$0xff]  }
  0x94   :  { %3305 = vmatpush1.bf16.msra.mxu0 %v4804_v63  ;;  %2854 = vmatprep.subr.bf16.mxu1 %v4809_v0  ;;  %v4905_v62 = vld [vmem:[%s6742_s0 + $0x14] ss:$72 sps:$4 sm:$0xff]   ;;  %v4897_v0 = vld [vmem:[%s6741_s1 + $0x2f0] ss:$8 sps:$4 sm:$0xff]  }
  0x95   :  { %3306 = vmatprep.subr.bf16.mxu0 %v4812_v1  ;;  %2793 = vmatprep.mubr.bf16.mxu1 %v4813_v2  ;;  %v4908_v63 = vld [vmem:[%s6742_s0 + $0x34] ss:$72 sps:$4 sm:$0xff]   ;;  %v4900_v1 = vld [vmem:[%s6741_s1 + $0x6f0] ss:$8 sps:$4 sm:$0xff]   ;;  %v4911_v2 = vld [vmem:[%s6741_s1 + $0x304] ss:$8 sps:$4 sm:$0xff]  }
  0x96   :  { %3245 = vmatprep.mubr.bf16.mxu0 %v4815_v3  ;;  %v4914_v3 = vld [vmem:[%s6741_s1 + $0x704] ss:$8 sps:$4 sm:$0xff]  }
  0x97   :  { %2855 = vmatpush1.bf16.msra.mxu1 %v4807_v4  ;;  %v4903_v4 = vld [vmem:[%s6742_s0 + $0x10] ss:$72 sps:$4 sm:$0xff]  }
  0x98   :  { %3307 = vmatpush1.bf16.msra.mxu0 %v4810_v5  ;;  %2856 = vmatprep.subr.bf16.mxu1 %v4820_v6  ;;  %v4906_v5 = vld [vmem:[%s6742_s0 + $0x30] ss:$72 sps:$4 sm:$0xff]   ;;  %v4909_v6 = vld [vmem:[%s6741_s1 + $0x300] ss:$8 sps:$4 sm:$0xff]  }
  0x99   :  { %3308 = vmatprep.subr.bf16.mxu0 %v4824_v7  ;;  %v4912_v7 = vld [vmem:[%s6741_s1 + $0x700] ss:$8 sps:$4 sm:$0xff]  }
  0x9a   :  { %2794 = vmatmul.mubr.bf16.gmra.mrb[12].mxu1 %v4817_v8  ;;  %v4917_v8 = vld [vmem:[%s6741_s1 + $0x314] ss:$8 sps:$4 sm:$0xff]  }
  0x9b   :  { %3246 = vmatmul.mubr.bf16.gmra.mrb[12].mxu0 %v4821_v10  ;;  %2857 = vmatpush1.bf16.msra.mxu1 %v4818_v9  ;;  %v4920_v9 = vld [vmem:[%s6741_s1 + $0x714] ss:$8 sps:$4 sm:$0xff]   ;;  %v4921_v10 = vld [vmem:[%s6742_s0 + $0xa4] ss:$72 sps:$4 sm:$0xff]  }
  0x9c   :  { %3309 = vmatpush1.bf16.msra.mxu0 %v4822_v11  ;;  %2858 = vmatprep.subr.bf16.mxu1 %v4827_v12  ;;  %v4923_v11 = vld [vmem:[%s6742_s0 + $0xc4] ss:$72 sps:$4 sm:$0xff]   ;;  %v4915_v12 = vld [vmem:[%s6741_s1 + $0x310] ss:$8 sps:$4 sm:$0xff]  }
  0x9d   :  { %3310 = vmatprep.subr.bf16.mxu0 %v4830_v13  ;;  %2803 = vmatprep.mubr.bf16.mxu1 %v4831_v14  ;;  %v4918_v13 = vld [vmem:[%s6741_s1 + $0x710] ss:$8 sps:$4 sm:$0xff]   ;;  %v4928_v14 = vld [vmem:[%s6741_s1 + $0x324] ss:$8 sps:$4 sm:$0xff]  }
  0x9e   :  { %3255 = vmatprep.mubr.bf16.mxu0 %v4833_v15  ;;  %v4932_v15 = vld [vmem:[%s6741_s1 + $0x724] ss:$8 sps:$4 sm:$0xff]  }
  0x9f   :  { %2859 = vmatpush1.bf16.msra.mxu1 %v4825_v16  ;;  %v4925_v16 = vld [vmem:[%s6742_s0 + $0xa0] ss:$72 sps:$4 sm:$0xff]  }
  0xa0   :  { %3311 = vmatpush1.bf16.msra.mxu0 %v4828_v17  ;;  %2860 = vmatprep.subr.bf16.mxu1 %v4838_v18  ;;  %v4926_v17 = vld [vmem:[%s6741_s1 + $0x320] ss:$8 sps:$4 sm:$0xff]  }
  0xa1   :  { %3312 = vmatprep.subr.bf16.mxu0 %v4842_v19  ;;  %v4929_v18 = vld [vmem:[%s6742_s0 + $0xc0] ss:$72 sps:$4 sm:$0xff]  }
  0xa2   :  { %2804 = vmatmul.mubr.bf16.gmra.mrb[16].mxu1 %v4835_v20  ;;  %v4930_v19 = vld [vmem:[%s6741_s1 + $0x720] ss:$8 sps:$4 sm:$0xff]   ;;  %v4935_v20 = vld [vmem:[%s6741_s1 + $0x334] ss:$8 sps:$4 sm:$0xff]  }
  0xa3   :  { %3256 = vmatmul.mubr.bf16.gmra.mrb[16].mxu0 %v4839_v22  ;;  %2861 = vmatpush1.bf16.msra.mxu1 %v4836_v21  ;;  %v4938_v21 = vld [vmem:[%s6741_s1 + $0x734] ss:$8 sps:$4 sm:$0xff]  }
  0xa4   :  { %3313 = vmatpush1.bf16.msra.mxu0 %v4840_v23  ;;  %2862 = vmatprep.subr.bf16.mxu1 %v4845_v24  ;;  %v4939_v22 = vld [vmem:[%s6742_s0 + $0x134] ss:$72 sps:$4 sm:$0xff]   ;;  %v4933_v24 = vld [vmem:[%s6741_s1 + $0x330] ss:$8 sps:$4 sm:$0xff]  }
  0xa5   :  { %3314 = vmatprep.subr.bf16.mxu0 %v4848_v25  ;;  %2813 = vmatprep.mubr.bf16.mxu1 %v4849_v26  ;;  %v4941_v23 = vld [vmem:[%s6742_s0 + $0x154] ss:$72 sps:$4 sm:$0xff]   ;;  %v4936_v25 = vld [vmem:[%s6741_s1 + $0x730] ss:$8 sps:$4 sm:$0xff]   ;;  %v4946_v26 = vld [vmem:[%s6741_s1 + $0x344] ss:$8 sps:$4 sm:$0xff]  }
  0xa6   :  { %3265 = vmatprep.mubr.bf16.mxu0 %v4851_v27  ;;  %v4950_v27 = vld [vmem:[%s6741_s1 + $0x744] ss:$8 sps:$4 sm:$0xff]  }
  0xa7   :  { %2863 = vmatpush1.bf16.msra.mxu1 %v4843_v28  ;;  %v4943_v28 = vld [vmem:[%s6742_s0 + $0x130] ss:$72 sps:$4 sm:$0xff]  }
  0xa8   :  { %3315 = vmatpush1.bf16.msra.mxu0 %v4846_v29  ;;  %2864 = vmatprep.subr.bf16.mxu1 %v4856_v30  ;;  %v4944_v29 = vld [vmem:[%s6741_s1 + $0x340] ss:$8 sps:$4 sm:$0xff]   ;;  %v4947_v30 = vld [vmem:[%s6742_s0 + $0x150] ss:$72 sps:$4 sm:$0xff]  }
  0xa9   :  { %3316 = vmatprep.subr.bf16.mxu0 %v4860_v31  ;;  %v4948_v31 = vld [vmem:[%s6741_s1 + $0x740] ss:$8 sps:$4 sm:$0xff]  }
  0xaa   :  { %2814 = vmatmul.mubr.bf16.gmra.mrb[20].mxu1 %v4853_v32  ;;  %v4953_v32 = vld [vmem:[%s6741_s1 + $0x354] ss:$8 sps:$4 sm:$0xff]  }
  0xab   :  { %3266 = vmatmul.mubr.bf16.gmra.mrb[20].mxu0 %v4857_v34  ;;  %2865 = vmatpush1.bf16.msra.mxu1 %v4854_v33  ;;  %v4956_v33 = vld [vmem:[%s6741_s1 + $0x754] ss:$8 sps:$4 sm:$0xff]   ;;  %v4957_v34 = vld [vmem:[%s6742_s0 + $0x1c4] ss:$72 sps:$4 sm:$0xff]  }
  0xac   :  { %3317 = vmatpush1.bf16.msra.mxu0 %v4858_v35  ;;  %2866 = vmatprep.subr.bf16.mxu1 %v4863_v36  ;;  %v4959_v35 = vld [vmem:[%s6742_s0 + $0x1e4] ss:$72 sps:$4 sm:$0xff]   ;;  %v4951_v36 = vld [vmem:[%s6741_s1 + $0x350] ss:$8 sps:$4 sm:$0xff]  }
  0xad   :  { %3318 = vmatprep.subr.bf16.mxu0 %v4866_v37  ;;  %2823 = vmatprep.mubr.bf16.mxu1 %v4867_v38  ;;  %v4954_v37 = vld [vmem:[%s6741_s1 + $0x750] ss:$8 sps:$4 sm:$0xff]   ;;  %v4964_v38 = vld [vmem:[%s6741_s1 + $0x364] ss:$8 sps:$4 sm:$0xff]  }
  0xae   :  { %3275 = vmatprep.mubr.bf16.mxu0 %v4869_v39  ;;  %v4968_v39 = vld [vmem:[%s6741_s1 + $0x764] ss:$8 sps:$4 sm:$0xff]  }
  0xaf   :  { %2867 = vmatpush1.bf16.msra.mxu1 %v4861_v40  ;;  %v4961_v40 = vld [vmem:[%s6742_s0 + $0x1c0] ss:$72 sps:$4 sm:$0xff]  }
  0xb0   :  { %3319 = vmatpush1.bf16.msra.mxu0 %v4864_v41  ;;  %2868 = vmatprep.subr.bf16.mxu1 %v4874_v42  ;;  %v4962_v41 = vld [vmem:[%s6741_s1 + $0x360] ss:$8 sps:$4 sm:$0xff]  }
  0xb1   :  { %3320 = vmatprep.subr.bf16.mxu0 %v4878_v43  ;;  %v4965_v42 = vld [vmem:[%s6742_s0 + $0x1e0] ss:$72 sps:$4 sm:$0xff]  }
  0xb2   :  { %2824 = vmatmul.mubr.bf16.gmra.mrb[24].mxu1 %v4871_v44  ;;  %v4966_v43 = vld [vmem:[%s6741_s1 + $0x760] ss:$8 sps:$4 sm:$0xff]   ;;  %v4971_v44 = vld [vmem:[%s6741_s1 + $0x374] ss:$8 sps:$4 sm:$0xff]  }
  0xb3   :  { %3276 = vmatmul.mubr.bf16.gmra.mrb[24].mxu0 %v4875_v46  ;;  %2869 = vmatpush1.bf16.msra.mxu1 %v4872_v45  ;;  %v4974_v45 = vld [vmem:[%s6741_s1 + $0x774] ss:$8 sps:$4 sm:$0xff]  }
  0xb4   :  { %3321 = vmatpush1.bf16.msra.mxu0 %v4876_v47  ;;  %2870 = vmatprep.subr.bf16.mxu1 %v4881_v48  ;;  %v4975_v46 = vld [vmem:[%s6742_s0 + $0x254] ss:$72 sps:$4 sm:$0xff]   ;;  %v4969_v48 = vld [vmem:[%s6741_s1 + $0x370] ss:$8 sps:$4 sm:$0xff]  }
  0xb5   :  { %3322 = vmatprep.subr.bf16.mxu0 %v4884_v49  ;;  %2833 = vmatprep.mubr.bf16.mxu1 %v4885_v50  ;;  %v4977_v47 = vld [vmem:[%s6742_s0 + $0x274] ss:$72 sps:$4 sm:$0xff]   ;;  %v4972_v49 = vld [vmem:[%s6741_s1 + $0x770] ss:$8 sps:$4 sm:$0xff]   ;;  %v4982_v50 = vld [vmem:[%s6741_s1 + $0x384] ss:$8 sps:$4 sm:$0xff]  }
  0xb6   :  { %3285 = vmatprep.mubr.bf16.mxu0 %v4887_v51  ;;  %v4986_v51 = vld [vmem:[%s6741_s1 + $0x784] ss:$8 sps:$4 sm:$0xff]  }
  0xb7   :  { %2871 = vmatpush1.bf16.msra.mxu1 %v4879_v52  ;;  %v4979_v52 = vld [vmem:[%s6742_s0 + $0x250] ss:$72 sps:$4 sm:$0xff]  }
  0xb8   :  { %3323 = vmatpush1.bf16.msra.mxu0 %v4882_v53  ;;  %2872 = vmatprep.subr.bf16.mxu1 %v4892_v54  ;;  %v4980_v53 = vld [vmem:[%s6741_s1 + $0x380] ss:$8 sps:$4 sm:$0xff]   ;;  %v4983_v54 = vld [vmem:[%s6742_s0 + $0x270] ss:$72 sps:$4 sm:$0xff]  }
  0xb9   :  { %3324 = vmatprep.subr.bf16.mxu0 %v4896_v55  ;;  %v4984_v55 = vld [vmem:[%s6741_s1 + $0x780] ss:$8 sps:$4 sm:$0xff]  }
  0xba   :  { %2834 = vmatmul.mubr.bf16.gmra.mrb[28].mxu1 %v4889_v56  ;;  %v4989_v56 = vld [vmem:[%s6741_s1 + $0x394] ss:$8 sps:$4 sm:$0xff]  }
  0xbb   :  { %3286 = vmatmul.mubr.bf16.gmra.mrb[28].mxu0 %v4893_v58  ;;  %2873 = vmatpush1.bf16.msra.mxu1 %v4890_v57  ;;  %v4992_v57 = vld [vmem:[%s6741_s1 + $0x794] ss:$8 sps:$4 sm:$0xff]   ;;  %v4993_v58 = vld [vmem:[%s6742_s0 + $0x2e4] ss:$72 sps:$4 sm:$0xff]  }
  0xbc   :  { %3325 = vmatpush1.bf16.msra.mxu0 %v4894_v59  ;;  %2874 = vmatprep.subr.bf16.mxu1 %v4899_v60  ;;  %v4995_v59 = vld [vmem:[%s6742_s0 + $0x304] ss:$72 sps:$4 sm:$0xff]   ;;  %v4987_v60 = vld [vmem:[%s6741_s1 + $0x390] ss:$8 sps:$4 sm:$0xff]  }
  0xbd   :  { %3326 = vmatprep.subr.bf16.mxu0 %v4902_v61  ;;  %2876 = vmatprep.mubr.bf16.mxu1 %v4905_v62  ;;  %v4990_v61 = vld [vmem:[%s6741_s1 + $0x790] ss:$8 sps:$4 sm:$0xff]   ;;  %v5000_v62 = vld [vmem:[%s6741_s1 + $0x3a4] ss:$8 sps:$4 sm:$0xff]  }
  0xbe   :  { %3328 = vmatprep.mubr.bf16.mxu0 %v4908_v63  ;;  %v5004_v63 = vld [vmem:[%s6741_s1 + $0x7a4] ss:$8 sps:$4 sm:$0xff]  }
  0xbf   :  { %2875 = vmatpush1.bf16.msra.mxu1 %v4897_v0  ;;  %v4997_v0 = vld [vmem:[%s6742_s0 + $0x2e0] ss:$72 sps:$4 sm:$0xff]  }
  0xc0   :  { %3327 = vmatpush1.bf16.msra.mxu0 %v4900_v1  ;;  %2957 = vmatprep.subr.bf16.mxu1 %v4911_v2  ;;  %v4998_v1 = vld [vmem:[%s6741_s1 + $0x3a0] ss:$8 sps:$4 sm:$0xff]  }
  0xc1   :  { %3409 = vmatprep.subr.bf16.mxu0 %v4914_v3  ;;  %v5001_v2 = vld [vmem:[%s6742_s0 + $0x300] ss:$72 sps:$4 sm:$0xff]  }
  0xc2   :  { %2877 = vmatmul.mubr.bf16.vlgmr.msra.gmra.mrb[0].mxu1 %v4903_v4  ;;  %v5002_v3 = vld [vmem:[%s6741_s1 + $0x7a0] ss:$8 sps:$4 sm:$0xff]   ;;  %v5007_v4 = vld [vmem:[%s6741_s1 + $0x3b4] ss:$8 sps:$4 sm:$0xff]  }
  0xc3   :  { %3329 = vmatmul.mubr.bf16.vlgmr.msra.gmra.mrb[0].mxu0 %v4906_v5  ;;  %2958 = vmatpush1.bf16.msra.mxu1 %v4909_v6  ;;  %v5010_v5 = vld [vmem:[%s6741_s1 + $0x7b4] ss:$8 sps:$4 sm:$0xff]  }
  0xc4   :  { %3410 = vmatpush1.bf16.msra.mxu0 %v4912_v7  ;;  %2959 = vmatprep.subr.bf16.mxu1 %v4917_v8  ;;  %v5011_v6 = vld [vmem:[%s6742_s0 + $0x374] ss:$72 sps:$4 sm:$0xff]   ;;  %v5005_v8 = vld [vmem:[%s6741_s1 + $0x3b0] ss:$8 sps:$4 sm:$0xff]  }
  0xc5   :  { %3411 = vmatprep.subr.bf16.mxu0 %v4920_v9  ;;  %2886 = vmatprep.mubr.bf16.mxu1 %v4921_v10  ;;  %v5013_v7 = vld [vmem:[%s6742_s0 + $0x394] ss:$72 sps:$4 sm:$0xff]   ;;  %v5008_v9 = vld [vmem:[%s6741_s1 + $0x7b0] ss:$8 sps:$4 sm:$0xff]   ;;  %v5018_v10 = vld [vmem:[%s6741_s1 + $0x3c4] ss:$8 sps:$4 sm:$0xff]  }
  0xc6   :  { %3338 = vmatprep.mubr.bf16.mxu0 %v4923_v11  ;;  %v5022_v11 = vld [vmem:[%s6741_s1 + $0x7c4] ss:$8 sps:$4 sm:$0xff]  }
  0xc7   :  { %2960 = vmatpush1.bf16.msra.mxu1 %v4915_v12  ;;  %v5015_v12 = vld [vmem:[%s6742_s0 + $0x370] ss:$72 sps:$4 sm:$0xff]  }
  0xc8   :  { %3412 = vmatpush1.bf16.msra.mxu0 %v4918_v13  ;;  %2961 = vmatprep.subr.bf16.mxu1 %v4928_v14  ;;  %v5016_v13 = vld [vmem:[%s6741_s1 + $0x3c0] ss:$8 sps:$4 sm:$0xff]   ;;  %v5019_v14 = vld [vmem:[%s6742_s0 + $0x390] ss:$72 sps:$4 sm:$0xff]  }
  0xc9   :  { %3413 = vmatprep.subr.bf16.mxu0 %v4932_v15  ;;  %v5020_v15 = vld [vmem:[%s6741_s1 + $0x7c0] ss:$8 sps:$4 sm:$0xff]  }
  0xca   :  { %2887 = vmatmul.mubr.bf16.gmra.mrb[4].mxu1 %v4925_v16  ;;  %v5025_v16 = vld [vmem:[%s6741_s1 + $0x3d4] ss:$8 sps:$4 sm:$0xff]  }
  0xcb   :  { %3339 = vmatmul.mubr.bf16.gmra.mrb[4].mxu0 %v4929_v18  ;;  %2962 = vmatpush1.bf16.msra.mxu1 %v4926_v17  ;;  %v5028_v17 = vld [vmem:[%s6741_s1 + $0x7d4] ss:$8 sps:$4 sm:$0xff]   ;;  %v5029_v18 = vld [vmem:[%s6742_s0 + $0x404] ss:$72 sps:$4 sm:$0xff]  }
  0xcc   :  { %3414 = vmatpush1.bf16.msra.mxu0 %v4930_v19  ;;  %2963 = vmatprep.subr.bf16.mxu1 %v4935_v20  ;;  %v5031_v19 = vld [vmem:[%s6742_s0 + $0x424] ss:$72 sps:$4 sm:$0xff]   ;;  %v5023_v20 = vld [vmem:[%s6741_s1 + $0x3d0] ss:$8 sps:$4 sm:$0xff]  }
  0xcd   :  { %3415 = vmatprep.subr.bf16.mxu0 %v4938_v21  ;;  %2896 = vmatprep.mubr.bf16.mxu1 %v4939_v22  ;;  %v5026_v21 = vld [vmem:[%s6741_s1 + $0x7d0] ss:$8 sps:$4 sm:$0xff]   ;;  %v5036_v22 = vld [vmem:[%s6741_s1 + $0x3e4] ss:$8 sps:$4 sm:$0xff]  }
  0xce   :  { %3348 = vmatprep.mubr.bf16.mxu0 %v4941_v23  ;;  %v5040_v23 = vld [vmem:[%s6741_s1 + $0x7e4] ss:$8 sps:$4 sm:$0xff]  }
  0xcf   :  { %2964 = vmatpush1.bf16.msra.mxu1 %v4933_v24  ;;  %v5033_v24 = vld [vmem:[%s6742_s0 + $0x400] ss:$72 sps:$4 sm:$0xff]  }
  0xd0   :  { %3416 = vmatpush1.bf16.msra.mxu0 %v4936_v25  ;;  %2965 = vmatprep.subr.bf16.mxu1 %v4946_v26  ;;  %v5034_v25 = vld [vmem:[%s6741_s1 + $0x3e0] ss:$8 sps:$4 sm:$0xff]  }
  0xd1   :  { %3417 = vmatprep.subr.bf16.mxu0 %v4950_v27  ;;  %v5037_v26 = vld [vmem:[%s6742_s0 + $0x420] ss:$72 sps:$4 sm:$0xff]  }
  0xd2   :  { %2897 = vmatmul.mubr.bf16.gmra.mrb[8].mxu1 %v4943_v28  ;;  %v5038_v27 = vld [vmem:[%s6741_s1 + $0x7e0] ss:$8 sps:$4 sm:$0xff]   ;;  %v5043_v28 = vld [vmem:[%s6741_s1 + $0x3f4] ss:$8 sps:$4 sm:$0xff]  }
  0xd3   :  { %3349 = vmatmul.mubr.bf16.gmra.mrb[8].mxu0 %v4947_v30  ;;  %2966 = vmatpush1.bf16.msra.mxu1 %v4944_v29  ;;  %v5046_v29 = vld [vmem:[%s6741_s1 + $0x7f4] ss:$8 sps:$4 sm:$0xff]  }
  0xd4   :  { %3418 = vmatpush1.bf16.msra.mxu0 %v4948_v31  ;;  %2967 = vmatprep.subr.bf16.mxu1 %v4953_v32  ;;  %v5049_v30 = vld [vmem:[%s6742_s0 + $0x1c] ss:$72 sps:$4 sm:$0xff]   ;;  %v5041_v32 = vld [vmem:[%s6741_s1 + $0x3f0] ss:$8 sps:$4 sm:$0xff]  }
  0xd5   :  { %3419 = vmatprep.subr.bf16.mxu0 %v4956_v33  ;;  %2906 = vmatprep.mubr.bf16.mxu1 %v4957_v34  ;;  %v5052_v31 = vld [vmem:[%s6742_s0 + $0x3c] ss:$72 sps:$4 sm:$0xff]   ;;  %v5044_v33 = vld [vmem:[%s6741_s1 + $0x7f0] ss:$8 sps:$4 sm:$0xff]  }
  0xd6   :  { %3358 = vmatprep.mubr.bf16.mxu0 %v4959_v35  ;;  %v5055_v34 = vld [vmem:[%s6741_s1 + $0x804] ss:$8 sps:$4 sm:$0xff]   ;;  %v5047_v35 = vld [vmem:[%s6742_s0 + $0x18] ss:$72 sps:$4 sm:$0xff]  }
  0xd7   :  { %2968 = vmatpush1.bf16.msra.mxu1 %v4951_v36  ;;  %v5050_v36 = vld [vmem:[%s6742_s0 + $0x38] ss:$72 sps:$4 sm:$0xff]  }
  0xd8   :  { %3420 = vmatpush1.bf16.msra.mxu0 %v4954_v37  ;;  %2969 = vmatprep.subr.bf16.mxu1 %v4964_v38  ;;  %v5053_v37 = vld [vmem:[%s6741_s1 + $0x800] ss:$8 sps:$4 sm:$0xff]   ;;  %v5058_v38 = vld [vmem:[%s6741_s1 + $0x814] ss:$8 sps:$4 sm:$0xff]  }
  0xd9   :  { %3421 = vmatprep.subr.bf16.mxu0 %v4968_v39  ;;  %v5059_v39 = vld [vmem:[%s6742_s0 + $0xac] ss:$72 sps:$4 sm:$0xff]  }
  0xda   :  { %2907 = vmatmul.mubr.bf16.gmra.mrb[12].mxu1 %v4961_v40  ;;  %v5061_v40 = vld [vmem:[%s6742_s0 + $0xcc] ss:$72 sps:$4 sm:$0xff]  }
  0xdb   :  { %3359 = vmatmul.mubr.bf16.gmra.mrb[12].mxu0 %v4965_v42  ;;  %2970 = vmatpush1.bf16.msra.mxu1 %v4962_v41  ;;  %v5056_v41 = vld [vmem:[%s6741_s1 + $0x810] ss:$8 sps:$4 sm:$0xff]   ;;  %v5067_v42 = vld [vmem:[%s6741_s1 + $0x824] ss:$8 sps:$4 sm:$0xff]  }
  0xdc   :  { %3422 = vmatpush1.bf16.msra.mxu0 %v4966_v43  ;;  %2971 = vmatprep.subr.bf16.mxu1 %v4971_v44  ;;  %v5063_v43 = vld [vmem:[%s6742_s0 + $0xa8] ss:$72 sps:$4 sm:$0xff]  }
  0xdd   :  { %3423 = vmatprep.subr.bf16.mxu0 %v4974_v45  ;;  %2916 = vmatprep.mubr.bf16.mxu1 %v4975_v46  ;;  %v5064_v44 = vld [vmem:[%s6742_s0 + $0xc8] ss:$72 sps:$4 sm:$0xff]   ;;  %v5070_v46 = vld [vmem:[%s6741_s1 + $0x834] ss:$8 sps:$4 sm:$0xff]  }
  0xde   :  { %3368 = vmatprep.mubr.bf16.mxu0 %v4977_v47  ;;  %v5065_v45 = vld [vmem:[%s6741_s1 + $0x820] ss:$8 sps:$4 sm:$0xff]   ;;  %v5071_v47 = vld [vmem:[%s6742_s0 + $0x13c] ss:$72 sps:$4 sm:$0xff]  }
  0xdf   :  { %2972 = vmatpush1.bf16.msra.mxu1 %v4969_v48  ;;  %v5073_v48 = vld [vmem:[%s6742_s0 + $0x15c] ss:$72 sps:$4 sm:$0xff]  }
  0xe0   :  { %3424 = vmatpush1.bf16.msra.mxu0 %v4972_v49  ;;  %2973 = vmatprep.subr.bf16.mxu1 %v4982_v50  ;;  %v5068_v49 = vld [vmem:[%s6741_s1 + $0x830] ss:$8 sps:$4 sm:$0xff]   ;;  %v5079_v50 = vld [vmem:[%s6741_s1 + $0x844] ss:$8 sps:$4 sm:$0xff]  }
  0xe1   :  { %3425 = vmatprep.subr.bf16.mxu0 %v4986_v51  ;;  %v5075_v51 = vld [vmem:[%s6742_s0 + $0x138] ss:$72 sps:$4 sm:$0xff]  }
  0xe2   :  { %2917 = vmatmul.mubr.bf16.gmra.mrb[16].mxu1 %v4979_v52  ;;  %v5076_v52 = vld [vmem:[%s6742_s0 + $0x158] ss:$72 sps:$4 sm:$0xff]  }
  0xe3   :  { %3369 = vmatmul.mubr.bf16.gmra.mrb[16].mxu0 %v4983_v54  ;;  %2974 = vmatpush1.bf16.msra.mxu1 %v4980_v53  ;;  %v5077_v53 = vld [vmem:[%s6741_s1 + $0x840] ss:$8 sps:$4 sm:$0xff]   ;;  %v5082_v54 = vld [vmem:[%s6741_s1 + $0x854] ss:$8 sps:$4 sm:$0xff]  }
  0xe4   :  { %3426 = vmatpush1.bf16.msra.mxu0 %v4984_v55  ;;  %2975 = vmatprep.subr.bf16.mxu1 %v4989_v56  ;;  %v5083_v55 = vld [vmem:[%s6742_s0 + $0x1cc] ss:$72 sps:$4 sm:$0xff]  }
  0xe5   :  { %3427 = vmatprep.subr.bf16.mxu0 %v4992_v57  ;;  %2926 = vmatprep.mubr.bf16.mxu1 %v4993_v58  ;;  %v5085_v56 = vld [vmem:[%s6742_s0 + $0x1ec] ss:$72 sps:$4 sm:$0xff]   ;;  %v5080_v57 = vld [vmem:[%s6741_s1 + $0x850] ss:$8 sps:$4 sm:$0xff]  }
  0xe6   :  { %3378 = vmatprep.mubr.bf16.mxu0 %v4995_v59  ;;  %v5091_v58 = vld [vmem:[%s6741_s1 + $0x864] ss:$8 sps:$4 sm:$0xff]   ;;  %v5087_v59 = vld [vmem:[%s6742_s0 + $0x1c8] ss:$72 sps:$4 sm:$0xff]  }
  0xe7   :  { %2976 = vmatpush1.bf16.msra.mxu1 %v4987_v60  ;;  %v5088_v60 = vld [vmem:[%s6742_s0 + $0x1e8] ss:$72 sps:$4 sm:$0xff]  }
  0xe8   :  { %3428 = vmatpush1.bf16.msra.mxu0 %v4990_v61  ;;  %2977 = vmatprep.subr.bf16.mxu1 %v5000_v62  ;;  %v5089_v61 = vld [vmem:[%s6741_s1 + $0x860] ss:$8 sps:$4 sm:$0xff]   ;;  %v5094_v62 = vld [vmem:[%s6741_s1 + $0x874] ss:$8 sps:$4 sm:$0xff]  }
  0xe9   :  { %3429 = vmatprep.subr.bf16.mxu0 %v5004_v63  ;;  %v5095_v63 = vld [vmem:[%s6742_s0 + $0x25c] ss:$72 sps:$4 sm:$0xff]  }
  0xea   :  { %2927 = vmatmul.mubr.bf16.gmra.mrb[20].mxu1 %v4997_v0  ;;  %v5097_v0 = vld [vmem:[%s6742_s0 + $0x27c] ss:$72 sps:$4 sm:$0xff]  }
  0xeb   :  { %3379 = vmatmul.mubr.bf16.gmra.mrb[20].mxu0 %v5001_v2  ;;  %2978 = vmatpush1.bf16.msra.mxu1 %v4998_v1  ;;  %v5092_v1 = vld [vmem:[%s6741_s1 + $0x870] ss:$8 sps:$4 sm:$0xff]   ;;  %v5103_v2 = vld [vmem:[%s6741_s1 + $0x884] ss:$8 sps:$4 sm:$0xff]  }
  0xec   :  { %3430 = vmatpush1.bf16.msra.mxu0 %v5002_v3  ;;  %2979 = vmatprep.subr.bf16.mxu1 %v5007_v4  ;;  %v5099_v3 = vld [vmem:[%s6742_s0 + $0x258] ss:$72 sps:$4 sm:$0xff]  }
  0xed   :  { %3431 = vmatprep.subr.bf16.mxu0 %v5010_v5  ;;  %2936 = vmatprep.mubr.bf16.mxu1 %v5011_v6  ;;  %v5100_v4 = vld [vmem:[%s6742_s0 + $0x278] ss:$72 sps:$4 sm:$0xff]   ;;  %v5106_v6 = vld [vmem:[%s6741_s1 + $0x894] ss:$8 sps:$4 sm:$0xff]  }
  0xee   :  { %3388 = vmatprep.mubr.bf16.mxu0 %v5013_v7  ;;  %v5101_v5 = vld [vmem:[%s6741_s1 + $0x880] ss:$8 sps:$4 sm:$0xff]   ;;  %v5107_v7 = vld [vmem:[%s6742_s0 + $0x2ec] ss:$72 sps:$4 sm:$0xff]  }
  0xef   :  { %2980 = vmatpush1.bf16.msra.mxu1 %v5005_v8  ;;  %v5109_v8 = vld [vmem:[%s6742_s0 + $0x30c] ss:$72 sps:$4 sm:$0xff]  }
  0xf0   :  { %3432 = vmatpush1.bf16.msra.mxu0 %v5008_v9  ;;  %2981 = vmatprep.subr.bf16.mxu1 %v5018_v10  ;;  %v5104_v9 = vld [vmem:[%s6741_s1 + $0x890] ss:$8 sps:$4 sm:$0xff]   ;;  %v5115_v10 = vld [vmem:[%s6741_s1 + $0x8a4] ss:$8 sps:$4 sm:$0xff]  }
  0xf1   :  { %3433 = vmatprep.subr.bf16.mxu0 %v5022_v11  ;;  %v5111_v11 = vld [vmem:[%s6742_s0 + $0x2e8] ss:$72 sps:$4 sm:$0xff]  }
  0xf2   :  { %2937 = vmatmul.mubr.bf16.gmra.mrb[24].mxu1 %v5015_v12  ;;  %v5112_v12 = vld [vmem:[%s6742_s0 + $0x308] ss:$72 sps:$4 sm:$0xff]  }
  0xf3   :  { %3389 = vmatmul.mubr.bf16.gmra.mrb[24].mxu0 %v5019_v14  ;;  %2982 = vmatpush1.bf16.msra.mxu1 %v5016_v13  ;;  %v5113_v13 = vld [vmem:[%s6741_s1 + $0x8a0] ss:$8 sps:$4 sm:$0xff]   ;;  %v5118_v14 = vld [vmem:[%s6741_s1 + $0x8b4] ss:$8 sps:$4 sm:$0xff]  }
  0xf4   :  { %3434 = vmatpush1.bf16.msra.mxu0 %v5020_v15  ;;  %2983 = vmatprep.subr.bf16.mxu1 %v5025_v16  ;;  %v5119_v15 = vld [vmem:[%s6742_s0 + $0x37c] ss:$72 sps:$4 sm:$0xff]  }
  0xf5   :  { %3435 = vmatprep.subr.bf16.mxu0 %v5028_v17  ;;  %2946 = vmatprep.mubr.bf16.mxu1 %v5029_v18  ;;  %v5121_v16 = vld [vmem:[%s6742_s0 + $0x39c] ss:$72 sps:$4 sm:$0xff]   ;;  %v5116_v17 = vld [vmem:[%s6741_s1 + $0x8b0] ss:$8 sps:$4 sm:$0xff]  }
  0xf6   :  { %3398 = vmatprep.mubr.bf16.mxu0 %v5031_v19  ;;  %v5127_v18 = vld [vmem:[%s6741_s1 + $0x8c4] ss:$8 sps:$4 sm:$0xff]   ;;  %v5123_v19 = vld [vmem:[%s6742_s0 + $0x378] ss:$72 sps:$4 sm:$0xff]  }
  0xf7   :  { %2984 = vmatpush1.bf16.msra.mxu1 %v5023_v20  ;;  %v5124_v20 = vld [vmem:[%s6742_s0 + $0x398] ss:$72 sps:$4 sm:$0xff]  }
  0xf8   :  { %3436 = vmatpush1.bf16.msra.mxu0 %v5026_v21  ;;  %2985 = vmatprep.subr.bf16.mxu1 %v5036_v22  ;;  %v5125_v21 = vld [vmem:[%s6741_s1 + $0x8c0] ss:$8 sps:$4 sm:$0xff]   ;;  %v5130_v22 = vld [vmem:[%s6741_s1 + $0x8d4] ss:$8 sps:$4 sm:$0xff]  }
  0xf9   :  { %3437 = vmatprep.subr.bf16.mxu0 %v5040_v23  ;;  %v5131_v23 = vld [vmem:[%s6742_s0 + $0x40c] ss:$72 sps:$4 sm:$0xff]  }
  0xfa   :  { %2947 = vmatmul.mubr.bf16.gmra.mrb[28].mxu1 %v5033_v24  ;;  %v5133_v24 = vld [vmem:[%s6742_s0 + $0x42c] ss:$72 sps:$4 sm:$0xff]  }
  0xfb   :  { %3399 = vmatmul.mubr.bf16.gmra.mrb[28].mxu0 %v5037_v26  ;;  %2986 = vmatpush1.bf16.msra.mxu1 %v5034_v25  ;;  %v5128_v25 = vld [vmem:[%s6741_s1 + $0x8d0] ss:$8 sps:$4 sm:$0xff]   ;;  %v5139_v26 = vld [vmem:[%s6741_s1 + $0x8e4] ss:$8 sps:$4 sm:$0xff]  }
  0xfc   :  { %3438 = vmatpush1.bf16.msra.mxu0 %v5038_v27  ;;  %2987 = vmatprep.subr.bf16.mxu1 %v5043_v28  ;;  %v5135_v27 = vld [vmem:[%s6742_s0 + $0x408] ss:$72 sps:$4 sm:$0xff]  }
  0xfd   :  { %3439 = vmatprep.subr.bf16.mxu0 %v5046_v29  ;;  %2989 = vmatprep.mubr.bf16.mxu1 %v5049_v30  ;;  %v5136_v28 = vld [vmem:[%s6742_s0 + $0x428] ss:$72 sps:$4 sm:$0xff]   ;;  %v5142_v30 = vld [vmem:[%s6741_s1 + $0x8f4] ss:$8 sps:$4 sm:$0xff]  }
  0xfe   :  { %3441 = vmatprep.mubr.bf16.mxu0 %v5052_v31  ;;  %v5137_v29 = vld [vmem:[%s6741_s1 + $0x8e0] ss:$8 sps:$4 sm:$0xff]   ;;  %v5145_v31 = vld [vmem:[%s6742_s0 + $0x44] ss:$72 sps:$4 sm:$0xff]  }
  0xff   :  { %2988 = vmatpush1.bf16.msra.mxu1 %v5041_v32  ;;  %v5148_v32 = vld [vmem:[%s6742_s0 + $0x284] ss:$72 sps:$4 sm:$0xff]  }
 0x100   :  { %3440 = vmatpush1.bf16.msra.mxu0 %v5044_v33  ;;  %4199 = vmatprep.subr.bf16.mxu1 %v5055_v34  ;;  %v5140_v33 = vld [vmem:[%s6741_s1 + $0x8f0] ss:$8 sps:$4 sm:$0xff]  }
 0x101   :  { %3522 = vmatprep.subr.bf16.mxu0 %v5055_v34  ;;  %v5143_v34 = vld [vmem:[%s6742_s0 + $0x40] ss:$72 sps:$4 sm:$0xff]  }
 0x102   :  { %2990 = vmatmul.mubr.bf16.vlgmr.msra.gmra.mrb[0].mxu1 %v5047_v35  ;;  %v5146_v35 = vld [vmem:[%s6742_s0 + $0x280] ss:$72 sps:$4 sm:$0xff]  }
 0x103   :  { %3442 = vmatmul.mubr.bf16.vlgmr.msra.gmra.mrb[0].mxu0 %v5050_v36  ;;  %4215 = vmatpush1.bf16.msra.mxu1 %v5053_v37  ;;  %v5149_v36 = vld [vmem:[%s6742_s0 + $0xd4] ss:$72 sps:$4 sm:$0xff]  }
 0x104   :  { %3523 = vmatpush1.bf16.msra.mxu0 %v5053_v37  ;;  %4200 = vmatprep.subr.bf16.mxu1 %v5058_v38  ;;  %v5151_v37 = vld [vmem:[%s6742_s0 + $0x314] ss:$72 sps:$4 sm:$0xff]  }
 0x105   :  { %3524 = vmatprep.subr.bf16.mxu0 %v5058_v38  ;;  %2999 = vmatprep.mubr.bf16.mxu1 %v5059_v39  ;;  %v5153_v38 = vld [vmem:[%s6742_s0 + $0xd0] ss:$72 sps:$4 sm:$0xff]  }
 0x106   :  { %3451 = vmatprep.mubr.bf16.mxu0 %v5061_v40  ;;  %v5154_v39 = vld [vmem:[%s6742_s0 + $0x310] ss:$72 sps:$4 sm:$0xff]   ;;  %v5155_v40 = vld [vmem:[%s6742_s0 + $0x164] ss:$72 sps:$4 sm:$0xff]  }
 0x107   :  { %4216 = vmatpush1.bf16.msra.mxu1 %v5056_v41 }
 0x108   :  { %3525 = vmatpush1.bf16.msra.mxu0 %v5056_v41  ;;  %4201 = vmatprep.subr.bf16.mxu1 %v5067_v42  ;;  %v5157_v41 = vld [vmem:[%s6742_s0 + $0x3a4] ss:$72 sps:$4 sm:$0xff]  }
 0x109   :  { %3526 = vmatprep.subr.bf16.mxu0 %v5067_v42  ;;  %v5159_v42 = vld [vmem:[%s6742_s0 + $0x160] ss:$72 sps:$4 sm:$0xff]  }
 0x10a   :  { %3000 = vmatmul.mubr.bf16.gmra.mrb[4].mxu1 %v5063_v43  ;;  %v5160_v43 = vld [vmem:[%s6742_s0 + $0x3a0] ss:$72 sps:$4 sm:$0xff]  }
 0x10b   :  { %3452 = vmatmul.mubr.bf16.gmra.mrb[4].mxu0 %v5064_v44  ;;  %4217 = vmatpush1.bf16.msra.mxu1 %v5065_v45  ;;  %v5161_v44 = vld [vmem:[%s6742_s0 + $0x1f4] ss:$72 sps:$4 sm:$0xff]  }
 0x10c   :  { %3527 = vmatpush1.bf16.msra.mxu0 %v5065_v45  ;;  %4202 = vmatprep.subr.bf16.mxu1 %v5070_v46  ;;  %v5163_v45 = vld [vmem:[%s6742_s0 + $0x434] ss:$72 sps:$4 sm:$0xff]  }
 0x10d   :  { %3528 = vmatprep.subr.bf16.mxu0 %v5070_v46  ;;  %3009 = vmatprep.mubr.bf16.mxu1 %v5071_v47  ;;  %v5165_v46 = vld [vmem:[%s6742_s0 + $0x1f0] ss:$72 sps:$4 sm:$0xff]  }
 0x10e   :  { %3461 = vmatprep.mubr.bf16.mxu0 %v5073_v48  ;;  %v5166_v47 = vld [vmem:[%s6742_s0 + $0x430] ss:$72 sps:$4 sm:$0xff]  }
 0x10f   :  { %4218 = vmatpush1.bf16.msra.mxu1 %v5068_v49 }
 0x110   :  { %3529 = vmatpush1.bf16.msra.mxu0 %v5068_v49  ;;  %4203 = vmatprep.subr.bf16.mxu1 %v5079_v50 }
 0x111   :  { %3530 = vmatprep.subr.bf16.mxu0 %v5079_v50 }
 0x112   :  { %3010 = vmatmul.mubr.bf16.gmra.mrb[8].mxu1 %v5075_v51 }
 0x113   :  { %3462 = vmatmul.mubr.bf16.gmra.mrb[8].mxu0 %v5076_v52  ;;  %4219 = vmatpush1.bf16.msra.mxu1 %v5077_v53 }
 0x114   :  { %3531 = vmatpush1.bf16.msra.mxu0 %v5077_v53  ;;  %4204 = vmatprep.subr.bf16.mxu1 %v5082_v54 }
 0x115   :  { %3532 = vmatprep.subr.bf16.mxu0 %v5082_v54  ;;  %3019 = vmatprep.mubr.bf16.mxu1 %v5083_v55 }
 0x116   :  { %3471 = vmatprep.mubr.bf16.mxu0 %v5085_v56 }
 0x117   :  { %4220 = vmatpush1.bf16.msra.mxu1 %v5080_v57 }
 0x118   :  { %3533 = vmatpush1.bf16.msra.mxu0 %v5080_v57  ;;  %4205 = vmatprep.subr.bf16.mxu1 %v5091_v58 }
 0x119   :  { %3534 = vmatprep.subr.bf16.mxu0 %v5091_v58 }
 0x11a   :  { %3020 = vmatmul.mubr.bf16.gmra.mrb[12].mxu1 %v5087_v59  ;;  %v448_v59 = vlaneseq }
 0x11b   :  { %3472 = vmatmul.mubr.bf16.gmra.mrb[12].mxu0 %v5088_v60  ;;  %4221 = vmatpush1.bf16.msra.mxu1 %v5089_v61 }
 0x11c   :  { %3535 = vmatpush1.bf16.msra.mxu0 %v5089_v61  ;;  %4206 = vmatprep.subr.bf16.mxu1 %v5094_v62  ;;  %v449_v61 = vshrl.u32 %v448_v59, 7 }
 0x11d   :  { %3536 = vmatprep.subr.bf16.mxu0 %v5094_v62  ;;  %3029 = vmatprep.mubr.bf16.mxu1 %v5095_v63 }
 0x11e   :  { %3481 = vmatprep.mubr.bf16.mxu0 %v5097_v0 }
 0x11f   :  { %4222 = vmatpush1.bf16.msra.mxu1 %v5092_v1 }
 0x120   :  { %3537 = vmatpush1.bf16.msra.mxu0 %v5092_v1  ;;  %4207 = vmatprep.subr.bf16.mxu1 %v5103_v2  ;;  %v450_v1 = vsub.s32 0, %v449_v61 }
 0x121   :  { %3538 = vmatprep.subr.bf16.mxu0 %v5103_v2 }
 0x122   :  { %3030 = vmatmul.mubr.bf16.gmra.mrb[16].mxu1 %v5099_v3  ;;  %v446_v3 = vld [vmem:[%s6743_s2] sm:$0x3] }
 0x123   :  { %3482 = vmatmul.mubr.bf16.gmra.mrb[16].mxu0 %v5100_v4  ;;  %4223 = vmatpush1.bf16.msra.mxu1 %v5101_v5  ;;  %v454_v4 = vsub.s32 1, %v449_v61 }
 0x124   :  { %3539 = vmatpush1.bf16.msra.mxu0 %v5101_v5  ;;  %4208 = vmatprep.subr.bf16.mxu1 %v5106_v6  ;;  %v6518_v5 = vrot.slane %v446_v3, %v450_v1 }
 0x125   :  { %3540 = vmatprep.subr.bf16.mxu0 %v5106_v6  ;;  %3039 = vmatprep.mubr.bf16.mxu1 %v5107_v7  ;;  %v6520_v6 = vrot.slane %v446_v3, %v454_v4 }
 0x126   :  { %3491 = vmatprep.mubr.bf16.mxu0 %v5109_v8 }
 0x127   :  { %4224 = vmatpush1.bf16.msra.mxu1 %v5104_v9 }
 0x128   :  { %3541 = vmatpush1.bf16.msra.mxu0 %v5104_v9  ;;  %4209 = vmatprep.subr.bf16.mxu1 %v5115_v10 }
 0x129   :  { %3542 = vmatprep.subr.bf16.mxu0 %v5115_v10 }
 0x12a   :  { %3040 = vmatmul.mubr.bf16.gmra.mrb[20].mxu1 %v5111_v11 }
 0x12b   :  { %3492 = vmatmul.mubr.bf16.gmra.mrb[20].mxu0 %v5112_v12  ;;  %4225 = vmatpush1.bf16.msra.mxu1 %v5113_v13 }
 0x12c   :  { %3543 = vmatpush1.bf16.msra.mxu0 %v5113_v13  ;;  %4210 = vmatprep.subr.bf16.mxu1 %v5118_v14 }
 0x12d   :  { %3544 = vmatprep.subr.bf16.mxu0 %v5118_v14  ;;  %3049 = vmatprep.mubr.bf16.mxu1 %v5119_v15 }
 0x12e   :  { %3501 = vmatprep.mubr.bf16.mxu0 %v5121_v16 }
 0x12f   :  { %4226 = vmatpush1.bf16.msra.mxu1 %v5116_v17 }
 0x130   :  { %3545 = vmatpush1.bf16.msra.mxu0 %v5116_v17  ;;  %4211 = vmatprep.subr.bf16.mxu1 %v5127_v18 }
 0x131   :  { %3546 = vmatprep.subr.bf16.mxu0 %v5127_v18 }
 0x132   :  { %3050 = vmatmul.mubr.bf16.gmra.mrb[24].mxu1 %v5123_v19 }
 0x133   :  { %3502 = vmatmul.mubr.bf16.gmra.mrb[24].mxu0 %v5124_v20  ;;  %4227 = vmatpush1.bf16.msra.mxu1 %v5125_v21 }
 0x134   :  { %3547 = vmatpush1.bf16.msra.mxu0 %v5125_v21  ;;  %4212 = vmatprep.subr.bf16.mxu1 %v5130_v22 }
 0x135   :  { %3548 = vmatprep.subr.bf16.mxu0 %v5130_v22  ;;  %3059 = vmatprep.mubr.bf16.mxu1 %v5131_v23 }
 0x136   :  { %3511 = vmatprep.mubr.bf16.mxu0 %v5133_v24 }
 0x137   :  { %4228 = vmatpush1.bf16.msra.mxu1 %v5128_v25 }
 0x138   :  { %3549 = vmatpush1.bf16.msra.mxu0 %v5128_v25  ;;  %4213 = vmatprep.subr.bf16.mxu1 %v5139_v26 }
 0x139   :  { %3550 = vmatprep.subr.bf16.mxu0 %v5139_v26 }
 0x13a   :  { %3060 = vmatmul.mubr.bf16.gmra.mrb[28].mxu1 %v5135_v27 }
 0x13b   :  { %3512 = vmatmul.mubr.bf16.gmra.mrb[28].mxu0 %v5136_v28  ;;  %4229 = vmatpush1.bf16.msra.mxu1 %v5137_v29 }
 0x13c   :  { %3551 = vmatpush1.bf16.msra.mxu0 %v5137_v29  ;;  %4214 = vmatprep.subr.bf16.mxu1 %v5142_v30 }
 0x13d   :  { %3552 = vmatprep.subr.bf16.mxu0 %v5142_v30  ;;  %3554 = vmatprep.mubr.bf16.mxu0 %v5145_v31 }
 0x13e   :  { %3594 = vmatprep.mubr.bf16.mxu1 %v5148_v32 }
 0x13f   :  { %4230 = vmatpush1.bf16.msra.mxu1 %v5140_v33 }
 0x140   :  { %3553 = vmatpush1.bf16.msra.mxu0 %v5140_v33 }
 0x142   :  { %3595 = vmatmul.mubr.bf16.vlgmr.msra.gmra.mrb[32].mxu1 %v5146_v35 }
 0x143   :  { %3555 = vmatmul.mubr.bf16.vlgmr.msra.gmra.mrb[0].mxu0 %v5143_v34  ;;  %3604 = vmatprep.mubr.bf16.mxu1 %v5151_v37 }
 0x144   :  { %3564 = vmatprep.mubr.bf16.mxu0 %v5149_v36 }
 0x14a   :  { %3605 = vmatmul.mubr.bf16.gmra.mrb[36].mxu1 %v5154_v39 }
 0x14b   :  { %3565 = vmatmul.mubr.bf16.gmra.mrb[4].mxu0 %v5153_v38  ;;  %3614 = vmatprep.mubr.bf16.mxu1 %v5157_v41 }
 0x14c   :  { %3574 = vmatprep.mubr.bf16.mxu0 %v5155_v40 }
 0x152   :  { %3615 = vmatmul.mubr.bf16.gmra.mrb[40].mxu1 %v5160_v43 }
 0x153   :  { %3575 = vmatmul.mubr.bf16.gmra.mrb[8].mxu0 %v5159_v42  ;;  %3624 = vmatprep.mubr.bf16.mxu1 %v5163_v45 }
 0x154   :  { %3584 = vmatprep.mubr.bf16.mxu0 %v5161_v44 }
 0x15a   :  { %3625 = vmatmul.mubr.bf16.gmra.mrb[44].mxu1 %v5166_v47 }
 0x15b   :  { %3585 = vmatmul.mubr.bf16.gmra.mrb[12].mxu0 %v5165_v46 }
 0x1d5   :  { %v6483_v48 = vpop.f32.mrb[0].mxu1 }
 0x1d6   :  { %v6485_v49 = vpop.f32.mrb[1].mxu1 }
 0x1d7   :  { %v6487_v50 = vpop.f32.mrb[2].mxu1 }
 0x1d8   :  { %v6489_v51 = vpop.f32.mrb[3].mxu1 }
 0x1dd   :  { %v6491_v52 = vpop.f32.mrb[4].mxu1 }
 0x1de   :  { %v6493_v53 = vpop.f32.mrb[5].mxu1 }
 0x1df   :  { %v6495_v54 = vpop.f32.mrb[6].mxu1 }
 0x1e0   :  { %v6497_v55 = vpop.f32.mrb[7].mxu1 }
 0x1e5   :  { %v6499_v56 = vpop.f32.mrb[8].mxu1 }
 0x1e6   :  { %v6501_v57 = vpop.f32.mrb[9].mxu1 }
 0x1e7   :  { %v6503_v58 = vpop.f32.mrb[10].mxu1 }
 0x1e8   :  { %v6505_v60 = vpop.f32.mrb[11].mxu1 }
 0x1ed   :  { %v6507_v62 = vpop.f32.mrb[12].mxu1 }
 0x1ee   :  { %v6509_v63 = vpop.f32.mrb[13].mxu1 }
 0x1ef   :  { %v6511_v0 = vpop.f32.mrb[14].mxu1 }
 0x1f0   :  { %v6513_v2 = vpop.f32.mrb[15].mxu1 }
 0x1f5   :  { %v3031_v7 = vpop.f32.mrb[16].mxu1 }
 0x1f6   :  { %v3483_v8 = vpop.f32.mrb[16].mxu0  ;;  %v4263_v9 = vadd.f32 %v3031_v7, %v6518_v5  ;;  %v3033_v10 = vpop.f32.mrb[17].mxu1 }
 0x1f7   :  { %v3485_v11 = vpop.f32.mrb[17].mxu0  ;;  %v4266_v12 = vadd.f32 %v3033_v10, %v6520_v6  ;;  %v3035_v13 = vpop.f32.mrb[18].mxu1 }
 0x1f8   :  { %v3487_v14 = vpop.f32.mrb[18].mxu0  ;;  %v6524_v15 = vadd.f32 %v4263_v9, %v3483_v8  ;;  %v4269_v16 = vadd.f32 %v3035_v13, %v6518_v5  ;;  %v3037_v17 = vpop.f32.mrb[19].mxu1 }
 0x1f9   :  { %v3489_v18 = vpop.f32.mrb[19].mxu0  ;;  %v6527_v19 = vadd.f32 %v4266_v12, %v3485_v11  ;;  %v4272_v20 = vadd.f32 %v3037_v17, %v6520_v6 }
 0x1fa   :  { %v6530_v21 = vadd.f32 %v4269_v16, %v3487_v14 }
 0x1fb   :  { %v6532_v22 = vadd.f32 %v4272_v20, %v3489_v18 }
 0x1fd   :  { %v3041_v23 = vpop.f32.mrb[20].mxu1 }
 0x1fe   :  { %v3493_v24 = vpop.f32.mrb[20].mxu0  ;;  %v4275_v25 = vadd.f32 %v3041_v23, %v6518_v5  ;;  %v3043_v26 = vpop.f32.mrb[21].mxu1 }
 0x1ff   :  { %v3495_v27 = vpop.f32.mrb[21].mxu0  ;;  %v4278_v28 = vadd.f32 %v3043_v26, %v6520_v6  ;;  %v3045_v29 = vpop.f32.mrb[22].mxu1 }
 0x200   :  { %v3497_v30 = vpop.f32.mrb[22].mxu0  ;;  %v6536_v31 = vadd.f32 %v4275_v25, %v3493_v24  ;;  %v4281_v32 = vadd.f32 %v3045_v29, %v6518_v5  ;;  %v3047_v33 = vpop.f32.mrb[23].mxu1  ;;  %v4231_v29 = vadd.f32 %v6483_v48, %v6518_v5 }
 0x201   :  { %v3499_v34 = vpop.f32.mrb[23].mxu0  ;;  %v6539_v35 = vadd.f32 %v4278_v28, %v3495_v27  ;;  %v4284_v36 = vadd.f32 %v3047_v33, %v6520_v6  ;;  %v4237_v33 = vadd.f32 %v6489_v51, %v6520_v6 }
 0x202   :  { %v6542_v37 = vadd.f32 %v4281_v32, %v3497_v30  ;;  %v4233_v30 = vadd.f32 %v6485_v49, %v6520_v6  ;;  %v4235_v32 = vadd.f32 %v6487_v50, %v6518_v5  ;;  %v6585_v49 = vadd.f32 %v6495_v54, %v6518_v5 }
 0x203   :  { %v6544_v38 = vadd.f32 %v4284_v36, %v3499_v34  ;;  %v6589_v50 = vadd.f32 %v6497_v55, %v6520_v6 }
 0x205   :  { %v3051_v39 = vpop.f32.mrb[24].mxu1 }
 0x206   :  { %v3503_v40 = vpop.f32.mrb[24].mxu0  ;;  %v4287_v41 = vadd.f32 %v3051_v39, %v6518_v5  ;;  %v3053_v42 = vpop.f32.mrb[25].mxu1  ;;  %v4239_v39 = vadd.f32 %v6491_v52, %v6518_v5 }
 0x207   :  { %v3505_v43 = vpop.f32.mrb[25].mxu0  ;;  %v4290_v44 = vadd.f32 %v3053_v42, %v6520_v6  ;;  %v3055_v45 = vpop.f32.mrb[26].mxu1 }
 0x208   :  { %v3507_v46 = vpop.f32.mrb[26].mxu0  ;;  %v6548_v47 = vadd.f32 %v4287_v41, %v3503_v40  ;;  %v4293_v59 = vadd.f32 %v3055_v45, %v6518_v5  ;;  %v3057_v61 = vpop.f32.mrb[27].mxu1  ;;  %v4241_v40 = vadd.f32 %v6493_v53, %v6520_v6 }
 0x209   :  { %v3509_v1 = vpop.f32.mrb[27].mxu0  ;;  %v6551_v3 = vadd.f32 %v4290_v44, %v3505_v43  ;;  %v4296_v4 = vadd.f32 %v3057_v61, %v6520_v6 }
 0x20a   :  { %v6554_v7 = vadd.f32 %v4293_v59, %v3507_v46 }
 0x20b   :  { %v6556_v8 = vadd.f32 %v4296_v4, %v3509_v1 }
 0x20d   :  { %v3061_v9 = vpop.f32.mrb[28].mxu1 }
 0x20e   :  { %v3513_v10 = vpop.f32.mrb[28].mxu0  ;;  %v4299_v11 = vadd.f32 %v3061_v9, %v6518_v5  ;;  %v3063_v12 = vpop.f32.mrb[29].mxu1 }
 0x20f   :  { %v3515_v13 = vpop.f32.mrb[29].mxu0  ;;  %v4302_v14 = vadd.f32 %v3063_v12, %v6520_v6  ;;  %v3065_v16 = vpop.f32.mrb[30].mxu1 }
 0x210   :  { %v3517_v17 = vpop.f32.mrb[30].mxu0  ;;  %v6560_v18 = vadd.f32 %v4299_v11, %v3513_v10  ;;  %v4305_v20 = vadd.f32 %v3065_v16, %v6518_v5  ;;  %v3067_v23 = vpop.f32.mrb[31].mxu1 }
 0x211   :  { %v3519_v24 = vpop.f32.mrb[31].mxu0  ;;  %v6563_v25 = vadd.f32 %v4302_v14, %v3515_v13  ;;  %v4308_v26 = vadd.f32 %v3067_v23, %v6520_v6 }
 0x212   :  { %v6566_v27 = vadd.f32 %v4305_v20, %v3517_v17  ;;  %v6608_v17 = vadd.f32 %v6499_v56, %v6518_v5 }
 0x213   :  { %v6568_v28 = vadd.f32 %v4308_v26, %v3519_v24 }
 0x215   :  { %v3596_v36 = vpop.f32.mrb[32].mxu1 }
 0x216   :  { %v3556_v34 = vpop.f32.mrb[0].mxu0  ;;  %v4265_v48 = vadd.f32 %v6524_v15, %v3596_v36  ;;  %v3598_v43 = vpop.f32.mrb[33].mxu1  ;;  %v6627_v36 = vadd.f32 %v6505_v60, %v6520_v6 }
 0x217   :  { %v4232_v41 = vadd.f32 %v4231_v29, %v3556_v34  ;;  %v3558_v42 = vpop.f32.mrb[1].mxu0  ;;  %v4268_v44 = vadd.f32 %v6527_v19, %v3598_v43  ;;  %v3600_v45 = vpop.f32.mrb[34].mxu1  ;;  %v6623_v34 = vadd.f32 %v6503_v58, %v6518_v5 }
 0x218   :  { %v4234_v51 = vadd.f32 %v4233_v30, %v3558_v42  ;;  %v3560_v52 = vpop.f32.mrb[2].mxu0  ;;  %vm3651_vm1 = vcmp.ge.f32.partialorder %v4265_v48, 0.0  ;;  %v3683_v46 = vmul.f32 0.2, %v4265_v48  ;;  %v4271_v4 = vadd.f32 %v6530_v21, %v3600_v45  ;;  %v3602_v9 = vpop.f32.mrb[35].mxu1 }
 0x219   :  { %vm3635_vm0 = vcmp.ge.f32.partialorder %v4232_v41, 0.0  ;;  %v3667_v53 = vmul.f32 0.2, %v4232_v41  ;;  %vm3652_vm3 = vcmp.ge.f32.partialorder %v4268_v44, 0.0  ;;  %v3684_v59 = vmul.f32 0.2, %v4268_v44 }
 0x21a   :  { %vm3636_vm2 = vcmp.ge.f32.partialorder %v4234_v51, 0.0  ;;  %v3668_v15 = vmul.f32 0.2, %v4234_v51  ;;  %v3715_v54 = vsel %vm3651_vm1, %v4265_v48, %v3683_v46  ;;  %v4236_v1 = vadd.f32 %v4235_v32, %v3560_v52  ;;  %v3562_v55 = vpop.f32.mrb[3].mxu0 }
 0x21b   :  { %v3699_v61 = vsel %vm3635_vm0, %v4232_v41, %v3667_v53  ;;  %3747 = vst [vmem:[%s6744_s3 + $0x80] sm:$0xff] %v3715_v54  ;;  %v3716_v10 = vsel %vm3652_vm3, %v4268_v44, %v3684_v59  ;;  %v4238_v11 = vadd.f32 %v4237_v33, %v3562_v55  ;;  %v4274_v12 = vadd.f32 %v6532_v22, %v3602_v9 }
 0x21c   :  { %3731 = vst [vmem:[%s6744_s3] sm:$0xff] %v3699_v61  ;;  %v3700_v19 = vsel %vm3636_vm2, %v4234_v51, %v3668_v15  ;;  %3748 = vst [vmem:[%s6744_s3 + $0x88] sm:$0xff] %v3716_v10  ;;  %vm3637_vm4 = vcmp.ge.f32.partialorder %v4236_v1, 0.0  ;;  %v3669_v21 = vmul.f32 0.2, %v4236_v1  ;;  %vm3653_vm5 = vcmp.ge.f32.partialorder %v4271_v4, 0.0 }
 0x21d   :  { %3732 = vst [vmem:[%s6744_s3 + $0x8] sm:$0xff] %v3700_v19  ;;  %v3685_v13 = vmul.f32 0.2, %v4271_v4  ;;  %vm3638_vm6 = vcmp.ge.f32.partialorder %v4238_v11, 0.0  ;;  %v3670_v14 = vmul.f32 0.2, %v4238_v11  ;;  %v6612_v22 = vadd.f32 %v6501_v57, %v6520_v6 }
 0x21e   :  { %vm3654_vm7 = vcmp.ge.f32.partialorder %v4274_v12, 0.0  ;;  %v3686_v16 = vmul.f32 0.2, %v4274_v12  ;;  %v3701_v20 = vsel %vm3637_vm4, %v4236_v1, %v3669_v21  ;;  %v3566_v24 = vpop.f32.mrb[4].mxu0  ;;  %v3606_v26 = vpop.f32.mrb[36].mxu1  ;;  %v6668_v21 = vadd.f32 %v6511_v0, %v6518_v5 }
 0x21f   :  { %v3717_v23 = vsel %vm3653_vm5, %v4271_v4, %v3685_v13  ;;  %3733 = vst [vmem:[%s6744_s3 + $0x10] sm:$0xff] %v3701_v20  ;;  %v3702_v29 = vsel %vm3638_vm6, %v4238_v11, %v3670_v14  ;;  %v4240_v56 = vadd.f32 %v4239_v39, %v3566_v24  ;;  %v4277_v32 = vadd.f32 %v6536_v31, %v3606_v26  ;;  %v3568_v33 = vpop.f32.mrb[5].mxu0  ;;  %v3608_v57 = vpop.f32.mrb[37].mxu1 }
 0x220   :  { %3749 = vst [vmem:[%s6744_s3 + $0x90] sm:$0xff] %v3717_v23  ;;  %v3718_v30 = vsel %vm3654_vm7, %v4274_v12, %v3686_v16  ;;  %3734 = vst [vmem:[%s6744_s3 + $0x18] sm:$0xff] %v3702_v29  ;;  %v4242_v39 = vadd.f32 %v4241_v40, %v3568_v33  ;;  %v4280_v31 = vadd.f32 %v6539_v35, %v3608_v57  ;;  %v3570_v41 = vpop.f32.mrb[6].mxu0  ;;  %v3610_v48 = vpop.f32.mrb[38].mxu1 }
 0x221   :  { %3750 = vst [vmem:[%s6744_s3 + $0x98] sm:$0xff] %v3718_v30  ;;  %vm3639_vm8 = vcmp.ge.f32.partialorder %v4240_v56, 0.0  ;;  %v3671_v58 = vmul.f32 0.2, %v4240_v56  ;;  %vm3655_vm9 = vcmp.ge.f32.partialorder %v4277_v32, 0.0  ;;  %v4244_v52 = vadd.f32 %v6585_v49, %v3570_v41  ;;  %v3572_v53 = vpop.f32.mrb[7].mxu0 }
 0x222   :  { %v3687_v42 = vmul.f32 0.2, %v4277_v32  ;;  %vm3640_vm10 = vcmp.ge.f32.partialorder %v4242_v39, 0.0  ;;  %v3672_v60 = vmul.f32 0.2, %v4242_v39  ;;  %vm3656_vm11 = vcmp.ge.f32.partialorder %v4280_v31, 0.0 }
 0x223   :  { %v3688_v43 = vmul.f32 0.2, %v4280_v31  ;;  %v3703_v51 = vsel %vm3639_vm8, %v4240_v56, %v3671_v58  ;;  %v4283_v45 = vadd.f32 %v6542_v37, %v3610_v48  ;;  %v3612_v40 = vpop.f32.mrb[39].mxu1  ;;  %v4246_v15 = vadd.f32 %v6589_v50, %v3572_v53 }
 0x224   :  { %v3719_v44 = vsel %vm3655_vm9, %v4277_v32, %v3687_v42  ;;  %3735 = vst [vmem:[%s6744_s3 + $0x20] sm:$0xff] %v3703_v51  ;;  %v3704_v35 = vsel %vm3640_vm10, %v4242_v39, %v3672_v60  ;;  %v4286_v59 = vadd.f32 %v6544_v38, %v3612_v40  ;;  %vm3641_vm12 = vcmp.ge.f32.partialorder %v4244_v52, 0.0 }
 0x225   :  { %3751 = vst [vmem:[%s6744_s3 + $0xa0] sm:$0xff] %v3719_v44  ;;  %v3720_v46 = vsel %vm3656_vm11, %v4280_v31, %v3688_v43  ;;  %3736 = vst [vmem:[%s6744_s3 + $0x28] sm:$0xff] %v3704_v35  ;;  %v3673_v37 = vmul.f32 0.2, %v4244_v52  ;;  %vm3657_vm13 = vcmp.ge.f32.partialorder %v4283_v45, 0.0  ;;  %vm3642_vm14 = vcmp.ge.f32.partialorder %v4246_v15, 0.0 }
 0x226   :  { %3752 = vst [vmem:[%s6744_s3 + $0xa8] sm:$0xff] %v3720_v46  ;;  %v3689_v49 = vmul.f32 0.2, %v4283_v45  ;;  %v3674_v61 = vmul.f32 0.2, %v4246_v15  ;;  %vm3658_vm15 = vcmp.ge.f32.partialorder %v4286_v59, 0.0  ;;  %v4255_v50 = vadd.f32 %v6507_v62, %v6518_v5 }
 0x227   :  { %v3690_v54 = vmul.f32 0.2, %v4286_v59  ;;  %v6656_v38 = vadd.f32 %v6509_v63, %v6520_v6  ;;  %v3705_v1 = vsel %vm3641_vm12, %v4244_v52, %v3673_v37  ;;  %v3576_v55 = vpop.f32.mrb[8].mxu0  ;;  %v3616_v9 = vpop.f32.mrb[40].mxu1  ;;  %v6672_v13 = vadd.f32 %v6513_v2, %v6520_v6 }
 0x228   :  { %v3721_v4 = vsel %vm3657_vm13, %v4283_v45, %v3689_v49  ;;  %3737 = vst [vmem:[%s6744_s3 + $0x30] sm:$0xff] %v3705_v1  ;;  %v3706_v19 = vsel %vm3642_vm14, %v4246_v15, %v3674_v61  ;;  %v4248_v62 = vadd.f32 %v6608_v17, %v3576_v55  ;;  %v4289_v11 = vadd.f32 %v6548_v47, %v3616_v9  ;;  %v3578_v63 = vpop.f32.mrb[9].mxu0  ;;  %v3618_v12 = vpop.f32.mrb[41].mxu1 }
 0x229   :  { %3753 = vst [vmem:[%s6744_s3 + $0xb0] sm:$0xff] %v3721_v4  ;;  %v3722_v10 = vsel %vm3658_vm15, %v4286_v59, %v3690_v54  ;;  %3738 = vst [vmem:[%s6744_s3 + $0x38] sm:$0xff] %v3706_v19  ;;  %v4250_v47 = vadd.f32 %v6612_v22, %v3578_v63  ;;  %v4292_v14 = vadd.f32 %v6551_v3, %v3618_v12  ;;  %v3580_v16 = vpop.f32.mrb[10].mxu0  ;;  %v3620_v17 = vpop.f32.mrb[42].mxu1 }
 0x22a   :  { %3754 = vst [vmem:[%s6744_s3 + $0xb8] sm:$0xff] %v3722_v10  ;;  %vm3643_vm0 = vcmp.ge.f32.partialorder %v4248_v62, 0.0  ;;  %v3675_v0 = vmul.f32 0.2, %v4248_v62  ;;  %vm3659_vm1 = vcmp.ge.f32.partialorder %v4289_v11, 0.0  ;;  %v4252_v24 = vadd.f32 %v6623_v34, %v3580_v16  ;;  %v3582_v29 = vpop.f32.mrb[11].mxu0 }
 0x22b   :  { %v3691_v5 = vmul.f32 0.2, %v4289_v11  ;;  %vm3644_vm2 = vcmp.ge.f32.partialorder %v4250_v47, 0.0  ;;  %v3676_v2 = vmul.f32 0.2, %v4250_v47  ;;  %vm3660_vm3 = vcmp.ge.f32.partialorder %v4292_v14, 0.0 }
 0x22c   :  { %v3692_v6 = vmul.f32 0.2, %v4292_v14  ;;  %v3707_v20 = vsel %vm3643_vm0, %v4248_v62, %v3675_v0  ;;  %v4295_v26 = vadd.f32 %v6554_v7, %v3620_v17  ;;  %v3622_v22 = vpop.f32.mrb[43].mxu1  ;;  %v4254_v56 = vadd.f32 %v6627_v36, %v3582_v29 }
 0x22d   :  { %v3723_v23 = vsel %vm3659_vm1, %v4289_v11, %v3691_v5  ;;  %3739 = vst [vmem:[%s6744_s3 + $0x40] sm:$0xff] %v3707_v20  ;;  %v3708_v3 = vsel %vm3644_vm2, %v4250_v47, %v3676_v2  ;;  %v4298_v32 = vadd.f32 %v6556_v8, %v3622_v22  ;;  %v3626_v57 = vpop.f32.mrb[44].mxu1  ;;  %vm3645_vm4 = vcmp.ge.f32.partialorder %v4252_v24, 0.0 }
 0x22e   :  { %3755 = vst [vmem:[%s6744_s3 + $0xc0] sm:$0xff] %v3723_v23  ;;  %v3724_v30 = vsel %vm3660_vm3, %v4292_v14, %v3692_v6  ;;  %v3586_v33 = vpop.f32.mrb[12].mxu0  ;;  %3740 = vst [vmem:[%s6744_s3 + $0x48] sm:$0xff] %v3708_v3  ;;  %v3677_v7 = vmul.f32 0.2, %v4252_v24  ;;  %vm3661_vm5 = vcmp.ge.f32.partialorder %v4295_v26, 0.0  ;;  %v4301_v48 = vadd.f32 %v6560_v18, %v3626_v57 }
 0x22f   :  { %3756 = vst [vmem:[%s6744_s3 + $0xc8] sm:$0xff] %v3724_v30  ;;  %v3693_v34 = vmul.f32 0.2, %v4295_v26  ;;  %vm3646_vm6 = vcmp.ge.f32.partialorder %v4254_v56, 0.0  ;;  %v3678_v39 = vmul.f32 0.2, %v4254_v56  ;;  %v4256_v41 = vadd.f32 %v4255_v50, %v3586_v33 }
 0x230   :  { %vm3662_vm7 = vcmp.ge.f32.partialorder %v4298_v32, 0.0  ;;  %v3694_v36 = vmul.f32 0.2, %v4298_v32  ;;  %v3709_v31 = vsel %vm3645_vm4, %v4252_v24, %v3677_v7  ;;  %v3588_v58 = vpop.f32.mrb[13].mxu0  ;;  %v3628_v42 = vpop.f32.mrb[45].mxu1  ;;  %vm3663_vm9 = vcmp.ge.f32.partialorder %v4301_v48, 0.0 }
 0x231   :  { %v3725_v8 = vsel %vm3661_vm5, %v4295_v26, %v3693_v34  ;;  %3741 = vst [vmem:[%s6744_s3 + $0x50] sm:$0xff] %v3709_v31  ;;  %v3710_v60 = vsel %vm3646_vm6, %v4254_v56, %v3678_v39  ;;  %v4258_v51 = vadd.f32 %v6656_v38, %v3588_v58  ;;  %v4304_v44 = vadd.f32 %v6563_v25, %v3628_v42  ;;  %v3590_v52 = vpop.f32.mrb[14].mxu0  ;;  %v3630_v45 = vpop.f32.mrb[46].mxu1 }
 0x232   :  { %3757 = vst [vmem:[%s6744_s3 + $0xd0] sm:$0xff] %v3725_v8  ;;  %v3726_v43 = vsel %vm3662_vm7, %v4298_v32, %v3694_v36  ;;  %3742 = vst [vmem:[%s6744_s3 + $0x58] sm:$0xff] %v3710_v60  ;;  %vm3647_vm8 = vcmp.ge.f32.partialorder %v4256_v41, 0.0  ;;  %v3679_v18 = vmul.f32 0.2, %v4256_v41  ;;  %v4260_v15 = vadd.f32 %v6668_v21, %v3590_v52  ;;  %v3592_v37 = vpop.f32.mrb[15].mxu0 }
 0x233   :  { %3758 = vst [vmem:[%s6744_s3 + $0xd8] sm:$0xff] %v3726_v43  ;;  %v3695_v53 = vmul.f32 0.2, %v4301_v48  ;;  %vm3648_vm10 = vcmp.ge.f32.partialorder %v4258_v51, 0.0  ;;  %v3680_v40 = vmul.f32 0.2, %v4258_v51  ;;  %v4307_v59 = vadd.f32 %v6566_v27, %v3630_v45 }
 0x234   :  { %vm3664_vm11 = vcmp.ge.f32.partialorder %v4304_v44, 0.0  ;;  %v3696_v35 = vmul.f32 0.2, %v4304_v44  ;;  %v3711_v46 = vsel %vm3647_vm8, %v4256_v41, %v3679_v18  ;;  %v3632_v49 = vpop.f32.mrb[47].mxu1  ;;  %v4262_v50 = vadd.f32 %v6672_v13, %v3592_v37 }
 0x235   :  { %v3727_v25 = vsel %vm3663_vm9, %v4301_v48, %v3695_v53  ;;  %3743 = vst [vmem:[%s6744_s3 + $0x60] sm:$0xff] %v3711_v46  ;;  %v3712_v61 = vsel %vm3648_vm10, %v4258_v51, %v3680_v40  ;;  %v4310_v38 = vadd.f32 %v6568_v28, %v3632_v49  ;;  %vm3649_vm12 = vcmp.ge.f32.partialorder %v4260_v15, 0.0 }
 0x236   :  { %3759 = vst [vmem:[%s6744_s3 + $0xe0] sm:$0xff] %v3727_v25  ;;  %v3728_v54 = vsel %vm3664_vm11, %v4304_v44, %v3696_v35  ;;  %3744 = vst [vmem:[%s6744_s3 + $0x68] sm:$0xff] %v3712_v61  ;;  %v3681_v27 = vmul.f32 0.2, %v4260_v15  ;;  %vm3665_vm13 = vcmp.ge.f32.partialorder %v4307_v59, 0.0  ;;  %vm3650_vm14 = vcmp.ge.f32.partialorder %v4262_v50, 0.0 }
 0x237   :  { %3760 = vst [vmem:[%s6744_s3 + $0xe8] sm:$0xff] %v3728_v54  ;;  %v3697_v1 = vmul.f32 0.2, %v4307_v59  ;;  %v3682_v4 = vmul.f32 0.2, %v4262_v50  ;;  %vm3666_vm15 = vcmp.ge.f32.partialorder %v4310_v38, 0.0 }
 0x238   :  { %v3698_v55 = vmul.f32 0.2, %v4310_v38  ;;  %v3713_v9 = vsel %vm3649_vm12, %v4260_v15, %v3681_v27 }
 0x239   :  { %v3729_v19 = vsel %vm3665_vm13, %v4307_v59, %v3697_v1  ;;  %3745 = vst [vmem:[%s6744_s3 + $0x70] sm:$0xff] %v3713_v9  ;;  %v3714_v28 = vsel %vm3650_vm14, %v4262_v50, %v3682_v4 }
 0x23a   :  { %3761 = vst [vmem:[%s6744_s3 + $0xf0] sm:$0xff] %v3729_v19  ;;  %v3730_v10 = vsel %vm3666_vm15, %v4310_v38, %v3698_v55  ;;  %3746 = vst [vmem:[%s6744_s3 + $0x78] sm:$0xff] %v3714_v28 }
 0x23b   :  { %3762 = vst [vmem:[%s6744_s3 + $0xf8] sm:$0xff] %v3730_v10 }

// kernel: _lambda_.7
= control target key start
LH: loop header
LB: loop body
LE: loop exit
PB: predicated region body
PF: predicated region fallthrough
CT: control target
= control target key end

     0   :  { %s6832_s12 = smov 0   ;;  %s8205_s0 = inlined_call_operand.vmem [shape: bf16[400,2304], index: 0, kind: input, shape index: {}]   ;;  %s8206_s1 = inlined_call_operand.vmem [shape: bf16[2304,256], index: 1, kind: input, shape index: {}]   ;;  %s8207_s2 = inlined_call_operand.vmem [shape: f32[1,256], index: 2, kind: input, shape index: {}]   ;;  %s8208_s3 = inlined_call_operand.vmem [shape: f32[400,256], index: 3, kind: output, shape index: {}]  }
   0x1 LB: > { %s4894_s13 = sadd.s32 4294967295, %s6810_s12   ;;  %p4898_p0 = scmp.ge.s32.totalorder %s6810_s12, 1  ;;  %s6810_s12 = sphi %s6832_s12, %s13_s12  }
   0x2   : > { %p139_p1 = scmp.lt.s32.totalorder %s6810_s12, 3 }
   0x4   : > { %p140_p2 = pnand %p4898_p0, %p139_p1 }
   0x6   : > { %143 = sbr.rel (%p140_p2) target bundleno = 772 (0x304), region = 32 }
   0xd   : > { %v5930_v0 = vld [vmem:[%s8206_s1 + $0x4] ss:$8 sps:$4 sm:$0xff]   ;;  %v5934_v2 = vld [vmem:[%s8206_s1] ss:$8 sps:$4 sm:$0xff]   ;;  %v5936_v4 = vld [vmem:[%s8206_s1 + $0x14] ss:$8 sps:$4 sm:$0xff]  }
   0xe   : > { %v5932_v1 = vld [vmem:[%s8206_s1 + $0x404] ss:$8 sps:$4 sm:$0xff]   ;;  %3287 = vmatprep.subr.bf16.mxu1 %v5930_v0  ;;  %v5935_v3 = vld [vmem:[%s8206_s1 + $0x400] ss:$8 sps:$4 sm:$0xff]   ;;  %v5938_v5 = vld [vmem:[%s8206_s1 + $0x414] ss:$8 sps:$4 sm:$0xff]  }
   0xf   : > { %3931 = vmatprep.subr.bf16.mxu0 %v5932_v1  ;;  %3288 = vmatpush1.bf16.msra.mxu1 %v5934_v2  ;;  %v5940_v6 = vld [vmem:[%s8206_s1 + $0x10] ss:$8 sps:$4 sm:$0xff]   ;;  %v5942_v8 = vld [vmem:[%s8206_s1 + $0x24] ss:$8 sps:$4 sm:$0xff]   ;;  %v5946_v10 = vld [vmem:[%s8206_s1 + $0x20] ss:$8 sps:$4 sm:$0xff]  }
  0x10   : > { %3932 = vmatpush1.bf16.msra.mxu0 %v5935_v3  ;;  %3289 = vmatprep.subr.bf16.mxu1 %v5936_v4  ;;  %v5941_v7 = vld [vmem:[%s8206_s1 + $0x410] ss:$8 sps:$4 sm:$0xff]   ;;  %v5944_v9 = vld [vmem:[%s8206_s1 + $0x424] ss:$8 sps:$4 sm:$0xff]   ;;  %v5947_v11 = vld [vmem:[%s8206_s1 + $0x420] ss:$8 sps:$4 sm:$0xff]  }
  0x11   : > { %3933 = vmatprep.subr.bf16.mxu0 %v5938_v5  ;;  %v5948_v12 = vld [vmem:[%s8206_s1 + $0x34] ss:$8 sps:$4 sm:$0xff]   ;;  %v5952_v14 = vld [vmem:[%s8206_s1 + $0x30] ss:$8 sps:$4 sm:$0xff]   ;;  %v5954_v16 = vld [vmem:[%s8206_s1 + $0x44] ss:$8 sps:$4 sm:$0xff]  }
  0x12   : > { %v5950_v13 = vld [vmem:[%s8206_s1 + $0x434] ss:$8 sps:$4 sm:$0xff]   ;;  %v5953_v15 = vld [vmem:[%s8206_s1 + $0x430] ss:$8 sps:$4 sm:$0xff]   ;;  %v5956_v17 = vld [vmem:[%s8206_s1 + $0x444] ss:$8 sps:$4 sm:$0xff]  }
  0x13   : > { %3290 = vmatpush1.bf16.msra.mxu1 %v5940_v6  ;;  %v5958_v18 = vld [vmem:[%s8206_s1 + $0x40] ss:$8 sps:$4 sm:$0xff]   ;;  %v5960_v20 = vld [vmem:[%s8206_s1 + $0x54] ss:$8 sps:$4 sm:$0xff]   ;;  %v5964_v22 = vld [vmem:[%s8206_s1 + $0x50] ss:$8 sps:$4 sm:$0xff]  }
  0x14   : > { %3934 = vmatpush1.bf16.msra.mxu0 %v5941_v7  ;;  %3291 = vmatprep.subr.bf16.mxu1 %v5942_v8  ;;  %v5959_v19 = vld [vmem:[%s8206_s1 + $0x440] ss:$8 sps:$4 sm:$0xff]   ;;  %v5962_v21 = vld [vmem:[%s8206_s1 + $0x454] ss:$8 sps:$4 sm:$0xff]   ;;  %v5965_v23 = vld [vmem:[%s8206_s1 + $0x450] ss:$8 sps:$4 sm:$0xff]  }
  0x15   : > { %3935 = vmatprep.subr.bf16.mxu0 %v5944_v9  ;;  %v5966_v24 = vld [vmem:[%s8206_s1 + $0x64] ss:$8 sps:$4 sm:$0xff]   ;;  %v5970_v26 = vld [vmem:[%s8206_s1 + $0x60] ss:$8 sps:$4 sm:$0xff]   ;;  %v5972_v28 = vld [vmem:[%s8206_s1 + $0x74] ss:$8 sps:$4 sm:$0xff]  }
  0x16   : > { %v5968_v25 = vld [vmem:[%s8206_s1 + $0x464] ss:$8 sps:$4 sm:$0xff]   ;;  %v5971_v27 = vld [vmem:[%s8206_s1 + $0x460] ss:$8 sps:$4 sm:$0xff]   ;;  %s165_s22 = smul.u32 25, %s4894_s13 }
  0x17   : > { %3292 = vmatpush1.bf16.msra.mxu1 %v5946_v10  ;;  %v5974_v29 = vld [vmem:[%s8206_s1 + $0x474] ss:$8 sps:$4 sm:$0xff]   ;;  %v5976_v30 = vld [vmem:[%s8206_s1 + $0x70] ss:$8 sps:$4 sm:$0xff]   ;;  %v5978_v32 = vld [vmem:[%s8206_s1 + $0x84] ss:$8 sps:$4 sm:$0xff]  }
  0x18   : > { %3936 = vmatpush1.bf16.msra.mxu0 %v5947_v11  ;;  %3293 = vmatprep.subr.bf16.mxu1 %v5948_v12  ;;  %v5977_v31 = vld [vmem:[%s8206_s1 + $0x470] ss:$8 sps:$4 sm:$0xff]   ;;  %p166_p3 = scmp.lt.s32.totalorder %s165_s22, 49  ;;  %v5980_v33 = vld [vmem:[%s8206_s1 + $0x484] ss:$8 sps:$4 sm:$0xff]  }
  0x19   : > { %3937 = vmatprep.subr.bf16.mxu0 %v5950_v13  ;;  %v5982_v34 = vld [vmem:[%s8206_s1 + $0x80] ss:$8 sps:$4 sm:$0xff]   ;;  %v5984_v36 = vld [vmem:[%s8206_s1 + $0x94] ss:$8 sps:$4 sm:$0xff]   ;;  %v5988_v38 = vld [vmem:[%s8206_s1 + $0x90] ss:$8 sps:$4 sm:$0xff]  }
  0x1a   : > { %v5983_v35 = vld [vmem:[%s8206_s1 + $0x480] ss:$8 sps:$4 sm:$0xff]   ;;  %s8216_s22 = smov (!%p166_p3, %s165_s22), 49  ;;  %v5986_v37 = vld [vmem:[%s8206_s1 + $0x494] ss:$8 sps:$4 sm:$0xff]  }
  0x1b   : > { %3294 = vmatpush1.bf16.msra.mxu1 %v5952_v14  ;;  %v5989_v39 = vld [vmem:[%s8206_s1 + $0x490] ss:$8 sps:$4 sm:$0xff]   ;;  %v5990_v40 = vld [vmem:[%s8206_s1 + $0xa4] ss:$8 sps:$4 sm:$0xff]   ;;  %s5921_s21 = smul.u32 72, %s8216_s22  ;;  %s5426_s15 = sshll.u32 %s8216_s22, 4 }
  0x1c   : > { %3938 = vmatpush1.bf16.msra.mxu0 %v5953_v15  ;;  %3295 = vmatprep.subr.bf16.mxu1 %v5954_v16  ;;  %v5992_v41 = vld [vmem:[%s8206_s1 + $0x4a4] ss:$8 sps:$4 sm:$0xff]   ;;  %v5994_v42 = vld [vmem:[%s8206_s1 + $0xa0] ss:$8 sps:$4 sm:$0xff]   ;;  %v5996_v44 = vld [vmem:[%s8206_s1 + $0xb4] ss:$8 sps:$4 sm:$0xff]   ;;  %s8094_s17 = scalar_lea.vmem %s8208_s3, %s5426_s15 }
  0x1d   : > { %3939 = vmatprep.subr.bf16.mxu0 %v5956_v17  ;;  %v5995_v43 = vld [vmem:[%s8206_s1 + $0x4a0] ss:$8 sps:$4 sm:$0xff]   ;;  %s6983_s5 = scalar_lea.vmem %s8205_s0, %s5921_s21  ;;  %v5998_v45 = vld [vmem:[%s8206_s1 + $0x4b4] ss:$8 sps:$4 sm:$0xff]   ;;  %v6000_v46 = vld [vmem:[%s8206_s1 + $0xb0] ss:$8 sps:$4 sm:$0xff]  }
  0x1e   : > { %v6001_v47 = vld [vmem:[%s8206_s1 + $0x4b0] ss:$8 sps:$4 sm:$0xff]   ;;  %v6002_v48 = vld [vmem:[%s8206_s1 + $0xc4] ss:$8 sps:$4 sm:$0xff]   ;;  %v6006_v52 = vld [vmem:[%s8206_s1 + $0xc0] ss:$8 sps:$4 sm:$0xff]  }
  0x1f   : > { %3296 = vmatpush1.bf16.msra.mxu1 %v5958_v18  ;;  %v6028_v49 = vld [vmem:[%s6983_s5 + $0x4] ss:$72 sps:$4 sm:$0xff]   ;;  %v6007_v53 = vld [vmem:[%s8206_s1 + $0x4c0] ss:$8 sps:$4 sm:$0xff]   ;;  %v6008_v54 = vld [vmem:[%s8206_s1 + $0xd4] ss:$8 sps:$4 sm:$0xff]  }
  0x20   : > { %3940 = vmatpush1.bf16.msra.mxu0 %v5959_v19  ;;  %3297 = vmatprep.subr.bf16.mxu1 %v5960_v20  ;;  %v6004_v50 = vld [vmem:[%s8206_s1 + $0x4c4] ss:$8 sps:$4 sm:$0xff]   ;;  %v6010_v55 = vld [vmem:[%s8206_s1 + $0x4d4] ss:$8 sps:$4 sm:$0xff]   ;;  %v6012_v56 = vld [vmem:[%s8206_s1 + $0xd0] ss:$8 sps:$4 sm:$0xff]  }
  0x21   : > { %3941 = vmatprep.subr.bf16.mxu0 %v5962_v21  ;;  %v6031_v51 = vld [vmem:[%s6983_s5 + $0x24] ss:$72 sps:$4 sm:$0xff]   ;;  %3319 = vmatprep.mubr.bf16.mxu1 %v6028_v49  ;;  %v6013_v57 = vld [vmem:[%s8206_s1 + $0x4d0] ss:$8 sps:$4 sm:$0xff]   ;;  %v6018_v60 = vld [vmem:[%s8206_s1 + $0xe0] ss:$8 sps:$4 sm:$0xff]  }
  0x22   : > { %3963 = vmatprep.mubr.bf16.mxu0 %v6031_v51  ;;  %v6014_v58 = vld [vmem:[%s8206_s1 + $0xe4] ss:$8 sps:$4 sm:$0xff]   ;;  %v6019_v61 = vld [vmem:[%s8206_s1 + $0x4e0] ss:$8 sps:$4 sm:$0xff]   ;;  %v6020_v62 = vld [vmem:[%s8206_s1 + $0xf4] ss:$8 sps:$4 sm:$0xff]  }
  0x23   : > { %3298 = vmatpush1.bf16.msra.mxu1 %v5964_v22  ;;  %v6016_v59 = vld [vmem:[%s8206_s1 + $0x4e4] ss:$8 sps:$4 sm:$0xff]   ;;  %v6022_v63 = vld [vmem:[%s8206_s1 + $0x4f4] ss:$8 sps:$4 sm:$0xff]   ;;  %v6024_v0 = vld [vmem:[%s8206_s1 + $0xf0] ss:$8 sps:$4 sm:$0xff]  }
  0x24   : > { %3942 = vmatpush1.bf16.msra.mxu0 %v5965_v23  ;;  %3299 = vmatprep.subr.bf16.mxu1 %v5966_v24  ;;  %v6025_v1 = vld [vmem:[%s8206_s1 + $0x4f0] ss:$8 sps:$4 sm:$0xff]   ;;  %v6034_v2 = vld [vmem:[%s8206_s1 + $0x504] ss:$8 sps:$4 sm:$0xff]   ;;  %v6026_v4 = vld [vmem:[%s6983_s5] ss:$72 sps:$4 sm:$0xff]  }
  0x25   : > { %3943 = vmatprep.subr.bf16.mxu0 %v5968_v25  ;;  %v6046_v3 = vld [vmem:[%s8206_s1 + $0x104] ss:$8 sps:$4 sm:$0xff]   ;;  %v6029_v5 = vld [vmem:[%s6983_s5 + $0x20] ss:$72 sps:$4 sm:$0xff]   ;;  %v6035_v7 = vld [vmem:[%s6983_s5 + $0x94] ss:$72 sps:$4 sm:$0xff]  }
  0x26   : > { %v6032_v6 = vld [vmem:[%s8206_s1 + $0x500] ss:$8 sps:$4 sm:$0xff]   ;;  %v6037_v8 = vld [vmem:[%s6983_s5 + $0xb4] ss:$72 sps:$4 sm:$0xff]   ;;  %v6039_v12 = vld [vmem:[%s8206_s1 + $0x510] ss:$8 sps:$4 sm:$0xff]  }
  0x27   : > { %3300 = vmatpush1.bf16.msra.mxu1 %v5970_v26  ;;  %v6041_v9 = vld [vmem:[%s8206_s1 + $0x514] ss:$8 sps:$4 sm:$0xff]   ;;  %v6044_v10 = vld [vmem:[%s8206_s1 + $0x100] ss:$8 sps:$4 sm:$0xff]   ;;  %v6042_v13 = vld [vmem:[%s6983_s5 + $0x90] ss:$72 sps:$4 sm:$0xff]  }
  0x28   : > { %3944 = vmatpush1.bf16.msra.mxu0 %v5971_v27  ;;  %3301 = vmatprep.subr.bf16.mxu1 %v5972_v28  ;;  %v6058_v11 = vld [vmem:[%s8206_s1 + $0x114] ss:$8 sps:$4 sm:$0xff]   ;;  %v6049_v14 = vld [vmem:[%s8206_s1 + $0x524] ss:$8 sps:$4 sm:$0xff]   ;;  %v6043_v15 = vld [vmem:[%s6983_s5 + $0xb0] ss:$72 sps:$4 sm:$0xff]  }
  0x29   : > { %3945 = vmatprep.subr.bf16.mxu0 %v5974_v29  ;;  %v6056_v16 = vld [vmem:[%s8206_s1 + $0x110] ss:$8 sps:$4 sm:$0xff]   ;;  %v6047_v17 = vld [vmem:[%s8206_s1 + $0x520] ss:$8 sps:$4 sm:$0xff]   ;;  %v6050_v18 = vld [vmem:[%s6983_s5 + $0x124] ss:$72 sps:$4 sm:$0xff]  }
  0x2a   : > { %v6052_v19 = vld [vmem:[%s6983_s5 + $0x144] ss:$72 sps:$4 sm:$0xff]   ;;  %v6061_v20 = vld [vmem:[%s8206_s1 + $0x534] ss:$8 sps:$4 sm:$0xff]   ;;  %v6059_v22 = vld [vmem:[%s8206_s1 + $0x530] ss:$8 sps:$4 sm:$0xff]  }
  0x2b   : > { %3302 = vmatpush1.bf16.msra.mxu1 %v5976_v30  ;;  %v6066_v21 = vld [vmem:[%s8206_s1 + $0x124] ss:$8 sps:$4 sm:$0xff]   ;;  %v6064_v23 = vld [vmem:[%s8206_s1 + $0x120] ss:$8 sps:$4 sm:$0xff]   ;;  %v6076_v24 = vld [vmem:[%s8206_s1 + $0x134] ss:$8 sps:$4 sm:$0xff]  }
  0x2c   : > { %3946 = vmatpush1.bf16.msra.mxu0 %v5977_v31  ;;  %3303 = vmatprep.subr.bf16.mxu1 %v5978_v32  ;;  %v6073_v25 = vld [vmem:[%s8206_s1 + $0x544] ss:$8 sps:$4 sm:$0xff]   ;;  %v6054_v26 = vld [vmem:[%s6983_s5 + $0x120] ss:$72 sps:$4 sm:$0xff]   ;;  %v6062_v28 = vld [vmem:[%s6983_s5 + $0x1b4] ss:$72 sps:$4 sm:$0xff]  }
  0x2d   : > { %3947 = vmatprep.subr.bf16.mxu0 %v5980_v33  ;;  %v6055_v27 = vld [vmem:[%s6983_s5 + $0x140] ss:$72 sps:$4 sm:$0xff]   ;;  %v6067_v29 = vld [vmem:[%s6983_s5 + $0x1d4] ss:$72 sps:$4 sm:$0xff]   ;;  %v6074_v31 = vld [vmem:[%s8206_s1 + $0x130] ss:$8 sps:$4 sm:$0xff]  }
  0x2e   : > { %v6071_v30 = vld [vmem:[%s8206_s1 + $0x540] ss:$8 sps:$4 sm:$0xff]   ;;  %v6085_v32 = vld [vmem:[%s8206_s1 + $0x554] ss:$8 sps:$4 sm:$0xff]   ;;  %v6088_v33 = vld [vmem:[%s8206_s1 + $0x144] ss:$8 sps:$4 sm:$0xff]  }
  0x2f   : > { %3304 = vmatpush1.bf16.msra.mxu1 %v5982_v34  ;;  %v6083_v34 = vld [vmem:[%s8206_s1 + $0x550] ss:$8 sps:$4 sm:$0xff]   ;;  %v6110_v49 = vld [vmem:[%s8206_s1 + $0x160] ss:$8 sps:$4 sm:$0xff]   ;;  %v6123_v51 = vld [vmem:[%s8206_s1 + $0x174] ss:$8 sps:$4 sm:$0xff]  }
  0x30   : > { %3948 = vmatpush1.bf16.msra.mxu0 %v5983_v35  ;;  %3305 = vmatprep.subr.bf16.mxu1 %v5984_v36  ;;  %v6069_v35 = vld [vmem:[%s6983_s5 + $0x1b0] ss:$72 sps:$4 sm:$0xff]  }
  0x31   : > { %3949 = vmatprep.subr.bf16.mxu0 %v5986_v37  ;;  %v6070_v36 = vld [vmem:[%s6983_s5 + $0x1d0] ss:$72 sps:$4 sm:$0xff]   ;;  %v6086_v37 = vld [vmem:[%s8206_s1 + $0x140] ss:$8 sps:$4 sm:$0xff]  }
  0x33   : > { %3306 = vmatpush1.bf16.msra.mxu1 %v5988_v38  ;;  %v6077_v38 = vld [vmem:[%s6983_s5 + $0x244] ss:$72 sps:$4 sm:$0xff]  }
  0x34   : > { %3950 = vmatpush1.bf16.msra.mxu0 %v5989_v39  ;;  %3307 = vmatprep.subr.bf16.mxu1 %v5990_v40  ;;  %v6095_v39 = vld [vmem:[%s8206_s1 + $0x564] ss:$8 sps:$4 sm:$0xff]   ;;  %v6100_v40 = vld [vmem:[%s8206_s1 + $0x154] ss:$8 sps:$4 sm:$0xff]  }
  0x35   : > { %3951 = vmatprep.subr.bf16.mxu0 %v5992_v41  ;;  %v6079_v41 = vld [vmem:[%s6983_s5 + $0x264] ss:$72 sps:$4 sm:$0xff]  }
  0x37   : > { %3308 = vmatpush1.bf16.msra.mxu1 %v5994_v42  ;;  %v6093_v42 = vld [vmem:[%s8206_s1 + $0x560] ss:$8 sps:$4 sm:$0xff]  }
  0x38   : > { %3952 = vmatpush1.bf16.msra.mxu0 %v5995_v43  ;;  %3309 = vmatprep.subr.bf16.mxu1 %v5996_v44  ;;  %v6098_v43 = vld [vmem:[%s8206_s1 + $0x150] ss:$8 sps:$4 sm:$0xff]   ;;  %v6103_v44 = vld [vmem:[%s8206_s1 + $0x574] ss:$8 sps:$4 sm:$0xff]  }
  0x39   : > { %3953 = vmatprep.subr.bf16.mxu0 %v5998_v45  ;;  %v6112_v45 = vld [vmem:[%s8206_s1 + $0x164] ss:$8 sps:$4 sm:$0xff]  }
  0x3b   : > { %3310 = vmatpush1.bf16.msra.mxu1 %v6000_v46  ;;  %v6101_v46 = vld [vmem:[%s8206_s1 + $0x570] ss:$8 sps:$4 sm:$0xff]  }
  0x3c   : > { %3954 = vmatpush1.bf16.msra.mxu0 %v6001_v47  ;;  %3311 = vmatprep.subr.bf16.mxu1 %v6002_v48  ;;  %v6081_v47 = vld [vmem:[%s6983_s5 + $0x240] ss:$72 sps:$4 sm:$0xff]  }
  0x3d   : > { %3955 = vmatprep.subr.bf16.mxu0 %v6004_v50  ;;  %v6082_v48 = vld [vmem:[%s6983_s5 + $0x260] ss:$72 sps:$4 sm:$0xff]   ;;  %v6115_v50 = vld [vmem:[%s8206_s1 + $0x584] ss:$8 sps:$4 sm:$0xff]  }
  0x3f   : > { %3312 = vmatpush1.bf16.msra.mxu1 %v6006_v52  ;;  %v6089_v52 = vld [vmem:[%s6983_s5 + $0x2d4] ss:$72 sps:$4 sm:$0xff]  }
  0x40   : > { %3956 = vmatpush1.bf16.msra.mxu0 %v6007_v53  ;;  %3313 = vmatprep.subr.bf16.mxu1 %v6008_v54  ;;  %v6091_v53 = vld [vmem:[%s6983_s5 + $0x2f4] ss:$72 sps:$4 sm:$0xff]   ;;  %v6113_v54 = vld [vmem:[%s8206_s1 + $0x580] ss:$8 sps:$4 sm:$0xff]  }
  0x41   : > { %3957 = vmatprep.subr.bf16.mxu0 %v6010_v55  ;;  %v6121_v55 = vld [vmem:[%s8206_s1 + $0x170] ss:$8 sps:$4 sm:$0xff]  }
  0x43   : > { %3314 = vmatpush1.bf16.msra.mxu1 %v6012_v56  ;;  %v6127_v56 = vld [vmem:[%s8206_s1 + $0x594] ss:$8 sps:$4 sm:$0xff]  }
  0x44   : > { %3958 = vmatpush1.bf16.msra.mxu0 %v6013_v57  ;;  %3315 = vmatprep.subr.bf16.mxu1 %v6014_v58  ;;  %v6130_v57 = vld [vmem:[%s8206_s1 + $0x184] ss:$8 sps:$4 sm:$0xff]   ;;  %v6125_v58 = vld [vmem:[%s8206_s1 + $0x590] ss:$8 sps:$4 sm:$0xff]  }
  0x45   : > { %3959 = vmatprep.subr.bf16.mxu0 %v6016_v59  ;;  %v6128_v59 = vld [vmem:[%s8206_s1 + $0x180] ss:$8 sps:$4 sm:$0xff]  }
  0x47   : > { %3316 = vmatpush1.bf16.msra.mxu1 %v6018_v60  ;;  %v6096_v60 = vld [vmem:[%s6983_s5 + $0x2d0] ss:$72 sps:$4 sm:$0xff]  }
  0x48   : > { %3960 = vmatpush1.bf16.msra.mxu0 %v6019_v61  ;;  %3317 = vmatprep.subr.bf16.mxu1 %v6020_v62  ;;  %v6139_v61 = vld [vmem:[%s8206_s1 + $0x5a4] ss:$8 sps:$4 sm:$0xff]   ;;  %v6142_v62 = vld [vmem:[%s8206_s1 + $0x194] ss:$8 sps:$4 sm:$0xff]  }
  0x49   : > { %3961 = vmatprep.subr.bf16.mxu0 %v6022_v63  ;;  %v6097_v63 = vld [vmem:[%s6983_s5 + $0x2f0] ss:$72 sps:$4 sm:$0xff]  }
  0x4b   : > { %3318 = vmatpush1.bf16.msra.mxu1 %v6024_v0  ;;  %v6104_v0 = vld [vmem:[%s6983_s5 + $0x364] ss:$72 sps:$4 sm:$0xff]  }
  0x4c   : > { %3962 = vmatpush1.bf16.msra.mxu0 %v6025_v1  ;;  %3448 = vmatprep.subr.bf16.mxu1 %v6046_v3  ;;  %v6106_v1 = vld [vmem:[%s6983_s5 + $0x384] ss:$72 sps:$4 sm:$0xff]   ;;  %v6140_v3 = vld [vmem:[%s8206_s1 + $0x190] ss:$8 sps:$4 sm:$0xff]  }
  0x4d   : > { %4092 = vmatprep.subr.bf16.mxu0 %v6034_v2  ;;  %v6137_v2 = vld [vmem:[%s8206_s1 + $0x5a0] ss:$8 sps:$4 sm:$0xff]  }
  0x4e   : > { %3320 = vmatmul.mubr.bf16.vlgmr.msra.gmra.mrb[0].mxu1 %v6026_v4  ;;  %v6151_v4 = vld [vmem:[%s8206_s1 + $0x5b4] ss:$8 sps:$4 sm:$0xff]  }
  0x4f   : > { %3964 = vmatmul.mubr.bf16.vlgmr.msra.gmra.mrb[0].mxu0 %v6029_v5  ;;  %3329 = vmatprep.mubr.bf16.mxu1 %v6035_v7  ;;  %v6154_v5 = vld [vmem:[%s8206_s1 + $0x1a4] ss:$8 sps:$4 sm:$0xff]   ;;  %v6108_v7 = vld [vmem:[%s6983_s5 + $0x360] ss:$72 sps:$4 sm:$0xff]  }
  0x50   : > { %4093 = vmatpush1.bf16.msra.mxu0 %v6032_v6  ;;  %3973 = vmatprep.mubr.bf16.mxu0 %v6037_v8  ;;  %v6149_v6 = vld [vmem:[%s8206_s1 + $0x5b0] ss:$8 sps:$4 sm:$0xff]   ;;  %v6152_v8 = vld [vmem:[%s8206_s1 + $0x1a0] ss:$8 sps:$4 sm:$0xff]  }
  0x51   : > { %4094 = vmatprep.subr.bf16.mxu0 %v6041_v9  ;;  %3449 = vmatpush1.bf16.msra.mxu1 %v6044_v10  ;;  %v6157_v9 = vld [vmem:[%s8206_s1 + $0x5c4] ss:$8 sps:$4 sm:$0xff]   ;;  %v6166_v10 = vld [vmem:[%s8206_s1 + $0x1b4] ss:$8 sps:$4 sm:$0xff]  }
  0x52   : > { %3450 = vmatprep.subr.bf16.mxu1 %v6058_v11  ;;  %v6109_v11 = vld [vmem:[%s6983_s5 + $0x380] ss:$72 sps:$4 sm:$0xff]  }
  0x54   : > { %4095 = vmatpush1.bf16.msra.mxu0 %v6039_v12  ;;  %v6116_v12 = vld [vmem:[%s6983_s5 + $0x3f4] ss:$72 sps:$4 sm:$0xff]  }
  0x55   : > { %4096 = vmatprep.subr.bf16.mxu0 %v6049_v14  ;;  %3451 = vmatpush1.bf16.msra.mxu1 %v6056_v16  ;;  %v6155_v14 = vld [vmem:[%s8206_s1 + $0x5c0] ss:$8 sps:$4 sm:$0xff]   ;;  %v6169_v16 = vld [vmem:[%s8206_s1 + $0x5d4] ss:$8 sps:$4 sm:$0xff]  }
  0x56   : > { %3330 = vmatmul.mubr.bf16.gmra.mrb[4].mxu1 %v6042_v13  ;;  %3452 = vmatprep.subr.bf16.mxu1 %v6066_v21  ;;  %v6118_v13 = vld [vmem:[%s6983_s5 + $0x414] ss:$72 sps:$4 sm:$0xff]   ;;  %v6175_v21 = vld [vmem:[%s8206_s1 + $0x1c0] ss:$8 sps:$4 sm:$0xff]  }
  0x57   : > { %3974 = vmatmul.mubr.bf16.gmra.mrb[4].mxu0 %v6043_v15  ;;  %3339 = vmatprep.mubr.bf16.mxu1 %v6050_v18  ;;  %v6164_v15 = vld [vmem:[%s8206_s1 + $0x1b0] ss:$8 sps:$4 sm:$0xff]  }
  0x58   : > { %4097 = vmatpush1.bf16.msra.mxu0 %v6047_v17  ;;  %3983 = vmatprep.mubr.bf16.mxu0 %v6052_v19  ;;  %v6177_v17 = vld [vmem:[%s8206_s1 + $0x1c4] ss:$8 sps:$4 sm:$0xff]   ;;  %v6167_v18 = vld [vmem:[%s8206_s1 + $0x5d0] ss:$8 sps:$4 sm:$0xff]  }
  0x59   : > { %4098 = vmatprep.subr.bf16.mxu0 %v6061_v20  ;;  %3453 = vmatpush1.bf16.msra.mxu1 %v6064_v23  ;;  %v6120_v19 = vld [vmem:[%s6983_s5 + $0x3f0] ss:$72 sps:$4 sm:$0xff]   ;;  %v6184_v23 = vld [vmem:[%s8206_s1 + $0x1d4] ss:$8 sps:$4 sm:$0xff]  }
  0x5a   : > { %3454 = vmatprep.subr.bf16.mxu1 %v6076_v24  ;;  %v6124_v20 = vld [vmem:[%s6983_s5 + $0x410] ss:$72 sps:$4 sm:$0xff]   ;;  %v6131_v24 = vld [vmem:[%s6983_s5 + $0x484] ss:$72 sps:$4 sm:$0xff]  }
  0x5c   : > { %4099 = vmatpush1.bf16.msra.mxu0 %v6059_v22  ;;  %v6181_v22 = vld [vmem:[%s8206_s1 + $0x5e4] ss:$8 sps:$4 sm:$0xff]  }
  0x5d   : > { %4100 = vmatprep.subr.bf16.mxu0 %v6073_v25  ;;  %3455 = vmatpush1.bf16.msra.mxu1 %v6074_v31  ;;  %v6133_v25 = vld [vmem:[%s6983_s5 + $0x4a4] ss:$72 sps:$4 sm:$0xff]   ;;  %v6188_v31 = vld [vmem:[%s8206_s1 + $0x1e0] ss:$8 sps:$4 sm:$0xff]  }
  0x5e   : > { %3340 = vmatmul.mubr.bf16.gmra.mrb[8].mxu1 %v6054_v26  ;;  %3456 = vmatprep.subr.bf16.mxu1 %v6088_v33  ;;  %v6179_v26 = vld [vmem:[%s8206_s1 + $0x5e0] ss:$8 sps:$4 sm:$0xff]   ;;  %v6197_v33 = vld [vmem:[%s8206_s1 + $0x1f4] ss:$8 sps:$4 sm:$0xff]  }
  0x5f   : > { %3984 = vmatmul.mubr.bf16.gmra.mrb[8].mxu0 %v6055_v27  ;;  %3349 = vmatprep.mubr.bf16.mxu1 %v6062_v28  ;;  %v6182_v27 = vld [vmem:[%s8206_s1 + $0x1d0] ss:$8 sps:$4 sm:$0xff]   ;;  %v6190_v28 = vld [vmem:[%s8206_s1 + $0x1e4] ss:$8 sps:$4 sm:$0xff]  }
  0x60   : > { %3993 = vmatprep.mubr.bf16.mxu0 %v6067_v29  ;;  %4101 = vmatpush1.bf16.msra.mxu0 %v6071_v30  ;;  %v6194_v29 = vld [vmem:[%s8206_s1 + $0x5f4] ss:$8 sps:$4 sm:$0xff]   ;;  %v6135_v30 = vld [vmem:[%s6983_s5 + $0x480] ss:$72 sps:$4 sm:$0xff]  }
  0x61   : > { %4102 = vmatprep.subr.bf16.mxu0 %v6085_v32  ;;  %3457 = vmatpush1.bf16.msra.mxu1 %v6086_v37  ;;  %v6192_v32 = vld [vmem:[%s8206_s1 + $0x5f0] ss:$8 sps:$4 sm:$0xff]   ;;  %v6145_v37 = vld [vmem:[%s6983_s5 + $0x534] ss:$72 sps:$4 sm:$0xff]  }
  0x62   : > { %3458 = vmatprep.subr.bf16.mxu1 %v6100_v40  ;;  %v6147_v40 = vld [vmem:[%s6983_s5 + $0x510] ss:$72 sps:$4 sm:$0xff]  }
  0x64   : > { %4103 = vmatpush1.bf16.msra.mxu0 %v6083_v34  ;;  %v6206_v34 = vld [vmem:[%s8206_s1 + $0x604] ss:$8 sps:$4 sm:$0xff]  }
  0x65   : > { %4104 = vmatprep.subr.bf16.mxu0 %v6095_v39  ;;  %3459 = vmatpush1.bf16.msra.mxu1 %v6098_v43  ;;  %v6218_v39 = vld [vmem:[%s8206_s1 + $0x204] ss:$8 sps:$4 sm:$0xff]  }
  0x66   : > { %3350 = vmatmul.mubr.bf16.gmra.mrb[12].mxu1 %v6069_v35  ;;  %3460 = vmatprep.subr.bf16.mxu1 %v6112_v45  ;;  %v6136_v35 = vld [vmem:[%s6983_s5 + $0x4a0] ss:$72 sps:$4 sm:$0xff]   ;;  %v6160_v43 = vld [vmem:[%s6983_s5 + $0x5c4] ss:$72 sps:$4 sm:$0xff]  }
  0x67   : > { %3994 = vmatmul.mubr.bf16.gmra.mrb[12].mxu0 %v6070_v36  ;;  %3359 = vmatprep.mubr.bf16.mxu1 %v6077_v38  ;;  %v6143_v36 = vld [vmem:[%s6983_s5 + $0x514] ss:$72 sps:$4 sm:$0xff]   ;;  %v6195_v38 = vld [vmem:[%s8206_s1 + $0x1f0] ss:$8 sps:$4 sm:$0xff]   ;;  %v6163_v45 = vld [vmem:[%s6983_s5 + $0x5c0] ss:$72 sps:$4 sm:$0xff]  }
  0x68   : > { %4003 = vmatprep.mubr.bf16.mxu0 %v6079_v41  ;;  %4105 = vmatpush1.bf16.msra.mxu0 %v6093_v42  ;;  %v6148_v41 = vld [vmem:[%s6983_s5 + $0x530] ss:$72 sps:$4 sm:$0xff]   ;;  %v6158_v42 = vld [vmem:[%s6983_s5 + $0x5a4] ss:$72 sps:$4 sm:$0xff]  }
  0x69   : > { %4106 = vmatprep.subr.bf16.mxu0 %v6103_v44  ;;  %3461 = vmatpush1.bf16.msra.mxu1 %v6110_v49  ;;  %v6162_v44 = vld [vmem:[%s6983_s5 + $0x5a0] ss:$72 sps:$4 sm:$0xff]  }
  0x6a   : > { %3462 = vmatprep.subr.bf16.mxu1 %v6123_v51  ;;  %v399_v49 = vld [vmem:[%s6983_s5 + $0x6e0] sm:$0xff]  ;;  %v6178_v51 = vld [vmem:[%s6983_s5 + $0x650] ss:$72 sps:$4 sm:$0xff]  }
  0x6c   : > { %4107 = vmatpush1.bf16.msra.mxu0 %v6101_v46  ;;  %v6170_v46 = vld [vmem:[%s6983_s5 + $0x634] ss:$72 sps:$4 sm:$0xff]  }
  0x6d   : > { %4108 = vmatprep.subr.bf16.mxu0 %v6115_v50  ;;  %3463 = vmatpush1.bf16.msra.mxu1 %v6121_v55  ;;  %v6174_v50 = vld [vmem:[%s6983_s5 + $0x630] ss:$72 sps:$4 sm:$0xff]   ;;  %v5126_v55 = vcombine.low %v399_v49, %v399_v49 }
  0x6e   : > { %3360 = vmatmul.mubr.bf16.gmra.mrb[16].mxu1 %v6081_v47  ;;  %3464 = vmatprep.subr.bf16.mxu1 %v6130_v57  ;;  %v6172_v47 = vld [vmem:[%s6983_s5 + $0x654] ss:$72 sps:$4 sm:$0xff]  }
  0x6f   : > { %4004 = vmatmul.mubr.bf16.gmra.mrb[16].mxu0 %v6082_v48  ;;  %3369 = vmatprep.mubr.bf16.mxu1 %v6089_v52  ;;  %v395_v48 = vld [vmem:[%s6983_s5 + $0x6c0] sm:$0xff]  ;;  %v6203_v57 = vld [vmem:[%s6983_s5 + $0x2c] ss:$72 sps:$4 sm:$0xff]  }
  0x70   : > { %4013 = vmatprep.mubr.bf16.mxu0 %v6091_v53  ;;  %4109 = vmatpush1.bf16.msra.mxu0 %v6113_v54  ;;  %v5119_v52 = vcombine.high %v395_v48, %v395_v48  ;;  %v5127_v53 = vcombine.high %v399_v49, %v399_v49  ;;  %v5118_v54 = vcombine.low %v395_v48, %v395_v48  ;;  %v6297_v48 = vld [vmem:[%s8206_s1 + $0x690] ss:$8 sps:$4 sm:$0xff]  }
  0x71   : > { %4110 = vmatprep.subr.bf16.mxu0 %v6127_v56  ;;  %3465 = vmatpush1.bf16.msra.mxu1 %v6128_v59  ;;  %v6200_v56 = vld [vmem:[%s6983_s5 + $0xc] ss:$72 sps:$4 sm:$0xff]   ;;  %v6201_v59 = vld [vmem:[%s6983_s5 + $0x28] ss:$72 sps:$4 sm:$0xff]   ;;  %v6268_v49 = vld [vmem:[%s6983_s5 + $0x2d8] ss:$72 sps:$4 sm:$0xff]  }
  0x72   : > { %3466 = vmatprep.subr.bf16.mxu1 %v6142_v62  ;;  %v6209_v62 = vld [vmem:[%s6983_s5 + $0xbc] ss:$72 sps:$4 sm:$0xff]  }
  0x74   : > { %4111 = vmatpush1.bf16.msra.mxu0 %v6125_v58  ;;  %v6198_v58 = vld [vmem:[%s6983_s5 + $0x8] ss:$72 sps:$4 sm:$0xff]  }
  0x75   : > { %4112 = vmatprep.subr.bf16.mxu0 %v6139_v61  ;;  %3467 = vmatpush1.bf16.msra.mxu1 %v6140_v3  ;;  %v6207_v61 = vld [vmem:[%s6983_s5 + $0x9c] ss:$72 sps:$4 sm:$0xff]   ;;  %v6214_v3 = vld [vmem:[%s6983_s5 + $0x98] ss:$72 sps:$4 sm:$0xff]  }
  0x76   : > { %3370 = vmatmul.mubr.bf16.gmra.mrb[20].mxu1 %v6096_v60  ;;  %3468 = vmatprep.subr.bf16.mxu1 %v6154_v5  ;;  %v6204_v60 = vld [vmem:[%s8206_s1 + $0x600] ss:$8 sps:$4 sm:$0xff]   ;;  %v6221_v5 = vld [vmem:[%s8206_s1 + $0x624] ss:$8 sps:$4 sm:$0xff]  }
  0x77   : > { %4014 = vmatmul.mubr.bf16.gmra.mrb[20].mxu0 %v6097_v63  ;;  %3379 = vmatprep.mubr.bf16.mxu1 %v6104_v0  ;;  %v6213_v63 = vld [vmem:[%s8206_s1 + $0x614] ss:$8 sps:$4 sm:$0xff]   ;;  %v6216_v0 = vld [vmem:[%s8206_s1 + $0x200] ss:$8 sps:$4 sm:$0xff]  }
  0x78   : > { %4023 = vmatprep.mubr.bf16.mxu0 %v6106_v1  ;;  %4113 = vmatpush1.bf16.msra.mxu0 %v6137_v2  ;;  %v6230_v1 = vld [vmem:[%s8206_s1 + $0x214] ss:$8 sps:$4 sm:$0xff]   ;;  %v6211_v2 = vld [vmem:[%s8206_s1 + $0x610] ss:$8 sps:$4 sm:$0xff]  }
  0x79   : > { %4114 = vmatprep.subr.bf16.mxu0 %v6151_v4  ;;  %3469 = vmatpush1.bf16.msra.mxu1 %v6152_v8  ;;  %v6215_v4 = vld [vmem:[%s6983_s5 + $0xb8] ss:$72 sps:$4 sm:$0xff]   ;;  %v6222_v8 = vld [vmem:[%s6983_s5 + $0x12c] ss:$72 sps:$4 sm:$0xff]  }
  0x7a   : > { %3470 = vmatprep.subr.bf16.mxu1 %v6166_v10  ;;  %v6233_v10 = vld [vmem:[%s8206_s1 + $0x634] ss:$8 sps:$4 sm:$0xff]  }
  0x7c   : > { %4115 = vmatpush1.bf16.msra.mxu0 %v6149_v6  ;;  %v6228_v6 = vld [vmem:[%s8206_s1 + $0x210] ss:$8 sps:$4 sm:$0xff]  }
  0x7d   : > { %4116 = vmatprep.subr.bf16.mxu0 %v6157_v9  ;;  %3471 = vmatpush1.bf16.msra.mxu1 %v6164_v15  ;;  %v6224_v9 = vld [vmem:[%s6983_s5 + $0x14c] ss:$72 sps:$4 sm:$0xff]   ;;  %v6226_v15 = vld [vmem:[%s6983_s5 + $0x128] ss:$72 sps:$4 sm:$0xff]  }
  0x7e   : > { %3380 = vmatmul.mubr.bf16.gmra.mrb[24].mxu1 %v6108_v7  ;;  %3472 = vmatprep.subr.bf16.mxu1 %v6177_v17  ;;  %v6219_v7 = vld [vmem:[%s8206_s1 + $0x620] ss:$8 sps:$4 sm:$0xff]  }
  0x7f   : > { %4024 = vmatmul.mubr.bf16.gmra.mrb[24].mxu0 %v6109_v11  ;;  %3389 = vmatprep.mubr.bf16.mxu1 %v6116_v12  ;;  %v6238_v11 = vld [vmem:[%s8206_s1 + $0x224] ss:$8 sps:$4 sm:$0xff]   ;;  %v6236_v12 = vld [vmem:[%s8206_s1 + $0x220] ss:$8 sps:$4 sm:$0xff]  }
  0x80   : > { %4033 = vmatprep.mubr.bf16.mxu0 %v6118_v13  ;;  %4117 = vmatpush1.bf16.msra.mxu0 %v6155_v14  ;;  %v6231_v13 = vld [vmem:[%s8206_s1 + $0x630] ss:$8 sps:$4 sm:$0xff]   ;;  %v6248_v14 = vld [vmem:[%s8206_s1 + $0x234] ss:$8 sps:$4 sm:$0xff]  }
  0x81   : > { %4118 = vmatprep.subr.bf16.mxu0 %v6169_v16  ;;  %3473 = vmatpush1.bf16.msra.mxu1 %v6175_v21  ;;  %v6245_v16 = vld [vmem:[%s8206_s1 + $0x644] ss:$8 sps:$4 sm:$0xff]   ;;  %v6227_v17 = vld [vmem:[%s6983_s5 + $0x148] ss:$72 sps:$4 sm:$0xff]  }
  0x82   : > { %3474 = vmatprep.subr.bf16.mxu1 %v6184_v23  ;;  %v6246_v21 = vld [vmem:[%s8206_s1 + $0x230] ss:$8 sps:$4 sm:$0xff]   ;;  %v6260_v23 = vld [vmem:[%s8206_s1 + $0x244] ss:$8 sps:$4 sm:$0xff]  }
  0x84   : > { %4119 = vmatpush1.bf16.msra.mxu0 %v6167_v18  ;;  %v6234_v18 = vld [vmem:[%s6983_s5 + $0x1bc] ss:$72 sps:$4 sm:$0xff]  }
  0x85   : > { %4120 = vmatprep.subr.bf16.mxu0 %v6181_v22  ;;  %3475 = vmatpush1.bf16.msra.mxu1 %v6182_v27  ;;  %v6257_v22 = vld [vmem:[%s8206_s1 + $0x654] ss:$8 sps:$4 sm:$0xff]   ;;  %v6258_v27 = vld [vmem:[%s8206_s1 + $0x240] ss:$8 sps:$4 sm:$0xff]  }
  0x86   : > { %3390 = vmatmul.mubr.bf16.gmra.mrb[28].mxu1 %v6120_v19  ;;  %3476 = vmatprep.subr.bf16.mxu1 %v6190_v28  ;;  %v6239_v19 = vld [vmem:[%s6983_s5 + $0x1dc] ss:$72 sps:$4 sm:$0xff]  }
  0x87   : > { %4034 = vmatmul.mubr.bf16.gmra.mrb[28].mxu0 %v6124_v20  ;;  %3399 = vmatprep.mubr.bf16.mxu1 %v6131_v24  ;;  %v6243_v20 = vld [vmem:[%s8206_s1 + $0x640] ss:$8 sps:$4 sm:$0xff]   ;;  %v6255_v24 = vld [vmem:[%s8206_s1 + $0x650] ss:$8 sps:$4 sm:$0xff]   ;;  %v6267_v28 = vld [vmem:[%s8206_s1 + $0x664] ss:$8 sps:$4 sm:$0xff]  }
  0x88   : > { %4043 = vmatprep.mubr.bf16.mxu0 %v6133_v25  ;;  %4121 = vmatpush1.bf16.msra.mxu0 %v6179_v26  ;;  %v6241_v25 = vld [vmem:[%s6983_s5 + $0x1b8] ss:$72 sps:$4 sm:$0xff]  }
  0x89   : > { %4122 = vmatprep.subr.bf16.mxu0 %v6194_v29  ;;  %3477 = vmatpush1.bf16.msra.mxu1 %v6188_v31  ;;  %v6242_v26 = vld [vmem:[%s6983_s5 + $0x1d8] ss:$72 sps:$4 sm:$0xff]   ;;  %v6272_v29 = vld [vmem:[%s8206_s1 + $0x254] ss:$8 sps:$4 sm:$0xff]  }
  0x8a   : > { %3478 = vmatprep.subr.bf16.mxu1 %v6197_v33  ;;  %v6251_v31 = vld [vmem:[%s6983_s5 + $0x26c] ss:$72 sps:$4 sm:$0xff]   ;;  %v6270_v33 = vld [vmem:[%s8206_s1 + $0x250] ss:$8 sps:$4 sm:$0xff]  }
  0x8c   : > { %4123 = vmatpush1.bf16.msra.mxu0 %v6192_v32  ;;  %v6265_v32 = vld [vmem:[%s8206_s1 + $0x660] ss:$8 sps:$4 sm:$0xff]  }
  0x8d   : > { %4253 = vmatprep.subr.bf16.mxu0 %v6206_v34  ;;  %3479 = vmatpush1.bf16.msra.mxu1 %v6195_v38  ;;  %v6275_v34 = vld [vmem:[%s8206_s1 + $0x674] ss:$8 sps:$4 sm:$0xff]   ;;  %v6253_v38 = vld [vmem:[%s6983_s5 + $0x248] ss:$72 sps:$4 sm:$0xff]  }
  0x8e   : > { %3400 = vmatmul.mubr.bf16.gmra.mrb[32].mxu1 %v6135_v30  ;;  %3609 = vmatprep.subr.bf16.mxu1 %v6218_v39  ;;  %v6249_v30 = vld [vmem:[%s6983_s5 + $0x24c] ss:$72 sps:$4 sm:$0xff]  }
  0x8f   : > { %4044 = vmatmul.mubr.bf16.gmra.mrb[32].mxu0 %v6136_v35  ;;  %3409 = vmatprep.mubr.bf16.mxu1 %v6143_v36  ;;  %v6284_v35 = vld [vmem:[%s8206_s1 + $0x264] ss:$8 sps:$4 sm:$0xff]   ;;  %v6273_v36 = vld [vmem:[%s8206_s1 + $0x670] ss:$8 sps:$4 sm:$0xff]  }
  0x90   : > { %4053 = vmatprep.mubr.bf16.mxu0 %v6145_v37  ;;  %v6282_v37 = vld [vmem:[%s8206_s1 + $0x260] ss:$8 sps:$4 sm:$0xff]   ;;  %v6287_v39 = vld [vmem:[%s8206_s1 + $0x684] ss:$8 sps:$4 sm:$0xff]  }
  0x96   : > { %3410 = vmatmul.mubr.bf16.gmra.mrb[36].mxu1 %v6147_v40  ;;  %v6295_v40 = vld [vmem:[%s8206_s1 + $0x274] ss:$8 sps:$4 sm:$0xff]  }
  0x97   : > { %4054 = vmatmul.mubr.bf16.gmra.mrb[36].mxu0 %v6148_v41  ;;  %3419 = vmatprep.mubr.bf16.mxu1 %v6158_v42  ;;  %v6254_v41 = vld [vmem:[%s6983_s5 + $0x268] ss:$72 sps:$4 sm:$0xff]   ;;  %v6261_v42 = vld [vmem:[%s6983_s5 + $0x2dc] ss:$72 sps:$4 sm:$0xff]  }
  0x98   : > { %4063 = vmatprep.mubr.bf16.mxu0 %v6160_v43  ;;  %v6263_v43 = vld [vmem:[%s6983_s5 + $0x2fc] ss:$72 sps:$4 sm:$0xff]  }
  0x9e   : > { %3420 = vmatmul.mubr.bf16.gmra.mrb[40].mxu1 %v6162_v44  ;;  %v6285_v44 = vld [vmem:[%s8206_s1 + $0x680] ss:$8 sps:$4 sm:$0xff]  }
  0x9f   : > { %4064 = vmatmul.mubr.bf16.gmra.mrb[40].mxu0 %v6163_v45  ;;  %3429 = vmatprep.mubr.bf16.mxu1 %v6170_v46  ;;  %v6293_v45 = vld [vmem:[%s8206_s1 + $0x270] ss:$8 sps:$4 sm:$0xff]   ;;  %v6299_v46 = vld [vmem:[%s8206_s1 + $0x694] ss:$8 sps:$4 sm:$0xff]  }
  0xa0   : > { %4073 = vmatprep.mubr.bf16.mxu0 %v6172_v47  ;;  %v6302_v47 = vld [vmem:[%s8206_s1 + $0x284] ss:$8 sps:$4 sm:$0xff]  }
  0xa6   : > { %3430 = vmatmul.mubr.bf16.gmra.mrb[44].mxu1 %v6174_v50  ;;  %v6269_v50 = vld [vmem:[%s6983_s5 + $0x2f8] ss:$72 sps:$4 sm:$0xff]  }
  0xa7   : > { %4074 = vmatmul.mubr.bf16.gmra.mrb[44].mxu0 %v6178_v51  ;;  %3439 = vmatprep.mubr.bf16.mxu1 %v5119_v52  ;;  %v6300_v51 = vld [vmem:[%s8206_s1 + $0x280] ss:$8 sps:$4 sm:$0xff]   ;;  %v6276_v52 = vld [vmem:[%s6983_s5 + $0x36c] ss:$72 sps:$4 sm:$0xff]  }
  0xa8   : > { %4083 = vmatprep.mubr.bf16.mxu0 %v5127_v53  ;;  %v6311_v53 = vld [vmem:[%s8206_s1 + $0x6a4] ss:$8 sps:$4 sm:$0xff]  }
  0xae   : > { %3440 = vmatmul.mubr.bf16.gmra.mrb[48].mxu1 %v5118_v54  ;;  %v6314_v54 = vld [vmem:[%s8206_s1 + $0x294] ss:$8 sps:$4 sm:$0xff]  }
  0xaf   : > { %4084 = vmatmul.mubr.bf16.gmra.mrb[48].mxu0 %v5126_v55  ;;  %3480 = vmatprep.mubr.bf16.mxu1 %v6200_v56  ;;  %v6278_v55 = vld [vmem:[%s6983_s5 + $0x38c] ss:$72 sps:$4 sm:$0xff]   ;;  %v6309_v56 = vld [vmem:[%s8206_s1 + $0x6a0] ss:$8 sps:$4 sm:$0xff]  }
  0xb0   : > { %4124 = vmatprep.mubr.bf16.mxu0 %v6203_v57  ;;  %v6312_v57 = vld [vmem:[%s8206_s1 + $0x290] ss:$8 sps:$4 sm:$0xff]  }
  0xb6   : > { %3481 = vmatmul.mubr.bf16.vlgmr.msra.gmra.mrb[0].mxu1 %v6198_v58  ;;  %v6323_v58 = vld [vmem:[%s8206_s1 + $0x6b4] ss:$8 sps:$4 sm:$0xff]  }
  0xb7   : > { %4125 = vmatmul.mubr.bf16.vlgmr.msra.gmra.mrb[0].mxu0 %v6201_v59  ;;  %3490 = vmatprep.mubr.bf16.mxu1 %v6207_v61  ;;  %v6326_v59 = vld [vmem:[%s8206_s1 + $0x2a4] ss:$8 sps:$4 sm:$0xff]   ;;  %v6280_v61 = vld [vmem:[%s6983_s5 + $0x368] ss:$72 sps:$4 sm:$0xff]  }
  0xb8   : > { %4254 = vmatpush1.bf16.msra.mxu0 %v6204_v60  ;;  %4134 = vmatprep.mubr.bf16.mxu0 %v6209_v62  ;;  %v6321_v60 = vld [vmem:[%s8206_s1 + $0x6b0] ss:$8 sps:$4 sm:$0xff]  }
  0xb9   : > { %4255 = vmatprep.subr.bf16.mxu0 %v6213_v63  ;;  %3610 = vmatpush1.bf16.msra.mxu1 %v6216_v0  ;;  %v6281_v62 = vld [vmem:[%s6983_s5 + $0x388] ss:$72 sps:$4 sm:$0xff]   ;;  %v6329_v0 = vld [vmem:[%s8206_s1 + $0x6c4] ss:$8 sps:$4 sm:$0xff]  }
  0xba   : > { %3611 = vmatprep.subr.bf16.mxu1 %v6230_v1  ;;  %v6324_v63 = vld [vmem:[%s8206_s1 + $0x2a0] ss:$8 sps:$4 sm:$0xff]   ;;  %v6338_v1 = vld [vmem:[%s8206_s1 + $0x2b4] ss:$8 sps:$4 sm:$0xff]  }
  0xbc   : > { %4256 = vmatpush1.bf16.msra.mxu0 %v6211_v2  ;;  %v6288_v2 = vld [vmem:[%s6983_s5 + $0x3fc] ss:$72 sps:$4 sm:$0xff]  }
  0xbd   : > { %4257 = vmatprep.subr.bf16.mxu0 %v6221_v5  ;;  %3612 = vmatpush1.bf16.msra.mxu1 %v6228_v6  ;;  %v6336_v5 = vld [vmem:[%s8206_s1 + $0x2b0] ss:$8 sps:$4 sm:$0xff]   ;;  %v6341_v6 = vld [vmem:[%s8206_s1 + $0x6d4] ss:$8 sps:$4 sm:$0xff]  }
  0xbe   : > { %3491 = vmatmul.mubr.bf16.gmra.mrb[4].mxu1 %v6214_v3  ;;  %3613 = vmatprep.subr.bf16.mxu1 %v6238_v11  ;;  %v6290_v3 = vld [vmem:[%s6983_s5 + $0x41c] ss:$72 sps:$4 sm:$0xff]  }
  0xbf   : > { %4135 = vmatmul.mubr.bf16.gmra.mrb[4].mxu0 %v6215_v4  ;;  %3500 = vmatprep.mubr.bf16.mxu1 %v6222_v8  ;;  %v6327_v4 = vld [vmem:[%s8206_s1 + $0x6c0] ss:$8 sps:$4 sm:$0xff]   ;;  %v6339_v8 = vld [vmem:[%s8206_s1 + $0x6d0] ss:$8 sps:$4 sm:$0xff]   ;;  %v6353_v11 = vld [vmem:[%s8206_s1 + $0x6e4] ss:$8 sps:$4 sm:$0xff]  }
  0xc0   : > { %4258 = vmatpush1.bf16.msra.mxu0 %v6219_v7  ;;  %4144 = vmatprep.mubr.bf16.mxu0 %v6224_v9  ;;  %v6349_v7 = vld [vmem:[%s8206_s1 + $0x2c4] ss:$8 sps:$4 sm:$0xff]   ;;  %v6347_v9 = vld [vmem:[%s8206_s1 + $0x2c0] ss:$8 sps:$4 sm:$0xff]  }
  0xc1   : > { %4259 = vmatprep.subr.bf16.mxu0 %v6233_v10  ;;  %3614 = vmatpush1.bf16.msra.mxu1 %v6236_v12  ;;  %v6292_v10 = vld [vmem:[%s6983_s5 + $0x3f8] ss:$72 sps:$4 sm:$0xff]   ;;  %v6356_v12 = vld [vmem:[%s8206_s1 + $0x2d4] ss:$8 sps:$4 sm:$0xff]  }
  0xc2   : > { %3615 = vmatprep.subr.bf16.mxu1 %v6248_v14  ;;  %v6303_v14 = vld [vmem:[%s6983_s5 + $0x48c] ss:$72 sps:$4 sm:$0xff]  }
  0xc4   : > { %4260 = vmatpush1.bf16.msra.mxu0 %v6231_v13  ;;  %v6296_v13 = vld [vmem:[%s6983_s5 + $0x418] ss:$72 sps:$4 sm:$0xff]  }
  0xc5   : > { %4261 = vmatprep.subr.bf16.mxu0 %v6245_v16  ;;  %3616 = vmatpush1.bf16.msra.mxu1 %v6246_v21  ;;  %v6351_v16 = vld [vmem:[%s8206_s1 + $0x6e0] ss:$8 sps:$4 sm:$0xff]  }
  0xc6   : > { %3501 = vmatmul.mubr.bf16.gmra.mrb[8].mxu1 %v6226_v15  ;;  %3617 = vmatprep.subr.bf16.mxu1 %v6260_v23  ;;  %v6305_v15 = vld [vmem:[%s6983_s5 + $0x4ac] ss:$72 sps:$4 sm:$0xff]   ;;  %v6307_v21 = vld [vmem:[%s6983_s5 + $0x488] ss:$72 sps:$4 sm:$0xff]  }
  0xc7   : > { %4145 = vmatmul.mubr.bf16.gmra.mrb[8].mxu0 %v6227_v17  ;;  %3510 = vmatprep.mubr.bf16.mxu1 %v6234_v18  ;;  %v6354_v17 = vld [vmem:[%s8206_s1 + $0x2d0] ss:$8 sps:$4 sm:$0xff]   ;;  %v6362_v18 = vld [vmem:[%s8206_s1 + $0x2e4] ss:$8 sps:$4 sm:$0xff]   ;;  %v6369_v23 = vld [vmem:[%s8206_s1 + $0x2f4] ss:$8 sps:$4 sm:$0xff]  }
  0xc8   : > { %4154 = vmatprep.mubr.bf16.mxu0 %v6239_v19  ;;  %4262 = vmatpush1.bf16.msra.mxu0 %v6243_v20  ;;  %v6366_v19 = vld [vmem:[%s8206_s1 + $0x6f4] ss:$8 sps:$4 sm:$0xff]   ;;  %v6360_v20 = vld [vmem:[%s8206_s1 + $0x2e0] ss:$8 sps:$4 sm:$0xff]  }
  0xc9   : > { %4263 = vmatprep.subr.bf16.mxu0 %v6257_v22  ;;  %3618 = vmatpush1.bf16.msra.mxu1 %v6258_v27  ;;  %v6364_v22 = vld [vmem:[%s8206_s1 + $0x6f0] ss:$8 sps:$4 sm:$0xff]   ;;  %v6317_v27 = vld [vmem:[%s6983_s5 + $0x53c] ss:$72 sps:$4 sm:$0xff]  }
  0xca   : > { %3619 = vmatprep.subr.bf16.mxu1 %v6272_v29  ;;  %v6390_v29 = vld [vmem:[%s8206_s1 + $0x304] ss:$8 sps:$4 sm:$0xff]  }
  0xcc   : > { %4264 = vmatpush1.bf16.msra.mxu0 %v6255_v24  ;;  %v6378_v24 = vld [vmem:[%s8206_s1 + $0x704] ss:$8 sps:$4 sm:$0xff]  }
  0xcd   : > { %4265 = vmatprep.subr.bf16.mxu0 %v6267_v28  ;;  %3620 = vmatpush1.bf16.msra.mxu1 %v6270_v33  ;;  %v6367_v28 = vld [vmem:[%s8206_s1 + $0x2f0] ss:$8 sps:$4 sm:$0xff]   ;;  %v6332_v33 = vld [vmem:[%s6983_s5 + $0x5cc] ss:$72 sps:$4 sm:$0xff]  }
  0xce   : > { %3511 = vmatmul.mubr.bf16.gmra.mrb[12].mxu1 %v6241_v25  ;;  %3621 = vmatprep.subr.bf16.mxu1 %v6284_v35  ;;  %v6308_v25 = vld [vmem:[%s6983_s5 + $0x4a8] ss:$72 sps:$4 sm:$0xff]  }
  0xcf   : > { %4155 = vmatmul.mubr.bf16.gmra.mrb[12].mxu0 %v6242_v26  ;;  %3520 = vmatprep.mubr.bf16.mxu1 %v6249_v30  ;;  %v6315_v26 = vld [vmem:[%s6983_s5 + $0x51c] ss:$72 sps:$4 sm:$0xff]   ;;  %v6319_v30 = vld [vmem:[%s6983_s5 + $0x518] ss:$72 sps:$4 sm:$0xff]   ;;  %v6335_v35 = vld [vmem:[%s6983_s5 + $0x5c8] ss:$72 sps:$4 sm:$0xff]  }
  0xd0   : > { %4164 = vmatprep.mubr.bf16.mxu0 %v6251_v31  ;;  %4266 = vmatpush1.bf16.msra.mxu0 %v6265_v32  ;;  %v6320_v31 = vld [vmem:[%s6983_s5 + $0x538] ss:$72 sps:$4 sm:$0xff]   ;;  %v6330_v32 = vld [vmem:[%s6983_s5 + $0x5ac] ss:$72 sps:$4 sm:$0xff]  }
  0xd1   : > { %4267 = vmatprep.subr.bf16.mxu0 %v6275_v34  ;;  %3622 = vmatpush1.bf16.msra.mxu1 %v6282_v37  ;;  %v6334_v34 = vld [vmem:[%s6983_s5 + $0x5a8] ss:$72 sps:$4 sm:$0xff]   ;;  %v6344_v37 = vld [vmem:[%s6983_s5 + $0x65c] ss:$72 sps:$4 sm:$0xff]  }
  0xd2   : > { %3623 = vmatprep.subr.bf16.mxu1 %v6295_v40  ;;  %v6346_v40 = vld [vmem:[%s6983_s5 + $0x638] ss:$72 sps:$4 sm:$0xff]  }
  0xd4   : > { %4268 = vmatpush1.bf16.msra.mxu0 %v6273_v36  ;;  %v6342_v36 = vld [vmem:[%s6983_s5 + $0x63c] ss:$72 sps:$4 sm:$0xff]  }
  0xd5   : > { %4269 = vmatprep.subr.bf16.mxu0 %v6287_v39  ;;  %3624 = vmatpush1.bf16.msra.mxu1 %v6293_v45  ;;  %v400_v39 = vld [vmem:[%s6983_s5 + $0x6e8] sm:$0xff] }
  0xd6   : > { %3521 = vmatmul.mubr.bf16.gmra.mrb[16].mxu1 %v6253_v38  ;;  %3625 = vmatprep.subr.bf16.mxu1 %v6302_v47  ;;  %v396_v38 = vld [vmem:[%s6983_s5 + $0x6c8] sm:$0xff]  ;;  %v5128_v45 = vcombine.low %v400_v39, %v400_v39  ;;  %v6375_v47 = vld [vmem:[%s6983_s5 + $0x34] ss:$72 sps:$4 sm:$0xff]  }
  0xd7   : > { %4165 = vmatmul.mubr.bf16.gmra.mrb[16].mxu0 %v6254_v41  ;;  %3530 = vmatprep.mubr.bf16.mxu1 %v6261_v42  ;;  %v6350_v41 = vld [vmem:[%s6983_s5 + $0x658] ss:$72 sps:$4 sm:$0xff]   ;;  %v5121_v42 = vcombine.high %v396_v38, %v396_v38 }
  0xd8   : > { %4174 = vmatprep.mubr.bf16.mxu0 %v6263_v43  ;;  %4270 = vmatpush1.bf16.msra.mxu0 %v6285_v44  ;;  %v5129_v43 = vcombine.high %v400_v39, %v400_v39  ;;  %v5120_v44 = vcombine.low %v396_v38, %v396_v38  ;;  %v6469_v38 = vld [vmem:[%s8206_s1 + $0x790] ss:$8 sps:$4 sm:$0xff]   ;;  %v6472_v39 = vld [vmem:[%s8206_s1 + $0x380] ss:$8 sps:$4 sm:$0xff]  }
  0xd9   : > { %4271 = vmatprep.subr.bf16.mxu0 %v6299_v46  ;;  %3626 = vmatpush1.bf16.msra.mxu1 %v6300_v51  ;;  %v6372_v46 = vld [vmem:[%s6983_s5 + $0x14] ss:$72 sps:$4 sm:$0xff]   ;;  %v6379_v51 = vld [vmem:[%s6983_s5 + $0xa4] ss:$72 sps:$4 sm:$0xff]  }
  0xda   : > { %3627 = vmatprep.subr.bf16.mxu1 %v6314_v54  ;;  %v6388_v54 = vld [vmem:[%s8206_s1 + $0x300] ss:$8 sps:$4 sm:$0xff]  }
  0xdc   : > { %4272 = vmatpush1.bf16.msra.mxu0 %v6297_v48  ;;  %v6370_v48 = vld [vmem:[%s6983_s5 + $0x10] ss:$72 sps:$4 sm:$0xff]  }
  0xdd   : > { %4273 = vmatprep.subr.bf16.mxu0 %v6311_v53  ;;  %3628 = vmatpush1.bf16.msra.mxu1 %v6312_v57  ;;  %v6385_v53 = vld [vmem:[%s8206_s1 + $0x714] ss:$8 sps:$4 sm:$0xff]   ;;  %v6386_v57 = vld [vmem:[%s6983_s5 + $0xa0] ss:$72 sps:$4 sm:$0xff]  }
  0xde   : > { %3531 = vmatmul.mubr.bf16.gmra.mrb[20].mxu1 %v6268_v49  ;;  %3629 = vmatprep.subr.bf16.mxu1 %v6326_v59  ;;  %v6373_v49 = vld [vmem:[%s6983_s5 + $0x30] ss:$72 sps:$4 sm:$0xff]  }
  0xdf   : > { %4175 = vmatmul.mubr.bf16.gmra.mrb[20].mxu0 %v6269_v50  ;;  %3540 = vmatprep.mubr.bf16.mxu1 %v6276_v52  ;;  %v6376_v50 = vld [vmem:[%s8206_s1 + $0x700] ss:$8 sps:$4 sm:$0xff]   ;;  %v6381_v52 = vld [vmem:[%s6983_s5 + $0xc4] ss:$72 sps:$4 sm:$0xff]   ;;  %v6400_v59 = vld [vmem:[%s8206_s1 + $0x310] ss:$8 sps:$4 sm:$0xff]  }
  0xe0   : > { %4184 = vmatprep.mubr.bf16.mxu0 %v6278_v55  ;;  %4274 = vmatpush1.bf16.msra.mxu0 %v6309_v56  ;;  %v6402_v55 = vld [vmem:[%s8206_s1 + $0x314] ss:$8 sps:$4 sm:$0xff]   ;;  %v6383_v56 = vld [vmem:[%s8206_s1 + $0x710] ss:$8 sps:$4 sm:$0xff]  }
  0xe1   : > { %4275 = vmatprep.subr.bf16.mxu0 %v6323_v58  ;;  %3630 = vmatpush1.bf16.msra.mxu1 %v6324_v63  ;;  %v6393_v58 = vld [vmem:[%s8206_s1 + $0x724] ss:$8 sps:$4 sm:$0xff]   ;;  %v6396_v63 = vld [vmem:[%s6983_s5 + $0x154] ss:$72 sps:$4 sm:$0xff]  }
  0xe2   : > { %3631 = vmatprep.subr.bf16.mxu1 %v6338_v1  ;;  %v6410_v1 = vld [vmem:[%s8206_s1 + $0x324] ss:$8 sps:$4 sm:$0xff]  }
  0xe4   : > { %4276 = vmatpush1.bf16.msra.mxu0 %v6321_v60  ;;  %v6387_v60 = vld [vmem:[%s6983_s5 + $0xc0] ss:$72 sps:$4 sm:$0xff]  }
  0xe5   : > { %4277 = vmatprep.subr.bf16.mxu0 %v6329_v0  ;;  %3632 = vmatpush1.bf16.msra.mxu1 %v6336_v5  ;;  %v6405_v0 = vld [vmem:[%s8206_s1 + $0x734] ss:$8 sps:$4 sm:$0xff]   ;;  %v6398_v5 = vld [vmem:[%s6983_s5 + $0x130] ss:$72 sps:$4 sm:$0xff]  }
  0xe6   : > { %3541 = vmatmul.mubr.bf16.gmra.mrb[24].mxu1 %v6280_v61  ;;  %3633 = vmatprep.subr.bf16.mxu1 %v6349_v7  ;;  %v6391_v61 = vld [vmem:[%s8206_s1 + $0x720] ss:$8 sps:$4 sm:$0xff]   ;;  %v6399_v7 = vld [vmem:[%s6983_s5 + $0x150] ss:$72 sps:$4 sm:$0xff]  }
  0xe7   : > { %4185 = vmatmul.mubr.bf16.gmra.mrb[24].mxu0 %v6281_v62  ;;  %3550 = vmatprep.mubr.bf16.mxu1 %v6288_v2  ;;  %v6394_v62 = vld [vmem:[%s6983_s5 + $0x134] ss:$72 sps:$4 sm:$0xff]   ;;  %v6408_v2 = vld [vmem:[%s8206_s1 + $0x320] ss:$8 sps:$4 sm:$0xff]  }
  0xe8   : > { %4194 = vmatprep.mubr.bf16.mxu0 %v6290_v3  ;;  %4278 = vmatpush1.bf16.msra.mxu0 %v6327_v4  ;;  %v6403_v3 = vld [vmem:[%s8206_s1 + $0x730] ss:$8 sps:$4 sm:$0xff]   ;;  %v6420_v4 = vld [vmem:[%s8206_s1 + $0x334] ss:$8 sps:$4 sm:$0xff]  }
  0xe9   : > { %4279 = vmatprep.subr.bf16.mxu0 %v6341_v6  ;;  %3634 = vmatpush1.bf16.msra.mxu1 %v6347_v9  ;;  %v6417_v6 = vld [vmem:[%s8206_s1 + $0x744] ss:$8 sps:$4 sm:$0xff]  }
  0xea   : > { %3635 = vmatprep.subr.bf16.mxu1 %v6356_v12  ;;  %v6411_v9 = vld [vmem:[%s6983_s5 + $0x1e4] ss:$72 sps:$4 sm:$0xff]   ;;  %v6429_v12 = vld [vmem:[%s8206_s1 + $0x754] ss:$8 sps:$4 sm:$0xff]  }
  0xec   : > { %4280 = vmatpush1.bf16.msra.mxu0 %v6339_v8  ;;  %v6406_v8 = vld [vmem:[%s6983_s5 + $0x1c4] ss:$72 sps:$4 sm:$0xff]  }
  0xed   : > { %4281 = vmatprep.subr.bf16.mxu0 %v6353_v11  ;;  %3636 = vmatpush1.bf16.msra.mxu1 %v6354_v17  ;;  %v6418_v11 = vld [vmem:[%s8206_s1 + $0x330] ss:$8 sps:$4 sm:$0xff]   ;;  %v6430_v17 = vld [vmem:[%s8206_s1 + $0x340] ss:$8 sps:$4 sm:$0xff]  }
  0xee   : > { %3551 = vmatmul.mubr.bf16.gmra.mrb[28].mxu1 %v6292_v10  ;;  %3637 = vmatprep.subr.bf16.mxu1 %v6362_v18  ;;  %v6415_v10 = vld [vmem:[%s8206_s1 + $0x740] ss:$8 sps:$4 sm:$0xff]   ;;  %v6439_v18 = vld [vmem:[%s8206_s1 + $0x764] ss:$8 sps:$4 sm:$0xff]  }
  0xef   : > { %4195 = vmatmul.mubr.bf16.gmra.mrb[28].mxu0 %v6296_v13  ;;  %3560 = vmatprep.mubr.bf16.mxu1 %v6303_v14  ;;  %v6432_v13 = vld [vmem:[%s8206_s1 + $0x344] ss:$8 sps:$4 sm:$0xff]   ;;  %v6413_v14 = vld [vmem:[%s6983_s5 + $0x1c0] ss:$72 sps:$4 sm:$0xff]  }
  0xf0   : > { %4204 = vmatprep.mubr.bf16.mxu0 %v6305_v15  ;;  %4282 = vmatpush1.bf16.msra.mxu0 %v6351_v16  ;;  %v6414_v15 = vld [vmem:[%s6983_s5 + $0x1e0] ss:$72 sps:$4 sm:$0xff]   ;;  %v6427_v16 = vld [vmem:[%s8206_s1 + $0x750] ss:$8 sps:$4 sm:$0xff]  }
  0xf1   : > { %4283 = vmatprep.subr.bf16.mxu0 %v6366_v19  ;;  %3638 = vmatpush1.bf16.msra.mxu1 %v6360_v20  ;;  %v6421_v19 = vld [vmem:[%s6983_s5 + $0x254] ss:$72 sps:$4 sm:$0xff]  }
  0xf2   : > { %3639 = vmatprep.subr.bf16.mxu1 %v6369_v23  ;;  %v6444_v20 = vld [vmem:[%s8206_s1 + $0x354] ss:$8 sps:$4 sm:$0xff]   ;;  %v6442_v23 = vld [vmem:[%s8206_s1 + $0x350] ss:$8 sps:$4 sm:$0xff]  }
  0xf4   : > { %4284 = vmatpush1.bf16.msra.mxu0 %v6364_v22  ;;  %v6437_v22 = vld [vmem:[%s8206_s1 + $0x760] ss:$8 sps:$4 sm:$0xff]  }
  0xf5   : > { %4414 = vmatprep.subr.bf16.mxu0 %v6378_v24  ;;  %3640 = vmatpush1.bf16.msra.mxu1 %v6367_v28  ;;  %v6447_v24 = vld [vmem:[%s8206_s1 + $0x774] ss:$8 sps:$4 sm:$0xff]   ;;  %v6425_v28 = vld [vmem:[%s6983_s5 + $0x250] ss:$72 sps:$4 sm:$0xff]  }
  0xf6   : > { %3561 = vmatmul.mubr.bf16.gmra.mrb[32].mxu1 %v6307_v21  ;;  %3770 = vmatprep.subr.bf16.mxu1 %v6390_v29  ;;  %v6423_v21 = vld [vmem:[%s6983_s5 + $0x274] ss:$72 sps:$4 sm:$0xff]   ;;  %v6426_v29 = vld [vmem:[%s6983_s5 + $0x270] ss:$72 sps:$4 sm:$0xff]  }
  0xf7   : > { %4205 = vmatmul.mubr.bf16.gmra.mrb[32].mxu0 %v6308_v25  ;;  %3570 = vmatprep.mubr.bf16.mxu1 %v6315_v26  ;;  %v6456_v25 = vld [vmem:[%s8206_s1 + $0x364] ss:$8 sps:$4 sm:$0xff]   ;;  %v6445_v26 = vld [vmem:[%s8206_s1 + $0x770] ss:$8 sps:$4 sm:$0xff]  }
  0xf8   : > { %4214 = vmatprep.mubr.bf16.mxu0 %v6317_v27  ;;  %v6454_v27 = vld [vmem:[%s8206_s1 + $0x360] ss:$8 sps:$4 sm:$0xff]  }
  0xfe   : > { %3571 = vmatmul.mubr.bf16.gmra.mrb[36].mxu1 %v6319_v30  ;;  %v6459_v30 = vld [vmem:[%s8206_s1 + $0x784] ss:$8 sps:$4 sm:$0xff]  }
  0xff   : > { %4215 = vmatmul.mubr.bf16.gmra.mrb[36].mxu0 %v6320_v31  ;;  %3580 = vmatprep.mubr.bf16.mxu1 %v6330_v32  ;;  %v6467_v31 = vld [vmem:[%s8206_s1 + $0x374] ss:$8 sps:$4 sm:$0xff]   ;;  %v6433_v32 = vld [vmem:[%s6983_s5 + $0x2e4] ss:$72 sps:$4 sm:$0xff]  }
 0x100   : > { %4224 = vmatprep.mubr.bf16.mxu0 %v6332_v33  ;;  %v6435_v33 = vld [vmem:[%s6983_s5 + $0x304] ss:$72 sps:$4 sm:$0xff]  }
 0x106   : > { %3581 = vmatmul.mubr.bf16.gmra.mrb[40].mxu1 %v6334_v34  ;;  %v6457_v34 = vld [vmem:[%s8206_s1 + $0x780] ss:$8 sps:$4 sm:$0xff]  }
 0x107   : > { %4225 = vmatmul.mubr.bf16.gmra.mrb[40].mxu0 %v6335_v35  ;;  %3590 = vmatprep.mubr.bf16.mxu1 %v6342_v36  ;;  %v6465_v35 = vld [vmem:[%s8206_s1 + $0x370] ss:$8 sps:$4 sm:$0xff]   ;;  %v6471_v36 = vld [vmem:[%s8206_s1 + $0x794] ss:$8 sps:$4 sm:$0xff]  }
 0x108   : > { %4234 = vmatprep.mubr.bf16.mxu0 %v6344_v37  ;;  %v6474_v37 = vld [vmem:[%s8206_s1 + $0x384] ss:$8 sps:$4 sm:$0xff]  }
 0x10e   : > { %3591 = vmatmul.mubr.bf16.gmra.mrb[44].mxu1 %v6346_v40  ;;  %v6483_v40 = vld [vmem:[%s8206_s1 + $0x7a4] ss:$8 sps:$4 sm:$0xff]  }
 0x10f   : > { %4235 = vmatmul.mubr.bf16.gmra.mrb[44].mxu0 %v6350_v41  ;;  %3600 = vmatprep.mubr.bf16.mxu1 %v5121_v42  ;;  %v6486_v41 = vld [vmem:[%s8206_s1 + $0x394] ss:$8 sps:$4 sm:$0xff]   ;;  %v6440_v42 = vld [vmem:[%s6983_s5 + $0x2e0] ss:$72 sps:$4 sm:$0xff]  }
 0x110   : > { %4244 = vmatprep.mubr.bf16.mxu0 %v5129_v43  ;;  %v6441_v43 = vld [vmem:[%s6983_s5 + $0x300] ss:$72 sps:$4 sm:$0xff]  }
 0x116   : > { %3601 = vmatmul.mubr.bf16.gmra.mrb[48].mxu1 %v5120_v44  ;;  %v6448_v44 = vld [vmem:[%s6983_s5 + $0x374] ss:$72 sps:$4 sm:$0xff]  }
 0x117   : > { %4245 = vmatmul.mubr.bf16.gmra.mrb[48].mxu0 %v5128_v45  ;;  %3641 = vmatprep.mubr.bf16.mxu1 %v6372_v46  ;;  %v6450_v45 = vld [vmem:[%s6983_s5 + $0x394] ss:$72 sps:$4 sm:$0xff]   ;;  %v6481_v46 = vld [vmem:[%s8206_s1 + $0x7a0] ss:$8 sps:$4 sm:$0xff]  }
 0x118   : > { %4285 = vmatprep.mubr.bf16.mxu0 %v6375_v47  ;;  %v6484_v47 = vld [vmem:[%s8206_s1 + $0x390] ss:$8 sps:$4 sm:$0xff]  }
 0x11e   : > { %3642 = vmatmul.mubr.bf16.vlgmr.msra.gmra.mrb[0].mxu1 %v6370_v48  ;;  %v6495_v48 = vld [vmem:[%s8206_s1 + $0x7b4] ss:$8 sps:$4 sm:$0xff]  }
 0x11f   : > { %4286 = vmatmul.mubr.bf16.vlgmr.msra.gmra.mrb[0].mxu0 %v6373_v49  ;;  %3651 = vmatprep.mubr.bf16.mxu1 %v6379_v51  ;;  %v6498_v49 = vld [vmem:[%s8206_s1 + $0x3a4] ss:$8 sps:$4 sm:$0xff]   ;;  %v6496_v51 = vld [vmem:[%s8206_s1 + $0x3a0] ss:$8 sps:$4 sm:$0xff]  }
 0x120   : > { %4415 = vmatpush1.bf16.msra.mxu0 %v6376_v50  ;;  %4295 = vmatprep.mubr.bf16.mxu0 %v6381_v52  ;;  %v6493_v50 = vld [vmem:[%s8206_s1 + $0x7b0] ss:$8 sps:$4 sm:$0xff]   ;;  %v6501_v52 = vld [vmem:[%s8206_s1 + $0x7c4] ss:$8 sps:$4 sm:$0xff]  }
 0x121   : > { %4416 = vmatprep.subr.bf16.mxu0 %v6385_v53  ;;  %3771 = vmatpush1.bf16.msra.mxu1 %v6388_v54  ;;  %v6510_v53 = vld [vmem:[%s8206_s1 + $0x3b4] ss:$8 sps:$4 sm:$0xff]   ;;  %v6452_v54 = vld [vmem:[%s6983_s5 + $0x370] ss:$72 sps:$4 sm:$0xff]  }
 0x122   : > { %3772 = vmatprep.subr.bf16.mxu1 %v6402_v55  ;;  %v6453_v55 = vld [vmem:[%s6983_s5 + $0x390] ss:$72 sps:$4 sm:$0xff]  }
 0x124   : > { %4417 = vmatpush1.bf16.msra.mxu0 %v6383_v56  ;;  %v6460_v56 = vld [vmem:[%s6983_s5 + $0x404] ss:$72 sps:$4 sm:$0xff]  }
 0x125   : > { %4418 = vmatprep.subr.bf16.mxu0 %v6393_v58  ;;  %3773 = vmatpush1.bf16.msra.mxu1 %v6400_v59  ;;  %v6499_v58 = vld [vmem:[%s8206_s1 + $0x7c0] ss:$8 sps:$4 sm:$0xff]   ;;  %v6508_v59 = vld [vmem:[%s8206_s1 + $0x3b0] ss:$8 sps:$4 sm:$0xff]  }
 0x126   : > { %3652 = vmatmul.mubr.bf16.gmra.mrb[4].mxu1 %v6386_v57  ;;  %3774 = vmatprep.subr.bf16.mxu1 %v6410_v1  ;;  %v6462_v57 = vld [vmem:[%s6983_s5 + $0x424] ss:$72 sps:$4 sm:$0xff]   ;;  %v6528_v1 = vld [vmem:[%s8206_s1 + $0x3d4] ss:$8 sps:$4 sm:$0xff]  }
 0x127   : > { %4296 = vmatmul.mubr.bf16.gmra.mrb[4].mxu0 %v6387_v60  ;;  %3661 = vmatprep.mubr.bf16.mxu1 %v6394_v62  ;;  %v6513_v60 = vld [vmem:[%s8206_s1 + $0x7d4] ss:$8 sps:$4 sm:$0xff]   ;;  %v6511_v62 = vld [vmem:[%s8206_s1 + $0x7d0] ss:$8 sps:$4 sm:$0xff]  }
 0x128   : > { %4419 = vmatpush1.bf16.msra.mxu0 %v6391_v61  ;;  %4305 = vmatprep.mubr.bf16.mxu0 %v6396_v63  ;;  %v6521_v61 = vld [vmem:[%s8206_s1 + $0x3c4] ss:$8 sps:$4 sm:$0xff]   ;;  %v6519_v63 = vld [vmem:[%s8206_s1 + $0x3c0] ss:$8 sps:$4 sm:$0xff]  }
 0x129   : > { %4420 = vmatprep.subr.bf16.mxu0 %v6405_v0  ;;  %3775 = vmatpush1.bf16.msra.mxu1 %v6408_v2  ;;  %v6525_v0 = vld [vmem:[%s8206_s1 + $0x7e4] ss:$8 sps:$4 sm:$0xff]   ;;  %v6464_v2 = vld [vmem:[%s6983_s5 + $0x400] ss:$72 sps:$4 sm:$0xff]  }
 0x12a   : > { %3776 = vmatprep.subr.bf16.mxu1 %v6420_v4  ;;  %v6475_v4 = vld [vmem:[%s6983_s5 + $0x494] ss:$72 sps:$4 sm:$0xff]  }
 0x12c   : > { %4421 = vmatpush1.bf16.msra.mxu0 %v6403_v3  ;;  %v6468_v3 = vld [vmem:[%s6983_s5 + $0x420] ss:$72 sps:$4 sm:$0xff]  }
 0x12d   : > { %4422 = vmatprep.subr.bf16.mxu0 %v6417_v6  ;;  %3777 = vmatpush1.bf16.msra.mxu1 %v6418_v11  ;;  %v6523_v6 = vld [vmem:[%s8206_s1 + $0x7e0] ss:$8 sps:$4 sm:$0xff]   ;;  %v6536_v11 = vld [vmem:[%s8206_s1 + $0x7f0] ss:$8 sps:$4 sm:$0xff]  }
 0x12e   : > { %3662 = vmatmul.mubr.bf16.gmra.mrb[8].mxu1 %v6398_v5  ;;  %3778 = vmatprep.subr.bf16.mxu1 %v6432_v13  ;;  %v6477_v5 = vld [vmem:[%s6983_s5 + $0x4b4] ss:$72 sps:$4 sm:$0xff]   ;;  %v6550_v13 = vld [vmem:[%s8206_s1 + $0x804] ss:$8 sps:$4 sm:$0xff]  }
 0x12f   : > { %4306 = vmatmul.mubr.bf16.gmra.mrb[8].mxu0 %v6399_v7  ;;  %3671 = vmatprep.mubr.bf16.mxu1 %v6406_v8  ;;  %v6526_v7 = vld [vmem:[%s8206_s1 + $0x3d0] ss:$8 sps:$4 sm:$0xff]   ;;  %v6534_v8 = vld [vmem:[%s8206_s1 + $0x3e4] ss:$8 sps:$4 sm:$0xff]  }
 0x130   : > { %4315 = vmatprep.mubr.bf16.mxu0 %v6411_v9  ;;  %4423 = vmatpush1.bf16.msra.mxu0 %v6415_v10  ;;  %v6538_v9 = vld [vmem:[%s8206_s1 + $0x7f4] ss:$8 sps:$4 sm:$0xff]   ;;  %v6532_v10 = vld [vmem:[%s8206_s1 + $0x3e0] ss:$8 sps:$4 sm:$0xff]  }
 0x131   : > { %4424 = vmatprep.subr.bf16.mxu0 %v6429_v12  ;;  %3779 = vmatpush1.bf16.msra.mxu1 %v6430_v17  ;;  %v6541_v12 = vld [vmem:[%s8206_s1 + $0x3f4] ss:$8 sps:$4 sm:$0xff]   ;;  %v6489_v17 = vld [vmem:[%s6983_s5 + $0x544] ss:$72 sps:$4 sm:$0xff]  }
 0x132   : > { %3780 = vmatprep.subr.bf16.mxu1 %v6444_v20  ;;  %v6492_v20 = vld [vmem:[%s6983_s5 + $0x540] ss:$72 sps:$4 sm:$0xff]  }
 0x134   : > { %4425 = vmatpush1.bf16.msra.mxu0 %v6427_v16  ;;  %v6487_v16 = vld [vmem:[%s6983_s5 + $0x524] ss:$72 sps:$4 sm:$0xff]  }
 0x135   : > { %4426 = vmatprep.subr.bf16.mxu0 %v6439_v18  ;;  %3781 = vmatpush1.bf16.msra.mxu1 %v6442_v23  ;;  %v6539_v18 = vld [vmem:[%s8206_s1 + $0x3f0] ss:$8 sps:$4 sm:$0xff]  }
 0x136   : > { %3672 = vmatmul.mubr.bf16.gmra.mrb[12].mxu1 %v6413_v14  ;;  %3782 = vmatprep.subr.bf16.mxu1 %v6456_v25  ;;  %v6479_v14 = vld [vmem:[%s6983_s5 + $0x490] ss:$72 sps:$4 sm:$0xff]   ;;  %v6514_v25 = vld [vmem:[%s6983_s5 + $0x644] ss:$72 sps:$4 sm:$0xff]  }
 0x137   : > { %4316 = vmatmul.mubr.bf16.gmra.mrb[12].mxu0 %v6414_v15  ;;  %3681 = vmatprep.mubr.bf16.mxu1 %v6421_v19  ;;  %v6480_v15 = vld [vmem:[%s6983_s5 + $0x4b0] ss:$72 sps:$4 sm:$0xff]   ;;  %v6491_v19 = vld [vmem:[%s6983_s5 + $0x520] ss:$72 sps:$4 sm:$0xff]  }
 0x138   : > { %4325 = vmatprep.mubr.bf16.mxu0 %v6423_v21  ;;  %4427 = vmatpush1.bf16.msra.mxu0 %v6437_v22  ;;  %v6502_v21 = vld [vmem:[%s6983_s5 + $0x5b4] ss:$72 sps:$4 sm:$0xff]   ;;  %v6506_v23 = vld [vmem:[%s6983_s5 + $0x5b0] ss:$72 sps:$4 sm:$0xff]  }
 0x139   : > { %4428 = vmatprep.subr.bf16.mxu0 %v6447_v24  ;;  %3783 = vmatpush1.bf16.msra.mxu1 %v6454_v27  ;;  %v6504_v22 = vld [vmem:[%s6983_s5 + $0x5d4] ss:$72 sps:$4 sm:$0xff]   ;;  %v6507_v24 = vld [vmem:[%s6983_s5 + $0x5d0] ss:$72 sps:$4 sm:$0xff]  }
 0x13a   : > { %3784 = vmatprep.subr.bf16.mxu1 %v6467_v31  ;;  %v397_v27 = vld [vmem:[%s6983_s5 + $0x6d0] sm:$0xff] }
 0x13b   : > { %v5123_v31 = vcombine.high %v397_v27, %v397_v27 }
 0x13c   : > { %4429 = vmatpush1.bf16.msra.mxu0 %v6445_v26  ;;  %v6516_v26 = vld [vmem:[%s6983_s5 + $0x664] ss:$72 sps:$4 sm:$0xff]  }
 0x13d   : > { %4430 = vmatprep.subr.bf16.mxu0 %v6459_v30  ;;  %3785 = vmatpush1.bf16.msra.mxu1 %v6465_v35  ;;  %v6522_v30 = vld [vmem:[%s6983_s5 + $0x660] ss:$72 sps:$4 sm:$0xff]   ;;  %v6544_v35 = vld [vmem:[%s6983_s5 + $0x1c] ss:$72 sps:$4 sm:$0xff]  }
 0x13e   : > { %3682 = vmatmul.mubr.bf16.gmra.mrb[16].mxu1 %v6425_v28  ;;  %3786 = vmatprep.subr.bf16.mxu1 %v6474_v37  ;;  %v401_v28 = vld [vmem:[%s6983_s5 + $0x6f0] sm:$0xff]  ;;  %v6542_v37 = vld [vmem:[%s6983_s5 + $0x18] ss:$72 sps:$4 sm:$0xff]  }
 0x13f   : > { %4326 = vmatmul.mubr.bf16.gmra.mrb[16].mxu0 %v6426_v29  ;;  %3691 = vmatprep.mubr.bf16.mxu1 %v6433_v32  ;;  %v6518_v29 = vld [vmem:[%s6983_s5 + $0x640] ss:$72 sps:$4 sm:$0xff]   ;;  %v5131_v32 = vcombine.high %v401_v28, %v401_v28 }
 0x140   : > { %4335 = vmatprep.mubr.bf16.mxu0 %v6435_v33  ;;  %4431 = vmatpush1.bf16.msra.mxu0 %v6457_v34  ;;  %v5122_v33 = vcombine.low %v397_v27, %v397_v27  ;;  %v5130_v34 = vcombine.low %v401_v28, %v401_v28  ;;  %v6647_v27 = vld [vmem:[%s8206_s1 + $0x8d0] ss:$8 sps:$4 sm:$0xff]   ;;  %v6658_v28 = vld [vmem:[%s8206_s1 + $0x8e4] ss:$8 sps:$4 sm:$0xff]  }
 0x141   : > { %4432 = vmatprep.subr.bf16.mxu0 %v6471_v36  ;;  %3787 = vmatpush1.bf16.msra.mxu1 %v6472_v39  ;;  %v6547_v36 = vld [vmem:[%s6983_s5 + $0x3c] ss:$72 sps:$4 sm:$0xff]   ;;  %v6548_v39 = vld [vmem:[%s8206_s1 + $0x800] ss:$8 sps:$4 sm:$0xff]  }
 0x142   : > { %3788 = vmatprep.subr.bf16.mxu1 %v6486_v41  ;;  %v6553_v41 = vld [vmem:[%s6983_s5 + $0xcc] ss:$72 sps:$4 sm:$0xff]  }
 0x144   : > { %4433 = vmatpush1.bf16.msra.mxu0 %v6469_v38  ;;  %v6545_v38 = vld [vmem:[%s6983_s5 + $0x38] ss:$72 sps:$4 sm:$0xff]  }
 0x145   : > { %4434 = vmatprep.subr.bf16.mxu0 %v6483_v40  ;;  %3789 = vmatpush1.bf16.msra.mxu1 %v6484_v47  ;;  %v6551_v40 = vld [vmem:[%s6983_s5 + $0xac] ss:$72 sps:$4 sm:$0xff]   ;;  %v6560_v47 = vld [vmem:[%s8206_s1 + $0x820] ss:$8 sps:$4 sm:$0xff]  }
 0x146   : > { %3692 = vmatmul.mubr.bf16.gmra.mrb[20].mxu1 %v6440_v42  ;;  %3790 = vmatprep.subr.bf16.mxu1 %v6498_v49  ;;  %v6557_v42 = vld [vmem:[%s8206_s1 + $0x814] ss:$8 sps:$4 sm:$0xff]  }
 0x147   : > { %4336 = vmatmul.mubr.bf16.gmra.mrb[20].mxu0 %v6441_v43  ;;  %3701 = vmatprep.mubr.bf16.mxu1 %v6448_v44  ;;  %v6555_v43 = vld [vmem:[%s8206_s1 + $0x810] ss:$8 sps:$4 sm:$0xff]   ;;  %v6562_v44 = vld [vmem:[%s8206_s1 + $0x824] ss:$8 sps:$4 sm:$0xff]  }
 0x148   : > { %4345 = vmatprep.mubr.bf16.mxu0 %v6450_v45  ;;  %4435 = vmatpush1.bf16.msra.mxu0 %v6481_v46  ;;  %v6558_v45 = vld [vmem:[%s6983_s5 + $0xa8] ss:$72 sps:$4 sm:$0xff]   ;;  %v6565_v49 = vld [vmem:[%s6983_s5 + $0x15c] ss:$72 sps:$4 sm:$0xff]  }
 0x149   : > { %4436 = vmatprep.subr.bf16.mxu0 %v6495_v48  ;;  %3791 = vmatpush1.bf16.msra.mxu1 %v6496_v51  ;;  %v6559_v46 = vld [vmem:[%s6983_s5 + $0xc8] ss:$72 sps:$4 sm:$0xff]   ;;  %v6563_v48 = vld [vmem:[%s6983_s5 + $0x13c] ss:$72 sps:$4 sm:$0xff]  }
 0x14a   : > { %3792 = vmatprep.subr.bf16.mxu1 %v6510_v53  ;;  %v6569_v51 = vld [vmem:[%s8206_s1 + $0x830] ss:$8 sps:$4 sm:$0xff]  }
 0x14b   : > { %v6567_v53 = vld [vmem:[%s6983_s5 + $0x138] ss:$72 sps:$4 sm:$0xff]  }
 0x14c   : > { %4437 = vmatpush1.bf16.msra.mxu0 %v6493_v50  ;;  %v6571_v50 = vld [vmem:[%s8206_s1 + $0x834] ss:$8 sps:$4 sm:$0xff]  }
 0x14d   : > { %4438 = vmatprep.subr.bf16.mxu0 %v6501_v52  ;;  %3793 = vmatpush1.bf16.msra.mxu1 %v6508_v59  ;;  %v6580_v52 = vld [vmem:[%s8206_s1 + $0x844] ss:$8 sps:$4 sm:$0xff]   ;;  %v6587_v59 = vld [vmem:[%s8206_s1 + $0x850] ss:$8 sps:$4 sm:$0xff]  }
 0x14e   : > { %3702 = vmatmul.mubr.bf16.gmra.mrb[24].mxu1 %v6452_v54  ;;  %3794 = vmatprep.subr.bf16.mxu1 %v6521_v61  ;;  %v6568_v54 = vld [vmem:[%s6983_s5 + $0x158] ss:$72 sps:$4 sm:$0xff]   ;;  %v6576_v61 = vld [vmem:[%s6983_s5 + $0x1c8] ss:$72 sps:$4 sm:$0xff]  }
 0x14f   : > { %4346 = vmatmul.mubr.bf16.gmra.mrb[24].mxu0 %v6453_v55  ;;  %3711 = vmatprep.mubr.bf16.mxu1 %v6460_v56  ;;  %v6572_v55 = vld [vmem:[%s6983_s5 + $0x1cc] ss:$72 sps:$4 sm:$0xff]  }
 0x150   : > { %4355 = vmatprep.mubr.bf16.mxu0 %v6462_v57  ;;  %4439 = vmatpush1.bf16.msra.mxu0 %v6499_v58  ;;  %v6574_v56 = vld [vmem:[%s6983_s5 + $0x1ec] ss:$72 sps:$4 sm:$0xff]   ;;  %v6578_v57 = vld [vmem:[%s8206_s1 + $0x840] ss:$8 sps:$4 sm:$0xff]  }
 0x151   : > { %4440 = vmatprep.subr.bf16.mxu0 %v6513_v60  ;;  %3795 = vmatpush1.bf16.msra.mxu1 %v6519_v63  ;;  %v6589_v58 = vld [vmem:[%s8206_s1 + $0x854] ss:$8 sps:$4 sm:$0xff]   ;;  %v6596_v60 = vld [vmem:[%s8206_s1 + $0x864] ss:$8 sps:$4 sm:$0xff]  }
 0x152   : > { %3796 = vmatprep.subr.bf16.mxu1 %v6528_v1  ;;  %v6581_v63 = vld [vmem:[%s6983_s5 + $0x25c] ss:$72 sps:$4 sm:$0xff]   ;;  %v6594_v1 = vld [vmem:[%s8206_s1 + $0x860] ss:$8 sps:$4 sm:$0xff]  }
 0x154   : > { %4441 = vmatpush1.bf16.msra.mxu0 %v6511_v62  ;;  %v6577_v62 = vld [vmem:[%s6983_s5 + $0x1e8] ss:$72 sps:$4 sm:$0xff]  }
 0x155   : > { %4442 = vmatprep.subr.bf16.mxu0 %v6525_v0  ;;  %3797 = vmatpush1.bf16.msra.mxu1 %v6526_v7  ;;  %v6583_v0 = vld [vmem:[%s6983_s5 + $0x27c] ss:$72 sps:$4 sm:$0xff]   ;;  %v6590_v7 = vld [vmem:[%s6983_s5 + $0x2ec] ss:$72 sps:$4 sm:$0xff]  }
 0x156   : > { %3712 = vmatmul.mubr.bf16.gmra.mrb[28].mxu1 %v6464_v2  ;;  %3798 = vmatprep.subr.bf16.mxu1 %v6534_v8  ;;  %v6601_v2 = vld [vmem:[%s8206_s1 + $0x874] ss:$8 sps:$4 sm:$0xff]  }
 0x157   : > { %4356 = vmatmul.mubr.bf16.gmra.mrb[28].mxu0 %v6468_v3  ;;  %3721 = vmatprep.mubr.bf16.mxu1 %v6475_v4  ;;  %v6599_v3 = vld [vmem:[%s8206_s1 + $0x870] ss:$8 sps:$4 sm:$0xff]   ;;  %v6610_v4 = vld [vmem:[%s8206_s1 + $0x884] ss:$8 sps:$4 sm:$0xff]  }
 0x158   : > { %4365 = vmatprep.mubr.bf16.mxu0 %v6477_v5  ;;  %4443 = vmatpush1.bf16.msra.mxu0 %v6523_v6  ;;  %v6585_v5 = vld [vmem:[%s6983_s5 + $0x258] ss:$72 sps:$4 sm:$0xff]   ;;  %v6592_v8 = vld [vmem:[%s6983_s5 + $0x30c] ss:$72 sps:$4 sm:$0xff]  }
 0x159   : > { %4444 = vmatprep.subr.bf16.mxu0 %v6538_v9  ;;  %3799 = vmatpush1.bf16.msra.mxu1 %v6532_v10  ;;  %v6586_v6 = vld [vmem:[%s6983_s5 + $0x278] ss:$72 sps:$4 sm:$0xff]   ;;  %v6619_v10 = vld [vmem:[%s8206_s1 + $0x894] ss:$8 sps:$4 sm:$0xff]  }
 0x15a   : > { %3800 = vmatprep.subr.bf16.mxu1 %v6541_v12  ;;  %v6608_v9 = vld [vmem:[%s8206_s1 + $0x880] ss:$8 sps:$4 sm:$0xff]   ;;  %v6628_v12 = vld [vmem:[%s8206_s1 + $0x8a4] ss:$8 sps:$4 sm:$0xff]  }
 0x15c   : > { %4445 = vmatpush1.bf16.msra.mxu0 %v6536_v11  ;;  %v6617_v11 = vld [vmem:[%s8206_s1 + $0x890] ss:$8 sps:$4 sm:$0xff]  }
 0x15d   : > { %4575 = vmatprep.subr.bf16.mxu0 %v6550_v13  ;;  %3801 = vmatpush1.bf16.msra.mxu1 %v6539_v18  ;;  %v6637_v18 = vld [vmem:[%s8206_s1 + $0x8b4] ss:$8 sps:$4 sm:$0xff]  }
 0x15e   : > { %3722 = vmatmul.mubr.bf16.gmra.mrb[32].mxu1 %v6479_v14  ;;  %5427 = vmatprep.subr.bf16.mxu1 %v6550_v13  ;;  %v6597_v13 = vld [vmem:[%s6983_s5 + $0x2e8] ss:$72 sps:$4 sm:$0xff]  }
 0x15f   : > { %4366 = vmatmul.mubr.bf16.gmra.mrb[32].mxu0 %v6480_v15  ;;  %3731 = vmatprep.mubr.bf16.mxu1 %v6487_v16  ;;  %v6598_v14 = vld [vmem:[%s6983_s5 + $0x308] ss:$72 sps:$4 sm:$0xff]   ;;  %v6602_v15 = vld [vmem:[%s6983_s5 + $0x37c] ss:$72 sps:$4 sm:$0xff]  }
 0x160   : > { %4375 = vmatprep.mubr.bf16.mxu0 %v6489_v17  ;;  %v6604_v16 = vld [vmem:[%s6983_s5 + $0x39c] ss:$72 sps:$4 sm:$0xff]   ;;  %v6626_v17 = vld [vmem:[%s8206_s1 + $0x8a0] ss:$8 sps:$4 sm:$0xff]  }
 0x166   : > { %3732 = vmatmul.mubr.bf16.gmra.mrb[36].mxu1 %v6491_v19  ;;  %v6635_v19 = vld [vmem:[%s8206_s1 + $0x8b0] ss:$8 sps:$4 sm:$0xff]  }
 0x167   : > { %4376 = vmatmul.mubr.bf16.gmra.mrb[36].mxu0 %v6492_v20  ;;  %3741 = vmatprep.mubr.bf16.mxu1 %v6502_v21  ;;  %v6640_v20 = vld [vmem:[%s8206_s1 + $0x8c4] ss:$8 sps:$4 sm:$0xff]   ;;  %v6606_v21 = vld [vmem:[%s6983_s5 + $0x378] ss:$72 sps:$4 sm:$0xff]  }
 0x168   : > { %4385 = vmatprep.mubr.bf16.mxu0 %v6504_v22  ;;  %v6607_v22 = vld [vmem:[%s6983_s5 + $0x398] ss:$72 sps:$4 sm:$0xff]  }
 0x16e   : > { %3742 = vmatmul.mubr.bf16.gmra.mrb[40].mxu1 %v6506_v23  ;;  %v6611_v23 = vld [vmem:[%s6983_s5 + $0x40c] ss:$72 sps:$4 sm:$0xff]  }
 0x16f   : > { %4386 = vmatmul.mubr.bf16.gmra.mrb[40].mxu0 %v6507_v24  ;;  %3751 = vmatprep.mubr.bf16.mxu1 %v6514_v25  ;;  %v6613_v24 = vld [vmem:[%s6983_s5 + $0x42c] ss:$72 sps:$4 sm:$0xff]   ;;  %v6638_v25 = vld [vmem:[%s8206_s1 + $0x8c0] ss:$8 sps:$4 sm:$0xff]  }
 0x170   : > { %4395 = vmatprep.mubr.bf16.mxu0 %v6516_v26  ;;  %v6649_v26 = vld [vmem:[%s8206_s1 + $0x8d4] ss:$8 sps:$4 sm:$0xff]  }
 0x176   : > { %3752 = vmatmul.mubr.bf16.gmra.mrb[44].mxu1 %v6518_v29  ;;  %v6615_v29 = vld [vmem:[%s6983_s5 + $0x408] ss:$72 sps:$4 sm:$0xff]  }
 0x177   : > { %4396 = vmatmul.mubr.bf16.gmra.mrb[44].mxu0 %v6522_v30  ;;  %3761 = vmatprep.mubr.bf16.mxu1 %v5123_v31  ;;  %v6616_v30 = vld [vmem:[%s6983_s5 + $0x428] ss:$72 sps:$4 sm:$0xff]   ;;  %v6620_v31 = vld [vmem:[%s6983_s5 + $0x49c] ss:$72 sps:$4 sm:$0xff]  }
 0x178   : > { %4405 = vmatprep.mubr.bf16.mxu0 %v5131_v32  ;;  %v6622_v32 = vld [vmem:[%s6983_s5 + $0x4bc] ss:$72 sps:$4 sm:$0xff]  }
 0x17e   : > { %3762 = vmatmul.mubr.bf16.gmra.mrb[48].mxu1 %v5122_v33  ;;  %v6656_v33 = vld [vmem:[%s8206_s1 + $0x8e0] ss:$8 sps:$4 sm:$0xff]  }
 0x17f   : > { %4406 = vmatmul.mubr.bf16.gmra.mrb[48].mxu0 %v5130_v34  ;;  %3802 = vmatprep.mubr.bf16.mxu1 %v6544_v35  ;;  %v6665_v34 = vld [vmem:[%s8206_s1 + $0x8f4] ss:$8 sps:$4 sm:$0xff]   ;;  %v6663_v35 = vld [vmem:[%s8206_s1 + $0x8f0] ss:$8 sps:$4 sm:$0xff]  }
 0x180   : > { %4446 = vmatprep.mubr.bf16.mxu0 %v6547_v36  ;;  %v6624_v36 = vld [vmem:[%s6983_s5 + $0x498] ss:$72 sps:$4 sm:$0xff]  }
 0x186   : > { %3803 = vmatmul.mubr.bf16.vlgmr.msra.gmra.mrb[0].mxu1 %v6542_v37  ;;  %v6625_v37 = vld [vmem:[%s6983_s5 + $0x4b8] ss:$72 sps:$4 sm:$0xff]  }
 0x187   : > { %4447 = vmatmul.mubr.bf16.vlgmr.msra.gmra.mrb[0].mxu0 %v6545_v38  ;;  %3812 = vmatprep.mubr.bf16.mxu1 %v6551_v40  ;;  %v6629_v38 = vld [vmem:[%s6983_s5 + $0x52c] ss:$72 sps:$4 sm:$0xff]   ;;  %v6633_v40 = vld [vmem:[%s6983_s5 + $0x528] ss:$72 sps:$4 sm:$0xff]  }
 0x188   : > { %4576 = vmatpush1.bf16.msra.mxu0 %v6548_v39  ;;  %4456 = vmatprep.mubr.bf16.mxu0 %v6553_v41  ;;  %v6634_v41 = vld [vmem:[%s6983_s5 + $0x548] ss:$72 sps:$4 sm:$0xff]  }
 0x189   : > { %4577 = vmatprep.subr.bf16.mxu0 %v6557_v42  ;;  %5443 = vmatpush1.bf16.msra.mxu1 %v6548_v39  ;;  %v6631_v39 = vld [vmem:[%s6983_s5 + $0x54c] ss:$72 sps:$4 sm:$0xff]  }
 0x18a   : > { %5428 = vmatprep.subr.bf16.mxu1 %v6557_v42  ;;  %v6641_v42 = vld [vmem:[%s6983_s5 + $0x5bc] ss:$72 sps:$4 sm:$0xff]  }
 0x18c   : > { %4578 = vmatpush1.bf16.msra.mxu0 %v6555_v43 }
 0x18d   : > { %4579 = vmatprep.subr.bf16.mxu0 %v6562_v44  ;;  %5444 = vmatpush1.bf16.msra.mxu1 %v6555_v43  ;;  %v6643_v43 = vld [vmem:[%s6983_s5 + $0x5dc] ss:$72 sps:$4 sm:$0xff]  }
 0x18e   : > { %3813 = vmatmul.mubr.bf16.gmra.mrb[4].mxu1 %v6558_v45  ;;  %5429 = vmatprep.subr.bf16.mxu1 %v6562_v44  ;;  %v6645_v44 = vld [vmem:[%s6983_s5 + $0x5b8] ss:$72 sps:$4 sm:$0xff]  }
 0x18f   : > { %4457 = vmatmul.mubr.bf16.gmra.mrb[4].mxu0 %v6559_v46  ;;  %3822 = vmatprep.mubr.bf16.mxu1 %v6563_v48  ;;  %v6646_v45 = vld [vmem:[%s6983_s5 + $0x5d8] ss:$72 sps:$4 sm:$0xff]   ;;  %v6650_v46 = vld [vmem:[%s6983_s5 + $0x64c] ss:$72 sps:$4 sm:$0xff]  }
 0x190   : > { %4580 = vmatpush1.bf16.msra.mxu0 %v6560_v47  ;;  %4466 = vmatprep.mubr.bf16.mxu0 %v6565_v49  ;;  %v398_v48 = vld [vmem:[%s6983_s5 + $0x6d8] sm:$0xff] }
 0x191   : > { %4581 = vmatprep.subr.bf16.mxu0 %v6571_v50  ;;  %5445 = vmatpush1.bf16.msra.mxu1 %v6560_v47  ;;  %v6652_v47 = vld [vmem:[%s6983_s5 + $0x66c] ss:$72 sps:$4 sm:$0xff]   ;;  %v402_v49 = vld [vmem:[%s6983_s5 + $0x6f8] sm:$0xff] }
 0x192   : > { %5430 = vmatprep.subr.bf16.mxu1 %v6571_v50  ;;  %v6654_v50 = vld [vmem:[%s6983_s5 + $0x648] ss:$72 sps:$4 sm:$0xff]  }
 0x194   : > { %4582 = vmatpush1.bf16.msra.mxu0 %v6569_v51 }
 0x195   : > { %4583 = vmatprep.subr.bf16.mxu0 %v6580_v52  ;;  %5446 = vmatpush1.bf16.msra.mxu1 %v6569_v51  ;;  %v6655_v51 = vld [vmem:[%s6983_s5 + $0x668] ss:$72 sps:$4 sm:$0xff]  }
 0x196   : > { %3823 = vmatmul.mubr.bf16.gmra.mrb[8].mxu1 %v6567_v53  ;;  %5431 = vmatprep.subr.bf16.mxu1 %v6580_v52  ;;  %v5125_v52 = vcombine.high %v398_v48, %v398_v48  ;;  %v5133_v53 = vcombine.high %v402_v49, %v402_v49 }
 0x197   : > { %4467 = vmatmul.mubr.bf16.gmra.mrb[8].mxu0 %v6568_v54  ;;  %3832 = vmatprep.mubr.bf16.mxu1 %v6572_v55  ;;  %v5124_v54 = vcombine.low %v398_v48, %v398_v48  ;;  %v5132_v55 = vcombine.low %v402_v49, %v402_v49 }
 0x198   : > { %4476 = vmatprep.mubr.bf16.mxu0 %v6574_v56  ;;  %4584 = vmatpush1.bf16.msra.mxu0 %v6578_v57  ;;  %v6668_v56 = vld [vmem:[%s6983_s5 + $0x44] ss:$72 sps:$4 sm:$0xff]  }
 0x199   : > { %4585 = vmatprep.subr.bf16.mxu0 %v6589_v58  ;;  %5447 = vmatpush1.bf16.msra.mxu1 %v6578_v57  ;;  %v6671_v57 = vld [vmem:[%s6983_s5 + $0x434] ss:$72 sps:$4 sm:$0xff]  }
 0x19a   : > { %5432 = vmatprep.subr.bf16.mxu1 %v6589_v58  ;;  %v6666_v58 = vld [vmem:[%s6983_s5 + $0x40] ss:$72 sps:$4 sm:$0xff]  }
 0x19c   : > { %4586 = vmatpush1.bf16.msra.mxu0 %v6587_v59 }
 0x19d   : > { %4587 = vmatprep.subr.bf16.mxu0 %v6596_v60  ;;  %5448 = vmatpush1.bf16.msra.mxu1 %v6587_v59  ;;  %v6669_v59 = vld [vmem:[%s6983_s5 + $0x430] ss:$72 sps:$4 sm:$0xff]  }
 0x19e   : > { %3833 = vmatmul.mubr.bf16.gmra.mrb[12].mxu1 %v6576_v61  ;;  %5433 = vmatprep.subr.bf16.mxu1 %v6596_v60  ;;  %v6672_v60 = vld [vmem:[%s6983_s5 + $0xd4] ss:$72 sps:$4 sm:$0xff]   ;;  %v6674_v61 = vld [vmem:[%s6983_s5 + $0x4c4] ss:$72 sps:$4 sm:$0xff]  }
 0x19f   : > { %4477 = vmatmul.mubr.bf16.gmra.mrb[12].mxu0 %v6577_v62  ;;  %3842 = vmatprep.mubr.bf16.mxu1 %v6581_v63  ;;  %v6676_v62 = vld [vmem:[%s6983_s5 + $0xd0] ss:$72 sps:$4 sm:$0xff]   ;;  %v6677_v63 = vld [vmem:[%s6983_s5 + $0x4c0] ss:$72 sps:$4 sm:$0xff]  }
 0x1a0   : > { %4486 = vmatprep.mubr.bf16.mxu0 %v6583_v0  ;;  %4588 = vmatpush1.bf16.msra.mxu0 %v6594_v1  ;;  %v6678_v0 = vld [vmem:[%s6983_s5 + $0x164] ss:$72 sps:$4 sm:$0xff]  }
 0x1a1   : > { %4589 = vmatprep.subr.bf16.mxu0 %v6601_v2  ;;  %5449 = vmatpush1.bf16.msra.mxu1 %v6594_v1  ;;  %v6680_v1 = vld [vmem:[%s6983_s5 + $0x554] ss:$72 sps:$4 sm:$0xff]  }
 0x1a2   : > { %5434 = vmatprep.subr.bf16.mxu1 %v6601_v2  ;;  %v6682_v2 = vld [vmem:[%s6983_s5 + $0x160] ss:$72 sps:$4 sm:$0xff]  }
 0x1a4   : > { %4590 = vmatpush1.bf16.msra.mxu0 %v6599_v3 }
 0x1a5   : > { %4591 = vmatprep.subr.bf16.mxu0 %v6610_v4  ;;  %5450 = vmatpush1.bf16.msra.mxu1 %v6599_v3  ;;  %v6683_v3 = vld [vmem:[%s6983_s5 + $0x550] ss:$72 sps:$4 sm:$0xff]  }
 0x1a6   : > { %3843 = vmatmul.mubr.bf16.gmra.mrb[16].mxu1 %v6585_v5  ;;  %5435 = vmatprep.subr.bf16.mxu1 %v6610_v4  ;;  %v6684_v4 = vld [vmem:[%s6983_s5 + $0x1f4] ss:$72 sps:$4 sm:$0xff]   ;;  %v6686_v5 = vld [vmem:[%s6983_s5 + $0x5e4] ss:$72 sps:$4 sm:$0xff]  }
 0x1a7   : > { %4487 = vmatmul.mubr.bf16.gmra.mrb[16].mxu0 %v6586_v6  ;;  %3852 = vmatprep.mubr.bf16.mxu1 %v6590_v7  ;;  %v6688_v6 = vld [vmem:[%s6983_s5 + $0x1f0] ss:$72 sps:$4 sm:$0xff]   ;;  %v6689_v7 = vld [vmem:[%s6983_s5 + $0x5e0] ss:$72 sps:$4 sm:$0xff]  }
 0x1a8   : > { %4496 = vmatprep.mubr.bf16.mxu0 %v6592_v8  ;;  %4592 = vmatpush1.bf16.msra.mxu0 %v6608_v9  ;;  %v6690_v8 = vld [vmem:[%s6983_s5 + $0x284] ss:$72 sps:$4 sm:$0xff]  }
 0x1a9   : > { %4593 = vmatprep.subr.bf16.mxu0 %v6619_v10  ;;  %5451 = vmatpush1.bf16.msra.mxu1 %v6608_v9  ;;  %v6692_v9 = vld [vmem:[%s6983_s5 + $0x674] ss:$72 sps:$4 sm:$0xff]  }
 0x1aa   : > { %5436 = vmatprep.subr.bf16.mxu1 %v6619_v10  ;;  %v403_v10 = vld [vmem:[%s6983_s5 + $0x700] sm:$0xff] }
 0x1ac   : > { %4594 = vmatpush1.bf16.msra.mxu0 %v6617_v11 }
 0x1ad   : > { %4595 = vmatprep.subr.bf16.mxu0 %v6628_v12  ;;  %5452 = vmatpush1.bf16.msra.mxu1 %v6617_v11  ;;  %v6694_v11 = vld [vmem:[%s6983_s5 + $0x280] ss:$72 sps:$4 sm:$0xff]  }
 0x1ae   : > { %3853 = vmatmul.mubr.bf16.gmra.mrb[20].mxu1 %v6597_v13  ;;  %5437 = vmatprep.subr.bf16.mxu1 %v6628_v12  ;;  %v6695_v12 = vld [vmem:[%s6983_s5 + $0x670] ss:$72 sps:$4 sm:$0xff]   ;;  %v6696_v13 = vld [vmem:[%s6983_s5 + $0x314] ss:$72 sps:$4 sm:$0xff]  }
 0x1af   : > { %4497 = vmatmul.mubr.bf16.gmra.mrb[20].mxu0 %v6598_v14  ;;  %3862 = vmatprep.mubr.bf16.mxu1 %v6602_v15  ;;  %v5135_v14 = vcombine.high %v403_v10, %v403_v10  ;;  %v6699_v15 = vld [vmem:[%s6983_s5 + $0x310] ss:$72 sps:$4 sm:$0xff]  }
 0x1b0   : > { %4506 = vmatprep.mubr.bf16.mxu0 %v6604_v16  ;;  %4596 = vmatpush1.bf16.msra.mxu0 %v6626_v17  ;;  %v5134_v16 = vcombine.low %v403_v10, %v403_v10 }
 0x1b1   : > { %4597 = vmatprep.subr.bf16.mxu0 %v6637_v18  ;;  %5453 = vmatpush1.bf16.msra.mxu1 %v6626_v17  ;;  %v6701_v17 = vld [vmem:[%s6983_s5 + $0x3a4] ss:$72 sps:$4 sm:$0xff]  }
 0x1b2   : > { %5438 = vmatprep.subr.bf16.mxu1 %v6637_v18  ;;  %v6703_v18 = vld [vmem:[%s6983_s5 + $0x3a0] ss:$72 sps:$4 sm:$0xff]  }
 0x1b4   : > { %4598 = vmatpush1.bf16.msra.mxu0 %v6635_v19 }
 0x1b5   : > { %4599 = vmatprep.subr.bf16.mxu0 %v6640_v20  ;;  %5454 = vmatpush1.bf16.msra.mxu1 %v6635_v19 }
 0x1b6   : > { %3863 = vmatmul.mubr.bf16.gmra.mrb[24].mxu1 %v6606_v21  ;;  %5439 = vmatprep.subr.bf16.mxu1 %v6640_v20 }
 0x1b7   : > { %4507 = vmatmul.mubr.bf16.gmra.mrb[24].mxu0 %v6607_v22  ;;  %3872 = vmatprep.mubr.bf16.mxu1 %v6611_v23 }
 0x1b8   : > { %4516 = vmatprep.mubr.bf16.mxu0 %v6613_v24  ;;  %4600 = vmatpush1.bf16.msra.mxu0 %v6638_v25 }
 0x1b9   : > { %4601 = vmatprep.subr.bf16.mxu0 %v6649_v26  ;;  %5455 = vmatpush1.bf16.msra.mxu1 %v6638_v25 }
 0x1ba   : > { %5440 = vmatprep.subr.bf16.mxu1 %v6649_v26 }
 0x1bc   : > { %4602 = vmatpush1.bf16.msra.mxu0 %v6647_v27 }
 0x1bd   : > { %4603 = vmatprep.subr.bf16.mxu0 %v6658_v28  ;;  %5456 = vmatpush1.bf16.msra.mxu1 %v6647_v27 }
 0x1be   : > { %3873 = vmatmul.mubr.bf16.gmra.mrb[28].mxu1 %v6615_v29  ;;  %5441 = vmatprep.subr.bf16.mxu1 %v6658_v28 }
 0x1bf   : > { %4517 = vmatmul.mubr.bf16.gmra.mrb[28].mxu0 %v6616_v30  ;;  %3882 = vmatprep.mubr.bf16.mxu1 %v6620_v31 }
 0x1c0   : > { %4526 = vmatprep.mubr.bf16.mxu0 %v6622_v32  ;;  %4604 = vmatpush1.bf16.msra.mxu0 %v6656_v33 }
 0x1c1   : > { %4605 = vmatprep.subr.bf16.mxu0 %v6665_v34  ;;  %5457 = vmatpush1.bf16.msra.mxu1 %v6656_v33 }
 0x1c2   : > { %5442 = vmatprep.subr.bf16.mxu1 %v6665_v34 }
 0x1c4   : > { %4606 = vmatpush1.bf16.msra.mxu0 %v6663_v35 }
 0x1c5   : > { %5458 = vmatpush1.bf16.msra.mxu1 %v6663_v35 }
 0x1c6   : > { %3883 = vmatmul.mubr.bf16.gmra.mrb[32].mxu1 %v6624_v36 }
 0x1c7   : > { %4527 = vmatmul.mubr.bf16.gmra.mrb[32].mxu0 %v6625_v37  ;;  %3892 = vmatprep.mubr.bf16.mxu1 %v6629_v38 }
 0x1c8   : > { %4536 = vmatprep.mubr.bf16.mxu0 %v6631_v39 }
 0x1ce   : > { %3893 = vmatmul.mubr.bf16.gmra.mrb[36].mxu1 %v6633_v40 }
 0x1cf   : > { %4537 = vmatmul.mubr.bf16.gmra.mrb[36].mxu0 %v6634_v41  ;;  %3902 = vmatprep.mubr.bf16.mxu1 %v6641_v42  ;;  %v694_v42 = vlaneseq }
 0x1d0   : > { %4546 = vmatprep.mubr.bf16.mxu0 %v6643_v43 }
 0x1d6   : > { %3903 = vmatmul.mubr.bf16.gmra.mrb[40].mxu1 %v6645_v44  ;;  %v695_v44 = vshrl.u32 %v694_v42, 7 }
 0x1d7   : > { %4547 = vmatmul.mubr.bf16.gmra.mrb[40].mxu0 %v6646_v45  ;;  %3912 = vmatprep.mubr.bf16.mxu1 %v6650_v46 }
 0x1d8   : > { %4556 = vmatprep.mubr.bf16.mxu0 %v6652_v47  ;;  %v696_v48 = vsub.s32 0, %v695_v44 }
 0x1de   : > { %3913 = vmatmul.mubr.bf16.gmra.mrb[44].mxu1 %v6654_v50  ;;  %v692_v50 = vld [vmem:[%s8207_s2] sm:$0x3] }
 0x1df   : > { %4557 = vmatmul.mubr.bf16.gmra.mrb[44].mxu0 %v6655_v51  ;;  %3922 = vmatprep.mubr.bf16.mxu1 %v5125_v52  ;;  %v700_v51 = vsub.s32 1, %v695_v44  ;;  %v7998_v52 = vrot.slane %v692_v50, %v696_v48 }
 0x1e0   : > { %4566 = vmatprep.mubr.bf16.mxu0 %v5133_v53 }
 0x1e1   : > { %v8000_v53 = vrot.slane %v692_v50, %v700_v51 }
 0x1e6   : > { %3923 = vmatmul.mubr.bf16.gmra.mrb[48].mxu1 %v5124_v54 }
 0x1e7   : > { %4567 = vmatmul.mubr.bf16.gmra.mrb[48].mxu0 %v5132_v55  ;;  %4677 = vmatprep.mubr.bf16.mxu1 %v6671_v57 }
 0x1e8   : > { %4607 = vmatprep.mubr.bf16.mxu0 %v6668_v56 }
 0x1ee   : > { %4678 = vmatmul.mubr.bf16.vlgmr.msra.gmra.mrb[52].mxu1 %v6669_v59 }
 0x1ef   : > { %4608 = vmatmul.mubr.bf16.vlgmr.msra.gmra.mrb[0].mxu0 %v6666_v58  ;;  %4687 = vmatprep.mubr.bf16.mxu1 %v6674_v61 }
 0x1f0   : > { %4617 = vmatprep.mubr.bf16.mxu0 %v6672_v60 }
 0x1f6   : > { %4688 = vmatmul.mubr.bf16.gmra.mrb[56].mxu1 %v6677_v63 }
 0x1f7   : > { %4618 = vmatmul.mubr.bf16.gmra.mrb[4].mxu0 %v6676_v62  ;;  %4697 = vmatprep.mubr.bf16.mxu1 %v6680_v1 }
 0x1f8   : > { %4627 = vmatprep.mubr.bf16.mxu0 %v6678_v0 }
 0x1fe   : > { %4698 = vmatmul.mubr.bf16.gmra.mrb[60].mxu1 %v6683_v3 }
 0x1ff   : > { %4628 = vmatmul.mubr.bf16.gmra.mrb[8].mxu0 %v6682_v2  ;;  %4707 = vmatprep.mubr.bf16.mxu1 %v6686_v5 }
 0x200   : > { %4637 = vmatprep.mubr.bf16.mxu0 %v6684_v4 }
 0x206   : > { %4708 = vmatmul.mubr.bf16.gmra.mrb[64].mxu1 %v6689_v7 }
 0x207   : > { %4638 = vmatmul.mubr.bf16.gmra.mrb[12].mxu0 %v6688_v6  ;;  %4717 = vmatprep.mubr.bf16.mxu1 %v6692_v9 }
 0x208   : > { %4647 = vmatprep.mubr.bf16.mxu0 %v6690_v8 }
 0x20e   : > { %4718 = vmatmul.mubr.bf16.gmra.mrb[68].mxu1 %v6695_v12 }
 0x20f   : > { %4648 = vmatmul.mubr.bf16.gmra.mrb[16].mxu0 %v6694_v11  ;;  %4727 = vmatprep.mubr.bf16.mxu1 %v5135_v14 }
 0x210   : > { %4657 = vmatprep.mubr.bf16.mxu0 %v6696_v13 }
 0x216   : > { %4728 = vmatmul.mubr.bf16.gmra.mrb[72].mxu1 %v5134_v16 }
 0x217   : > { %4658 = vmatmul.mubr.bf16.gmra.mrb[20].mxu0 %v6699_v15 }
 0x218   : > { %4667 = vmatprep.mubr.bf16.mxu0 %v6701_v17 }
 0x21f   : > { %4668 = vmatmul.mubr.bf16.gmra.mrb[24].mxu0 %v6703_v18 }
 0x259   : > { %v7939_v19 = vpop.f32.mrb[0].mxu1 }
 0x25a   : > { %v7941_v20 = vpop.f32.mrb[1].mxu1 }
 0x25b   : > { %v7943_v21 = vpop.f32.mrb[2].mxu1 }
 0x25c   : > { %v7945_v22 = vpop.f32.mrb[3].mxu1 }
 0x261   : > { %v7947_v23 = vpop.f32.mrb[4].mxu1 }
 0x262   : > { %v7949_v24 = vpop.f32.mrb[5].mxu1 }
 0x263   : > { %v7951_v25 = vpop.f32.mrb[6].mxu1 }
 0x264   : > { %v7953_v26 = vpop.f32.mrb[7].mxu1 }
 0x269   : > { %v7955_v27 = vpop.f32.mrb[8].mxu1 }
 0x26a   : > { %v7957_v28 = vpop.f32.mrb[9].mxu1 }
 0x26b   : > { %v7959_v29 = vpop.f32.mrb[10].mxu1 }
 0x26c   : > { %v7961_v30 = vpop.f32.mrb[11].mxu1 }
 0x271   : > { %v7963_v31 = vpop.f32.mrb[12].mxu1 }
 0x272   : > { %v7965_v32 = vpop.f32.mrb[13].mxu1 }
 0x273   : > { %v7967_v33 = vpop.f32.mrb[14].mxu1 }
 0x274   : > { %v7969_v34 = vpop.f32.mrb[15].mxu1 }
 0x279   : > { %v7971_v35 = vpop.f32.mrb[16].mxu1 }
 0x27a   : > { %v7973_v36 = vpop.f32.mrb[17].mxu1 }
 0x27b   : > { %v7975_v37 = vpop.f32.mrb[18].mxu1 }
 0x27c   : > { %v7977_v38 = vpop.f32.mrb[19].mxu1 }
 0x281   : > { %v7979_v39 = vpop.f32.mrb[20].mxu1 }
 0x282   : > { %v7981_v40 = vpop.f32.mrb[21].mxu1 }
 0x283   : > { %v7983_v41 = vpop.f32.mrb[22].mxu1 }
 0x284   : > { %v7985_v43 = vpop.f32.mrb[23].mxu1 }
 0x289   : > { %v7987_v45 = vpop.f32.mrb[24].mxu1 }
 0x28a   : > { %v7989_v46 = vpop.f32.mrb[25].mxu1 }
 0x28b   : > { %8209 = vst [vmem:[#allocation2_spill] sm:$0xff] %v7989_v46  ;;  %v7991_v47 = vpop.f32.mrb[26].mxu1 }
 0x28c   : > { %8210 = vst [vmem:[#allocation3_spill] sm:$0xff] %v7991_v47  ;;  %v7993_v49 = vpop.f32.mrb[27].mxu1 }
 0x28d   : > { %8211 = vst [vmem:[#allocation4_spill] sm:$0xff] %v7993_v49 }
 0x291   : > { %v3874_v54 = vpop.f32.mrb[28].mxu1 }
 0x292   : > { %v4518_v55 = vpop.f32.mrb[28].mxu0  ;;  %v5515_v56 = vadd.f32 %v3874_v54, %v7998_v52  ;;  %v3876_v57 = vpop.f32.mrb[29].mxu1 }
 0x293   : > { %v4520_v58 = vpop.f32.mrb[29].mxu0  ;;  %v5518_v59 = vadd.f32 %v3876_v57, %v8000_v53  ;;  %v3878_v60 = vpop.f32.mrb[30].mxu1 }
 0x294   : > { %v4522_v61 = vpop.f32.mrb[30].mxu0  ;;  %v8004_v62 = vadd.f32 %v5515_v56, %v4518_v55  ;;  %v5521_v63 = vadd.f32 %v3878_v60, %v7998_v52  ;;  %v3880_v0 = vpop.f32.mrb[31].mxu1 }
 0x295   : > { %v4524_v1 = vpop.f32.mrb[31].mxu0  ;;  %v8007_v2 = vadd.f32 %v5518_v59, %v4520_v58  ;;  %v5524_v3 = vadd.f32 %v3880_v0, %v8000_v53 }
 0x296   : > { %v8010_v4 = vadd.f32 %v5521_v63, %v4522_v61 }
 0x297   : > { %v8012_v5 = vadd.f32 %v5524_v3, %v4524_v1 }
 0x299   : > { %v3884_v6 = vpop.f32.mrb[32].mxu1 }
 0x29a   : > { %v4528_v7 = vpop.f32.mrb[32].mxu0  ;;  %v5527_v8 = vadd.f32 %v3884_v6, %v7998_v52  ;;  %v3886_v9 = vpop.f32.mrb[33].mxu1 }
 0x29b   : > { %v4530_v10 = vpop.f32.mrb[33].mxu0  ;;  %v5530_v11 = vadd.f32 %v3886_v9, %v8000_v53  ;;  %v3888_v12 = vpop.f32.mrb[34].mxu1 }
 0x29c   : > { %v4532_v13 = vpop.f32.mrb[34].mxu0  ;;  %v8016_v14 = vadd.f32 %v5527_v8, %v4528_v7  ;;  %v5533_v15 = vadd.f32 %v3888_v12, %v7998_v52  ;;  %v3890_v16 = vpop.f32.mrb[35].mxu1 }
 0x29d   : > { %v4534_v17 = vpop.f32.mrb[35].mxu0  ;;  %v8019_v18 = vadd.f32 %v5530_v11, %v4530_v10  ;;  %v5536_v42 = vadd.f32 %v3890_v16, %v8000_v53 }
 0x29e   : > { %v8022_v44 = vadd.f32 %v5533_v15, %v4532_v13 }
 0x29f   : > { %v8024_v48 = vadd.f32 %v5536_v42, %v4534_v17 }
 0x2a1   : > { %v3894_v50 = vpop.f32.mrb[36].mxu1 }
 0x2a2   : > { %v4538_v51 = vpop.f32.mrb[36].mxu0  ;;  %v5539_v54 = vadd.f32 %v3894_v50, %v7998_v52  ;;  %v3896_v55 = vpop.f32.mrb[37].mxu1 }
 0x2a3   : > { %v4540_v56 = vpop.f32.mrb[37].mxu0  ;;  %v5542_v57 = vadd.f32 %v3896_v55, %v8000_v53  ;;  %v3898_v58 = vpop.f32.mrb[38].mxu1 }
 0x2a4   : > { %v4542_v59 = vpop.f32.mrb[38].mxu0  ;;  %v8028_v60 = vadd.f32 %v5539_v54, %v4538_v51  ;;  %v5545_v61 = vadd.f32 %v3898_v58, %v7998_v52  ;;  %v3900_v63 = vpop.f32.mrb[39].mxu1 }
 0x2a5   : > { %v4544_v0 = vpop.f32.mrb[39].mxu0  ;;  %v8031_v1 = vadd.f32 %v5542_v57, %v4540_v56  ;;  %v5548_v3 = vadd.f32 %v3900_v63, %v8000_v53 }
 0x2a6   : > { %v8034_v6 = vadd.f32 %v5545_v61, %v4542_v59 }
 0x2a7   : > { %v8036_v7 = vadd.f32 %v5548_v3, %v4544_v0 }
 0x2a9   : > { %v3904_v8 = vpop.f32.mrb[40].mxu1 }
 0x2aa   : > { %v4548_v9 = vpop.f32.mrb[40].mxu0  ;;  %v5551_v10 = vadd.f32 %v3904_v8, %v7998_v52  ;;  %v3906_v11 = vpop.f32.mrb[41].mxu1 }
 0x2ab   : > { %v4550_v12 = vpop.f32.mrb[41].mxu0  ;;  %v5554_v13 = vadd.f32 %v3906_v11, %v8000_v53  ;;  %v3908_v15 = vpop.f32.mrb[42].mxu1 }
 0x2ac   : > { %v4552_v16 = vpop.f32.mrb[42].mxu0  ;;  %v8040_v17 = vadd.f32 %v5551_v10, %v4548_v9  ;;  %v5557_v42 = vadd.f32 %v3908_v15, %v7998_v52  ;;  %v3910_v50 = vpop.f32.mrb[43].mxu1 }
 0x2ad   : > { %v4554_v51 = vpop.f32.mrb[43].mxu0  ;;  %v8043_v54 = vadd.f32 %v5554_v13, %v4550_v12  ;;  %v5560_v55 = vadd.f32 %v3910_v50, %v8000_v53 }
 0x2ae   : > { %v8046_v56 = vadd.f32 %v5557_v42, %v4552_v16 }
 0x2af   : > { %v8048_v57 = vadd.f32 %v5560_v55, %v4554_v51 }
 0x2b1   : > { %v3914_v58 = vpop.f32.mrb[44].mxu1 }
 0x2b2   : > { %v4558_v59 = vpop.f32.mrb[44].mxu0  ;;  %v5563_v61 = vadd.f32 %v3914_v58, %v7998_v52  ;;  %v3916_v63 = vpop.f32.mrb[45].mxu1 }
 0x2b3   : > { %v4560_v0 = vpop.f32.mrb[45].mxu0  ;;  %v5566_v3 = vadd.f32 %v3916_v63, %v8000_v53  ;;  %v3918_v8 = vpop.f32.mrb[46].mxu1 }
 0x2b4   : > { %v4562_v9 = vpop.f32.mrb[46].mxu0  ;;  %v8052_v10 = vadd.f32 %v5563_v61, %v4558_v59  ;;  %v5569_v11 = vadd.f32 %v3918_v8, %v7998_v52  ;;  %v3920_v12 = vpop.f32.mrb[47].mxu1 }
 0x2b5   : > { %v4564_v13 = vpop.f32.mrb[47].mxu0  ;;  %v8055_v15 = vadd.f32 %v5566_v3, %v4560_v0  ;;  %v5572_v16 = vadd.f32 %v3920_v12, %v8000_v53 }
 0x2b6   : > { %v8058_v42 = vadd.f32 %v5569_v11, %v4562_v9  ;;  %v5459_v9 = vadd.f32 %v7939_v19, %v7998_v52  ;;  %v5461_v11 = vadd.f32 %v7941_v20, %v8000_v53 }
 0x2b7   : > { %v8060_v50 = vadd.f32 %v5572_v16, %v4564_v13  ;;  %v5463_v16 = vadd.f32 %v7943_v21, %v7998_v52 }
 0x2b9   : > { %v3924_v51 = vpop.f32.mrb[48].mxu1 }
 0x2ba   : > { %v4568_v55 = vpop.f32.mrb[48].mxu0  ;;  %v5575_v58 = vadd.f32 %v3924_v51, %v7998_v52  ;;  %v3926_v63 = vpop.f32.mrb[49].mxu1 }
 0x2bb   : > { %v4570_v49 = vpop.f32.mrb[49].mxu0  ;;  %v5578_v59 = vadd.f32 %v3926_v63, %v8000_v53  ;;  %v3928_v61 = vpop.f32.mrb[50].mxu1 }
 0x2bc   : > { %v4572_v8 = vpop.f32.mrb[50].mxu0  ;;  %v8064_v47 = vadd.f32 %v5575_v58, %v4568_v55  ;;  %v3929_v0 = vpop.f32.mrb[51].mxu1 }
 0x2bd   : > { %v4573_v3 = vpop.f32.mrb[51].mxu0  ;;  %v8066_v46 = vadd.f32 %v5578_v59, %v4570_v49  ;;  %v5465_v49 = vadd.f32 %v7945_v22, %v8000_v53  ;;  %v5467_v22 = vadd.f32 %v7947_v23, %v7998_v52  ;;  %v5473_v23 = vadd.f32 %v7953_v26, %v8000_v53 }
 0x2c1   : > { %v4679_v13 = vpop.f32.mrb[52].mxu1 }
 0x2c2   : > { %v4609_v12 = vpop.f32.mrb[0].mxu0  ;;  %v5517_v63 = vadd.f32 %v8004_v62, %v4679_v13  ;;  %v4681_v58 = vpop.f32.mrb[53].mxu1 }
 0x2c3   : > { %v5460_v51 = vadd.f32 %v5459_v9, %v4609_v12  ;;  %v4611_v55 = vpop.f32.mrb[1].mxu0  ;;  %v5520_v61 = vadd.f32 %v8007_v2, %v4681_v58  ;;  %v4683_v8 = vpop.f32.mrb[54].mxu1  ;;  %v5469_v2 = vadd.f32 %v7949_v24, %v8000_v53 }
 0x2c4   : > { %v5462_v59 = vadd.f32 %v5461_v11, %v4611_v55  ;;  %v4613_v19 = vpop.f32.mrb[2].mxu0  ;;  %v5523_v0 = vadd.f32 %v8010_v4, %v4683_v8  ;;  %v4685_v21 = vpop.f32.mrb[55].mxu1  ;;  %v5471_v4 = vadd.f32 %v7951_v25, %v7998_v52 }
 0x2c5   : > { %6704 = vtanh.f32 %v5460_v51  ;;  %v5464_v20 = vadd.f32 %v5463_v16, %v4613_v19  ;;  %v4615_v3 = vpop.f32.mrb[3].mxu0  ;;  %v5526_v62 = vadd.f32 %v8012_v5, %v4685_v21 }
 0x2c6   : > { %6706 = vtanh.f32 %v5517_v63  ;;  %v5466_v9 = vadd.f32 %v5465_v49, %v4615_v3 }
 0x2c7   : > { %6708 = vtanh.f32 %v5462_v59 }
 0x2c8   : > { %6710 = vtanh.f32 %v5520_v61 }
 0x2c9   : > { %6712 = vtanh.f32 %v5464_v20  ;;  %v4689_v12 = vpop.f32.mrb[56].mxu1  ;;  %v5475_v20 = vadd.f32 %v7955_v27, %v7998_v52 }
 0x2ca   : > { %6714 = vtanh.f32 %v5523_v0  ;;  %v4619_v11 = vpop.f32.mrb[4].mxu0  ;;  %v5529_v5 = vadd.f32 %v8016_v14, %v4689_v12  ;;  %v4691_v51 = vpop.f32.mrb[57].mxu1  ;;  %v5477_v0 = vadd.f32 %v7957_v28, %v8000_v53  ;;  %v5481_v28 = vadd.f32 %v7961_v30, %v8000_v53 }
 0x2cb   : > { %6716 = vtanh.f32 %v5466_v9  ;;  %v5468_v13 = vadd.f32 %v5467_v22, %v4619_v11  ;;  %v4621_v16 = vpop.f32.mrb[5].mxu0  ;;  %v5532_v24 = vadd.f32 %v8019_v18, %v4691_v51  ;;  %v4693_v58 = vpop.f32.mrb[58].mxu1  ;;  %v5479_v9 = vadd.f32 %v7959_v29, %v7998_v52 }
 0x2cc   : > { %6718 = vtanh.f32 %v5526_v62  ;;  %v5470_v63 = vadd.f32 %v5469_v2, %v4621_v16  ;;  %v4623_v55 = vpop.f32.mrb[6].mxu0  ;;  %v5535_v14 = vadd.f32 %v8022_v44, %v4693_v58  ;;  %v4695_v26 = vpop.f32.mrb[59].mxu1 }
 0x2cd   : > { %6720 = vtanh.f32 %v5468_v13  ;;  %v5472_v25 = vadd.f32 %v5471_v4, %v4623_v55  ;;  %v4625_v49 = vpop.f32.mrb[7].mxu0  ;;  %v5538_v18 = vadd.f32 %v8024_v48, %v4695_v26 }
 0x2ce   : > { %6722 = vtanh.f32 %v5529_v5  ;;  %v5474_v59 = vadd.f32 %v5473_v23, %v4625_v49 }
 0x2cf   : > { %v6705_v61 = vpop.eup %6704  ;;  %6724 = vtanh.f32 %v5470_v63 }
 0x2d0   : > { %v6707_v19 = vpop.eup %6706  ;;  %4786 = vst [vmem:[%s8094_s17] sm:$0xff] %v6705_v61  ;;  %6726 = vtanh.f32 %v5532_v24 }
 0x2d1   : > { %v6709_v8 = vpop.eup %6708  ;;  %4814 = vst [vmem:[%s8094_s17 + $0xe0] sm:$0xff] %v6707_v19  ;;  %6728 = vtanh.f32 %v5472_v25  ;;  %v4699_v3 = vpop.f32.mrb[60].mxu1 }
 0x2d2   : > { %v6711_v44 = vpop.eup %6710  ;;  %4787 = vst [vmem:[%s8094_s17 + $0x8] sm:$0xff] %v6709_v8  ;;  %6730 = vtanh.f32 %v5535_v14  ;;  %v4629_v48 = vpop.f32.mrb[8].mxu0  ;;  %v5541_v27 = vadd.f32 %v8028_v60, %v4699_v3  ;;  %v5485_v14 = vadd.f32 %v7965_v32, %v8000_v53  ;;  %v5489_v32 = vadd.f32 %v7969_v34, %v8000_v53 }
 0x2d3   : > { %v6713_v21 = vpop.eup %6712  ;;  %4815 = vst [vmem:[%s8094_s17 + $0xe8] sm:$0xff] %v6711_v44  ;;  %6732 = vtanh.f32 %v5474_v59  ;;  %v5476_v62 = vadd.f32 %v5475_v20, %v4629_v48  ;;  %v4631_v22 = vpop.f32.mrb[9].mxu0  ;;  %v5487_v59 = vadd.f32 %v7967_v33, %v7998_v52 }
 0x2d4   : > { %v4701_v2 = vpop.f32.mrb[61].mxu1  ;;  %v6715_v11 = vpop.eup %6714  ;;  %4788 = vst [vmem:[%s8094_s17 + $0x10] sm:$0xff] %v6713_v21  ;;  %6734 = vtanh.f32 %v5538_v18  ;;  %v5478_v12 = vadd.f32 %v5477_v0, %v4631_v22 }
 0x2d5   : > { %v5544_v4 = vadd.f32 %v8031_v1, %v4701_v2  ;;  %v4633_v29 = vpop.f32.mrb[10].mxu0  ;;  %v4703_v13 = vpop.f32.mrb[62].mxu1  ;;  %4816 = vst [vmem:[%s8094_s17 + $0xf0] sm:$0xff] %v6715_v11  ;;  %6736 = vtanh.f32 %v5476_v62 }
 0x2d6   : > { %v6717_v5 = vpop.eup %6716  ;;  %v5480_v60 = vadd.f32 %v5479_v9, %v4633_v29  ;;  %v5547_v16 = vadd.f32 %v8034_v6, %v4703_v13  ;;  %v4635_v51 = vpop.f32.mrb[11].mxu0  ;;  %6738 = vtanh.f32 %v5541_v27  ;;  %v5483_v6 = vadd.f32 %v7963_v31, %v7998_v52 }
 0x2d7   : > { %v4705_v23 = vpop.f32.mrb[63].mxu1  ;;  %v6719_v63 = vpop.eup %6718  ;;  %4789 = vst [vmem:[%s8094_s17 + $0x18] sm:$0xff] %v6717_v5  ;;  %v5482_v30 = vadd.f32 %v5481_v28, %v4635_v51  ;;  %6740 = vtanh.f32 %v5478_v12  ;;  %v5493_v28 = vadd.f32 %v7973_v36, %v8000_v53  ;;  %v5495_v29 = vadd.f32 %v7975_v37, %v7998_v52 }
 0x2d8   : > { %v5550_v1 = vadd.f32 %v8036_v7, %v4705_v23  ;;  %v6721_v24 = vpop.eup %6720  ;;  %4817 = vst [vmem:[%s8094_s17 + $0xf8] sm:$0xff] %v6719_v63  ;;  %6742 = vtanh.f32 %v5544_v4  ;;  %v5497_v36 = vadd.f32 %v7977_v38, %v8000_v53 }
 0x2d9   : > { %v6723_v55 = vpop.eup %6722  ;;  %4790 = vst [vmem:[%s8094_s17 + $0x20] sm:$0xff] %v6721_v24  ;;  %6744 = vtanh.f32 %v5480_v60  ;;  %v4709_v49 = vpop.f32.mrb[64].mxu1 }
 0x2da   : > { %v6725_v58 = vpop.eup %6724  ;;  %4818 = vst [vmem:[%s8094_s17 + $0x100] sm:$0xff] %v6723_v55  ;;  %6746 = vtanh.f32 %v5547_v16  ;;  %v4639_v7 = vpop.f32.mrb[12].mxu0  ;;  %v5553_v31 = vadd.f32 %v8040_v17, %v4709_v49  ;;  %v5501_v49 = vadd.f32 %v7981_v40, %v8000_v53  ;;  %v5505_v40 = vadd.f32 %v7985_v43, %v8000_v53 }
 0x2db   : > { %v6727_v25 = vpop.eup %6726  ;;  %4791 = vst [vmem:[%s8094_s17 + $0x28] sm:$0xff] %v6725_v58  ;;  %6748 = vtanh.f32 %v5482_v30  ;;  %v5484_v18 = vadd.f32 %v5483_v6, %v4639_v7  ;;  %v4641_v61 = vpop.f32.mrb[13].mxu0 }
 0x2dc   : > { %v6729_v26 = vpop.eup %6728  ;;  %4819 = vst [vmem:[%s8094_s17 + $0x108] sm:$0xff] %v6727_v25  ;;  %v4711_v19 = vpop.f32.mrb[65].mxu1  ;;  %6750 = vtanh.f32 %v5550_v1  ;;  %v5486_v20 = vadd.f32 %v5485_v14, %v4641_v61 }
 0x2dd   : > { %v6731_v8 = vpop.eup %6730  ;;  %4792 = vst [vmem:[%s8094_s17 + $0x30] sm:$0xff] %v6729_v26  ;;  %v5556_v44 = vadd.f32 %v8043_v54, %v4711_v19  ;;  %v4643_v33 = vpop.f32.mrb[14].mxu0  ;;  %6752 = vtanh.f32 %v5484_v18  ;;  %v5503_v18 = vadd.f32 %v7983_v41, %v7998_v52 }
 0x2de   : > { %v4713_v0 = vpop.f32.mrb[66].mxu1  ;;  %v6733_v48 = vpop.eup %6732  ;;  %4820 = vst [vmem:[%s8094_s17 + $0x110] sm:$0xff] %v6731_v8  ;;  %v5488_v17 = vadd.f32 %v5487_v59, %v4643_v33  ;;  %6754 = vtanh.f32 %v5553_v31 }
 0x2df   : > { %v5559_v3 = vadd.f32 %v8046_v56, %v4713_v0  ;;  %v4645_v21 = vpop.f32.mrb[15].mxu0  ;;  %v4715_v9 = vpop.f32.mrb[67].mxu1  ;;  %4793 = vst [vmem:[%s8094_s17 + $0x38] sm:$0xff] %v6733_v48  ;;  %6756 = vtanh.f32 %v5486_v20  ;;  %v5491_v56 = vadd.f32 %v7971_v35, %v7998_v52 }
 0x2e0   : > { %v6735_v62 = vpop.eup %6734  ;;  %v5490_v34 = vadd.f32 %v5489_v32, %v4645_v21  ;;  %v5562_v54 = vadd.f32 %v8048_v57, %v4715_v9  ;;  %6758 = vtanh.f32 %v5556_v44  ;;  %v5507_v9 = vadd.f32 %v7987_v45, %v7998_v52 }
 0x2e1   : > { %v6737_v27 = vpop.eup %6736  ;;  %4821 = vst [vmem:[%s8094_s17 + $0x118] sm:$0xff] %v6735_v62  ;;  %6760 = vtanh.f32 %v5488_v17  ;;  %v4719_v12 = vpop.f32.mrb[68].mxu1 }
 0x2e2   : > { %v6739_v22 = vpop.eup %6738  ;;  %4794 = vst [vmem:[%s8094_s17 + $0x40] sm:$0xff] %v6737_v27  ;;  %6762 = vtanh.f32 %v5559_v3  ;;  %v4649_v57 = vpop.f32.mrb[16].mxu0  ;;  %v5565_v35 = vadd.f32 %v8052_v10, %v4719_v12 }
 0x2e3   : > { %v6741_v2 = vpop.eup %6740  ;;  %4822 = vst [vmem:[%s8094_s17 + $0x120] sm:$0xff] %v6739_v22  ;;  %6764 = vtanh.f32 %v5490_v34  ;;  %v5492_v13 = vadd.f32 %v5491_v56, %v4649_v57  ;;  %v4651_v5 = vpop.f32.mrb[17].mxu0  ;;  %v8212_v34 = vld [vmem:[#allocation2_spill] sm:$0xff]  ;;  %v8214_v57 = vld [vmem:[#allocation4_spill] sm:$0xff] }
 0x2e4   : > { %v6743_v11 = vpop.eup %6742  ;;  %4795 = vst [vmem:[%s8094_s17 + $0x48] sm:$0xff] %v6741_v2  ;;  %v4721_v60 = vpop.f32.mrb[69].mxu1  ;;  %6766 = vtanh.f32 %v5562_v54  ;;  %v5494_v51 = vadd.f32 %v5493_v28, %v4651_v5  ;;  %v5509_v54 = vadd.f32 %v8212_v34, %v8000_v53  ;;  %v8213_v2 = vld [vmem:[#allocation3_spill] sm:$0xff]  ;;  %v5513_v12 = vadd.f32 %v8214_v57, %v8000_v53 }
 0x2e5   : > { %v6745_v4 = vpop.eup %6744  ;;  %4823 = vst [vmem:[%s8094_s17 + $0x128] sm:$0xff] %v6743_v11  ;;  %v5568_v23 = vadd.f32 %v8055_v15, %v4721_v60  ;;  %v4653_v37 = vpop.f32.mrb[18].mxu0  ;;  %6768 = vtanh.f32 %v5492_v13  ;;  %v5511_v56 = vadd.f32 %v8213_v2, %v7998_v52 }
 0x2e6   : > { %v6747_v16 = vpop.eup %6746  ;;  %4796 = vst [vmem:[%s8094_s17 + $0x50] sm:$0xff] %v6745_v4  ;;  %v4723_v63 = vpop.f32.mrb[70].mxu1  ;;  %v5496_v10 = vadd.f32 %v5495_v29, %v4653_v37  ;;  %6770 = vtanh.f32 %v5565_v35 }
 0x2e7   : > { %v6749_v30 = vpop.eup %6748  ;;  %4824 = vst [vmem:[%s8094_s17 + $0x130] sm:$0xff] %v6747_v16  ;;  %v5571_v1 = vadd.f32 %v8058_v42, %v4723_v63  ;;  %v4655_v24 = vpop.f32.mrb[19].mxu0  ;;  %6772 = vtanh.f32 %v5494_v51  ;;  %v5499_v42 = vadd.f32 %v7979_v39, %v7998_v52 }
 0x2e8   : > { %v4725_v55 = vpop.f32.mrb[71].mxu1  ;;  %v6751_v58 = vpop.eup %6750  ;;  %4797 = vst [vmem:[%s8094_s17 + $0x58] sm:$0xff] %v6749_v30  ;;  %v5498_v38 = vadd.f32 %v5497_v36, %v4655_v24  ;;  %6774 = vtanh.f32 %v5568_v23 }
 0x2e9   : > { %v5574_v15 = vadd.f32 %v8060_v50, %v4725_v55  ;;  %v6753_v6 = vpop.eup %6752  ;;  %4825 = vst [vmem:[%s8094_s17 + $0x138] sm:$0xff] %v6751_v58  ;;  %6776 = vtanh.f32 %v5496_v10  ;;  %v4729_v26 = vpop.f32.mrb[72].mxu1 }
 0x2ea   : > { %v6755_v25 = vpop.eup %6754  ;;  %4798 = vst [vmem:[%s8094_s17 + $0x60] sm:$0xff] %v6753_v6  ;;  %6778 = vtanh.f32 %v5571_v1  ;;  %v4659_v50 = vpop.f32.mrb[20].mxu0  ;;  %v5577_v39 = vadd.f32 %v8064_v47, %v4729_v26 }
 0x2eb   : > { %v6757_v14 = vpop.eup %6756  ;;  %4826 = vst [vmem:[%s8094_s17 + $0x140] sm:$0xff] %v6755_v25  ;;  %6780 = vtanh.f32 %v5498_v38  ;;  %v5500_v31 = vadd.f32 %v5499_v42, %v4659_v50  ;;  %v4661_v61 = vpop.f32.mrb[21].mxu0 }
 0x2ec   : > { %v6759_v7 = vpop.eup %6758  ;;  %4799 = vst [vmem:[%s8094_s17 + $0x68] sm:$0xff] %v6757_v14  ;;  %v4731_v19 = vpop.f32.mrb[73].mxu1  ;;  %6782 = vtanh.f32 %v5574_v15  ;;  %v5502_v32 = vadd.f32 %v5501_v49, %v4661_v61 }
 0x2ed   : > { %v6761_v59 = vpop.eup %6760  ;;  %4827 = vst [vmem:[%s8094_s17 + $0x148] sm:$0xff] %v6759_v7  ;;  %v5580_v20 = vadd.f32 %v8066_v46, %v4731_v19  ;;  %v4663_v41 = vpop.f32.mrb[22].mxu0  ;;  %6784 = vtanh.f32 %v5500_v31 }
 0x2ee   : > { %v6763_v8 = vpop.eup %6762  ;;  %4800 = vst [vmem:[%s8094_s17 + $0x70] sm:$0xff] %v6761_v59  ;;  %v4733_v44 = vpop.f32.mrb[74].mxu1  ;;  %v5504_v47 = vadd.f32 %v5503_v18, %v4663_v41  ;;  %6786 = vtanh.f32 %v5577_v39 }
 0x2ef   : > { %v6765_v33 = vpop.eup %6764  ;;  %4828 = vst [vmem:[%s8094_s17 + $0x150] sm:$0xff] %v6763_v8  ;;  %v4665_v0 = vpop.f32.mrb[23].mxu0  ;;  %6788 = vtanh.f32 %v5502_v32 }
 0x2f0   : > { %v4734_v48 = vpop.f32.mrb[75].mxu1  ;;  %v6767_v17 = vpop.eup %6766  ;;  %4801 = vst [vmem:[%s8094_s17 + $0x78] sm:$0xff] %v6765_v33  ;;  %v5506_v43 = vadd.f32 %v5505_v40, %v4665_v0  ;;  %6790 = vtanh.f32 %v5580_v20 }
 0x2f1   : > { %v6769_v3 = vpop.eup %6768  ;;  %4829 = vst [vmem:[%s8094_s17 + $0x158] sm:$0xff] %v6767_v17  ;;  %6792 = vtanh.f32 %v5504_v47 }
 0x2f2   : > { %v6771_v46 = vpop.eup %6770  ;;  %4802 = vst [vmem:[%s8094_s17 + $0x80] sm:$0xff] %v6769_v3  ;;  %6794 = vtanh.f32 %v5506_v43  ;;  %v4669_v27 = vpop.f32.mrb[24].mxu0 }
 0x2f3   : > { %v6773_v21 = vpop.eup %6772  ;;  %4830 = vst [vmem:[%s8094_s17 + $0x160] sm:$0xff] %v6771_v46  ;;  %v5508_v11 = vadd.f32 %v5507_v9, %v4669_v27  ;;  %v4671_v28 = vpop.f32.mrb[25].mxu0 }
 0x2f4   : > { %v6775_v62 = vpop.eup %6774  ;;  %4803 = vst [vmem:[%s8094_s17 + $0x88] sm:$0xff] %v6773_v21  ;;  %v5510_v4 = vadd.f32 %v5509_v54, %v4671_v28  ;;  %v4673_v29 = vpop.f32.mrb[26].mxu0 }
 0x2f5   : > { %v6777_v22 = vpop.eup %6776  ;;  %4831 = vst [vmem:[%s8094_s17 + $0x168] sm:$0xff] %v6775_v62  ;;  %6796 = vtanh.f32 %v5508_v11  ;;  %v5512_v35 = vadd.f32 %v5511_v56, %v4673_v29  ;;  %v4675_v5 = vpop.f32.mrb[27].mxu0 }
 0x2f6   : > { %v6779_v45 = vpop.eup %6778  ;;  %4804 = vst [vmem:[%s8094_s17 + $0x90] sm:$0xff] %v6777_v22  ;;  %6798 = vtanh.f32 %v5510_v4  ;;  %v5514_v60 = vadd.f32 %v5513_v12, %v4675_v5 }
 0x2f7   : > { %v6781_v13 = vpop.eup %6780  ;;  %4832 = vst [vmem:[%s8094_s17 + $0x170] sm:$0xff] %v6779_v45  ;;  %6800 = vtanh.f32 %v5512_v35 }
 0x2f8   : > { %v6783_v52 = vpop.eup %6782  ;;  %4805 = vst [vmem:[%s8094_s17 + $0x98] sm:$0xff] %v6781_v13  ;;  %6802 = vtanh.f32 %v5514_v60 }
 0x2f9   : > { %v6785_v16 = vpop.eup %6784  ;;  %4833 = vst [vmem:[%s8094_s17 + $0x178] sm:$0xff] %v6783_v52 }
 0x2fa   : > { %v6787_v53 = vpop.eup %6786  ;;  %4806 = vst [vmem:[%s8094_s17 + $0xa0] sm:$0xff] %v6785_v16 }
 0x2fb   : > { %v6789_v36 = vpop.eup %6788  ;;  %4834 = vst [vmem:[%s8094_s17 + $0x180] sm:$0xff] %v6787_v53 }
 0x2fc   : > { %v6791_v51 = vpop.eup %6790  ;;  %4807 = vst [vmem:[%s8094_s17 + $0xa8] sm:$0xff] %v6789_v36 }
 0x2fd   : > { %v6793_v23 = vpop.eup %6792  ;;  %4835 = vst [vmem:[%s8094_s17 + $0x188] sm:$0xff] %v6791_v51 }
 0x2fe   : > { %v6795_v37 = vpop.eup %6794  ;;  %4808 = vst [vmem:[%s8094_s17 + $0xb0] sm:$0xff] %v6793_v23 }
 0x2ff   : > { %4809 = vst [vmem:[%s8094_s17 + $0xb8] sm:$0xff] %v6795_v37  ;;  %v6797_v63 = vpop.eup %6796 }
 0x300   : > { %v6799_v30 = vpop.eup %6798  ;;  %4810 = vst [vmem:[%s8094_s17 + $0xc0] sm:$0xff] %v6797_v63 }
 0x301   : > { %v6801_v10 = vpop.eup %6800  ;;  %4811 = vst [vmem:[%s8094_s17 + $0xc8] sm:$0xff] %v6799_v30 }
 0x302   : > { %v6803_v1 = vpop.eup %6802  ;;  %4812 = vst [vmem:[%s8094_s17 + $0xd0] sm:$0xff] %v6801_v10 }
 0x303   : > { %4813 = vst [vmem:[%s8094_s17 + $0xd8] sm:$0xff] %v6803_v1 }
 0x304 PF: > { %s13_s12 = sadd.s32 1, %s6810_s12  }
 0x305   : > { %p10_p4 = scmp.ge.s32.totalorder %s13_s12, 4  }
 0x307   :  { %12 = sbr.rel (!%p10_p4) target bundleno = 1 (0x1), region = 62 }

</bundles_post_ra>
